<compile_context>
chip_gen: v6e
topology: v6e:2x2x1
jax: 0.10.0
libtpu: 0.0.40
codegen_flags: <defaults>
</compile_context>

<pallas_src>
import functools
import math

import jax
import jax.numpy as jnp
from jax.experimental import pallas as pl
from jax.experimental.pallas import tpu as pltpu

_VMEM_LIMIT = 32 * 1024 * 1024  # safe on v5e/v6e (128 MiB) and v7x (64 MiB)


# ----------------------------------------------------------------------------
# Fused attention sub-layer:
#   out = LayerNorm(xq + MHA(q = xq+qpos, k = xkv+kpos, v = xkv))
# One grid step per batch element ("parallel" axis -> megacore).
# cvec rows: 0=bq 1=bk 2=bv 3=bo 4=gamma 5=beta (rows 6,7 pad).
# ----------------------------------------------------------------------------
def _mha_add_ln_kernel(*refs, nhead, scale, eps, self_attn, has_bias):
    f32, bf16 = jnp.float32, jnp.bfloat16
    it = iter(refs)
    xq_ref = next(it)
    qpos_ref = next(it)
    xkv_ref = xq_ref if self_attn else next(it)
    kpos_ref = qpos_ref if self_attn else next(it)
    bias_ref = next(it) if has_bias else None
    wqk_ref = next(it)      # (E, 2E) bf16
    wv_ref = next(it)       # (E, E)  bf16
    wo_ref = next(it)       # (E, E)  bf16
    cvec_ref = next(it)     # (8, E)  f32
    o_ref = next(it)        # (1, Lq, E) out
    oc_ref = next(it)       # (Lq, E) bf16 VMEM scratch (concat of head outputs)

    Lq, E = xq_ref.shape[1], xq_ref.shape[2]
    Lk = xkv_ref.shape[1]
    Dh = E // nhead

    bq = cvec_ref[0:1, :]
    bk = cvec_ref[1:2, :]
    bv = cvec_ref[2:3, :]

    # ---- fused in-projections (bf16 MXU operands, f32 accumulate) ----
    q_in = xq_ref[0] + qpos_ref[0]                       # (Lq, E) bf16
    if self_attn:
        # q_in == k_in: single (Lq,E)@(E,2E) GEMM for Q and K.
        qk = jnp.dot(q_in, wqk_ref[...], preferred_element_type=f32)
        q = (qk[:, :E] + bq) * scale
        k = qk[:, E:] + bk
        kv = xq_ref[0]
    else:
        kv = xkv_ref[0]
        k_in = kv + kpos_ref[0]
        q = (jnp.dot(q_in, wqk_ref[:, :E], preferred_element_type=f32) + bq) * scale
        k = jnp.dot(k_in, wqk_ref[:, E:], preferred_element_type=f32) + bk
    v = jnp.dot(kv, wv_ref[...], preferred_element_type=f32) + bv

    q = q.astype(bf16)
    k = k.astype(bf16)
    v = v.astype(bf16)
    bias = bias_ref[0] if has_bias else None             # (1, Lk) f32

    # ---- per-head attention; head outputs land in the concat scratch ----
    for h in range(nhead):
        sl = slice(h * Dh, (h + 1) * Dh)
        s = jax.lax.dot_general(q[:, sl], k[:, sl], (((1,), (1,)), ((), ())),
                                preferred_element_type=f32)        # (Lq, Lk)
        if has_bias:
            s = s + bias
        s = s - jnp.max(s, axis=-1, keepdims=True)
        p = jnp.exp(s)
        p = p * pl.reciprocal(jnp.sum(p, axis=-1, keepdims=True), approx=True)
        oh = jnp.dot(p.astype(bf16), v[:, sl], preferred_element_type=f32)
        oc_ref[:, sl] = oh.astype(bf16)

    # ---- ONE K=128 output-projection GEMM; Wo / xq only read here ----
    attn = jnp.dot(oc_ref[...], wo_ref[...], preferred_element_type=f32) \
        + cvec_ref[3:4, :]

    # ---- residual + LayerNorm (f32 statistics) ----
    y = xq_ref[0].astype(f32) + attn
    mu = jnp.mean(y, axis=-1, keepdims=True)
    var = jnp.mean((y - mu) * (y - mu), axis=-1, keepdims=True)
    yn = (y - mu) * jax.lax.rsqrt(var + eps)
    o_ref[0] = (yn * cvec_ref[4:5, :] + cvec_ref[5:6, :]).astype(o_ref.dtype)


def _bspec3(arr, shape):
    # Broadcast (leading dim 1) tensors reuse the same VMEM block.
    if arr.shape[0] == 1:
        return pl.BlockSpec(shape, lambda n: (0, 0, 0))
    return pl.BlockSpec(shape, lambda n: (n, 0, 0))


def mha_add_ln(xq, qpos, xkv, kpos, bias, p, nhead, *, self_attn,
               eps=1e-5, out_dtype=jnp.bfloat16):
    """xq: (N, Lq, E) bf16; qpos: (N|1, Lq, E); xkv/kpos: (N|1, Lk, E) or None
       (self-attention); bias: (N|1, 1, Lk) f32 or None.
       Returns LayerNorm(xq + MHA(...)): (N, Lq, E) in out_dtype."""
    N, Lq, E = xq.shape
    Dh = E // nhead
    scale = 1.0 / math.sqrt(Dh)
    has_bias = bias is not None
    Lk = Lq if self_attn else xkv.shape[1]
    const2d = lambda n: (0, 0)

    args = [xq, qpos]
    in_specs = [_bspec3(xq, (1, Lq, E)), _bspec3(qpos, (1, Lq, E))]
    if not self_attn:
        args += [xkv, kpos]
        in_specs += [_bspec3(xkv, (1, Lk, E)), _bspec3(kpos, (1, Lk, E))]
    if has_bias:
        args.append(bias)
        in_specs.append(_bspec3(bias, (1, 1, Lk)))
    args += [p["wqk"], p["wv"], p["wo"], p["cvec"]]
    in_specs += [
        pl.BlockSpec((E, 2 * E), const2d),
        pl.BlockSpec((E, E), const2d),
        pl.BlockSpec((E, E), const2d),
        pl.BlockSpec((8, E), const2d),
    ]

    kernel = functools.partial(_mha_add_ln_kernel, nhead=nhead, scale=scale,
                               eps=eps, self_attn=self_attn, has_bias=has_bias)
    return pl.pallas_call(
        kernel,
        out_shape=jax.ShapeDtypeStruct((N, Lq, E), out_dtype),
        grid=(N,),
        in_specs=in_specs,
        out_specs=pl.BlockSpec((1, Lq, E), lambda n: (n, 0, 0)),
        scratch_shapes=[pltpu.VMEM((Lq, E), jnp.bfloat16)],
        compiler_params=pltpu.CompilerParams(
            dimension_semantics=("parallel",),
            vmem_limit_bytes=_VMEM_LIMIT),
    )(*args)


# ----------------------------------------------------------------------------
# Fused FFN sub-layer:  out = LN(x + relu(x@W1+b1)@W2 + b2)   [+ optional 2nd
# LayerNorm to fold the final decoder norm into the last decoder layer].
# cvec rows: 0=b2 1=gamma 2=beta 3=final_gamma 4=final_beta (rows 5-7 pad).
# ----------------------------------------------------------------------------
def _ffn_add_ln_kernel(x_ref, w1_ref, b1_ref, w2_ref, cvec_ref, o_ref,
                       *, eps, final_ln):
    f32, bf16 = jnp.float32, jnp.bfloat16
    x = x_ref[...]                                               # (tm, E) bf16
    h = jnp.dot(x, w1_ref[...], preferred_element_type=f32) + b1_ref[...]
    h = jnp.maximum(h, 0.0).astype(bf16)
    y = jnp.dot(h, w2_ref[...], preferred_element_type=f32) + cvec_ref[0:1, :]
    y = x.astype(f32) + y
    mu = jnp.mean(y, axis=-1, keepdims=True)
    var = jnp.mean((y - mu) * (y - mu), axis=-1, keepdims=True)
    y = (y - mu) * jax.lax.rsqrt(var + eps) * cvec_ref[1:2, :] + cvec_ref[2:3, :]
    if final_ln:
        mu = jnp.mean(y, axis=-1, keepdims=True)
        var = jnp.mean((y - mu) * (y - mu), axis=-1, keepdims=True)
        y = (y - mu) * jax.lax.rsqrt(var + eps) * cvec_ref[3:4, :] + cvec_ref[4:5, :]
    o_ref[...] = y.astype(o_ref.dtype)


def _row_tile(M, block_rows=512):
    """Largest tile <= block_rows that still yields >= 2 grid steps (v7x
    megacore) and is sublane-aligned (multiple of 8)."""
    if M <= 8:
        return M
    half = ((-(-M // 2)) + 7) // 8 * 8
    return max(8, min(block_rows, half, M))


def ffn_add_ln(x, p, *, eps=1e-5, final_ln=False, out_dtype=jnp.bfloat16,
               block_rows=512):
    M, E = x.shape
    F = p["w1"].shape[1]
    tm = _row_tile(M, block_rows)
    const = lambda i: (0, 0)
    return pl.pallas_call(
        functools.partial(_ffn_add_ln_kernel, eps=eps, final_ln=final_ln),
        out_shape=jax.ShapeDtypeStruct((M, E), out_dtype),
        grid=(pl.cdiv(M, tm),),
        in_specs=[
            pl.BlockSpec((tm, E), lambda i: (i, 0)),
            pl.BlockSpec((E, F), const),
            pl.BlockSpec((1, F), const),
            pl.BlockSpec((F, E), const),
            pl.BlockSpec((8, E), const),
        ],
        out_specs=pl.BlockSpec((tm, E), lambda i: (i, 0)),
        compiler_params=pltpu.CompilerParams(
            dimension_semantics=("parallel",),
            vmem_limit_bytes=_VMEM_LIMIT),
    )(x, p["w1"], p["b1"], p["w2"], p["cvec"])


# ----------------------------------------------------------------------------
# Model glue (internal layout: batch-major (N, L, E), bf16 activations).
# ----------------------------------------------------------------------------
def transformer_forward(params, src, mask, query_embed, pos_embed, nhead):
    """Mirrors Transformer.forward (eval mode):
       src, pos_embed: [bs, c, h, w]; mask: [bs, h, w] bool; query_embed: [Q, c]."""
    bs, c, h, w = src.shape
    hw = h * w
    src_seq = src.reshape(bs, c, hw).transpose(0, 2, 1).astype(jnp.bfloat16)
    pos_seq = pos_embed.reshape(bs, c, hw).transpose(0, 2, 1).astype(jnp.bfloat16)
    Q = query_embed.shape[0]
    query_pos = query_embed[None].astype(jnp.bfloat16)           # (1, Q, E)
    key_bias = jnp.where(mask.reshape(bs, 1, hw), -1e30, 0.0).astype(jnp.float32)
    tgt = jnp.zeros((bs, Q, c), jnp.bfloat16)

    # ---------------- encoder ----------------
    memory = src_seq
    for lp in params["encoder_layers"]:
        memory = mha_add_ln(memory, pos_seq, None, None, key_bias,
                            lp["self_attn"], nhead, self_attn=True)
        N, L, E = memory.shape
        memory = ffn_add_ln(memory.reshape(N * L, E), lp["ffn"]).reshape(N, L, E)

    # ---------------- decoder ----------------
    output = tgt
    n_dec = len(params["decoder_layers"])
    for i, lp in enumerate(params["decoder_layers"]):
        last = (i == n_dec - 1)
        # self-attention (no key-padding mask on queries)
        output = mha_add_ln(output, query_pos, None, None, None,
                            lp["self_attn"], nhead, self_attn=True)
        # cross-attention against encoder memory
        output = mha_add_ln(output, query_pos, memory, pos_seq, key_bias,
                            lp["cross_attn"], nhead, self_attn=False)
        N, Qn, E = output.shape
        output = ffn_add_ln(
            output.reshape(N * Qn, E), lp["ffn"], final_ln=last,
            out_dtype=jnp.float32 if last else jnp.bfloat16,
        ).reshape(N, Qn, E)

    hs = output[None]                                            # (1, bs, Q, c)
    memory_out = memory.astype(jnp.float32).transpose(0, 2, 1).reshape(bs, c, h, w)
    return hs, memory_out


# ----------------------------------------------------------------------------
# Deterministic parameter init (xavier_uniform matrices, 0/1 biases / LN) and
# one-time host-side packing into the kernel-ready (bf16 weights, packed bias
# vectors) form.
# ----------------------------------------------------------------------------
def _xavier(key, shape):
    bound = math.sqrt(6.0 / (shape[0] + shape[1]))
    return jax.random.uniform(key, shape, jnp.float32, -bound, bound)


def _init_attn(key, d_model):
    ks = jax.random.split(key, 4)
    z = jnp.zeros((d_model,), jnp.float32)
    return {"wq": _xavier(ks[0], (d_model, d_model)), "bq": z,
            "wk": _xavier(ks[1], (d_model, d_model)), "bk": z,
            "wv": _xavier(ks[2], (d_model, d_model)), "bv": z,
            "wo": _xavier(ks[3], (d_model, d_model)), "bo": z}


def _init_enc_layer(key, d_model, dim_ff):
    ks = jax.random.split(key, 3)
    return {
        "self_attn": _init_attn(ks[0], d_model),
        "lin1_w": _xavier(ks[1], (d_model, dim_ff)), "lin1_b": jnp.zeros((dim_ff,), jnp.float32),
        "lin2_w": _xavier(ks[2], (dim_ff, d_model)), "lin2_b": jnp.zeros((d_model,), jnp.float32),
        "norm1_g": jnp.ones((d_model,), jnp.float32), "norm1_b": jnp.zeros((d_model,), jnp.float32),
        "norm2_g": jnp.ones((d_model,), jnp.float32), "norm2_b": jnp.zeros((d_model,), jnp.float32),
    }


def _init_dec_layer(key, d_model, dim_ff):
    ks = jax.random.split(key, 4)
    return {
        "self_attn": _init_attn(ks[0], d_model),
        "cross_attn": _init_attn(ks[1], d_model),
        "lin1_w": _xavier(ks[2], (d_model, dim_ff)), "lin1_b": jnp.zeros((dim_ff,), jnp.float32),
        "lin2_w": _xavier(ks[3], (dim_ff, d_model)), "lin2_b": jnp.zeros((d_model,), jnp.float32),
        "norm1_g": jnp.ones((d_model,), jnp.float32), "norm1_b": jnp.zeros((d_model,), jnp.float32),
        "norm2_g": jnp.ones((d_model,), jnp.float32), "norm2_b": jnp.zeros((d_model,), jnp.float32),
        "norm3_g": jnp.ones((d_model,), jnp.float32), "norm3_b": jnp.zeros((d_model,), jnp.float32),
    }


def init_transformer_params(key, d_model, dim_ff, n_enc, n_dec):
    keys = jax.random.split(key, n_enc + n_dec)
    return {
        "encoder_layers": [_init_enc_layer(keys[i], d_model, dim_ff) for i in range(n_enc)],
        "decoder_layers": [_init_dec_layer(keys[n_enc + i], d_model, dim_ff) for i in range(n_dec)],
        "dec_norm_g": jnp.ones((d_model,), jnp.float32),
        "dec_norm_b": jnp.zeros((d_model,), jnp.float32),
    }


def pack_params(raw):
    """One-time host packing: bf16 weights, Wq|Wk packed, biases/LN packed."""
    bf16, f32 = jnp.bfloat16, jnp.float32

    def pack_attn(a, g, b):
        z = jnp.zeros_like(g)
        return {
            "wqk": jnp.concatenate([a["wq"], a["wk"]], axis=1).astype(bf16),
            "wv": a["wv"].astype(bf16),
            "wo": a["wo"].astype(bf16),
            "cvec": jnp.stack([a["bq"], a["bk"], a["bv"], a["bo"], g, b, z, z]).astype(f32),
        }

    def pack_ffn(lp, g, b, g2=None, b2=None):
        E = lp["lin2_w"].shape[1]
        g2 = jnp.ones((E,), f32) if g2 is None else g2
        b2 = jnp.zeros((E,), f32) if b2 is None else b2
        z = jnp.zeros((E,), f32)
        return {
            "w1": lp["lin1_w"].astype(bf16),
            "b1": lp["lin1_b"].reshape(1, -1).astype(f32),
            "w2": lp["lin2_w"].astype(bf16),
            "cvec": jnp.stack([lp["lin2_b"], g, b, g2, b2, z, z, z]).astype(f32),
        }

    enc = [{"self_attn": pack_attn(lp["self_attn"], lp["norm1_g"], lp["norm1_b"]),
            "ffn": pack_ffn(lp, lp["norm2_g"], lp["norm2_b"])}
           for lp in raw["encoder_layers"]]
    n_dec = len(raw["decoder_layers"])
    dec = []
    for i, lp in enumerate(raw["decoder_layers"]):
        last = (i == n_dec - 1)
        dec.append({
            "self_attn": pack_attn(lp["self_attn"], lp["norm1_g"], lp["norm1_b"]),
            "cross_attn": pack_attn(lp["cross_attn"], lp["norm2_g"], lp["norm2_b"]),
            "ffn": pack_ffn(lp, lp["norm3_g"], lp["norm3_b"],
                            raw["dec_norm_g"] if last else None,
                            raw["dec_norm_b"] if last else None),
        })
    return {"encoder_layers": enc, "decoder_layers": dec}


# ----------------------------------------------------------------------------
if __name__ == "__main__":
    # Small but lane-dense config (d_model / dim_ff multiples of 128).
    d_model, nhead = 128, 8
    num_encoder_layers, num_decoder_layers = 2, 2
    dim_feedforward = 256
    bs, h, w = 2, 8, 8
    num_queries = 16
    # TODO(synk): `num_group` from the registry config is unused by the given
    # TransformerDecoderLayer forward path, so it has no kernel-side effect.

    root = jax.random.PRNGKey(0)
    k_src, k_pos, k_query, k_params = jax.random.split(root, 4)

    src = jax.random.normal(k_src, (bs, d_model, h, w), jnp.float32)
    pos_embed = jax.random.normal(k_pos, (bs, d_model, h, w), jnp.float32)
    query_embed = jax.random.normal(k_query, (num_queries, d_model), jnp.float32)
    # key_padding_mask: True = padded position (last column padded).
    mask = jnp.zeros((bs, h, w), dtype=bool).at[:, :, -1].set(True)

    raw_params = init_transformer_params(k_params, d_model, dim_feedforward,
                                         num_encoder_layers, num_decoder_layers)
    params = pack_params(raw_params)

    fwd = jax.jit(functools.partial(transformer_forward, nhead=nhead))
    hs, memory = fwd(params, src, mask, query_embed, pos_embed)
    jax.block_until_ready(hs)
    jax.block_until_ready(memory)

    assert hs.shape == (1, bs, num_queries, d_model)
    assert memory.shape == (bs, d_model, h, w)
    assert bool(jnp.all(jnp.isfinite(hs))) and bool(jnp.all(jnp.isfinite(memory)))
    print("KERNEL_OK")
</pallas_src>

<mosaic_0001>
module attributes {stable_mosaic.version = 11 : i64} {
  func.func @_ffn_add_ln_kernel(%arg0: i32, %arg1: memref<64x128xbf16, #tpu.memory_space<vmem>>, %arg2: memref<128x256xbf16, #tpu.memory_space<vmem>>, %arg3: memref<1x256xf32, #tpu.memory_space<vmem>>, %arg4: memref<256x128xbf16, #tpu.memory_space<vmem>>, %arg5: memref<8x128xf32, #tpu.memory_space<vmem>>, %arg6: memref<64x128xbf16, #tpu.memory_space<vmem>>) attributes {dimension_semantics = [#tpu.dimension_semantics<parallel>], iteration_bounds = array<i64: 2>, scalar_prefetch = 0 : i64, scratch_operands = 0 : i64, tpu.core_type = #tpu.core_type<tc>, window_params = [{transform_indices = @transform_0, window_bounds = array<i64: 64, 128>}, {pipeline_mode = #tpu.pipeline_mode<synchronous>, transform_indices = @transform_1, window_bounds = array<i64: 128, 256>}, {pipeline_mode = #tpu.pipeline_mode<synchronous>, transform_indices = @transform_2, window_bounds = array<i64: 1, 256>}, {pipeline_mode = #tpu.pipeline_mode<synchronous>, transform_indices = @transform_3, window_bounds = array<i64: 256, 128>}, {pipeline_mode = #tpu.pipeline_mode<synchronous>, transform_indices = @transform_4, window_bounds = array<i64: 8, 128>}, {transform_indices = @transform_5, window_bounds = array<i64: 64, 128>}]} {
    %c0 = arith.constant 0 : index
    %c0_0 = arith.constant 0 : index
    %0 = vector.load %arg1[%c0, %c0_0] : memref<64x128xbf16, #tpu.memory_space<vmem>>, vector<64x128xbf16>
    %c0_1 = arith.constant 0 : index
    %c0_2 = arith.constant 0 : index
    %1 = vector.load %arg2[%c0_1, %c0_2] : memref<128x256xbf16, #tpu.memory_space<vmem>>, vector<128x256xbf16>
    %cst = arith.constant dense<0.000000e+00> : vector<64x256xf32>
    %2 = tpu.matmul %0, %1, %cst {dimension_numbers = #tpu.dot_dimension_numbers<[1], [0], [0], [1], [0, 0, 1, 1], [], []>} : vector<64x128xbf16>, vector<128x256xbf16>, vector<64x256xf32> -> vector<64x256xf32>
    %c0_3 = arith.constant 0 : index
    %c0_4 = arith.constant 0 : index
    %3 = vector.load %arg3[%c0_3, %c0_4] : memref<1x256xf32, #tpu.memory_space<vmem>>, vector<1x256xf32>
    %4 = vector.broadcast %3 : vector<1x256xf32> to vector<64x256xf32>
    %5 = arith.addf %2, %4 : vector<64x256xf32>
    %cst_5 = arith.constant 0.000000e+00 : f32
    %6 = vector.broadcast %cst_5 : f32 to vector<64x256xf32>
    %7 = arith.maximumf %5, %6 : vector<64x256xf32>
    %8 = arith.truncf %7 : vector<64x256xf32> to vector<64x256xbf16>
    %c0_6 = arith.constant 0 : index
    %c0_7 = arith.constant 0 : index
    %9 = vector.load %arg4[%c0_6, %c0_7] : memref<256x128xbf16, #tpu.memory_space<vmem>>, vector<256x128xbf16>
    %cst_8 = arith.constant dense<0.000000e+00> : vector<64x128xf32>
    %10 = tpu.matmul %8, %9, %cst_8 {dimension_numbers = #tpu.dot_dimension_numbers<[1], [0], [0], [1], [0, 0, 1, 1], [], []>} : vector<64x256xbf16>, vector<256x128xbf16>, vector<64x128xf32> -> vector<64x128xf32>
    %c0_9 = arith.constant 0 : index
    %c0_10 = arith.constant 0 : index
    %11 = vector.load %arg5[%c0_9, %c0_10] : memref<8x128xf32, #tpu.memory_space<vmem>>, vector<1x128xf32>
    %12 = vector.broadcast %11 : vector<1x128xf32> to vector<64x128xf32>
    %13 = arith.addf %10, %12 : vector<64x128xf32>
    %14 = arith.extf %0 : vector<64x128xbf16> to vector<64x128xf32>
    %15 = arith.addf %14, %13 : vector<64x128xf32>
    %cst_11 = arith.constant dense<0.000000e+00> : vector<64xf32>
    %16 = vector.multi_reduction <add>, %15, %cst_11 [1] : vector<64x128xf32> to vector<64xf32>
    %17 = vector.shape_cast %16 : vector<64xf32> to vector<64x1xf32>
    %cst_12 = arith.constant 1.280000e+02 : f32
    %18 = vector.broadcast %cst_12 : f32 to vector<64x1xf32>
    %19 = arith.divf %17, %18 : vector<64x1xf32>
    %20 = vector.broadcast %19 : vector<64x1xf32> to vector<64x128xf32>
    %21 = arith.subf %15, %20 : vector<64x128xf32>
    %22 = vector.broadcast %19 : vector<64x1xf32> to vector<64x128xf32>
    %23 = arith.subf %15, %22 : vector<64x128xf32>
    %24 = arith.mulf %21, %23 : vector<64x128xf32>
    %cst_13 = arith.constant dense<0.000000e+00> : vector<64xf32>
    %25 = vector.multi_reduction <add>, %24, %cst_13 [1] : vector<64x128xf32> to vector<64xf32>
    %26 = vector.shape_cast %25 : vector<64xf32> to vector<64x1xf32>
    %cst_14 = arith.constant 1.280000e+02 : f32
    %27 = vector.broadcast %cst_14 : f32 to vector<64x1xf32>
    %28 = arith.divf %26, %27 : vector<64x1xf32>
    %29 = vector.broadcast %19 : vector<64x1xf32> to vector<64x128xf32>
    %30 = arith.subf %15, %29 : vector<64x128xf32>
    %cst_15 = arith.constant 9.99999974E-6 : f32
    %31 = vector.broadcast %cst_15 : f32 to vector<64x1xf32>
    %32 = arith.addf %28, %31 : vector<64x1xf32>
    %33 = math.rsqrt %32 : vector<64x1xf32>
    %34 = vector.broadcast %33 : vector<64x1xf32> to vector<64x128xf32>
    %35 = arith.mulf %30, %34 : vector<64x128xf32>
    %c1 = arith.constant 1 : index
    %c0_16 = arith.constant 0 : index
    %36 = vector.load %arg5[%c1, %c0_16] : memref<8x128xf32, #tpu.memory_space<vmem>>, vector<1x128xf32>
    %37 = vector.broadcast %36 : vector<1x128xf32> to vector<64x128xf32>
    %38 = arith.mulf %35, %37 : vector<64x128xf32>
    %c2 = arith.constant 2 : index
    %c0_17 = arith.constant 0 : index
    %39 = vector.load %arg5[%c2, %c0_17] : memref<8x128xf32, #tpu.memory_space<vmem>>, vector<1x128xf32>
    %40 = vector.broadcast %39 : vector<1x128xf32> to vector<64x128xf32>
    %41 = arith.addf %38, %40 : vector<64x128xf32>
    %42 = arith.truncf %41 : vector<64x128xf32> to vector<64x128xbf16>
    %c0_18 = arith.constant 0 : index
    %c0_19 = arith.constant 0 : index
    %43 = vector.load %arg6[%c0_18, %c0_19] : memref<64x128xbf16, #tpu.memory_space<vmem>>, vector<64x128xbf16>
    tpu.vector_store %arg6[%c0_18, %c0_19], %42 {strides = array<i32>} : memref<64x128xbf16, #tpu.memory_space<vmem>>, vector<64x128xbf16>,
    return
  }
  func.func @transform_0(%arg0: i32) -> (i32, i32) {
    %c0_i32 = arith.constant 0 : i32
    %c0_i32_0 = arith.constant 0 : i32
    return %arg0, %c0_i32 : i32, i32
  }
  func.func @transform_1(%arg0: i32) -> (i32, i32) {
    %c0_i32 = arith.constant 0 : i32
    %c0_i32_0 = arith.constant 0 : i32
    %c0_i32_1 = arith.constant 0 : i32
    return %c0_i32, %c0_i32_0 : i32, i32
  }
  func.func @transform_2(%arg0: i32) -> (i32, i32) {
    %c0_i32 = arith.constant 0 : i32
    %c0_i32_0 = arith.constant 0 : i32
    %c0_i32_1 = arith.constant 0 : i32
    return %c0_i32, %c0_i32_0 : i32, i32
  }
  func.func @transform_3(%arg0: i32) -> (i32, i32) {
    %c0_i32 = arith.constant 0 : i32
    %c0_i32_0 = arith.constant 0 : i32
    %c0_i32_1 = arith.constant 0 : i32
    return %c0_i32, %c0_i32_0 : i32, i32
  }
  func.func @transform_4(%arg0: i32) -> (i32, i32) {
    %c0_i32 = arith.constant 0 : i32
    %c0_i32_0 = arith.constant 0 : i32
    %c0_i32_1 = arith.constant 0 : i32
    return %c0_i32, %c0_i32_0 : i32, i32
  }
  func.func @transform_5(%arg0: i32) -> (i32, i32) {
    %c0_i32 = arith.constant 0 : i32
    %c0_i32_0 = arith.constant 0 : i32
    return %arg0, %c0_i32 : i32, i32
  }
}

module attributes {stable_mosaic.version = 11 : i64} {
  func.func @_mha_add_ln_kernel(%arg0: i32, %arg1: memref<1x64x128xbf16, #tpu.memory_space<vmem>>, %arg2: memref<1x64x128xbf16, #tpu.memory_space<vmem>>, %arg3: memref<1x1x64xf32, #tpu.memory_space<vmem>>, %arg4: memref<128x256xbf16, #tpu.memory_space<vmem>>, %arg5: memref<128x128xbf16, #tpu.memory_space<vmem>>, %arg6: memref<128x128xbf16, #tpu.memory_space<vmem>>, %arg7: memref<8x128xf32, #tpu.memory_space<vmem>>, %arg8: memref<1x64x128xbf16, #tpu.memory_space<vmem>>, %arg9: memref<64x128xbf16, #tpu.memory_space<vmem>>) attributes {dimension_semantics = [#tpu.dimension_semantics<parallel>], iteration_bounds = array<i64: 2>, scalar_prefetch = 0 : i64, scratch_operands = 1 : i64, tpu.core_type = #tpu.core_type<tc>, window_params = [{transform_indices = @transform_0, window_bounds = array<i64: 1, 64, 128>}, {transform_indices = @transform_1, window_bounds = array<i64: 1, 64, 128>}, {transform_indices = @transform_2, window_bounds = array<i64: 1, 1, 64>}, {pipeline_mode = #tpu.pipeline_mode<synchronous>, transform_indices = @transform_3, window_bounds = array<i64: 128, 256>}, {pipeline_mode = #tpu.pipeline_mode<synchronous>, transform_indices = @transform_4, window_bounds = array<i64: 128, 128>}, {pipeline_mode = #tpu.pipeline_mode<synchronous>, transform_indices = @transform_5, window_bounds = array<i64: 128, 128>}, {pipeline_mode = #tpu.pipeline_mode<synchronous>, transform_indices = @transform_6, window_bounds = array<i64: 8, 128>}, {transform_indices = @transform_7, window_bounds = array<i64: 1, 64, 128>}]} {
    %c0 = arith.constant 0 : index
    %c0_0 = arith.constant 0 : index
    %0 = vector.load %arg7[%c0, %c0_0] : memref<8x128xf32, #tpu.memory_space<vmem>>, vector<1x128xf32>
    %c1 = arith.constant 1 : index
    %c0_1 = arith.constant 0 : index
    %1 = vector.load %arg7[%c1, %c0_1] : memref<8x128xf32, #tpu.memory_space<vmem>>, vector<1x128xf32>
    %c2 = arith.constant 2 : index
    %c0_2 = arith.constant 0 : index
    %2 = vector.load %arg7[%c2, %c0_2] : memref<8x128xf32, #tpu.memory_space<vmem>>, vector<1x128xf32>
    %c0_3 = arith.constant 0 : index
    %c0_4 = arith.constant 0 : index
    %c0_5 = arith.constant 0 : index
    %3 = vector.load %arg1[%c0_3, %c0_4, %c0_5] : memref<1x64x128xbf16, #tpu.memory_space<vmem>>, vector<1x64x128xbf16>
    %4 = vector.shape_cast %3 : vector<1x64x128xbf16> to vector<64x128xbf16>
    %c0_6 = arith.constant 0 : index
    %c0_7 = arith.constant 0 : index
    %c0_8 = arith.constant 0 : index
    %5 = vector.load %arg2[%c0_6, %c0_7, %c0_8] : memref<1x64x128xbf16, #tpu.memory_space<vmem>>, vector<1x64x128xbf16>
    %6 = vector.shape_cast %5 : vector<1x64x128xbf16> to vector<64x128xbf16>
    %7 = arith.addf %4, %6 : vector<64x128xbf16>
    %c0_9 = arith.constant 0 : index
    %c0_10 = arith.constant 0 : index
    %8 = vector.load %arg4[%c0_9, %c0_10] : memref<128x256xbf16, #tpu.memory_space<vmem>>, vector<128x256xbf16>
    %cst = arith.constant dense<0.000000e+00> : vector<64x256xf32>
    %9 = tpu.matmul %7, %8, %cst {dimension_numbers = #tpu.dot_dimension_numbers<[1], [0], [0], [1], [0, 0, 1, 1], [], []>} : vector<64x128xbf16>, vector<128x256xbf16>, vector<64x256xf32> -> vector<64x256xf32>
    %10 = vector.extract_strided_slice %9 {offsets = [0, 0], sizes = [64, 128], strides = [1, 1]} : vector<64x256xf32> to vector<64x128xf32>
    %11 = vector.broadcast %0 : vector<1x128xf32> to vector<64x128xf32>
    %12 = arith.addf %10, %11 : vector<64x128xf32>
    %cst_11 = arith.constant 2.500000e-01 : f32
    %13 = vector.broadcast %cst_11 : f32 to vector<64x128xf32>
    %14 = arith.mulf %12, %13 : vector<64x128xf32>
    %15 = vector.extract_strided_slice %9 {offsets = [0, 128], sizes = [64, 128], strides = [1, 1]} : vector<64x256xf32> to vector<64x128xf32>
    %16 = vector.broadcast %1 : vector<1x128xf32> to vector<64x128xf32>
    %17 = arith.addf %15, %16 : vector<64x128xf32>
    %c0_12 = arith.constant 0 : index
    %c0_13 = arith.constant 0 : index
    %c0_14 = arith.constant 0 : index
    %18 = vector.load %arg1[%c0_12, %c0_13, %c0_14] : memref<1x64x128xbf16, #tpu.memory_space<vmem>>, vector<1x64x128xbf16>
    %19 = vector.shape_cast %18 : vector<1x64x128xbf16> to vector<64x128xbf16>
    %c0_15 = arith.constant 0 : index
    %c0_16 = arith.constant 0 : index
    %20 = vector.load %arg5[%c0_15, %c0_16] : memref<128x128xbf16, #tpu.memory_space<vmem>>, vector<128x128xbf16>
    %cst_17 = arith.constant dense<0.000000e+00> : vector<64x128xf32>
    %21 = tpu.matmul %19, %20, %cst_17 {dimension_numbers = #tpu.dot_dimension_numbers<[1], [0], [0], [1], [0, 0, 1, 1], [], []>} : vector<64x128xbf16>, vector<128x128xbf16>, vector<64x128xf32> -> vector<64x128xf32>
    %22 = vector.broadcast %2 : vector<1x128xf32> to vector<64x128xf32>
    %23 = arith.addf %21, %22 : vector<64x128xf32>
    %24 = arith.truncf %14 : vector<64x128xf32> to vector<64x128xbf16>
    %25 = arith.truncf %17 : vector<64x128xf32> to vector<64x128xbf16>
    %26 = arith.truncf %23 : vector<64x128xf32> to vector<64x128xbf16>
    %c0_18 = arith.constant 0 : index
    %c0_19 = arith.constant 0 : index
    %c0_20 = arith.constant 0 : index
    %27 = vector.load %arg3[%c0_18, %c0_19, %c0_20] : memref<1x1x64xf32, #tpu.memory_space<vmem>>, vector<1x1x64xf32>
    %28 = vector.shape_cast %27 : vector<1x1x64xf32> to vector<1x64xf32>
    %29 = vector.extract_strided_slice %24 {offsets = [0, 0], sizes = [64, 16], strides = [1, 1]} : vector<64x128xbf16> to vector<64x16xbf16>
    %30 = vector.extract_strided_slice %25 {offsets = [0, 0], sizes = [64, 16], strides = [1, 1]} : vector<64x128xbf16> to vector<64x16xbf16>
    %cst_21 = arith.constant dense<0.000000e+00> : vector<64x64xf32>
    %31 = tpu.matmul %29, %30, %cst_21 {dimension_numbers = #tpu.dot_dimension_numbers<[1], [1], [0], [0], [0, 0, 1, 0], [], []>} : vector<64x16xbf16>, vector<64x16xbf16>, vector<64x64xf32> -> vector<64x64xf32>
    %32 = vector.broadcast %28 : vector<1x64xf32> to vector<64x64xf32>
    %33 = arith.addf %31, %32 : vector<64x64xf32>
    %cst_22 = arith.constant dense<0xFF800000> : vector<64xf32>
    %34 = vector.multi_reduction <maximumf>, %33, %cst_22 [1] : vector<64x64xf32> to vector<64xf32>
    %35 = vector.shape_cast %34 : vector<64xf32> to vector<64x1xf32>
    %36 = vector.broadcast %35 : vector<64x1xf32> to vector<64x64xf32>
    %37 = arith.subf %33, %36 : vector<64x64xf32>
    %38 = math.exp %37 : vector<64x64xf32>
    %cst_23 = arith.constant dense<0.000000e+00> : vector<64xf32>
    %39 = vector.multi_reduction <add>, %38, %cst_23 [1] : vector<64x64xf32> to vector<64xf32>
    %40 = vector.shape_cast %39 : vector<64xf32> to vector<64x1xf32>
    %41 = tpu.reciprocal %40 {approx = true} : vector<64x1xf32> -> vector<64x1xf32>
    %42 = vector.broadcast %41 : vector<64x1xf32> to vector<64x64xf32>
    %43 = arith.mulf %38, %42 : vector<64x64xf32>
    %44 = arith.truncf %43 : vector<64x64xf32> to vector<64x64xbf16>
    %45 = vector.extract_strided_slice %26 {offsets = [0, 0], sizes = [64, 16], strides = [1, 1]} : vector<64x128xbf16> to vector<64x16xbf16>
    %cst_24 = arith.constant dense<0.000000e+00> : vector<64x16xf32>
    %46 = tpu.matmul %44, %45, %cst_24 {dimension_numbers = #tpu.dot_dimension_numbers<[1], [0], [0], [1], [0, 0, 1, 1], [], []>} : vector<64x64xbf16>, vector<64x16xbf16>, vector<64x16xf32> -> vector<64x16xf32>
    %47 = arith.truncf %46 : vector<64x16xf32> to vector<64x16xbf16>
    %c0_25 = arith.constant 0 : index
    %c0_26 = arith.constant 0 : index
    %48 = vector.load %arg9[%c0_25, %c0_26] : memref<64x128xbf16, #tpu.memory_space<vmem>>, vector<64x16xbf16>
    tpu.vector_store %arg9[%c0_25, %c0_26], %47 {strides = array<i32>} : memref<64x128xbf16, #tpu.memory_space<vmem>>, vector<64x16xbf16>,
    %49 = vector.extract_strided_slice %24 {offsets = [0, 16], sizes = [64, 16], strides = [1, 1]} : vector<64x128xbf16> to vector<64x16xbf16>
    %50 = vector.extract_strided_slice %25 {offsets = [0, 16], sizes = [64, 16], strides = [1, 1]} : vector<64x128xbf16> to vector<64x16xbf16>
    %cst_27 = arith.constant dense<0.000000e+00> : vector<64x64xf32>
    %51 = tpu.matmul %49, %50, %cst_27 {dimension_numbers = #tpu.dot_dimension_numbers<[1], [1], [0], [0], [0, 0, 1, 0], [], []>} : vector<64x16xbf16>, vector<64x16xbf16>, vector<64x64xf32> -> vector<64x64xf32>
    %52 = vector.broadcast %28 : vector<1x64xf32> to vector<64x64xf32>
    %53 = arith.addf %51, %52 : vector<64x64xf32>
    %cst_28 = arith.constant dense<0xFF800000> : vector<64xf32>
    %54 = vector.multi_reduction <maximumf>, %53, %cst_28 [1] : vector<64x64xf32> to vector<64xf32>
    %55 = vector.shape_cast %54 : vector<64xf32> to vector<64x1xf32>
    %56 = vector.broadcast %55 : vector<64x1xf32> to vector<64x64xf32>
    %57 = arith.subf %53, %56 : vector<64x64xf32>
    %58 = math.exp %57 : vector<64x64xf32>
    %cst_29 = arith.constant dense<0.000000e+00> : vector<64xf32>
    %59 = vector.multi_reduction <add>, %58, %cst_29 [1] : vector<64x64xf32> to vector<64xf32>
    %60 = vector.shape_cast %59 : vector<64xf32> to vector<64x1xf32>
    %61 = tpu.reciprocal %60 {approx = true} : vector<64x1xf32> -> vector<64x1xf32>
    %62 = vector.broadcast %61 : vector<64x1xf32> to vector<64x64xf32>
    %63 = arith.mulf %58, %62 : vector<64x64xf32>
    %64 = arith.truncf %63 : vector<64x64xf32> to vector<64x64xbf16>
    %65 = vector.extract_strided_slice %26 {offsets = [0, 16], sizes = [64, 16], strides = [1, 1]} : vector<64x128xbf16> to vector<64x16xbf16>
    %cst_30 = arith.constant dense<0.000000e+00> : vector<64x16xf32>
    %66 = tpu.matmul %64, %65, %cst_30 {dimension_numbers = #tpu.dot_dimension_numbers<[1], [0], [0], [1], [0, 0, 1, 1], [], []>} : vector<64x64xbf16>, vector<64x16xbf16>, vector<64x16xf32> -> vector<64x16xf32>
    %67 = arith.truncf %66 : vector<64x16xf32> to vector<64x16xbf16>
    %c0_31 = arith.constant 0 : index
    %c16 = arith.constant 16 : index
    %68 = vector.load %arg9[%c0_31, %c16] : memref<64x128xbf16, #tpu.memory_space<vmem>>, vector<64x16xbf16>
    tpu.vector_store %arg9[%c0_31, %c16], %67 {strides = array<i32>} : memref<64x128xbf16, #tpu.memory_space<vmem>>, vector<64x16xbf16>,
    %69 = vector.extract_strided_slice %24 {offsets = [0, 32], sizes = [64, 16], strides = [1, 1]} : vector<64x128xbf16> to vector<64x16xbf16>
    %70 = vector.extract_strided_slice %25 {offsets = [0, 32], sizes = [64, 16], strides = [1, 1]} : vector<64x128xbf16> to vector<64x16xbf16>
    %cst_32 = arith.constant dense<0.000000e+00> : vector<64x64xf32>
    %71 = tpu.matmul %69, %70, %cst_32 {dimension_numbers = #tpu.dot_dimension_numbers<[1], [1], [0], [0], [0, 0, 1, 0], [], []>} : vector<64x16xbf16>, vector<64x16xbf16>, vector<64x64xf32> -> vector<64x64xf32>
    %72 = vector.broadcast %28 : vector<1x64xf32> to vector<64x64xf32>
    %73 = arith.addf %71, %72 : vector<64x64xf32>
    %cst_33 = arith.constant dense<0xFF800000> : vector<64xf32>
    %74 = vector.multi_reduction <maximumf>, %73, %cst_33 [1] : vector<64x64xf32> to vector<64xf32>
    %75 = vector.shape_cast %74 : vector<64xf32> to vector<64x1xf32>
    %76 = vector.broadcast %75 : vector<64x1xf32> to vector<64x64xf32>
    %77 = arith.subf %73, %76 : vector<64x64xf32>
    %78 = math.exp %77 : vector<64x64xf32>
    %cst_34 = arith.constant dense<0.000000e+00> : vector<64xf32>
    %79 = vector.multi_reduction <add>, %78, %cst_34 [1] : vector<64x64xf32> to vector<64xf32>
    %80 = vector.shape_cast %79 : vector<64xf32> to vector<64x1xf32>
    %81 = tpu.reciprocal %80 {approx = true} : vector<64x1xf32> -> vector<64x1xf32>
    %82 = vector.broadcast %81 : vector<64x1xf32> to vector<64x64xf32>
    %83 = arith.mulf %78, %82 : vector<64x64xf32>
    %84 = arith.truncf %83 : vector<64x64xf32> to vector<64x64xbf16>
    %85 = vector.extract_strided_slice %26 {offsets = [0, 32], sizes = [64, 16], strides = [1, 1]} : vector<64x128xbf16> to vector<64x16xbf16>
    %cst_35 = arith.constant dense<0.000000e+00> : vector<64x16xf32>
    %86 = tpu.matmul %84, %85, %cst_35 {dimension_numbers = #tpu.dot_dimension_numbers<[1], [0], [0], [1], [0, 0, 1, 1], [], []>} : vector<64x64xbf16>, vector<64x16xbf16>, vector<64x16xf32> -> vector<64x16xf32>
    %87 = arith.truncf %86 : vector<64x16xf32> to vector<64x16xbf16>
    %c0_36 = arith.constant 0 : index
    %c32 = arith.constant 32 : index
    %88 = vector.load %arg9[%c0_36, %c32] : memref<64x128xbf16, #tpu.memory_space<vmem>>, vector<64x16xbf16>
    tpu.vector_store %arg9[%c0_36, %c32], %87 {strides = array<i32>} : memref<64x128xbf16, #tpu.memory_space<vmem>>, vector<64x16xbf16>,
    %89 = vector.extract_strided_slice %24 {offsets = [0, 48], sizes = [64, 16], strides = [1, 1]} : vector<64x128xbf16> to vector<64x16xbf16>
    %90 = vector.extract_strided_slice %25 {offsets = [0, 48], sizes = [64, 16], strides = [1, 1]} : vector<64x128xbf16> to vector<64x16xbf16>
    %cst_37 = arith.constant dense<0.000000e+00> : vector<64x64xf32>
    %91 = tpu.matmul %89, %90, %cst_37 {dimension_numbers = #tpu.dot_dimension_numbers<[1], [1], [0], [0], [0, 0, 1, 0], [], []>} : vector<64x16xbf16>, vector<64x16xbf16>, vector<64x64xf32> -> vector<64x64xf32>
    %92 = vector.broadcast %28 : vector<1x64xf32> to vector<64x64xf32>
    %93 = arith.addf %91, %92 : vector<64x64xf32>
    %cst_38 = arith.constant dense<0xFF800000> : vector<64xf32>
    %94 = vector.multi_reduction <maximumf>, %93, %cst_38 [1] : vector<64x64xf32> to vector<64xf32>
    %95 = vector.shape_cast %94 : vector<64xf32> to vector<64x1xf32>
    %96 = vector.broadcast %95 : vector<64x1xf32> to vector<64x64xf32>
    %97 = arith.subf %93, %96 : vector<64x64xf32>
    %98 = math.exp %97 : vector<64x64xf32>
    %cst_39 = arith.constant dense<0.000000e+00> : vector<64xf32>
    %99 = vector.multi_reduction <add>, %98, %cst_39 [1] : vector<64x64xf32> to vector<64xf32>
    %100 = vector.shape_cast %99 : vector<64xf32> to vector<64x1xf32>
    %101 = tpu.reciprocal %100 {approx = true} : vector<64x1xf32> -> vector<64x1xf32>
    %102 = vector.broadcast %101 : vector<64x1xf32> to vector<64x64xf32>
    %103 = arith.mulf %98, %102 : vector<64x64xf32>
    %104 = arith.truncf %103 : vector<64x64xf32> to vector<64x64xbf16>
    %105 = vector.extract_strided_slice %26 {offsets = [0, 48], sizes = [64, 16], strides = [1, 1]} : vector<64x128xbf16> to vector<64x16xbf16>
    %cst_40 = arith.constant dense<0.000000e+00> : vector<64x16xf32>
    %106 = tpu.matmul %104, %105, %cst_40 {dimension_numbers = #tpu.dot_dimension_numbers<[1], [0], [0], [1], [0, 0, 1, 1], [], []>} : vector<64x64xbf16>, vector<64x16xbf16>, vector<64x16xf32> -> vector<64x16xf32>
    %107 = arith.truncf %106 : vector<64x16xf32> to vector<64x16xbf16>
    %c0_41 = arith.constant 0 : index
    %c48 = arith.constant 48 : index
    %108 = vector.load %arg9[%c0_41, %c48] : memref<64x128xbf16, #tpu.memory_space<vmem>>, vector<64x16xbf16>
    tpu.vector_store %arg9[%c0_41, %c48], %107 {strides = array<i32>} : memref<64x128xbf16, #tpu.memory_space<vmem>>, vector<64x16xbf16>,
    %109 = vector.extract_strided_slice %24 {offsets = [0, 64], sizes = [64, 16], strides = [1, 1]} : vector<64x128xbf16> to vector<64x16xbf16>
    %110 = vector.extract_strided_slice %25 {offsets = [0, 64], sizes = [64, 16], strides = [1, 1]} : vector<64x128xbf16> to vector<64x16xbf16>
    %cst_42 = arith.constant dense<0.000000e+00> : vector<64x64xf32>
    %111 = tpu.matmul %109, %110, %cst_42 {dimension_numbers = #tpu.dot_dimension_numbers<[1], [1], [0], [0], [0, 0, 1, 0], [], []>} : vector<64x16xbf16>, vector<64x16xbf16>, vector<64x64xf32> -> vector<64x64xf32>
    %112 = vector.broadcast %28 : vector<1x64xf32> to vector<64x64xf32>
    %113 = arith.addf %111, %112 : vector<64x64xf32>
    %cst_43 = arith.constant dense<0xFF800000> : vector<64xf32>
    %114 = vector.multi_reduction <maximumf>, %113, %cst_43 [1] : vector<64x64xf32> to vector<64xf32>
    %115 = vector.shape_cast %114 : vector<64xf32> to vector<64x1xf32>
    %116 = vector.broadcast %115 : vector<64x1xf32> to vector<64x64xf32>
    %117 = arith.subf %113, %116 : vector<64x64xf32>
    %118 = math.exp %117 : vector<64x64xf32>
    %cst_44 = arith.constant dense<0.000000e+00> : vector<64xf32>
    %119 = vector.multi_reduction <add>, %118, %cst_44 [1] : vector<64x64xf32> to vector<64xf32>
    %120 = vector.shape_cast %119 : vector<64xf32> to vector<64x1xf32>
    %121 = tpu.reciprocal %120 {approx = true} : vector<64x1xf32> -> vector<64x1xf32>
    %122 = vector.broadcast %121 : vector<64x1xf32> to vector<64x64xf32>
    %123 = arith.mulf %118, %122 : vector<64x64xf32>
    %124 = arith.truncf %123 : vector<64x64xf32> to vector<64x64xbf16>
    %125 = vector.extract_strided_slice %26 {offsets = [0, 64], sizes = [64, 16], strides = [1, 1]} : vector<64x128xbf16> to vector<64x16xbf16>
    %cst_45 = arith.constant dense<0.000000e+00> : vector<64x16xf32>
    %126 = tpu.matmul %124, %125, %cst_45 {dimension_numbers = #tpu.dot_dimension_numbers<[1], [0], [0], [1], [0, 0, 1, 1], [], []>} : vector<64x64xbf16>, vector<64x16xbf16>, vector<64x16xf32> -> vector<64x16xf32>
    %127 = arith.truncf %126 : vector<64x16xf32> to vector<64x16xbf16>
    %c0_46 = arith.constant 0 : index
    %c64 = arith.constant 64 : index
    %128 = vector.load %arg9[%c0_46, %c64] : memref<64x128xbf16, #tpu.memory_space<vmem>>, vector<64x16xbf16>
    tpu.vector_store %arg9[%c0_46, %c64], %127 {strides = array<i32>} : memref<64x128xbf16, #tpu.memory_space<vmem>>, vector<64x16xbf16>,
    %129 = vector.extract_strided_slice %24 {offsets = [0, 80], sizes = [64, 16], strides = [1, 1]} : vector<64x128xbf16> to vector<64x16xbf16>
    %130 = vector.extract_strided_slice %25 {offsets = [0, 80], sizes = [64, 16], strides = [1, 1]} : vector<64x128xbf16> to vector<64x16xbf16>
    %cst_47 = arith.constant dense<0.000000e+00> : vector<64x64xf32>
    %131 = tpu.matmul %129, %130, %cst_47 {dimension_numbers = #tpu.dot_dimension_numbers<[1], [1], [0], [0], [0, 0, 1, 0], [], []>} : vector<64x16xbf16>, vector<64x16xbf16>, vector<64x64xf32> -> vector<64x64xf32>
    %132 = vector.broadcast %28 : vector<1x64xf32> to vector<64x64xf32>
    %133 = arith.addf %131, %132 : vector<64x64xf32>
    %cst_48 = arith.constant dense<0xFF800000> : vector<64xf32>
    %134 = vector.multi_reduction <maximumf>, %133, %cst_48 [1] : vector<64x64xf32> to vector<64xf32>
    %135 = vector.shape_cast %134 : vector<64xf32> to vector<64x1xf32>
    %136 = vector.broadcast %135 : vector<64x1xf32> to vector<64x64xf32>
    %137 = arith.subf %133, %136 : vector<64x64xf32>
    %138 = math.exp %137 : vector<64x64xf32>
    %cst_49 = arith.constant dense<0.000000e+00> : vector<64xf32>
    %139 = vector.multi_reduction <add>, %138, %cst_49 [1] : vector<64x64xf32> to vector<64xf32>
    %140 = vector.shape_cast %139 : vector<64xf32> to vector<64x1xf32>
    %141 = tpu.reciprocal %140 {approx = true} : vector<64x1xf32> -> vector<64x1xf32>
    %142 = vector.broadcast %141 : vector<64x1xf32> to vector<64x64xf32>
    %143 = arith.mulf %138, %142 : vector<64x64xf32>
    %144 = arith.truncf %143 : vector<64x64xf32> to vector<64x64xbf16>
    %145 = vector.extract_strided_slice %26 {offsets = [0, 80], sizes = [64, 16], strides = [1, 1]} : vector<64x128xbf16> to vector<64x16xbf16>
    %cst_50 = arith.constant dense<0.000000e+00> : vector<64x16xf32>
    %146 = tpu.matmul %144, %145, %cst_50 {dimension_numbers = #tpu.dot_dimension_numbers<[1], [0], [0], [1], [0, 0, 1, 1], [], []>} : vector<64x64xbf16>, vector<64x16xbf16>, vector<64x16xf32> -> vector<64x16xf32>
    %147 = arith.truncf %146 : vector<64x16xf32> to vector<64x16xbf16>
    %c0_51 = arith.constant 0 : index
    %c80 = arith.constant 80 : index
    %148 = vector.load %arg9[%c0_51, %c80] : memref<64x128xbf16, #tpu.memory_space<vmem>>, vector<64x16xbf16>
    tpu.vector_store %arg9[%c0_51, %c80], %147 {strides = array<i32>} : memref<64x128xbf16, #tpu.memory_space<vmem>>, vector<64x16xbf16>,
    %149 = vector.extract_strided_slice %24 {offsets = [0, 96], sizes = [64, 16], strides = [1, 1]} : vector<64x128xbf16> to vector<64x16xbf16>
    %150 = vector.extract_strided_slice %25 {offsets = [0, 96], sizes = [64, 16], strides = [1, 1]} : vector<64x128xbf16> to vector<64x16xbf16>
    %cst_52 = arith.constant dense<0.000000e+00> : vector<64x64xf32>
    %151 = tpu.matmul %149, %150, %cst_52 {dimension_numbers = #tpu.dot_dimension_numbers<[1], [1], [0], [0], [0, 0, 1, 0], [], []>} : vector<64x16xbf16>, vector<64x16xbf16>, vector<64x64xf32> -> vector<64x64xf32>
    %152 = vector.broadcast %28 : vector<1x64xf32> to vector<64x64xf32>
    %153 = arith.addf %151, %152 : vector<64x64xf32>
    %cst_53 = arith.constant dense<0xFF800000> : vector<64xf32>
    %154 = vector.multi_reduction <maximumf>, %153, %cst_53 [1] : vector<64x64xf32> to vector<64xf32>
    %155 = vector.shape_cast %154 : vector<64xf32> to vector<64x1xf32>
    %156 = vector.broadcast %155 : vector<64x1xf32> to vector<64x64xf32>
    %157 = arith.subf %153, %156 : vector<64x64xf32>
    %158 = math.exp %157 : vector<64x64xf32>
    %cst_54 = arith.constant dense<0.000000e+00> : vector<64xf32>
    %159 = vector.multi_reduction <add>, %158, %cst_54 [1] : vector<64x64xf32> to vector<64xf32>
    %160 = vector.shape_cast %159 : vector<64xf32> to vector<64x1xf32>
    %161 = tpu.reciprocal %160 {approx = true} : vector<64x1xf32> -> vector<64x1xf32>
    %162 = vector.broadcast %161 : vector<64x1xf32> to vector<64x64xf32>
    %163 = arith.mulf %158, %162 : vector<64x64xf32>
    %164 = arith.truncf %163 : vector<64x64xf32> to vector<64x64xbf16>
    %165 = vector.extract_strided_slice %26 {offsets = [0, 96], sizes = [64, 16], strides = [1, 1]} : vector<64x128xbf16> to vector<64x16xbf16>
    %cst_55 = arith.constant dense<0.000000e+00> : vector<64x16xf32>
    %166 = tpu.matmul %164, %165, %cst_55 {dimension_numbers = #tpu.dot_dimension_numbers<[1], [0], [0], [1], [0, 0, 1, 1], [], []>} : vector<64x64xbf16>, vector<64x16xbf16>, vector<64x16xf32> -> vector<64x16xf32>
    %167 = arith.truncf %166 : vector<64x16xf32> to vector<64x16xbf16>
    %c0_56 = arith.constant 0 : index
    %c96 = arith.constant 96 : index
    %168 = vector.load %arg9[%c0_56, %c96] : memref<64x128xbf16, #tpu.memory_space<vmem>>, vector<64x16xbf16>
    tpu.vector_store %arg9[%c0_56, %c96], %167 {strides = array<i32>} : memref<64x128xbf16, #tpu.memory_space<vmem>>, vector<64x16xbf16>,
    %169 = vector.extract_strided_slice %24 {offsets = [0, 112], sizes = [64, 16], strides = [1, 1]} : vector<64x128xbf16> to vector<64x16xbf16>
    %170 = vector.extract_strided_slice %25 {offsets = [0, 112], sizes = [64, 16], strides = [1, 1]} : vector<64x128xbf16> to vector<64x16xbf16>
    %cst_57 = arith.constant dense<0.000000e+00> : vector<64x64xf32>
    %171 = tpu.matmul %169, %170, %cst_57 {dimension_numbers = #tpu.dot_dimension_numbers<[1], [1], [0], [0], [0, 0, 1, 0], [], []>} : vector<64x16xbf16>, vector<64x16xbf16>, vector<64x64xf32> -> vector<64x64xf32>
    %172 = vector.broadcast %28 : vector<1x64xf32> to vector<64x64xf32>
    %173 = arith.addf %171, %172 : vector<64x64xf32>
    %cst_58 = arith.constant dense<0xFF800000> : vector<64xf32>
    %174 = vector.multi_reduction <maximumf>, %173, %cst_58 [1] : vector<64x64xf32> to vector<64xf32>
    %175 = vector.shape_cast %174 : vector<64xf32> to vector<64x1xf32>
    %176 = vector.broadcast %175 : vector<64x1xf32> to vector<64x64xf32>
    %177 = arith.subf %173, %176 : vector<64x64xf32>
    %178 = math.exp %177 : vector<64x64xf32>
    %cst_59 = arith.constant dense<0.000000e+00> : vector<64xf32>
    %179 = vector.multi_reduction <add>, %178, %cst_59 [1] : vector<64x64xf32> to vector<64xf32>
    %180 = vector.shape_cast %179 : vector<64xf32> to vector<64x1xf32>
    %181 = tpu.reciprocal %180 {approx = true} : vector<64x1xf32> -> vector<64x1xf32>
    %182 = vector.broadcast %181 : vector<64x1xf32> to vector<64x64xf32>
    %183 = arith.mulf %178, %182 : vector<64x64xf32>
    %184 = arith.truncf %183 : vector<64x64xf32> to vector<64x64xbf16>
    %185 = vector.extract_strided_slice %26 {offsets = [0, 112], sizes = [64, 16], strides = [1, 1]} : vector<64x128xbf16> to vector<64x16xbf16>
    %cst_60 = arith.constant dense<0.000000e+00> : vector<64x16xf32>
    %186 = tpu.matmul %184, %185, %cst_60 {dimension_numbers = #tpu.dot_dimension_numbers<[1], [0], [0], [1], [0, 0, 1, 1], [], []>} : vector<64x64xbf16>, vector<64x16xbf16>, vector<64x16xf32> -> vector<64x16xf32>
    %187 = arith.truncf %186 : vector<64x16xf32> to vector<64x16xbf16>
    %c0_61 = arith.constant 0 : index
    %c112 = arith.constant 112 : index
    %188 = vector.load %arg9[%c0_61, %c112] : memref<64x128xbf16, #tpu.memory_space<vmem>>, vector<64x16xbf16>
    tpu.vector_store %arg9[%c0_61, %c112], %187 {strides = array<i32>} : memref<64x128xbf16, #tpu.memory_space<vmem>>, vector<64x16xbf16>,
    %c0_62 = arith.constant 0 : index
    %c0_63 = arith.constant 0 : index
    %189 = vector.load %arg9[%c0_62, %c0_63] : memref<64x128xbf16, #tpu.memory_space<vmem>>, vector<64x128xbf16>
    %c0_64 = arith.constant 0 : index
    %c0_65 = arith.constant 0 : index
    %190 = vector.load %arg6[%c0_64, %c0_65] : memref<128x128xbf16, #tpu.memory_space<vmem>>, vector<128x128xbf16>
    %cst_66 = arith.constant dense<0.000000e+00> : vector<64x128xf32>
    %191 = tpu.matmul %189, %190, %cst_66 {dimension_numbers = #tpu.dot_dimension_numbers<[1], [0], [0], [1], [0, 0, 1, 1], [], []>} : vector<64x128xbf16>, vector<128x128xbf16>, vector<64x128xf32> -> vector<64x128xf32>
    %c3 = arith.constant 3 : index
    %c0_67 = arith.constant 0 : index
    %192 = vector.load %arg7[%c3, %c0_67] : memref<8x128xf32, #tpu.memory_space<vmem>>, vector<1x128xf32>
    %193 = vector.broadcast %192 : vector<1x128xf32> to vector<64x128xf32>
    %194 = arith.addf %191, %193 : vector<64x128xf32>
    %c0_68 = arith.constant 0 : index
    %c0_69 = arith.constant 0 : index
    %c0_70 = arith.constant 0 : index
    %195 = vector.load %arg1[%c0_68, %c0_69, %c0_70] : memref<1x64x128xbf16, #tpu.memory_space<vmem>>, vector<1x64x128xbf16>
    %196 = vector.shape_cast %195 : vector<1x64x128xbf16> to vector<64x128xbf16>
    %197 = arith.extf %196 : vector<64x128xbf16> to vector<64x128xf32>
    %198 = arith.addf %197, %194 : vector<64x128xf32>
    %cst_71 = arith.constant dense<0.000000e+00> : vector<64xf32>
    %199 = vector.multi_reduction <add>, %198, %cst_71 [1] : vector<64x128xf32> to vector<64xf32>
    %200 = vector.shape_cast %199 : vector<64xf32> to vector<64x1xf32>
    %cst_72 = arith.constant 1.280000e+02 : f32
    %201 = vector.broadcast %cst_72 : f32 to vector<64x1xf32>
    %202 = arith.divf %200, %201 : vector<64x1xf32>
    %203 = vector.broadcast %202 : vector<64x1xf32> to vector<64x128xf32>
    %204 = arith.subf %198, %203 : vector<64x128xf32>
    %205 = vector.broadcast %202 : vector<64x1xf32> to vector<64x128xf32>
    %206 = arith.subf %198, %205 : vector<64x128xf32>
    %207 = arith.mulf %204, %206 : vector<64x128xf32>
    %cst_73 = arith.constant dense<0.000000e+00> : vector<64xf32>
    %208 = vector.multi_reduction <add>, %207, %cst_73 [1] : vector<64x128xf32> to vector<64xf32>
    %209 = vector.shape_cast %208 : vector<64xf32> to vector<64x1xf32>
    %cst_74 = arith.constant 1.280000e+02 : f32
    %210 = vector.broadcast %cst_74 : f32 to vector<64x1xf32>
    %211 = arith.divf %209, %210 : vector<64x1xf32>
    %212 = vector.broadcast %202 : vector<64x1xf32> to vector<64x128xf32>
    %213 = arith.subf %198, %212 : vector<64x128xf32>
    %cst_75 = arith.constant 9.99999974E-6 : f32
    %214 = vector.broadcast %cst_75 : f32 to vector<64x1xf32>
    %215 = arith.addf %211, %214 : vector<64x1xf32>
    %216 = math.rsqrt %215 : vector<64x1xf32>
    %217 = vector.broadcast %216 : vector<64x1xf32> to vector<64x128xf32>
    %218 = arith.mulf %213, %217 : vector<64x128xf32>
    %c4 = arith.constant 4 : index
    %c0_76 = arith.constant 0 : index
    %219 = vector.load %arg7[%c4, %c0_76] : memref<8x128xf32, #tpu.memory_space<vmem>>, vector<1x128xf32>
    %220 = vector.broadcast %219 : vector<1x128xf32> to vector<64x128xf32>
    %221 = arith.mulf %218, %220 : vector<64x128xf32>
    %c5 = arith.constant 5 : index
    %c0_77 = arith.constant 0 : index
    %222 = vector.load %arg7[%c5, %c0_77] : memref<8x128xf32, #tpu.memory_space<vmem>>, vector<1x128xf32>
    %223 = vector.broadcast %222 : vector<1x128xf32> to vector<64x128xf32>
    %224 = arith.addf %221, %223 : vector<64x128xf32>
    %225 = arith.truncf %224 : vector<64x128xf32> to vector<64x128xbf16>
    %c0_78 = arith.constant 0 : index
    %c0_79 = arith.constant 0 : index
    %c0_80 = arith.constant 0 : index
    %226 = vector.load %arg8[%c0_78, %c0_79, %c0_80] : memref<1x64x128xbf16, #tpu.memory_space<vmem>>, vector<1x64x128xbf16>
    %227 = vector.shape_cast %226 : vector<1x64x128xbf16> to vector<64x128xbf16>
    %228 = vector.shape_cast %225 : vector<64x128xbf16> to vector<1x64x128xbf16>
    tpu.vector_store %arg8[%c0_78, %c0_79, %c0_80], %228 {strides = array<i32>} : memref<1x64x128xbf16, #tpu.memory_space<vmem>>, vector<1x64x128xbf16>,
    return
  }
  func.func @transform_0(%arg0: i32) -> (i32, i32, i32) {
    %c0_i32 = arith.constant 0 : i32
    %c0_i32_0 = arith.constant 0 : i32
    %c0_i32_1 = arith.constant 0 : i32
    return %arg0, %c0_i32, %c0_i32_0 : i32, i32, i32
  }
  func.func @transform_1(%arg0: i32) -> (i32, i32, i32) {
    %c0_i32 = arith.constant 0 : i32
    %c0_i32_0 = arith.constant 0 : i32
    %c0_i32_1 = arith.constant 0 : i32
    return %arg0, %c0_i32, %c0_i32_0 : i32, i32, i32
  }
  func.func @transform_2(%arg0: i32) -> (i32, i32, i32) {
    %c0_i32 = arith.constant 0 : i32
    %c0_i32_0 = arith.constant 0 : i32
    %c0_i32_1 = arith.constant 0 : i32
    return %arg0, %c0_i32, %c0_i32_0 : i32, i32, i32
  }
  func.func @transform_3(%arg0: i32) -> (i32, i32) {
    %c0_i32 = arith.constant 0 : i32
    %c0_i32_0 = arith.constant 0 : i32
    %c0_i32_1 = arith.constant 0 : i32
    return %c0_i32, %c0_i32_0 : i32, i32
  }
  func.func @transform_4(%arg0: i32) -> (i32, i32) {
    %c0_i32 = arith.constant 0 : i32
    %c0_i32_0 = arith.constant 0 : i32
    %c0_i32_1 = arith.constant 0 : i32
    return %c0_i32, %c0_i32_0 : i32, i32
  }
  func.func @transform_5(%arg0: i32) -> (i32, i32) {
    %c0_i32 = arith.constant 0 : i32
    %c0_i32_0 = arith.constant 0 : i32
    %c0_i32_1 = arith.constant 0 : i32
    return %c0_i32, %c0_i32_0 : i32, i32
  }
  func.func @transform_6(%arg0: i32) -> (i32, i32) {
    %c0_i32 = arith.constant 0 : i32
    %c0_i32_0 = arith.constant 0 : i32
    %c0_i32_1 = arith.constant 0 : i32
    return %c0_i32, %c0_i32_0 : i32, i32
  }
  func.func @transform_7(%arg0: i32) -> (i32, i32, i32) {
    %c0_i32 = arith.constant 0 : i32
    %c0_i32_0 = arith.constant 0 : i32
    %c0_i32_1 = arith.constant 0 : i32
    return %arg0, %c0_i32, %c0_i32_0 : i32, i32, i32
  }
}

module attributes {stable_mosaic.version = 11 : i64} {
  func.func @_mha_add_ln_kernel(%arg0: i32, %arg1: memref<1x16x128xbf16, #tpu.memory_space<vmem>>, %arg2: memref<1x16x128xbf16, #tpu.memory_space<vmem>>, %arg3: memref<128x256xbf16, #tpu.memory_space<vmem>>, %arg4: memref<128x128xbf16, #tpu.memory_space<vmem>>, %arg5: memref<128x128xbf16, #tpu.memory_space<vmem>>, %arg6: memref<8x128xf32, #tpu.memory_space<vmem>>, %arg7: memref<1x16x128xbf16, #tpu.memory_space<vmem>>, %arg8: memref<16x128xbf16, #tpu.memory_space<vmem>>) attributes {dimension_semantics = [#tpu.dimension_semantics<parallel>], iteration_bounds = array<i64: 2>, scalar_prefetch = 0 : i64, scratch_operands = 1 : i64, tpu.core_type = #tpu.core_type<tc>, window_params = [{transform_indices = @transform_0, window_bounds = array<i64: 1, 16, 128>}, {pipeline_mode = #tpu.pipeline_mode<synchronous>, transform_indices = @transform_1, window_bounds = array<i64: 1, 16, 128>}, {pipeline_mode = #tpu.pipeline_mode<synchronous>, transform_indices = @transform_2, window_bounds = array<i64: 128, 256>}, {pipeline_mode = #tpu.pipeline_mode<synchronous>, transform_indices = @transform_3, window_bounds = array<i64: 128, 128>}, {pipeline_mode = #tpu.pipeline_mode<synchronous>, transform_indices = @transform_4, window_bounds = array<i64: 128, 128>}, {pipeline_mode = #tpu.pipeline_mode<synchronous>, transform_indices = @transform_5, window_bounds = array<i64: 8, 128>}, {transform_indices = @transform_6, window_bounds = array<i64: 1, 16, 128>}]} {
    %c0 = arith.constant 0 : index
    %c0_0 = arith.constant 0 : index
    %0 = vector.load %arg6[%c0, %c0_0] : memref<8x128xf32, #tpu.memory_space<vmem>>, vector<1x128xf32>
    %c1 = arith.constant 1 : index
    %c0_1 = arith.constant 0 : index
    %1 = vector.load %arg6[%c1, %c0_1] : memref<8x128xf32, #tpu.memory_space<vmem>>, vector<1x128xf32>
    %c2 = arith.constant 2 : index
    %c0_2 = arith.constant 0 : index
    %2 = vector.load %arg6[%c2, %c0_2] : memref<8x128xf32, #tpu.memory_space<vmem>>, vector<1x128xf32>
    %c0_3 = arith.constant 0 : index
    %c0_4 = arith.constant 0 : index
    %c0_5 = arith.constant 0 : index
    %3 = vector.load %arg1[%c0_3, %c0_4, %c0_5] : memref<1x16x128xbf16, #tpu.memory_space<vmem>>, vector<1x16x128xbf16>
    %4 = vector.shape_cast %3 : vector<1x16x128xbf16> to vector<16x128xbf16>
    %c0_6 = arith.constant 0 : index
    %c0_7 = arith.constant 0 : index
    %c0_8 = arith.constant 0 : index
    %5 = vector.load %arg2[%c0_6, %c0_7, %c0_8] : memref<1x16x128xbf16, #tpu.memory_space<vmem>>, vector<1x16x128xbf16>
    %6 = vector.shape_cast %5 : vector<1x16x128xbf16> to vector<16x128xbf16>
    %7 = arith.addf %4, %6 : vector<16x128xbf16>
    %c0_9 = arith.constant 0 : index
    %c0_10 = arith.constant 0 : index
    %8 = vector.load %arg3[%c0_9, %c0_10] : memref<128x256xbf16, #tpu.memory_space<vmem>>, vector<128x256xbf16>
    %cst = arith.constant dense<0.000000e+00> : vector<16x256xf32>
    %9 = tpu.matmul %7, %8, %cst {dimension_numbers = #tpu.dot_dimension_numbers<[1], [0], [0], [1], [0, 0, 1, 1], [], []>} : vector<16x128xbf16>, vector<128x256xbf16>, vector<16x256xf32> -> vector<16x256xf32>
    %10 = vector.extract_strided_slice %9 {offsets = [0, 0], sizes = [16, 128], strides = [1, 1]} : vector<16x256xf32> to vector<16x128xf32>
    %11 = vector.broadcast %0 : vector<1x128xf32> to vector<16x128xf32>
    %12 = arith.addf %10, %11 : vector<16x128xf32>
    %cst_11 = arith.constant 2.500000e-01 : f32
    %13 = vector.broadcast %cst_11 : f32 to vector<16x128xf32>
    %14 = arith.mulf %12, %13 : vector<16x128xf32>
    %15 = vector.extract_strided_slice %9 {offsets = [0, 128], sizes = [16, 128], strides = [1, 1]} : vector<16x256xf32> to vector<16x128xf32>
    %16 = vector.broadcast %1 : vector<1x128xf32> to vector<16x128xf32>
    %17 = arith.addf %15, %16 : vector<16x128xf32>
    %c0_12 = arith.constant 0 : index
    %c0_13 = arith.constant 0 : index
    %c0_14 = arith.constant 0 : index
    %18 = vector.load %arg1[%c0_12, %c0_13, %c0_14] : memref<1x16x128xbf16, #tpu.memory_space<vmem>>, vector<1x16x128xbf16>
    %19 = vector.shape_cast %18 : vector<1x16x128xbf16> to vector<16x128xbf16>
    %c0_15 = arith.constant 0 : index
    %c0_16 = arith.constant 0 : index
    %20 = vector.load %arg4[%c0_15, %c0_16] : memref<128x128xbf16, #tpu.memory_space<vmem>>, vector<128x128xbf16>
    %cst_17 = arith.constant dense<0.000000e+00> : vector<16x128xf32>
    %21 = tpu.matmul %19, %20, %cst_17 {dimension_numbers = #tpu.dot_dimension_numbers<[1], [0], [0], [1], [0, 0, 1, 1], [], []>} : vector<16x128xbf16>, vector<128x128xbf16>, vector<16x128xf32> -> vector<16x128xf32>
    %22 = vector.broadcast %2 : vector<1x128xf32> to vector<16x128xf32>
    %23 = arith.addf %21, %22 : vector<16x128xf32>
    %24 = arith.truncf %14 : vector<16x128xf32> to vector<16x128xbf16>
    %25 = arith.truncf %17 : vector<16x128xf32> to vector<16x128xbf16>
    %26 = arith.truncf %23 : vector<16x128xf32> to vector<16x128xbf16>
    %27 = vector.extract_strided_slice %24 {offsets = [0, 0], sizes = [16, 16], strides = [1, 1]} : vector<16x128xbf16> to vector<16x16xbf16>
    %28 = vector.extract_strided_slice %25 {offsets = [0, 0], sizes = [16, 16], strides = [1, 1]} : vector<16x128xbf16> to vector<16x16xbf16>
    %cst_18 = arith.constant dense<0.000000e+00> : vector<16x16xf32>
    %29 = tpu.matmul %27, %28, %cst_18 {dimension_numbers = #tpu.dot_dimension_numbers<[1], [1], [0], [0], [0, 0, 1, 0], [], []>} : vector<16x16xbf16>, vector<16x16xbf16>, vector<16x16xf32> -> vector<16x16xf32>
    %cst_19 = arith.constant dense<0xFF800000> : vector<16xf32>
    %30 = vector.multi_reduction <maximumf>, %29, %cst_19 [1] : vector<16x16xf32> to vector<16xf32>
    %31 = vector.shape_cast %30 : vector<16xf32> to vector<16x1xf32>
    %32 = vector.broadcast %31 : vector<16x1xf32> to vector<16x16xf32>
    %33 = arith.subf %29, %32 : vector<16x16xf32>
    %34 = math.exp %33 : vector<16x16xf32>
    %cst_20 = arith.constant dense<0.000000e+00> : vector<16xf32>
    %35 = vector.multi_reduction <add>, %34, %cst_20 [1] : vector<16x16xf32> to vector<16xf32>
    %36 = vector.shape_cast %35 : vector<16xf32> to vector<16x1xf32>
    %37 = tpu.reciprocal %36 {approx = true} : vector<16x1xf32> -> vector<16x1xf32>
    %38 = vector.broadcast %37 : vector<16x1xf32> to vector<16x16xf32>
    %39 = arith.mulf %34, %38 : vector<16x16xf32>
    %40 = arith.truncf %39 : vector<16x16xf32> to vector<16x16xbf16>
    %41 = vector.extract_strided_slice %26 {offsets = [0, 0], sizes = [16, 16], strides = [1, 1]} : vector<16x128xbf16> to vector<16x16xbf16>
    %cst_21 = arith.constant dense<0.000000e+00> : vector<16x16xf32>
    %42 = tpu.matmul %40, %41, %cst_21 {dimension_numbers = #tpu.dot_dimension_numbers<[1], [0], [0], [1], [0, 0, 1, 1], [], []>} : vector<16x16xbf16>, vector<16x16xbf16>, vector<16x16xf32> -> vector<16x16xf32>
    %43 = arith.truncf %42 : vector<16x16xf32> to vector<16x16xbf16>
    %c0_22 = arith.constant 0 : index
    %c0_23 = arith.constant 0 : index
    %44 = vector.load %arg8[%c0_22, %c0_23] : memref<16x128xbf16, #tpu.memory_space<vmem>>, vector<16x16xbf16>
    tpu.vector_store %arg8[%c0_22, %c0_23], %43 {strides = array<i32>} : memref<16x128xbf16, #tpu.memory_space<vmem>>, vector<16x16xbf16>,
    %45 = vector.extract_strided_slice %24 {offsets = [0, 16], sizes = [16, 16], strides = [1, 1]} : vector<16x128xbf16> to vector<16x16xbf16>
    %46 = vector.extract_strided_slice %25 {offsets = [0, 16], sizes = [16, 16], strides = [1, 1]} : vector<16x128xbf16> to vector<16x16xbf16>
    %cst_24 = arith.constant dense<0.000000e+00> : vector<16x16xf32>
    %47 = tpu.matmul %45, %46, %cst_24 {dimension_numbers = #tpu.dot_dimension_numbers<[1], [1], [0], [0], [0, 0, 1, 0], [], []>} : vector<16x16xbf16>, vector<16x16xbf16>, vector<16x16xf32> -> vector<16x16xf32>
    %cst_25 = arith.constant dense<0xFF800000> : vector<16xf32>
    %48 = vector.multi_reduction <maximumf>, %47, %cst_25 [1] : vector<16x16xf32> to vector<16xf32>
    %49 = vector.shape_cast %48 : vector<16xf32> to vector<16x1xf32>
    %50 = vector.broadcast %49 : vector<16x1xf32> to vector<16x16xf32>
    %51 = arith.subf %47, %50 : vector<16x16xf32>
    %52 = math.exp %51 : vector<16x16xf32>
    %cst_26 = arith.constant dense<0.000000e+00> : vector<16xf32>
    %53 = vector.multi_reduction <add>, %52, %cst_26 [1] : vector<16x16xf32> to vector<16xf32>
    %54 = vector.shape_cast %53 : vector<16xf32> to vector<16x1xf32>
    %55 = tpu.reciprocal %54 {approx = true} : vector<16x1xf32> -> vector<16x1xf32>
    %56 = vector.broadcast %55 : vector<16x1xf32> to vector<16x16xf32>
    %57 = arith.mulf %52, %56 : vector<16x16xf32>
    %58 = arith.truncf %57 : vector<16x16xf32> to vector<16x16xbf16>
    %59 = vector.extract_strided_slice %26 {offsets = [0, 16], sizes = [16, 16], strides = [1, 1]} : vector<16x128xbf16> to vector<16x16xbf16>
    %cst_27 = arith.constant dense<0.000000e+00> : vector<16x16xf32>
    %60 = tpu.matmul %58, %59, %cst_27 {dimension_numbers = #tpu.dot_dimension_numbers<[1], [0], [0], [1], [0, 0, 1, 1], [], []>} : vector<16x16xbf16>, vector<16x16xbf16>, vector<16x16xf32> -> vector<16x16xf32>
    %61 = arith.truncf %60 : vector<16x16xf32> to vector<16x16xbf16>
    %c0_28 = arith.constant 0 : index
    %c16 = arith.constant 16 : index
    %62 = vector.load %arg8[%c0_28, %c16] : memref<16x128xbf16, #tpu.memory_space<vmem>>, vector<16x16xbf16>
    tpu.vector_store %arg8[%c0_28, %c16], %61 {strides = array<i32>} : memref<16x128xbf16, #tpu.memory_space<vmem>>, vector<16x16xbf16>,
    %63 = vector.extract_strided_slice %24 {offsets = [0, 32], sizes = [16, 16], strides = [1, 1]} : vector<16x128xbf16> to vector<16x16xbf16>
    %64 = vector.extract_strided_slice %25 {offsets = [0, 32], sizes = [16, 16], strides = [1, 1]} : vector<16x128xbf16> to vector<16x16xbf16>
    %cst_29 = arith.constant dense<0.000000e+00> : vector<16x16xf32>
    %65 = tpu.matmul %63, %64, %cst_29 {dimension_numbers = #tpu.dot_dimension_numbers<[1], [1], [0], [0], [0, 0, 1, 0], [], []>} : vector<16x16xbf16>, vector<16x16xbf16>, vector<16x16xf32> -> vector<16x16xf32>
    %cst_30 = arith.constant dense<0xFF800000> : vector<16xf32>
    %66 = vector.multi_reduction <maximumf>, %65, %cst_30 [1] : vector<16x16xf32> to vector<16xf32>
    %67 = vector.shape_cast %66 : vector<16xf32> to vector<16x1xf32>
    %68 = vector.broadcast %67 : vector<16x1xf32> to vector<16x16xf32>
    %69 = arith.subf %65, %68 : vector<16x16xf32>
    %70 = math.exp %69 : vector<16x16xf32>
    %cst_31 = arith.constant dense<0.000000e+00> : vector<16xf32>
    %71 = vector.multi_reduction <add>, %70, %cst_31 [1] : vector<16x16xf32> to vector<16xf32>
    %72 = vector.shape_cast %71 : vector<16xf32> to vector<16x1xf32>
    %73 = tpu.reciprocal %72 {approx = true} : vector<16x1xf32> -> vector<16x1xf32>
    %74 = vector.broadcast %73 : vector<16x1xf32> to vector<16x16xf32>
    %75 = arith.mulf %70, %74 : vector<16x16xf32>
    %76 = arith.truncf %75 : vector<16x16xf32> to vector<16x16xbf16>
    %77 = vector.extract_strided_slice %26 {offsets = [0, 32], sizes = [16, 16], strides = [1, 1]} : vector<16x128xbf16> to vector<16x16xbf16>
    %cst_32 = arith.constant dense<0.000000e+00> : vector<16x16xf32>
    %78 = tpu.matmul %76, %77, %cst_32 {dimension_numbers = #tpu.dot_dimension_numbers<[1], [0], [0], [1], [0, 0, 1, 1], [], []>} : vector<16x16xbf16>, vector<16x16xbf16>, vector<16x16xf32> -> vector<16x16xf32>
    %79 = arith.truncf %78 : vector<16x16xf32> to vector<16x16xbf16>
    %c0_33 = arith.constant 0 : index
    %c32 = arith.constant 32 : index
    %80 = vector.load %arg8[%c0_33, %c32] : memref<16x128xbf16, #tpu.memory_space<vmem>>, vector<16x16xbf16>
    tpu.vector_store %arg8[%c0_33, %c32], %79 {strides = array<i32>} : memref<16x128xbf16, #tpu.memory_space<vmem>>, vector<16x16xbf16>,
    %81 = vector.extract_strided_slice %24 {offsets = [0, 48], sizes = [16, 16], strides = [1, 1]} : vector<16x128xbf16> to vector<16x16xbf16>
    %82 = vector.extract_strided_slice %25 {offsets = [0, 48], sizes = [16, 16], strides = [1, 1]} : vector<16x128xbf16> to vector<16x16xbf16>
    %cst_34 = arith.constant dense<0.000000e+00> : vector<16x16xf32>
    %83 = tpu.matmul %81, %82, %cst_34 {dimension_numbers = #tpu.dot_dimension_numbers<[1], [1], [0], [0], [0, 0, 1, 0], [], []>} : vector<16x16xbf16>, vector<16x16xbf16>, vector<16x16xf32> -> vector<16x16xf32>
    %cst_35 = arith.constant dense<0xFF800000> : vector<16xf32>
    %84 = vector.multi_reduction <maximumf>, %83, %cst_35 [1] : vector<16x16xf32> to vector<16xf32>
    %85 = vector.shape_cast %84 : vector<16xf32> to vector<16x1xf32>
    %86 = vector.broadcast %85 : vector<16x1xf32> to vector<16x16xf32>
    %87 = arith.subf %83, %86 : vector<16x16xf32>
    %88 = math.exp %87 : vector<16x16xf32>
    %cst_36 = arith.constant dense<0.000000e+00> : vector<16xf32>
    %89 = vector.multi_reduction <add>, %88, %cst_36 [1] : vector<16x16xf32> to vector<16xf32>
    %90 = vector.shape_cast %89 : vector<16xf32> to vector<16x1xf32>
    %91 = tpu.reciprocal %90 {approx = true} : vector<16x1xf32> -> vector<16x1xf32>
    %92 = vector.broadcast %91 : vector<16x1xf32> to vector<16x16xf32>
    %93 = arith.mulf %88, %92 : vector<16x16xf32>
    %94 = arith.truncf %93 : vector<16x16xf32> to vector<16x16xbf16>
    %95 = vector.extract_strided_slice %26 {offsets = [0, 48], sizes = [16, 16], strides = [1, 1]} : vector<16x128xbf16> to vector<16x16xbf16>
    %cst_37 = arith.constant dense<0.000000e+00> : vector<16x16xf32>
    %96 = tpu.matmul %94, %95, %cst_37 {dimension_numbers = #tpu.dot_dimension_numbers<[1], [0], [0], [1], [0, 0, 1, 1], [], []>} : vector<16x16xbf16>, vector<16x16xbf16>, vector<16x16xf32> -> vector<16x16xf32>
    %97 = arith.truncf %96 : vector<16x16xf32> to vector<16x16xbf16>
    %c0_38 = arith.constant 0 : index
    %c48 = arith.constant 48 : index
    %98 = vector.load %arg8[%c0_38, %c48] : memref<16x128xbf16, #tpu.memory_space<vmem>>, vector<16x16xbf16>
    tpu.vector_store %arg8[%c0_38, %c48], %97 {strides = array<i32>} : memref<16x128xbf16, #tpu.memory_space<vmem>>, vector<16x16xbf16>,
    %99 = vector.extract_strided_slice %24 {offsets = [0, 64], sizes = [16, 16], strides = [1, 1]} : vector<16x128xbf16> to vector<16x16xbf16>
    %100 = vector.extract_strided_slice %25 {offsets = [0, 64], sizes = [16, 16], strides = [1, 1]} : vector<16x128xbf16> to vector<16x16xbf16>
    %cst_39 = arith.constant dense<0.000000e+00> : vector<16x16xf32>
    %101 = tpu.matmul %99, %100, %cst_39 {dimension_numbers = #tpu.dot_dimension_numbers<[1], [1], [0], [0], [0, 0, 1, 0], [], []>} : vector<16x16xbf16>, vector<16x16xbf16>, vector<16x16xf32> -> vector<16x16xf32>
    %cst_40 = arith.constant dense<0xFF800000> : vector<16xf32>
    %102 = vector.multi_reduction <maximumf>, %101, %cst_40 [1] : vector<16x16xf32> to vector<16xf32>
    %103 = vector.shape_cast %102 : vector<16xf32> to vector<16x1xf32>
    %104 = vector.broadcast %103 : vector<16x1xf32> to vector<16x16xf32>
    %105 = arith.subf %101, %104 : vector<16x16xf32>
    %106 = math.exp %105 : vector<16x16xf32>
    %cst_41 = arith.constant dense<0.000000e+00> : vector<16xf32>
    %107 = vector.multi_reduction <add>, %106, %cst_41 [1] : vector<16x16xf32> to vector<16xf32>
    %108 = vector.shape_cast %107 : vector<16xf32> to vector<16x1xf32>
    %109 = tpu.reciprocal %108 {approx = true} : vector<16x1xf32> -> vector<16x1xf32>
    %110 = vector.broadcast %109 : vector<16x1xf32> to vector<16x16xf32>
    %111 = arith.mulf %106, %110 : vector<16x16xf32>
    %112 = arith.truncf %111 : vector<16x16xf32> to vector<16x16xbf16>
    %113 = vector.extract_strided_slice %26 {offsets = [0, 64], sizes = [16, 16], strides = [1, 1]} : vector<16x128xbf16> to vector<16x16xbf16>
    %cst_42 = arith.constant dense<0.000000e+00> : vector<16x16xf32>
    %114 = tpu.matmul %112, %113, %cst_42 {dimension_numbers = #tpu.dot_dimension_numbers<[1], [0], [0], [1], [0, 0, 1, 1], [], []>} : vector<16x16xbf16>, vector<16x16xbf16>, vector<16x16xf32> -> vector<16x16xf32>
    %115 = arith.truncf %114 : vector<16x16xf32> to vector<16x16xbf16>
    %c0_43 = arith.constant 0 : index
    %c64 = arith.constant 64 : index
    %116 = vector.load %arg8[%c0_43, %c64] : memref<16x128xbf16, #tpu.memory_space<vmem>>, vector<16x16xbf16>
    tpu.vector_store %arg8[%c0_43, %c64], %115 {strides = array<i32>} : memref<16x128xbf16, #tpu.memory_space<vmem>>, vector<16x16xbf16>,
    %117 = vector.extract_strided_slice %24 {offsets = [0, 80], sizes = [16, 16], strides = [1, 1]} : vector<16x128xbf16> to vector<16x16xbf16>
    %118 = vector.extract_strided_slice %25 {offsets = [0, 80], sizes = [16, 16], strides = [1, 1]} : vector<16x128xbf16> to vector<16x16xbf16>
    %cst_44 = arith.constant dense<0.000000e+00> : vector<16x16xf32>
    %119 = tpu.matmul %117, %118, %cst_44 {dimension_numbers = #tpu.dot_dimension_numbers<[1], [1], [0], [0], [0, 0, 1, 0], [], []>} : vector<16x16xbf16>, vector<16x16xbf16>, vector<16x16xf32> -> vector<16x16xf32>
    %cst_45 = arith.constant dense<0xFF800000> : vector<16xf32>
    %120 = vector.multi_reduction <maximumf>, %119, %cst_45 [1] : vector<16x16xf32> to vector<16xf32>
    %121 = vector.shape_cast %120 : vector<16xf32> to vector<16x1xf32>
    %122 = vector.broadcast %121 : vector<16x1xf32> to vector<16x16xf32>
    %123 = arith.subf %119, %122 : vector<16x16xf32>
    %124 = math.exp %123 : vector<16x16xf32>
    %cst_46 = arith.constant dense<0.000000e+00> : vector<16xf32>
    %125 = vector.multi_reduction <add>, %124, %cst_46 [1] : vector<16x16xf32> to vector<16xf32>
    %126 = vector.shape_cast %125 : vector<16xf32> to vector<16x1xf32>
    %127 = tpu.reciprocal %126 {approx = true} : vector<16x1xf32> -> vector<16x1xf32>
    %128 = vector.broadcast %127 : vector<16x1xf32> to vector<16x16xf32>
    %129 = arith.mulf %124, %128 : vector<16x16xf32>
    %130 = arith.truncf %129 : vector<16x16xf32> to vector<16x16xbf16>
    %131 = vector.extract_strided_slice %26 {offsets = [0, 80], sizes = [16, 16], strides = [1, 1]} : vector<16x128xbf16> to vector<16x16xbf16>
    %cst_47 = arith.constant dense<0.000000e+00> : vector<16x16xf32>
    %132 = tpu.matmul %130, %131, %cst_47 {dimension_numbers = #tpu.dot_dimension_numbers<[1], [0], [0], [1], [0, 0, 1, 1], [], []>} : vector<16x16xbf16>, vector<16x16xbf16>, vector<16x16xf32> -> vector<16x16xf32>
    %133 = arith.truncf %132 : vector<16x16xf32> to vector<16x16xbf16>
    %c0_48 = arith.constant 0 : index
    %c80 = arith.constant 80 : index
    %134 = vector.load %arg8[%c0_48, %c80] : memref<16x128xbf16, #tpu.memory_space<vmem>>, vector<16x16xbf16>
    tpu.vector_store %arg8[%c0_48, %c80], %133 {strides = array<i32>} : memref<16x128xbf16, #tpu.memory_space<vmem>>, vector<16x16xbf16>,
    %135 = vector.extract_strided_slice %24 {offsets = [0, 96], sizes = [16, 16], strides = [1, 1]} : vector<16x128xbf16> to vector<16x16xbf16>
    %136 = vector.extract_strided_slice %25 {offsets = [0, 96], sizes = [16, 16], strides = [1, 1]} : vector<16x128xbf16> to vector<16x16xbf16>
    %cst_49 = arith.constant dense<0.000000e+00> : vector<16x16xf32>
    %137 = tpu.matmul %135, %136, %cst_49 {dimension_numbers = #tpu.dot_dimension_numbers<[1], [1], [0], [0], [0, 0, 1, 0], [], []>} : vector<16x16xbf16>, vector<16x16xbf16>, vector<16x16xf32> -> vector<16x16xf32>
    %cst_50 = arith.constant dense<0xFF800000> : vector<16xf32>
    %138 = vector.multi_reduction <maximumf>, %137, %cst_50 [1] : vector<16x16xf32> to vector<16xf32>
    %139 = vector.shape_cast %138 : vector<16xf32> to vector<16x1xf32>
    %140 = vector.broadcast %139 : vector<16x1xf32> to vector<16x16xf32>
    %141 = arith.subf %137, %140 : vector<16x16xf32>
    %142 = math.exp %141 : vector<16x16xf32>
    %cst_51 = arith.constant dense<0.000000e+00> : vector<16xf32>
    %143 = vector.multi_reduction <add>, %142, %cst_51 [1] : vector<16x16xf32> to vector<16xf32>
    %144 = vector.shape_cast %143 : vector<16xf32> to vector<16x1xf32>
    %145 = tpu.reciprocal %144 {approx = true} : vector<16x1xf32> -> vector<16x1xf32>
    %146 = vector.broadcast %145 : vector<16x1xf32> to vector<16x16xf32>
    %147 = arith.mulf %142, %146 : vector<16x16xf32>
    %148 = arith.truncf %147 : vector<16x16xf32> to vector<16x16xbf16>
    %149 = vector.extract_strided_slice %26 {offsets = [0, 96], sizes = [16, 16], strides = [1, 1]} : vector<16x128xbf16> to vector<16x16xbf16>
    %cst_52 = arith.constant dense<0.000000e+00> : vector<16x16xf32>
    %150 = tpu.matmul %148, %149, %cst_52 {dimension_numbers = #tpu.dot_dimension_numbers<[1], [0], [0], [1], [0, 0, 1, 1], [], []>} : vector<16x16xbf16>, vector<16x16xbf16>, vector<16x16xf32> -> vector<16x16xf32>
    %151 = arith.truncf %150 : vector<16x16xf32> to vector<16x16xbf16>
    %c0_53 = arith.constant 0 : index
    %c96 = arith.constant 96 : index
    %152 = vector.load %arg8[%c0_53, %c96] : memref<16x128xbf16, #tpu.memory_space<vmem>>, vector<16x16xbf16>
    tpu.vector_store %arg8[%c0_53, %c96], %151 {strides = array<i32>} : memref<16x128xbf16, #tpu.memory_space<vmem>>, vector<16x16xbf16>,
    %153 = vector.extract_strided_slice %24 {offsets = [0, 112], sizes = [16, 16], strides = [1, 1]} : vector<16x128xbf16> to vector<16x16xbf16>
    %154 = vector.extract_strided_slice %25 {offsets = [0, 112], sizes = [16, 16], strides = [1, 1]} : vector<16x128xbf16> to vector<16x16xbf16>
    %cst_54 = arith.constant dense<0.000000e+00> : vector<16x16xf32>
    %155 = tpu.matmul %153, %154, %cst_54 {dimension_numbers = #tpu.dot_dimension_numbers<[1], [1], [0], [0], [0, 0, 1, 0], [], []>} : vector<16x16xbf16>, vector<16x16xbf16>, vector<16x16xf32> -> vector<16x16xf32>
    %cst_55 = arith.constant dense<0xFF800000> : vector<16xf32>
    %156 = vector.multi_reduction <maximumf>, %155, %cst_55 [1] : vector<16x16xf32> to vector<16xf32>
    %157 = vector.shape_cast %156 : vector<16xf32> to vector<16x1xf32>
    %158 = vector.broadcast %157 : vector<16x1xf32> to vector<16x16xf32>
    %159 = arith.subf %155, %158 : vector<16x16xf32>
    %160 = math.exp %159 : vector<16x16xf32>
    %cst_56 = arith.constant dense<0.000000e+00> : vector<16xf32>
    %161 = vector.multi_reduction <add>, %160, %cst_56 [1] : vector<16x16xf32> to vector<16xf32>
    %162 = vector.shape_cast %161 : vector<16xf32> to vector<16x1xf32>
    %163 = tpu.reciprocal %162 {approx = true} : vector<16x1xf32> -> vector<16x1xf32>
    %164 = vector.broadcast %163 : vector<16x1xf32> to vector<16x16xf32>
    %165 = arith.mulf %160, %164 : vector<16x16xf32>
    %166 = arith.truncf %165 : vector<16x16xf32> to vector<16x16xbf16>
    %167 = vector.extract_strided_slice %26 {offsets = [0, 112], sizes = [16, 16], strides = [1, 1]} : vector<16x128xbf16> to vector<16x16xbf16>
    %cst_57 = arith.constant dense<0.000000e+00> : vector<16x16xf32>
    %168 = tpu.matmul %166, %167, %cst_57 {dimension_numbers = #tpu.dot_dimension_numbers<[1], [0], [0], [1], [0, 0, 1, 1], [], []>} : vector<16x16xbf16>, vector<16x16xbf16>, vector<16x16xf32> -> vector<16x16xf32>
    %169 = arith.truncf %168 : vector<16x16xf32> to vector<16x16xbf16>
    %c0_58 = arith.constant 0 : index
    %c112 = arith.constant 112 : index
    %170 = vector.load %arg8[%c0_58, %c112] : memref<16x128xbf16, #tpu.memory_space<vmem>>, vector<16x16xbf16>
    tpu.vector_store %arg8[%c0_58, %c112], %169 {strides = array<i32>} : memref<16x128xbf16, #tpu.memory_space<vmem>>, vector<16x16xbf16>,
    %c0_59 = arith.constant 0 : index
    %c0_60 = arith.constant 0 : index
    %171 = vector.load %arg8[%c0_59, %c0_60] : memref<16x128xbf16, #tpu.memory_space<vmem>>, vector<16x128xbf16>
    %c0_61 = arith.constant 0 : index
    %c0_62 = arith.constant 0 : index
    %172 = vector.load %arg5[%c0_61, %c0_62] : memref<128x128xbf16, #tpu.memory_space<vmem>>, vector<128x128xbf16>
    %cst_63 = arith.constant dense<0.000000e+00> : vector<16x128xf32>
    %173 = tpu.matmul %171, %172, %cst_63 {dimension_numbers = #tpu.dot_dimension_numbers<[1], [0], [0], [1], [0, 0, 1, 1], [], []>} : vector<16x128xbf16>, vector<128x128xbf16>, vector<16x128xf32> -> vector<16x128xf32>
    %c3 = arith.constant 3 : index
    %c0_64 = arith.constant 0 : index
    %174 = vector.load %arg6[%c3, %c0_64] : memref<8x128xf32, #tpu.memory_space<vmem>>, vector<1x128xf32>
    %175 = vector.broadcast %174 : vector<1x128xf32> to vector<16x128xf32>
    %176 = arith.addf %173, %175 : vector<16x128xf32>
    %c0_65 = arith.constant 0 : index
    %c0_66 = arith.constant 0 : index
    %c0_67 = arith.constant 0 : index
    %177 = vector.load %arg1[%c0_65, %c0_66, %c0_67] : memref<1x16x128xbf16, #tpu.memory_space<vmem>>, vector<1x16x128xbf16>
    %178 = vector.shape_cast %177 : vector<1x16x128xbf16> to vector<16x128xbf16>
    %179 = arith.extf %178 : vector<16x128xbf16> to vector<16x128xf32>
    %180 = arith.addf %179, %176 : vector<16x128xf32>
    %cst_68 = arith.constant dense<0.000000e+00> : vector<16xf32>
    %181 = vector.multi_reduction <add>, %180, %cst_68 [1] : vector<16x128xf32> to vector<16xf32>
    %182 = vector.shape_cast %181 : vector<16xf32> to vector<16x1xf32>
    %cst_69 = arith.constant 1.280000e+02 : f32
    %183 = vector.broadcast %cst_69 : f32 to vector<16x1xf32>
    %184 = arith.divf %182, %183 : vector<16x1xf32>
    %185 = vector.broadcast %184 : vector<16x1xf32> to vector<16x128xf32>
    %186 = arith.subf %180, %185 : vector<16x128xf32>
    %187 = vector.broadcast %184 : vector<16x1xf32> to vector<16x128xf32>
    %188 = arith.subf %180, %187 : vector<16x128xf32>
    %189 = arith.mulf %186, %188 : vector<16x128xf32>
    %cst_70 = arith.constant dense<0.000000e+00> : vector<16xf32>
    %190 = vector.multi_reduction <add>, %189, %cst_70 [1] : vector<16x128xf32> to vector<16xf32>
    %191 = vector.shape_cast %190 : vector<16xf32> to vector<16x1xf32>
    %cst_71 = arith.constant 1.280000e+02 : f32
    %192 = vector.broadcast %cst_71 : f32 to vector<16x1xf32>
    %193 = arith.divf %191, %192 : vector<16x1xf32>
    %194 = vector.broadcast %184 : vector<16x1xf32> to vector<16x128xf32>
    %195 = arith.subf %180, %194 : vector<16x128xf32>
    %cst_72 = arith.constant 9.99999974E-6 : f32
    %196 = vector.broadcast %cst_72 : f32 to vector<16x1xf32>
    %197 = arith.addf %193, %196 : vector<16x1xf32>
    %198 = math.rsqrt %197 : vector<16x1xf32>
    %199 = vector.broadcast %198 : vector<16x1xf32> to vector<16x128xf32>
    %200 = arith.mulf %195, %199 : vector<16x128xf32>
    %c4 = arith.constant 4 : index
    %c0_73 = arith.constant 0 : index
    %201 = vector.load %arg6[%c4, %c0_73] : memref<8x128xf32, #tpu.memory_space<vmem>>, vector<1x128xf32>
    %202 = vector.broadcast %201 : vector<1x128xf32> to vector<16x128xf32>
    %203 = arith.mulf %200, %202 : vector<16x128xf32>
    %c5 = arith.constant 5 : index
    %c0_74 = arith.constant 0 : index
    %204 = vector.load %arg6[%c5, %c0_74] : memref<8x128xf32, #tpu.memory_space<vmem>>, vector<1x128xf32>
    %205 = vector.broadcast %204 : vector<1x128xf32> to vector<16x128xf32>
    %206 = arith.addf %203, %205 : vector<16x128xf32>
    %207 = arith.truncf %206 : vector<16x128xf32> to vector<16x128xbf16>
    %c0_75 = arith.constant 0 : index
    %c0_76 = arith.constant 0 : index
    %c0_77 = arith.constant 0 : index
    %208 = vector.load %arg7[%c0_75, %c0_76, %c0_77] : memref<1x16x128xbf16, #tpu.memory_space<vmem>>, vector<1x16x128xbf16>
    %209 = vector.shape_cast %208 : vector<1x16x128xbf16> to vector<16x128xbf16>
    %210 = vector.shape_cast %207 : vector<16x128xbf16> to vector<1x16x128xbf16>
    tpu.vector_store %arg7[%c0_75, %c0_76, %c0_77], %210 {strides = array<i32>} : memref<1x16x128xbf16, #tpu.memory_space<vmem>>, vector<1x16x128xbf16>,
    return
  }
  func.func @transform_0(%arg0: i32) -> (i32, i32, i32) {
    %c0_i32 = arith.constant 0 : i32
    %c0_i32_0 = arith.constant 0 : i32
    %c0_i32_1 = arith.constant 0 : i32
    return %arg0, %c0_i32, %c0_i32_0 : i32, i32, i32
  }
  func.func @transform_1(%arg0: i32) -> (i32, i32, i32) {
    %c0_i32 = arith.constant 0 : i32
    %c0_i32_0 = arith.constant 0 : i32
    %c0_i32_1 = arith.constant 0 : i32
    %c0_i32_2 = arith.constant 0 : i32
    return %c0_i32, %c0_i32_0, %c0_i32_1 : i32, i32, i32
  }
  func.func @transform_2(%arg0: i32) -> (i32, i32) {
    %c0_i32 = arith.constant 0 : i32
    %c0_i32_0 = arith.constant 0 : i32
    %c0_i32_1 = arith.constant 0 : i32
    return %c0_i32, %c0_i32_0 : i32, i32
  }
  func.func @transform_3(%arg0: i32) -> (i32, i32) {
    %c0_i32 = arith.constant 0 : i32
    %c0_i32_0 = arith.constant 0 : i32
    %c0_i32_1 = arith.constant 0 : i32
    return %c0_i32, %c0_i32_0 : i32, i32
  }
  func.func @transform_4(%arg0: i32) -> (i32, i32) {
    %c0_i32 = arith.constant 0 : i32
    %c0_i32_0 = arith.constant 0 : i32
    %c0_i32_1 = arith.constant 0 : i32
    return %c0_i32, %c0_i32_0 : i32, i32
  }
  func.func @transform_5(%arg0: i32) -> (i32, i32) {
    %c0_i32 = arith.constant 0 : i32
    %c0_i32_0 = arith.constant 0 : i32
    %c0_i32_1 = arith.constant 0 : i32
    return %c0_i32, %c0_i32_0 : i32, i32
  }
  func.func @transform_6(%arg0: i32) -> (i32, i32, i32) {
    %c0_i32 = arith.constant 0 : i32
    %c0_i32_0 = arith.constant 0 : i32
    %c0_i32_1 = arith.constant 0 : i32
    return %arg0, %c0_i32, %c0_i32_0 : i32, i32, i32
  }
}

module attributes {stable_mosaic.version = 11 : i64} {
  func.func @_mha_add_ln_kernel(%arg0: i32, %arg1: memref<1x16x128xbf16, #tpu.memory_space<vmem>>, %arg2: memref<1x16x128xbf16, #tpu.memory_space<vmem>>, %arg3: memref<1x64x128xbf16, #tpu.memory_space<vmem>>, %arg4: memref<1x64x128xbf16, #tpu.memory_space<vmem>>, %arg5: memref<1x1x64xf32, #tpu.memory_space<vmem>>, %arg6: memref<128x256xbf16, #tpu.memory_space<vmem>>, %arg7: memref<128x128xbf16, #tpu.memory_space<vmem>>, %arg8: memref<128x128xbf16, #tpu.memory_space<vmem>>, %arg9: memref<8x128xf32, #tpu.memory_space<vmem>>, %arg10: memref<1x16x128xbf16, #tpu.memory_space<vmem>>, %arg11: memref<16x128xbf16, #tpu.memory_space<vmem>>) attributes {dimension_semantics = [#tpu.dimension_semantics<parallel>], iteration_bounds = array<i64: 2>, scalar_prefetch = 0 : i64, scratch_operands = 1 : i64, tpu.core_type = #tpu.core_type<tc>, window_params = [{transform_indices = @transform_0, window_bounds = array<i64: 1, 16, 128>}, {pipeline_mode = #tpu.pipeline_mode<synchronous>, transform_indices = @transform_1, window_bounds = array<i64: 1, 16, 128>}, {transform_indices = @transform_2, window_bounds = array<i64: 1, 64, 128>}, {transform_indices = @transform_3, window_bounds = array<i64: 1, 64, 128>}, {transform_indices = @transform_4, window_bounds = array<i64: 1, 1, 64>}, {pipeline_mode = #tpu.pipeline_mode<synchronous>, transform_indices = @transform_5, window_bounds = array<i64: 128, 256>}, {pipeline_mode = #tpu.pipeline_mode<synchronous>, transform_indices = @transform_6, window_bounds = array<i64: 128, 128>}, {pipeline_mode = #tpu.pipeline_mode<synchronous>, transform_indices = @transform_7, window_bounds = array<i64: 128, 128>}, {pipeline_mode = #tpu.pipeline_mode<synchronous>, transform_indices = @transform_8, window_bounds = array<i64: 8, 128>}, {transform_indices = @transform_9, window_bounds = array<i64: 1, 16, 128>}]} {
    %c0 = arith.constant 0 : index
    %c0_0 = arith.constant 0 : index
    %0 = vector.load %arg9[%c0, %c0_0] : memref<8x128xf32, #tpu.memory_space<vmem>>, vector<1x128xf32>
    %c1 = arith.constant 1 : index
    %c0_1 = arith.constant 0 : index
    %1 = vector.load %arg9[%c1, %c0_1] : memref<8x128xf32, #tpu.memory_space<vmem>>, vector<1x128xf32>
    %c2 = arith.constant 2 : index
    %c0_2 = arith.constant 0 : index
    %2 = vector.load %arg9[%c2, %c0_2] : memref<8x128xf32, #tpu.memory_space<vmem>>, vector<1x128xf32>
    %c0_3 = arith.constant 0 : index
    %c0_4 = arith.constant 0 : index
    %c0_5 = arith.constant 0 : index
    %3 = vector.load %arg1[%c0_3, %c0_4, %c0_5] : memref<1x16x128xbf16, #tpu.memory_space<vmem>>, vector<1x16x128xbf16>
    %4 = vector.shape_cast %3 : vector<1x16x128xbf16> to vector<16x128xbf16>
    %c0_6 = arith.constant 0 : index
    %c0_7 = arith.constant 0 : index
    %c0_8 = arith.constant 0 : index
    %5 = vector.load %arg2[%c0_6, %c0_7, %c0_8] : memref<1x16x128xbf16, #tpu.memory_space<vmem>>, vector<1x16x128xbf16>
    %6 = vector.shape_cast %5 : vector<1x16x128xbf16> to vector<16x128xbf16>
    %7 = arith.addf %4, %6 : vector<16x128xbf16>
    %c0_9 = arith.constant 0 : index
    %c0_10 = arith.constant 0 : index
    %c0_11 = arith.constant 0 : index
    %8 = vector.load %arg3[%c0_9, %c0_10, %c0_11] : memref<1x64x128xbf16, #tpu.memory_space<vmem>>, vector<1x64x128xbf16>
    %9 = vector.shape_cast %8 : vector<1x64x128xbf16> to vector<64x128xbf16>
    %c0_12 = arith.constant 0 : index
    %c0_13 = arith.constant 0 : index
    %c0_14 = arith.constant 0 : index
    %10 = vector.load %arg4[%c0_12, %c0_13, %c0_14] : memref<1x64x128xbf16, #tpu.memory_space<vmem>>, vector<1x64x128xbf16>
    %11 = vector.shape_cast %10 : vector<1x64x128xbf16> to vector<64x128xbf16>
    %12 = arith.addf %9, %11 : vector<64x128xbf16>
    %c0_15 = arith.constant 0 : index
    %c0_16 = arith.constant 0 : index
    %13 = vector.load %arg6[%c0_15, %c0_16] : memref<128x256xbf16, #tpu.memory_space<vmem>>, vector<128x128xbf16>
    %cst = arith.constant dense<0.000000e+00> : vector<16x128xf32>
    %14 = tpu.matmul %7, %13, %cst {dimension_numbers = #tpu.dot_dimension_numbers<[1], [0], [0], [1], [0, 0, 1, 1], [], []>} : vector<16x128xbf16>, vector<128x128xbf16>, vector<16x128xf32> -> vector<16x128xf32>
    %15 = vector.broadcast %0 : vector<1x128xf32> to vector<16x128xf32>
    %16 = arith.addf %14, %15 : vector<16x128xf32>
    %cst_17 = arith.constant 2.500000e-01 : f32
    %17 = vector.broadcast %cst_17 : f32 to vector<16x128xf32>
    %18 = arith.mulf %16, %17 : vector<16x128xf32>
    %c0_18 = arith.constant 0 : index
    %c128 = arith.constant 128 : index
    %19 = vector.load %arg6[%c0_18, %c128] : memref<128x256xbf16, #tpu.memory_space<vmem>>, vector<128x128xbf16>
    %cst_19 = arith.constant dense<0.000000e+00> : vector<64x128xf32>
    %20 = tpu.matmul %12, %19, %cst_19 {dimension_numbers = #tpu.dot_dimension_numbers<[1], [0], [0], [1], [0, 0, 1, 1], [], []>} : vector<64x128xbf16>, vector<128x128xbf16>, vector<64x128xf32> -> vector<64x128xf32>
    %21 = vector.broadcast %1 : vector<1x128xf32> to vector<64x128xf32>
    %22 = arith.addf %20, %21 : vector<64x128xf32>
    %c0_20 = arith.constant 0 : index
    %c0_21 = arith.constant 0 : index
    %23 = vector.load %arg7[%c0_20, %c0_21] : memref<128x128xbf16, #tpu.memory_space<vmem>>, vector<128x128xbf16>
    %cst_22 = arith.constant dense<0.000000e+00> : vector<64x128xf32>
    %24 = tpu.matmul %9, %23, %cst_22 {dimension_numbers = #tpu.dot_dimension_numbers<[1], [0], [0], [1], [0, 0, 1, 1], [], []>} : vector<64x128xbf16>, vector<128x128xbf16>, vector<64x128xf32> -> vector<64x128xf32>
    %25 = vector.broadcast %2 : vector<1x128xf32> to vector<64x128xf32>
    %26 = arith.addf %24, %25 : vector<64x128xf32>
    %27 = arith.truncf %18 : vector<16x128xf32> to vector<16x128xbf16>
    %28 = arith.truncf %22 : vector<64x128xf32> to vector<64x128xbf16>
    %29 = arith.truncf %26 : vector<64x128xf32> to vector<64x128xbf16>
    %c0_23 = arith.constant 0 : index
    %c0_24 = arith.constant 0 : index
    %c0_25 = arith.constant 0 : index
    %30 = vector.load %arg5[%c0_23, %c0_24, %c0_25] : memref<1x1x64xf32, #tpu.memory_space<vmem>>, vector<1x1x64xf32>
    %31 = vector.shape_cast %30 : vector<1x1x64xf32> to vector<1x64xf32>
    %32 = vector.extract_strided_slice %27 {offsets = [0, 0], sizes = [16, 16], strides = [1, 1]} : vector<16x128xbf16> to vector<16x16xbf16>
    %33 = vector.extract_strided_slice %28 {offsets = [0, 0], sizes = [64, 16], strides = [1, 1]} : vector<64x128xbf16> to vector<64x16xbf16>
    %cst_26 = arith.constant dense<0.000000e+00> : vector<16x64xf32>
    %34 = tpu.matmul %32, %33, %cst_26 {dimension_numbers = #tpu.dot_dimension_numbers<[1], [1], [0], [0], [0, 0, 1, 0], [], []>} : vector<16x16xbf16>, vector<64x16xbf16>, vector<16x64xf32> -> vector<16x64xf32>
    %35 = vector.broadcast %31 : vector<1x64xf32> to vector<16x64xf32>
    %36 = arith.addf %34, %35 : vector<16x64xf32>
    %cst_27 = arith.constant dense<0xFF800000> : vector<16xf32>
    %37 = vector.multi_reduction <maximumf>, %36, %cst_27 [1] : vector<16x64xf32> to vector<16xf32>
    %38 = vector.shape_cast %37 : vector<16xf32> to vector<16x1xf32>
    %39 = vector.broadcast %38 : vector<16x1xf32> to vector<16x64xf32>
    %40 = arith.subf %36, %39 : vector<16x64xf32>
    %41 = math.exp %40 : vector<16x64xf32>
    %cst_28 = arith.constant dense<0.000000e+00> : vector<16xf32>
    %42 = vector.multi_reduction <add>, %41, %cst_28 [1] : vector<16x64xf32> to vector<16xf32>
    %43 = vector.shape_cast %42 : vector<16xf32> to vector<16x1xf32>
    %44 = tpu.reciprocal %43 {approx = true} : vector<16x1xf32> -> vector<16x1xf32>
    %45 = vector.broadcast %44 : vector<16x1xf32> to vector<16x64xf32>
    %46 = arith.mulf %41, %45 : vector<16x64xf32>
    %47 = arith.truncf %46 : vector<16x64xf32> to vector<16x64xbf16>
    %48 = vector.extract_strided_slice %29 {offsets = [0, 0], sizes = [64, 16], strides = [1, 1]} : vector<64x128xbf16> to vector<64x16xbf16>
    %cst_29 = arith.constant dense<0.000000e+00> : vector<16x16xf32>
    %49 = tpu.matmul %47, %48, %cst_29 {dimension_numbers = #tpu.dot_dimension_numbers<[1], [0], [0], [1], [0, 0, 1, 1], [], []>} : vector<16x64xbf16>, vector<64x16xbf16>, vector<16x16xf32> -> vector<16x16xf32>
    %50 = arith.truncf %49 : vector<16x16xf32> to vector<16x16xbf16>
    %c0_30 = arith.constant 0 : index
    %c0_31 = arith.constant 0 : index
    %51 = vector.load %arg11[%c0_30, %c0_31] : memref<16x128xbf16, #tpu.memory_space<vmem>>, vector<16x16xbf16>
    tpu.vector_store %arg11[%c0_30, %c0_31], %50 {strides = array<i32>} : memref<16x128xbf16, #tpu.memory_space<vmem>>, vector<16x16xbf16>,
    %52 = vector.extract_strided_slice %27 {offsets = [0, 16], sizes = [16, 16], strides = [1, 1]} : vector<16x128xbf16> to vector<16x16xbf16>
    %53 = vector.extract_strided_slice %28 {offsets = [0, 16], sizes = [64, 16], strides = [1, 1]} : vector<64x128xbf16> to vector<64x16xbf16>
    %cst_32 = arith.constant dense<0.000000e+00> : vector<16x64xf32>
    %54 = tpu.matmul %52, %53, %cst_32 {dimension_numbers = #tpu.dot_dimension_numbers<[1], [1], [0], [0], [0, 0, 1, 0], [], []>} : vector<16x16xbf16>, vector<64x16xbf16>, vector<16x64xf32> -> vector<16x64xf32>
    %55 = vector.broadcast %31 : vector<1x64xf32> to vector<16x64xf32>
    %56 = arith.addf %54, %55 : vector<16x64xf32>
    %cst_33 = arith.constant dense<0xFF800000> : vector<16xf32>
    %57 = vector.multi_reduction <maximumf>, %56, %cst_33 [1] : vector<16x64xf32> to vector<16xf32>
    %58 = vector.shape_cast %57 : vector<16xf32> to vector<16x1xf32>
    %59 = vector.broadcast %58 : vector<16x1xf32> to vector<16x64xf32>
    %60 = arith.subf %56, %59 : vector<16x64xf32>
    %61 = math.exp %60 : vector<16x64xf32>
    %cst_34 = arith.constant dense<0.000000e+00> : vector<16xf32>
    %62 = vector.multi_reduction <add>, %61, %cst_34 [1] : vector<16x64xf32> to vector<16xf32>
    %63 = vector.shape_cast %62 : vector<16xf32> to vector<16x1xf32>
    %64 = tpu.reciprocal %63 {approx = true} : vector<16x1xf32> -> vector<16x1xf32>
    %65 = vector.broadcast %64 : vector<16x1xf32> to vector<16x64xf32>
    %66 = arith.mulf %61, %65 : vector<16x64xf32>
    %67 = arith.truncf %66 : vector<16x64xf32> to vector<16x64xbf16>
    %68 = vector.extract_strided_slice %29 {offsets = [0, 16], sizes = [64, 16], strides = [1, 1]} : vector<64x128xbf16> to vector<64x16xbf16>
    %cst_35 = arith.constant dense<0.000000e+00> : vector<16x16xf32>
    %69 = tpu.matmul %67, %68, %cst_35 {dimension_numbers = #tpu.dot_dimension_numbers<[1], [0], [0], [1], [0, 0, 1, 1], [], []>} : vector<16x64xbf16>, vector<64x16xbf16>, vector<16x16xf32> -> vector<16x16xf32>
    %70 = arith.truncf %69 : vector<16x16xf32> to vector<16x16xbf16>
    %c0_36 = arith.constant 0 : index
    %c16 = arith.constant 16 : index
    %71 = vector.load %arg11[%c0_36, %c16] : memref<16x128xbf16, #tpu.memory_space<vmem>>, vector<16x16xbf16>
    tpu.vector_store %arg11[%c0_36, %c16], %70 {strides = array<i32>} : memref<16x128xbf16, #tpu.memory_space<vmem>>, vector<16x16xbf16>,
    %72 = vector.extract_strided_slice %27 {offsets = [0, 32], sizes = [16, 16], strides = [1, 1]} : vector<16x128xbf16> to vector<16x16xbf16>
    %73 = vector.extract_strided_slice %28 {offsets = [0, 32], sizes = [64, 16], strides = [1, 1]} : vector<64x128xbf16> to vector<64x16xbf16>
    %cst_37 = arith.constant dense<0.000000e+00> : vector<16x64xf32>
    %74 = tpu.matmul %72, %73, %cst_37 {dimension_numbers = #tpu.dot_dimension_numbers<[1], [1], [0], [0], [0, 0, 1, 0], [], []>} : vector<16x16xbf16>, vector<64x16xbf16>, vector<16x64xf32> -> vector<16x64xf32>
    %75 = vector.broadcast %31 : vector<1x64xf32> to vector<16x64xf32>
    %76 = arith.addf %74, %75 : vector<16x64xf32>
    %cst_38 = arith.constant dense<0xFF800000> : vector<16xf32>
    %77 = vector.multi_reduction <maximumf>, %76, %cst_38 [1] : vector<16x64xf32> to vector<16xf32>
    %78 = vector.shape_cast %77 : vector<16xf32> to vector<16x1xf32>
    %79 = vector.broadcast %78 : vector<16x1xf32> to vector<16x64xf32>
    %80 = arith.subf %76, %79 : vector<16x64xf32>
    %81 = math.exp %80 : vector<16x64xf32>
    %cst_39 = arith.constant dense<0.000000e+00> : vector<16xf32>
    %82 = vector.multi_reduction <add>, %81, %cst_39 [1] : vector<16x64xf32> to vector<16xf32>
    %83 = vector.shape_cast %82 : vector<16xf32> to vector<16x1xf32>
    %84 = tpu.reciprocal %83 {approx = true} : vector<16x1xf32> -> vector<16x1xf32>
    %85 = vector.broadcast %84 : vector<16x1xf32> to vector<16x64xf32>
    %86 = arith.mulf %81, %85 : vector<16x64xf32>
    %87 = arith.truncf %86 : vector<16x64xf32> to vector<16x64xbf16>
    %88 = vector.extract_strided_slice %29 {offsets = [0, 32], sizes = [64, 16], strides = [1, 1]} : vector<64x128xbf16> to vector<64x16xbf16>
    %cst_40 = arith.constant dense<0.000000e+00> : vector<16x16xf32>
    %89 = tpu.matmul %87, %88, %cst_40 {dimension_numbers = #tpu.dot_dimension_numbers<[1], [0], [0], [1], [0, 0, 1, 1], [], []>} : vector<16x64xbf16>, vector<64x16xbf16>, vector<16x16xf32> -> vector<16x16xf32>
    %90 = arith.truncf %89 : vector<16x16xf32> to vector<16x16xbf16>
    %c0_41 = arith.constant 0 : index
    %c32 = arith.constant 32 : index
    %91 = vector.load %arg11[%c0_41, %c32] : memref<16x128xbf16, #tpu.memory_space<vmem>>, vector<16x16xbf16>
    tpu.vector_store %arg11[%c0_41, %c32], %90 {strides = array<i32>} : memref<16x128xbf16, #tpu.memory_space<vmem>>, vector<16x16xbf16>,
    %92 = vector.extract_strided_slice %27 {offsets = [0, 48], sizes = [16, 16], strides = [1, 1]} : vector<16x128xbf16> to vector<16x16xbf16>
    %93 = vector.extract_strided_slice %28 {offsets = [0, 48], sizes = [64, 16], strides = [1, 1]} : vector<64x128xbf16> to vector<64x16xbf16>
    %cst_42 = arith.constant dense<0.000000e+00> : vector<16x64xf32>
    %94 = tpu.matmul %92, %93, %cst_42 {dimension_numbers = #tpu.dot_dimension_numbers<[1], [1], [0], [0], [0, 0, 1, 0], [], []>} : vector<16x16xbf16>, vector<64x16xbf16>, vector<16x64xf32> -> vector<16x64xf32>
    %95 = vector.broadcast %31 : vector<1x64xf32> to vector<16x64xf32>
    %96 = arith.addf %94, %95 : vector<16x64xf32>
    %cst_43 = arith.constant dense<0xFF800000> : vector<16xf32>
    %97 = vector.multi_reduction <maximumf>, %96, %cst_43 [1] : vector<16x64xf32> to vector<16xf32>
    %98 = vector.shape_cast %97 : vector<16xf32> to vector<16x1xf32>
    %99 = vector.broadcast %98 : vector<16x1xf32> to vector<16x64xf32>
    %100 = arith.subf %96, %99 : vector<16x64xf32>
    %101 = math.exp %100 : vector<16x64xf32>
    %cst_44 = arith.constant dense<0.000000e+00> : vector<16xf32>
    %102 = vector.multi_reduction <add>, %101, %cst_44 [1] : vector<16x64xf32> to vector<16xf32>
    %103 = vector.shape_cast %102 : vector<16xf32> to vector<16x1xf32>
    %104 = tpu.reciprocal %103 {approx = true} : vector<16x1xf32> -> vector<16x1xf32>
    %105 = vector.broadcast %104 : vector<16x1xf32> to vector<16x64xf32>
    %106 = arith.mulf %101, %105 : vector<16x64xf32>
    %107 = arith.truncf %106 : vector<16x64xf32> to vector<16x64xbf16>
    %108 = vector.extract_strided_slice %29 {offsets = [0, 48], sizes = [64, 16], strides = [1, 1]} : vector<64x128xbf16> to vector<64x16xbf16>
    %cst_45 = arith.constant dense<0.000000e+00> : vector<16x16xf32>
    %109 = tpu.matmul %107, %108, %cst_45 {dimension_numbers = #tpu.dot_dimension_numbers<[1], [0], [0], [1], [0, 0, 1, 1], [], []>} : vector<16x64xbf16>, vector<64x16xbf16>, vector<16x16xf32> -> vector<16x16xf32>
    %110 = arith.truncf %109 : vector<16x16xf32> to vector<16x16xbf16>
    %c0_46 = arith.constant 0 : index
    %c48 = arith.constant 48 : index
    %111 = vector.load %arg11[%c0_46, %c48] : memref<16x128xbf16, #tpu.memory_space<vmem>>, vector<16x16xbf16>
    tpu.vector_store %arg11[%c0_46, %c48], %110 {strides = array<i32>} : memref<16x128xbf16, #tpu.memory_space<vmem>>, vector<16x16xbf16>,
    %112 = vector.extract_strided_slice %27 {offsets = [0, 64], sizes = [16, 16], strides = [1, 1]} : vector<16x128xbf16> to vector<16x16xbf16>
    %113 = vector.extract_strided_slice %28 {offsets = [0, 64], sizes = [64, 16], strides = [1, 1]} : vector<64x128xbf16> to vector<64x16xbf16>
    %cst_47 = arith.constant dense<0.000000e+00> : vector<16x64xf32>
    %114 = tpu.matmul %112, %113, %cst_47 {dimension_numbers = #tpu.dot_dimension_numbers<[1], [1], [0], [0], [0, 0, 1, 0], [], []>} : vector<16x16xbf16>, vector<64x16xbf16>, vector<16x64xf32> -> vector<16x64xf32>
    %115 = vector.broadcast %31 : vector<1x64xf32> to vector<16x64xf32>
    %116 = arith.addf %114, %115 : vector<16x64xf32>
    %cst_48 = arith.constant dense<0xFF800000> : vector<16xf32>
    %117 = vector.multi_reduction <maximumf>, %116, %cst_48 [1] : vector<16x64xf32> to vector<16xf32>
    %118 = vector.shape_cast %117 : vector<16xf32> to vector<16x1xf32>
    %119 = vector.broadcast %118 : vector<16x1xf32> to vector<16x64xf32>
    %120 = arith.subf %116, %119 : vector<16x64xf32>
    %121 = math.exp %120 : vector<16x64xf32>
    %cst_49 = arith.constant dense<0.000000e+00> : vector<16xf32>
    %122 = vector.multi_reduction <add>, %121, %cst_49 [1] : vector<16x64xf32> to vector<16xf32>
    %123 = vector.shape_cast %122 : vector<16xf32> to vector<16x1xf32>
    %124 = tpu.reciprocal %123 {approx = true} : vector<16x1xf32> -> vector<16x1xf32>
    %125 = vector.broadcast %124 : vector<16x1xf32> to vector<16x64xf32>
    %126 = arith.mulf %121, %125 : vector<16x64xf32>
    %127 = arith.truncf %126 : vector<16x64xf32> to vector<16x64xbf16>
    %128 = vector.extract_strided_slice %29 {offsets = [0, 64], sizes = [64, 16], strides = [1, 1]} : vector<64x128xbf16> to vector<64x16xbf16>
    %cst_50 = arith.constant dense<0.000000e+00> : vector<16x16xf32>
    %129 = tpu.matmul %127, %128, %cst_50 {dimension_numbers = #tpu.dot_dimension_numbers<[1], [0], [0], [1], [0, 0, 1, 1], [], []>} : vector<16x64xbf16>, vector<64x16xbf16>, vector<16x16xf32> -> vector<16x16xf32>
    %130 = arith.truncf %129 : vector<16x16xf32> to vector<16x16xbf16>
    %c0_51 = arith.constant 0 : index
    %c64 = arith.constant 64 : index
    %131 = vector.load %arg11[%c0_51, %c64] : memref<16x128xbf16, #tpu.memory_space<vmem>>, vector<16x16xbf16>
    tpu.vector_store %arg11[%c0_51, %c64], %130 {strides = array<i32>} : memref<16x128xbf16, #tpu.memory_space<vmem>>, vector<16x16xbf16>,
    %132 = vector.extract_strided_slice %27 {offsets = [0, 80], sizes = [16, 16], strides = [1, 1]} : vector<16x128xbf16> to vector<16x16xbf16>
    %133 = vector.extract_strided_slice %28 {offsets = [0, 80], sizes = [64, 16], strides = [1, 1]} : vector<64x128xbf16> to vector<64x16xbf16>
    %cst_52 = arith.constant dense<0.000000e+00> : vector<16x64xf32>
    %134 = tpu.matmul %132, %133, %cst_52 {dimension_numbers = #tpu.dot_dimension_numbers<[1], [1], [0], [0], [0, 0, 1, 0], [], []>} : vector<16x16xbf16>, vector<64x16xbf16>, vector<16x64xf32> -> vector<16x64xf32>
    %135 = vector.broadcast %31 : vector<1x64xf32> to vector<16x64xf32>
    %136 = arith.addf %134, %135 : vector<16x64xf32>
    %cst_53 = arith.constant dense<0xFF800000> : vector<16xf32>
    %137 = vector.multi_reduction <maximumf>, %136, %cst_53 [1] : vector<16x64xf32> to vector<16xf32>
    %138 = vector.shape_cast %137 : vector<16xf32> to vector<16x1xf32>
    %139 = vector.broadcast %138 : vector<16x1xf32> to vector<16x64xf32>
    %140 = arith.subf %136, %139 : vector<16x64xf32>
    %141 = math.exp %140 : vector<16x64xf32>
    %cst_54 = arith.constant dense<0.000000e+00> : vector<16xf32>
    %142 = vector.multi_reduction <add>, %141, %cst_54 [1] : vector<16x64xf32> to vector<16xf32>
    %143 = vector.shape_cast %142 : vector<16xf32> to vector<16x1xf32>
    %144 = tpu.reciprocal %143 {approx = true} : vector<16x1xf32> -> vector<16x1xf32>
    %145 = vector.broadcast %144 : vector<16x1xf32> to vector<16x64xf32>
    %146 = arith.mulf %141, %145 : vector<16x64xf32>
    %147 = arith.truncf %146 : vector<16x64xf32> to vector<16x64xbf16>
    %148 = vector.extract_strided_slice %29 {offsets = [0, 80], sizes = [64, 16], strides = [1, 1]} : vector<64x128xbf16> to vector<64x16xbf16>
    %cst_55 = arith.constant dense<0.000000e+00> : vector<16x16xf32>
    %149 = tpu.matmul %147, %148, %cst_55 {dimension_numbers = #tpu.dot_dimension_numbers<[1], [0], [0], [1], [0, 0, 1, 1], [], []>} : vector<16x64xbf16>, vector<64x16xbf16>, vector<16x16xf32> -> vector<16x16xf32>
    %150 = arith.truncf %149 : vector<16x16xf32> to vector<16x16xbf16>
    %c0_56 = arith.constant 0 : index
    %c80 = arith.constant 80 : index
    %151 = vector.load %arg11[%c0_56, %c80] : memref<16x128xbf16, #tpu.memory_space<vmem>>, vector<16x16xbf16>
    tpu.vector_store %arg11[%c0_56, %c80], %150 {strides = array<i32>} : memref<16x128xbf16, #tpu.memory_space<vmem>>, vector<16x16xbf16>,
    %152 = vector.extract_strided_slice %27 {offsets = [0, 96], sizes = [16, 16], strides = [1, 1]} : vector<16x128xbf16> to vector<16x16xbf16>
    %153 = vector.extract_strided_slice %28 {offsets = [0, 96], sizes = [64, 16], strides = [1, 1]} : vector<64x128xbf16> to vector<64x16xbf16>
    %cst_57 = arith.constant dense<0.000000e+00> : vector<16x64xf32>
    %154 = tpu.matmul %152, %153, %cst_57 {dimension_numbers = #tpu.dot_dimension_numbers<[1], [1], [0], [0], [0, 0, 1, 0], [], []>} : vector<16x16xbf16>, vector<64x16xbf16>, vector<16x64xf32> -> vector<16x64xf32>
    %155 = vector.broadcast %31 : vector<1x64xf32> to vector<16x64xf32>
    %156 = arith.addf %154, %155 : vector<16x64xf32>
    %cst_58 = arith.constant dense<0xFF800000> : vector<16xf32>
    %157 = vector.multi_reduction <maximumf>, %156, %cst_58 [1] : vector<16x64xf32> to vector<16xf32>
    %158 = vector.shape_cast %157 : vector<16xf32> to vector<16x1xf32>
    %159 = vector.broadcast %158 : vector<16x1xf32> to vector<16x64xf32>
    %160 = arith.subf %156, %159 : vector<16x64xf32>
    %161 = math.exp %160 : vector<16x64xf32>
    %cst_59 = arith.constant dense<0.000000e+00> : vector<16xf32>
    %162 = vector.multi_reduction <add>, %161, %cst_59 [1] : vector<16x64xf32> to vector<16xf32>
    %163 = vector.shape_cast %162 : vector<16xf32> to vector<16x1xf32>
    %164 = tpu.reciprocal %163 {approx = true} : vector<16x1xf32> -> vector<16x1xf32>
    %165 = vector.broadcast %164 : vector<16x1xf32> to vector<16x64xf32>
    %166 = arith.mulf %161, %165 : vector<16x64xf32>
    %167 = arith.truncf %166 : vector<16x64xf32> to vector<16x64xbf16>
    %168 = vector.extract_strided_slice %29 {offsets = [0, 96], sizes = [64, 16], strides = [1, 1]} : vector<64x128xbf16> to vector<64x16xbf16>
    %cst_60 = arith.constant dense<0.000000e+00> : vector<16x16xf32>
    %169 = tpu.matmul %167, %168, %cst_60 {dimension_numbers = #tpu.dot_dimension_numbers<[1], [0], [0], [1], [0, 0, 1, 1], [], []>} : vector<16x64xbf16>, vector<64x16xbf16>, vector<16x16xf32> -> vector<16x16xf32>
    %170 = arith.truncf %169 : vector<16x16xf32> to vector<16x16xbf16>
    %c0_61 = arith.constant 0 : index
    %c96 = arith.constant 96 : index
    %171 = vector.load %arg11[%c0_61, %c96] : memref<16x128xbf16, #tpu.memory_space<vmem>>, vector<16x16xbf16>
    tpu.vector_store %arg11[%c0_61, %c96], %170 {strides = array<i32>} : memref<16x128xbf16, #tpu.memory_space<vmem>>, vector<16x16xbf16>,
    %172 = vector.extract_strided_slice %27 {offsets = [0, 112], sizes = [16, 16], strides = [1, 1]} : vector<16x128xbf16> to vector<16x16xbf16>
    %173 = vector.extract_strided_slice %28 {offsets = [0, 112], sizes = [64, 16], strides = [1, 1]} : vector<64x128xbf16> to vector<64x16xbf16>
    %cst_62 = arith.constant dense<0.000000e+00> : vector<16x64xf32>
    %174 = tpu.matmul %172, %173, %cst_62 {dimension_numbers = #tpu.dot_dimension_numbers<[1], [1], [0], [0], [0, 0, 1, 0], [], []>} : vector<16x16xbf16>, vector<64x16xbf16>, vector<16x64xf32> -> vector<16x64xf32>
    %175 = vector.broadcast %31 : vector<1x64xf32> to vector<16x64xf32>
    %176 = arith.addf %174, %175 : vector<16x64xf32>
    %cst_63 = arith.constant dense<0xFF800000> : vector<16xf32>
    %177 = vector.multi_reduction <maximumf>, %176, %cst_63 [1] : vector<16x64xf32> to vector<16xf32>
    %178 = vector.shape_cast %177 : vector<16xf32> to vector<16x1xf32>
    %179 = vector.broadcast %178 : vector<16x1xf32> to vector<16x64xf32>
    %180 = arith.subf %176, %179 : vector<16x64xf32>
    %181 = math.exp %180 : vector<16x64xf32>
    %cst_64 = arith.constant dense<0.000000e+00> : vector<16xf32>
    %182 = vector.multi_reduction <add>, %181, %cst_64 [1] : vector<16x64xf32> to vector<16xf32>
    %183 = vector.shape_cast %182 : vector<16xf32> to vector<16x1xf32>
    %184 = tpu.reciprocal %183 {approx = true} : vector<16x1xf32> -> vector<16x1xf32>
    %185 = vector.broadcast %184 : vector<16x1xf32> to vector<16x64xf32>
    %186 = arith.mulf %181, %185 : vector<16x64xf32>
    %187 = arith.truncf %186 : vector<16x64xf32> to vector<16x64xbf16>
    %188 = vector.extract_strided_slice %29 {offsets = [0, 112], sizes = [64, 16], strides = [1, 1]} : vector<64x128xbf16> to vector<64x16xbf16>
    %cst_65 = arith.constant dense<0.000000e+00> : vector<16x16xf32>
    %189 = tpu.matmul %187, %188, %cst_65 {dimension_numbers = #tpu.dot_dimension_numbers<[1], [0], [0], [1], [0, 0, 1, 1], [], []>} : vector<16x64xbf16>, vector<64x16xbf16>, vector<16x16xf32> -> vector<16x16xf32>
    %190 = arith.truncf %189 : vector<16x16xf32> to vector<16x16xbf16>
    %c0_66 = arith.constant 0 : index
    %c112 = arith.constant 112 : index
    %191 = vector.load %arg11[%c0_66, %c112] : memref<16x128xbf16, #tpu.memory_space<vmem>>, vector<16x16xbf16>
    tpu.vector_store %arg11[%c0_66, %c112], %190 {strides = array<i32>} : memref<16x128xbf16, #tpu.memory_space<vmem>>, vector<16x16xbf16>,
    %c0_67 = arith.constant 0 : index
    %c0_68 = arith.constant 0 : index
    %192 = vector.load %arg11[%c0_67, %c0_68] : memref<16x128xbf16, #tpu.memory_space<vmem>>, vector<16x128xbf16>
    %c0_69 = arith.constant 0 : index
    %c0_70 = arith.constant 0 : index
    %193 = vector.load %arg8[%c0_69, %c0_70] : memref<128x128xbf16, #tpu.memory_space<vmem>>, vector<128x128xbf16>
    %cst_71 = arith.constant dense<0.000000e+00> : vector<16x128xf32>
    %194 = tpu.matmul %192, %193, %cst_71 {dimension_numbers = #tpu.dot_dimension_numbers<[1], [0], [0], [1], [0, 0, 1, 1], [], []>} : vector<16x128xbf16>, vector<128x128xbf16>, vector<16x128xf32> -> vector<16x128xf32>
    %c3 = arith.constant 3 : index
    %c0_72 = arith.constant 0 : index
    %195 = vector.load %arg9[%c3, %c0_72] : memref<8x128xf32, #tpu.memory_space<vmem>>, vector<1x128xf32>
    %196 = vector.broadcast %195 : vector<1x128xf32> to vector<16x128xf32>
    %197 = arith.addf %194, %196 : vector<16x128xf32>
    %c0_73 = arith.constant 0 : index
    %c0_74 = arith.constant 0 : index
    %c0_75 = arith.constant 0 : index
    %198 = vector.load %arg1[%c0_73, %c0_74, %c0_75] : memref<1x16x128xbf16, #tpu.memory_space<vmem>>, vector<1x16x128xbf16>
    %199 = vector.shape_cast %198 : vector<1x16x128xbf16> to vector<16x128xbf16>
    %200 = arith.extf %199 : vector<16x128xbf16> to vector<16x128xf32>
    %201 = arith.addf %200, %197 : vector<16x128xf32>
    %cst_76 = arith.constant dense<0.000000e+00> : vector<16xf32>
    %202 = vector.multi_reduction <add>, %201, %cst_76 [1] : vector<16x128xf32> to vector<16xf32>
    %203 = vector.shape_cast %202 : vector<16xf32> to vector<16x1xf32>
    %cst_77 = arith.constant 1.280000e+02 : f32
    %204 = vector.broadcast %cst_77 : f32 to vector<16x1xf32>
    %205 = arith.divf %203, %204 : vector<16x1xf32>
    %206 = vector.broadcast %205 : vector<16x1xf32> to vector<16x128xf32>
    %207 = arith.subf %201, %206 : vector<16x128xf32>
    %208 = vector.broadcast %205 : vector<16x1xf32> to vector<16x128xf32>
    %209 = arith.subf %201, %208 : vector<16x128xf32>
    %210 = arith.mulf %207, %209 : vector<16x128xf32>
    %cst_78 = arith.constant dense<0.000000e+00> : vector<16xf32>
    %211 = vector.multi_reduction <add>, %210, %cst_78 [1] : vector<16x128xf32> to vector<16xf32>
    %212 = vector.shape_cast %211 : vector<16xf32> to vector<16x1xf32>
    %cst_79 = arith.constant 1.280000e+02 : f32
    %213 = vector.broadcast %cst_79 : f32 to vector<16x1xf32>
    %214 = arith.divf %212, %213 : vector<16x1xf32>
    %215 = vector.broadcast %205 : vector<16x1xf32> to vector<16x128xf32>
    %216 = arith.subf %201, %215 : vector<16x128xf32>
    %cst_80 = arith.constant 9.99999974E-6 : f32
    %217 = vector.broadcast %cst_80 : f32 to vector<16x1xf32>
    %218 = arith.addf %214, %217 : vector<16x1xf32>
    %219 = math.rsqrt %218 : vector<16x1xf32>
    %220 = vector.broadcast %219 : vector<16x1xf32> to vector<16x128xf32>
    %221 = arith.mulf %216, %220 : vector<16x128xf32>
    %c4 = arith.constant 4 : index
    %c0_81 = arith.constant 0 : index
    %222 = vector.load %arg9[%c4, %c0_81] : memref<8x128xf32, #tpu.memory_space<vmem>>, vector<1x128xf32>
    %223 = vector.broadcast %222 : vector<1x128xf32> to vector<16x128xf32>
    %224 = arith.mulf %221, %223 : vector<16x128xf32>
    %c5 = arith.constant 5 : index
    %c0_82 = arith.constant 0 : index
    %225 = vector.load %arg9[%c5, %c0_82] : memref<8x128xf32, #tpu.memory_space<vmem>>, vector<1x128xf32>
    %226 = vector.broadcast %225 : vector<1x128xf32> to vector<16x128xf32>
    %227 = arith.addf %224, %226 : vector<16x128xf32>
    %228 = arith.truncf %227 : vector<16x128xf32> to vector<16x128xbf16>
    %c0_83 = arith.constant 0 : index
    %c0_84 = arith.constant 0 : index
    %c0_85 = arith.constant 0 : index
    %229 = vector.load %arg10[%c0_83, %c0_84, %c0_85] : memref<1x16x128xbf16, #tpu.memory_space<vmem>>, vector<1x16x128xbf16>
    %230 = vector.shape_cast %229 : vector<1x16x128xbf16> to vector<16x128xbf16>
    %231 = vector.shape_cast %228 : vector<16x128xbf16> to vector<1x16x128xbf16>
    tpu.vector_store %arg10[%c0_83, %c0_84, %c0_85], %231 {strides = array<i32>} : memref<1x16x128xbf16, #tpu.memory_space<vmem>>, vector<1x16x128xbf16>,
    return
  }
  func.func @transform_0(%arg0: i32) -> (i32, i32, i32) {
    %c0_i32 = arith.constant 0 : i32
    %c0_i32_0 = arith.constant 0 : i32
    %c0_i32_1 = arith.constant 0 : i32
    return %arg0, %c0_i32, %c0_i32_0 : i32, i32, i32
  }
  func.func @transform_1(%arg0: i32) -> (i32, i32, i32) {
    %c0_i32 = arith.constant 0 : i32
    %c0_i32_0 = arith.constant 0 : i32
    %c0_i32_1 = arith.constant 0 : i32
    %c0_i32_2 = arith.constant 0 : i32
    return %c0_i32, %c0_i32_0, %c0_i32_1 : i32, i32, i32
  }
  func.func @transform_2(%arg0: i32) -> (i32, i32, i32) {
    %c0_i32 = arith.constant 0 : i32
    %c0_i32_0 = arith.constant 0 : i32
    %c0_i32_1 = arith.constant 0 : i32
    return %arg0, %c0_i32, %c0_i32_0 : i32, i32, i32
  }
  func.func @transform_3(%arg0: i32) -> (i32, i32, i32) {
    %c0_i32 = arith.constant 0 : i32
    %c0_i32_0 = arith.constant 0 : i32
    %c0_i32_1 = arith.constant 0 : i32
    return %arg0, %c0_i32, %c0_i32_0 : i32, i32, i32
  }
  func.func @transform_4(%arg0: i32) -> (i32, i32, i32) {
    %c0_i32 = arith.constant 0 : i32
    %c0_i32_0 = arith.constant 0 : i32
    %c0_i32_1 = arith.constant 0 : i32
    return %arg0, %c0_i32, %c0_i32_0 : i32, i32, i32
  }
  func.func @transform_5(%arg0: i32) -> (i32, i32) {
    %c0_i32 = arith.constant 0 : i32
    %c0_i32_0 = arith.constant 0 : i32
    %c0_i32_1 = arith.constant 0 : i32
    return %c0_i32, %c0_i32_0 : i32, i32
  }
  func.func @transform_6(%arg0: i32) -> (i32, i32) {
    %c0_i32 = arith.constant 0 : i32
    %c0_i32_0 = arith.constant 0 : i32
    %c0_i32_1 = arith.constant 0 : i32
    return %c0_i32, %c0_i32_0 : i32, i32
  }
  func.func @transform_7(%arg0: i32) -> (i32, i32) {
    %c0_i32 = arith.constant 0 : i32
    %c0_i32_0 = arith.constant 0 : i32
    %c0_i32_1 = arith.constant 0 : i32
    return %c0_i32, %c0_i32_0 : i32, i32
  }
  func.func @transform_8(%arg0: i32) -> (i32, i32) {
    %c0_i32 = arith.constant 0 : i32
    %c0_i32_0 = arith.constant 0 : i32
    %c0_i32_1 = arith.constant 0 : i32
    return %c0_i32, %c0_i32_0 : i32, i32
  }
  func.func @transform_9(%arg0: i32) -> (i32, i32, i32) {
    %c0_i32 = arith.constant 0 : i32
    %c0_i32_0 = arith.constant 0 : i32
    %c0_i32_1 = arith.constant 0 : i32
    return %arg0, %c0_i32, %c0_i32_0 : i32, i32, i32
  }
}

module attributes {stable_mosaic.version = 11 : i64} {
  func.func @_ffn_add_ln_kernel(%arg0: i32, %arg1: memref<16x128xbf16, #tpu.memory_space<vmem>>, %arg2: memref<128x256xbf16, #tpu.memory_space<vmem>>, %arg3: memref<1x256xf32, #tpu.memory_space<vmem>>, %arg4: memref<256x128xbf16, #tpu.memory_space<vmem>>, %arg5: memref<8x128xf32, #tpu.memory_space<vmem>>, %arg6: memref<16x128xbf16, #tpu.memory_space<vmem>>) attributes {dimension_semantics = [#tpu.dimension_semantics<parallel>], iteration_bounds = array<i64: 2>, scalar_prefetch = 0 : i64, scratch_operands = 0 : i64, tpu.core_type = #tpu.core_type<tc>, window_params = [{transform_indices = @transform_0, window_bounds = array<i64: 16, 128>}, {pipeline_mode = #tpu.pipeline_mode<synchronous>, transform_indices = @transform_1, window_bounds = array<i64: 128, 256>}, {pipeline_mode = #tpu.pipeline_mode<synchronous>, transform_indices = @transform_2, window_bounds = array<i64: 1, 256>}, {pipeline_mode = #tpu.pipeline_mode<synchronous>, transform_indices = @transform_3, window_bounds = array<i64: 256, 128>}, {pipeline_mode = #tpu.pipeline_mode<synchronous>, transform_indices = @transform_4, window_bounds = array<i64: 8, 128>}, {transform_indices = @transform_5, window_bounds = array<i64: 16, 128>}]} {
    %c0 = arith.constant 0 : index
    %c0_0 = arith.constant 0 : index
    %0 = vector.load %arg1[%c0, %c0_0] : memref<16x128xbf16, #tpu.memory_space<vmem>>, vector<16x128xbf16>
    %c0_1 = arith.constant 0 : index
    %c0_2 = arith.constant 0 : index
    %1 = vector.load %arg2[%c0_1, %c0_2] : memref<128x256xbf16, #tpu.memory_space<vmem>>, vector<128x256xbf16>
    %cst = arith.constant dense<0.000000e+00> : vector<16x256xf32>
    %2 = tpu.matmul %0, %1, %cst {dimension_numbers = #tpu.dot_dimension_numbers<[1], [0], [0], [1], [0, 0, 1, 1], [], []>} : vector<16x128xbf16>, vector<128x256xbf16>, vector<16x256xf32> -> vector<16x256xf32>
    %c0_3 = arith.constant 0 : index
    %c0_4 = arith.constant 0 : index
    %3 = vector.load %arg3[%c0_3, %c0_4] : memref<1x256xf32, #tpu.memory_space<vmem>>, vector<1x256xf32>
    %4 = vector.broadcast %3 : vector<1x256xf32> to vector<16x256xf32>
    %5 = arith.addf %2, %4 : vector<16x256xf32>
    %cst_5 = arith.constant 0.000000e+00 : f32
    %6 = vector.broadcast %cst_5 : f32 to vector<16x256xf32>
    %7 = arith.maximumf %5, %6 : vector<16x256xf32>
    %8 = arith.truncf %7 : vector<16x256xf32> to vector<16x256xbf16>
    %c0_6 = arith.constant 0 : index
    %c0_7 = arith.constant 0 : index
    %9 = vector.load %arg4[%c0_6, %c0_7] : memref<256x128xbf16, #tpu.memory_space<vmem>>, vector<256x128xbf16>
    %cst_8 = arith.constant dense<0.000000e+00> : vector<16x128xf32>
    %10 = tpu.matmul %8, %9, %cst_8 {dimension_numbers = #tpu.dot_dimension_numbers<[1], [0], [0], [1], [0, 0, 1, 1], [], []>} : vector<16x256xbf16>, vector<256x128xbf16>, vector<16x128xf32> -> vector<16x128xf32>
    %c0_9 = arith.constant 0 : index
    %c0_10 = arith.constant 0 : index
    %11 = vector.load %arg5[%c0_9, %c0_10] : memref<8x128xf32, #tpu.memory_space<vmem>>, vector<1x128xf32>
    %12 = vector.broadcast %11 : vector<1x128xf32> to vector<16x128xf32>
    %13 = arith.addf %10, %12 : vector<16x128xf32>
    %14 = arith.extf %0 : vector<16x128xbf16> to vector<16x128xf32>
    %15 = arith.addf %14, %13 : vector<16x128xf32>
    %cst_11 = arith.constant dense<0.000000e+00> : vector<16xf32>
    %16 = vector.multi_reduction <add>, %15, %cst_11 [1] : vector<16x128xf32> to vector<16xf32>
    %17 = vector.shape_cast %16 : vector<16xf32> to vector<16x1xf32>
    %cst_12 = arith.constant 1.280000e+02 : f32
    %18 = vector.broadcast %cst_12 : f32 to vector<16x1xf32>
    %19 = arith.divf %17, %18 : vector<16x1xf32>
    %20 = vector.broadcast %19 : vector<16x1xf32> to vector<16x128xf32>
    %21 = arith.subf %15, %20 : vector<16x128xf32>
    %22 = vector.broadcast %19 : vector<16x1xf32> to vector<16x128xf32>
    %23 = arith.subf %15, %22 : vector<16x128xf32>
    %24 = arith.mulf %21, %23 : vector<16x128xf32>
    %cst_13 = arith.constant dense<0.000000e+00> : vector<16xf32>
    %25 = vector.multi_reduction <add>, %24, %cst_13 [1] : vector<16x128xf32> to vector<16xf32>
    %26 = vector.shape_cast %25 : vector<16xf32> to vector<16x1xf32>
    %cst_14 = arith.constant 1.280000e+02 : f32
    %27 = vector.broadcast %cst_14 : f32 to vector<16x1xf32>
    %28 = arith.divf %26, %27 : vector<16x1xf32>
    %29 = vector.broadcast %19 : vector<16x1xf32> to vector<16x128xf32>
    %30 = arith.subf %15, %29 : vector<16x128xf32>
    %cst_15 = arith.constant 9.99999974E-6 : f32
    %31 = vector.broadcast %cst_15 : f32 to vector<16x1xf32>
    %32 = arith.addf %28, %31 : vector<16x1xf32>
    %33 = math.rsqrt %32 : vector<16x1xf32>
    %34 = vector.broadcast %33 : vector<16x1xf32> to vector<16x128xf32>
    %35 = arith.mulf %30, %34 : vector<16x128xf32>
    %c1 = arith.constant 1 : index
    %c0_16 = arith.constant 0 : index
    %36 = vector.load %arg5[%c1, %c0_16] : memref<8x128xf32, #tpu.memory_space<vmem>>, vector<1x128xf32>
    %37 = vector.broadcast %36 : vector<1x128xf32> to vector<16x128xf32>
    %38 = arith.mulf %35, %37 : vector<16x128xf32>
    %c2 = arith.constant 2 : index
    %c0_17 = arith.constant 0 : index
    %39 = vector.load %arg5[%c2, %c0_17] : memref<8x128xf32, #tpu.memory_space<vmem>>, vector<1x128xf32>
    %40 = vector.broadcast %39 : vector<1x128xf32> to vector<16x128xf32>
    %41 = arith.addf %38, %40 : vector<16x128xf32>
    %42 = arith.truncf %41 : vector<16x128xf32> to vector<16x128xbf16>
    %c0_18 = arith.constant 0 : index
    %c0_19 = arith.constant 0 : index
    %43 = vector.load %arg6[%c0_18, %c0_19] : memref<16x128xbf16, #tpu.memory_space<vmem>>, vector<16x128xbf16>
    tpu.vector_store %arg6[%c0_18, %c0_19], %42 {strides = array<i32>} : memref<16x128xbf16, #tpu.memory_space<vmem>>, vector<16x128xbf16>,
    return
  }
  func.func @transform_0(%arg0: i32) -> (i32, i32) {
    %c0_i32 = arith.constant 0 : i32
    %c0_i32_0 = arith.constant 0 : i32
    return %arg0, %c0_i32 : i32, i32
  }
  func.func @transform_1(%arg0: i32) -> (i32, i32) {
    %c0_i32 = arith.constant 0 : i32
    %c0_i32_0 = arith.constant 0 : i32
    %c0_i32_1 = arith.constant 0 : i32
    return %c0_i32, %c0_i32_0 : i32, i32
  }
  func.func @transform_2(%arg0: i32) -> (i32, i32) {
    %c0_i32 = arith.constant 0 : i32
    %c0_i32_0 = arith.constant 0 : i32
    %c0_i32_1 = arith.constant 0 : i32
    return %c0_i32, %c0_i32_0 : i32, i32
  }
  func.func @transform_3(%arg0: i32) -> (i32, i32) {
    %c0_i32 = arith.constant 0 : i32
    %c0_i32_0 = arith.constant 0 : i32
    %c0_i32_1 = arith.constant 0 : i32
    return %c0_i32, %c0_i32_0 : i32, i32
  }
  func.func @transform_4(%arg0: i32) -> (i32, i32) {
    %c0_i32 = arith.constant 0 : i32
    %c0_i32_0 = arith.constant 0 : i32
    %c0_i32_1 = arith.constant 0 : i32
    return %c0_i32, %c0_i32_0 : i32, i32
  }
  func.func @transform_5(%arg0: i32) -> (i32, i32) {
    %c0_i32 = arith.constant 0 : i32
    %c0_i32_0 = arith.constant 0 : i32
    return %arg0, %c0_i32 : i32, i32
  }
}

module attributes {stable_mosaic.version = 11 : i64} {
  func.func @_mha_add_ln_kernel(%arg0: i32, %arg1: memref<1x16x128xbf16, #tpu.memory_space<vmem>>, %arg2: memref<1x16x128xbf16, #tpu.memory_space<vmem>>, %arg3: memref<128x256xbf16, #tpu.memory_space<vmem>>, %arg4: memref<128x128xbf16, #tpu.memory_space<vmem>>, %arg5: memref<128x128xbf16, #tpu.memory_space<vmem>>, %arg6: memref<8x128xf32, #tpu.memory_space<vmem>>, %arg7: memref<1x16x128xbf16, #tpu.memory_space<vmem>>, %arg8: memref<16x128xbf16, #tpu.memory_space<vmem>>) attributes {dimension_semantics = [#tpu.dimension_semantics<parallel>], iteration_bounds = array<i64: 2>, scalar_prefetch = 0 : i64, scratch_operands = 1 : i64, tpu.core_type = #tpu.core_type<tc>, window_params = [{transform_indices = @transform_0, window_bounds = array<i64: 1, 16, 128>}, {pipeline_mode = #tpu.pipeline_mode<synchronous>, transform_indices = @transform_1, window_bounds = array<i64: 1, 16, 128>}, {pipeline_mode = #tpu.pipeline_mode<synchronous>, transform_indices = @transform_2, window_bounds = array<i64: 128, 256>}, {pipeline_mode = #tpu.pipeline_mode<synchronous>, transform_indices = @transform_3, window_bounds = array<i64: 128, 128>}, {pipeline_mode = #tpu.pipeline_mode<synchronous>, transform_indices = @transform_4, window_bounds = array<i64: 128, 128>}, {pipeline_mode = #tpu.pipeline_mode<synchronous>, transform_indices = @transform_5, window_bounds = array<i64: 8, 128>}, {transform_indices = @transform_6, window_bounds = array<i64: 1, 16, 128>}]} {
    %c0 = arith.constant 0 : index
    %c0_0 = arith.constant 0 : index
    %0 = vector.load %arg6[%c0, %c0_0] : memref<8x128xf32, #tpu.memory_space<vmem>>, vector<1x128xf32>
    %c1 = arith.constant 1 : index
    %c0_1 = arith.constant 0 : index
    %1 = vector.load %arg6[%c1, %c0_1] : memref<8x128xf32, #tpu.memory_space<vmem>>, vector<1x128xf32>
    %c2 = arith.constant 2 : index
    %c0_2 = arith.constant 0 : index
    %2 = vector.load %arg6[%c2, %c0_2] : memref<8x128xf32, #tpu.memory_space<vmem>>, vector<1x128xf32>
    %c0_3 = arith.constant 0 : index
    %c0_4 = arith.constant 0 : index
    %c0_5 = arith.constant 0 : index
    %3 = vector.load %arg1[%c0_3, %c0_4, %c0_5] : memref<1x16x128xbf16, #tpu.memory_space<vmem>>, vector<1x16x128xbf16>
    %4 = vector.shape_cast %3 : vector<1x16x128xbf16> to vector<16x128xbf16>
    %c0_6 = arith.constant 0 : index
    %c0_7 = arith.constant 0 : index
    %c0_8 = arith.constant 0 : index
    %5 = vector.load %arg2[%c0_6, %c0_7, %c0_8] : memref<1x16x128xbf16, #tpu.memory_space<vmem>>, vector<1x16x128xbf16>
    %6 = vector.shape_cast %5 : vector<1x16x128xbf16> to vector<16x128xbf16>
    %7 = arith.addf %4, %6 : vector<16x128xbf16>
    %c0_9 = arith.constant 0 : index
    %c0_10 = arith.constant 0 : index
    %8 = vector.load %arg3[%c0_9, %c0_10] : memref<128x256xbf16, #tpu.memory_space<vmem>>, vector<128x256xbf16>
    %cst = arith.constant dense<0.000000e+00> : vector<16x256xf32>
    %9 = tpu.matmul %7, %8, %cst {dimension_numbers = #tpu.dot_dimension_numbers<[1], [0], [0], [1], [0, 0, 1, 1], [], []>} : vector<16x128xbf16>, vector<128x256xbf16>, vector<16x256xf32> -> vector<16x256xf32>
    %10 = vector.extract_strided_slice %9 {offsets = [0, 0], sizes = [16, 128], strides = [1, 1]} : vector<16x256xf32> to vector<16x128xf32>
    %11 = vector.broadcast %0 : vector<1x128xf32> to vector<16x128xf32>
    %12 = arith.addf %10, %11 : vector<16x128xf32>
    %cst_11 = arith.constant 2.500000e-01 : f32
    %13 = vector.broadcast %cst_11 : f32 to vector<16x128xf32>
    %14 = arith.mulf %12, %13 : vector<16x128xf32>
    %15 = vector.extract_strided_slice %9 {offsets = [0, 128], sizes = [16, 128], strides = [1, 1]} : vector<16x256xf32> to vector<16x128xf32>
    %16 = vector.broadcast %1 : vector<1x128xf32> to vector<16x128xf32>
    %17 = arith.addf %15, %16 : vector<16x128xf32>
    %c0_12 = arith.constant 0 : index
    %c0_13 = arith.constant 0 : index
    %c0_14 = arith.constant 0 : index
    %18 = vector.load %arg1[%c0_12, %c0_13, %c0_14] : memref<1x16x128xbf16, #tpu.memory_space<vmem>>, vector<1x16x128xbf16>
    %19 = vector.shape_cast %18 : vector<1x16x128xbf16> to vector<16x128xbf16>
    %c0_15 = arith.constant 0 : index
    %c0_16 = arith.constant 0 : index
    %20 = vector.load %arg4[%c0_15, %c0_16] : memref<128x128xbf16, #tpu.memory_space<vmem>>, vector<128x128xbf16>
    %cst_17 = arith.constant dense<0.000000e+00> : vector<16x128xf32>
    %21 = tpu.matmul %19, %20, %cst_17 {dimension_numbers = #tpu.dot_dimension_numbers<[1], [0], [0], [1], [0, 0, 1, 1], [], []>} : vector<16x128xbf16>, vector<128x128xbf16>, vector<16x128xf32> -> vector<16x128xf32>
    %22 = vector.broadcast %2 : vector<1x128xf32> to vector<16x128xf32>
    %23 = arith.addf %21, %22 : vector<16x128xf32>
    %24 = arith.truncf %14 : vector<16x128xf32> to vector<16x128xbf16>
    %25 = arith.truncf %17 : vector<16x128xf32> to vector<16x128xbf16>
    %26 = arith.truncf %23 : vector<16x128xf32> to vector<16x128xbf16>
    %27 = vector.extract_strided_slice %24 {offsets = [0, 0], sizes = [16, 16], strides = [1, 1]} : vector<16x128xbf16> to vector<16x16xbf16>
    %28 = vector.extract_strided_slice %25 {offsets = [0, 0], sizes = [16, 16], strides = [1, 1]} : vector<16x128xbf16> to vector<16x16xbf16>
    %cst_18 = arith.constant dense<0.000000e+00> : vector<16x16xf32>
    %29 = tpu.matmul %27, %28, %cst_18 {dimension_numbers = #tpu.dot_dimension_numbers<[1], [1], [0], [0], [0, 0, 1, 0], [], []>} : vector<16x16xbf16>, vector<16x16xbf16>, vector<16x16xf32> -> vector<16x16xf32>
    %cst_19 = arith.constant dense<0xFF800000> : vector<16xf32>
    %30 = vector.multi_reduction <maximumf>, %29, %cst_19 [1] : vector<16x16xf32> to vector<16xf32>
    %31 = vector.shape_cast %30 : vector<16xf32> to vector<16x1xf32>
    %32 = vector.broadcast %31 : vector<16x1xf32> to vector<16x16xf32>
    %33 = arith.subf %29, %32 : vector<16x16xf32>
    %34 = math.exp %33 : vector<16x16xf32>
    %cst_20 = arith.constant dense<0.000000e+00> : vector<16xf32>
    %35 = vector.multi_reduction <add>, %34, %cst_20 [1] : vector<16x16xf32> to vector<16xf32>
    %36 = vector.shape_cast %35 : vector<16xf32> to vector<16x1xf32>
    %37 = tpu.reciprocal %36 {approx = true} : vector<16x1xf32> -> vector<16x1xf32>
    %38 = vector.broadcast %37 : vector<16x1xf32> to vector<16x16xf32>
    %39 = arith.mulf %34, %38 : vector<16x16xf32>
    %40 = arith.truncf %39 : vector<16x16xf32> to vector<16x16xbf16>
    %41 = vector.extract_strided_slice %26 {offsets = [0, 0], sizes = [16, 16], strides = [1, 1]} : vector<16x128xbf16> to vector<16x16xbf16>
    %cst_21 = arith.constant dense<0.000000e+00> : vector<16x16xf32>
    %42 = tpu.matmul %40, %41, %cst_21 {dimension_numbers = #tpu.dot_dimension_numbers<[1], [0], [0], [1], [0, 0, 1, 1], [], []>} : vector<16x16xbf16>, vector<16x16xbf16>, vector<16x16xf32> -> vector<16x16xf32>
    %43 = arith.truncf %42 : vector<16x16xf32> to vector<16x16xbf16>
    %c0_22 = arith.constant 0 : index
    %c0_23 = arith.constant 0 : index
    %44 = vector.load %arg8[%c0_22, %c0_23] : memref<16x128xbf16, #tpu.memory_space<vmem>>, vector<16x16xbf16>
    tpu.vector_store %arg8[%c0_22, %c0_23], %43 {strides = array<i32>} : memref<16x128xbf16, #tpu.memory_space<vmem>>, vector<16x16xbf16>,
    %45 = vector.extract_strided_slice %24 {offsets = [0, 16], sizes = [16, 16], strides = [1, 1]} : vector<16x128xbf16> to vector<16x16xbf16>
    %46 = vector.extract_strided_slice %25 {offsets = [0, 16], sizes = [16, 16], strides = [1, 1]} : vector<16x128xbf16> to vector<16x16xbf16>
    %cst_24 = arith.constant dense<0.000000e+00> : vector<16x16xf32>
    %47 = tpu.matmul %45, %46, %cst_24 {dimension_numbers = #tpu.dot_dimension_numbers<[1], [1], [0], [0], [0, 0, 1, 0], [], []>} : vector<16x16xbf16>, vector<16x16xbf16>, vector<16x16xf32> -> vector<16x16xf32>
    %cst_25 = arith.constant dense<0xFF800000> : vector<16xf32>
    %48 = vector.multi_reduction <maximumf>, %47, %cst_25 [1] : vector<16x16xf32> to vector<16xf32>
    %49 = vector.shape_cast %48 : vector<16xf32> to vector<16x1xf32>
    %50 = vector.broadcast %49 : vector<16x1xf32> to vector<16x16xf32>
    %51 = arith.subf %47, %50 : vector<16x16xf32>
    %52 = math.exp %51 : vector<16x16xf32>
    %cst_26 = arith.constant dense<0.000000e+00> : vector<16xf32>
    %53 = vector.multi_reduction <add>, %52, %cst_26 [1] : vector<16x16xf32> to vector<16xf32>
    %54 = vector.shape_cast %53 : vector<16xf32> to vector<16x1xf32>
    %55 = tpu.reciprocal %54 {approx = true} : vector<16x1xf32> -> vector<16x1xf32>
    %56 = vector.broadcast %55 : vector<16x1xf32> to vector<16x16xf32>
    %57 = arith.mulf %52, %56 : vector<16x16xf32>
    %58 = arith.truncf %57 : vector<16x16xf32> to vector<16x16xbf16>
    %59 = vector.extract_strided_slice %26 {offsets = [0, 16], sizes = [16, 16], strides = [1, 1]} : vector<16x128xbf16> to vector<16x16xbf16>
    %cst_27 = arith.constant dense<0.000000e+00> : vector<16x16xf32>
    %60 = tpu.matmul %58, %59, %cst_27 {dimension_numbers = #tpu.dot_dimension_numbers<[1], [0], [0], [1], [0, 0, 1, 1], [], []>} : vector<16x16xbf16>, vector<16x16xbf16>, vector<16x16xf32> -> vector<16x16xf32>
    %61 = arith.truncf %60 : vector<16x16xf32> to vector<16x16xbf16>
    %c0_28 = arith.constant 0 : index
    %c16 = arith.constant 16 : index
    %62 = vector.load %arg8[%c0_28, %c16] : memref<16x128xbf16, #tpu.memory_space<vmem>>, vector<16x16xbf16>
    tpu.vector_store %arg8[%c0_28, %c16], %61 {strides = array<i32>} : memref<16x128xbf16, #tpu.memory_space<vmem>>, vector<16x16xbf16>,
    %63 = vector.extract_strided_slice %24 {offsets = [0, 32], sizes = [16, 16], strides = [1, 1]} : vector<16x128xbf16> to vector<16x16xbf16>
    %64 = vector.extract_strided_slice %25 {offsets = [0, 32], sizes = [16, 16], strides = [1, 1]} : vector<16x128xbf16> to vector<16x16xbf16>
    %cst_29 = arith.constant dense<0.000000e+00> : vector<16x16xf32>
    %65 = tpu.matmul %63, %64, %cst_29 {dimension_numbers = #tpu.dot_dimension_numbers<[1], [1], [0], [0], [0, 0, 1, 0], [], []>} : vector<16x16xbf16>, vector<16x16xbf16>, vector<16x16xf32> -> vector<16x16xf32>
    %cst_30 = arith.constant dense<0xFF800000> : vector<16xf32>
    %66 = vector.multi_reduction <maximumf>, %65, %cst_30 [1] : vector<16x16xf32> to vector<16xf32>
    %67 = vector.shape_cast %66 : vector<16xf32> to vector<16x1xf32>
    %68 = vector.broadcast %67 : vector<16x1xf32> to vector<16x16xf32>
    %69 = arith.subf %65, %68 : vector<16x16xf32>
    %70 = math.exp %69 : vector<16x16xf32>
    %cst_31 = arith.constant dense<0.000000e+00> : vector<16xf32>
    %71 = vector.multi_reduction <add>, %70, %cst_31 [1] : vector<16x16xf32> to vector<16xf32>
    %72 = vector.shape_cast %71 : vector<16xf32> to vector<16x1xf32>
    %73 = tpu.reciprocal %72 {approx = true} : vector<16x1xf32> -> vector<16x1xf32>
    %74 = vector.broadcast %73 : vector<16x1xf32> to vector<16x16xf32>
    %75 = arith.mulf %70, %74 : vector<16x16xf32>
    %76 = arith.truncf %75 : vector<16x16xf32> to vector<16x16xbf16>
    %77 = vector.extract_strided_slice %26 {offsets = [0, 32], sizes = [16, 16], strides = [1, 1]} : vector<16x128xbf16> to vector<16x16xbf16>
    %cst_32 = arith.constant dense<0.000000e+00> : vector<16x16xf32>
    %78 = tpu.matmul %76, %77, %cst_32 {dimension_numbers = #tpu.dot_dimension_numbers<[1], [0], [0], [1], [0, 0, 1, 1], [], []>} : vector<16x16xbf16>, vector<16x16xbf16>, vector<16x16xf32> -> vector<16x16xf32>
    %79 = arith.truncf %78 : vector<16x16xf32> to vector<16x16xbf16>
    %c0_33 = arith.constant 0 : index
    %c32 = arith.constant 32 : index
    %80 = vector.load %arg8[%c0_33, %c32] : memref<16x128xbf16, #tpu.memory_space<vmem>>, vector<16x16xbf16>
    tpu.vector_store %arg8[%c0_33, %c32], %79 {strides = array<i32>} : memref<16x128xbf16, #tpu.memory_space<vmem>>, vector<16x16xbf16>,
    %81 = vector.extract_strided_slice %24 {offsets = [0, 48], sizes = [16, 16], strides = [1, 1]} : vector<16x128xbf16> to vector<16x16xbf16>
    %82 = vector.extract_strided_slice %25 {offsets = [0, 48], sizes = [16, 16], strides = [1, 1]} : vector<16x128xbf16> to vector<16x16xbf16>
    %cst_34 = arith.constant dense<0.000000e+00> : vector<16x16xf32>
    %83 = tpu.matmul %81, %82, %cst_34 {dimension_numbers = #tpu.dot_dimension_numbers<[1], [1], [0], [0], [0, 0, 1, 0], [], []>} : vector<16x16xbf16>, vector<16x16xbf16>, vector<16x16xf32> -> vector<16x16xf32>
    %cst_35 = arith.constant dense<0xFF800000> : vector<16xf32>
    %84 = vector.multi_reduction <maximumf>, %83, %cst_35 [1] : vector<16x16xf32> to vector<16xf32>
    %85 = vector.shape_cast %84 : vector<16xf32> to vector<16x1xf32>
    %86 = vector.broadcast %85 : vector<16x1xf32> to vector<16x16xf32>
    %87 = arith.subf %83, %86 : vector<16x16xf32>
    %88 = math.exp %87 : vector<16x16xf32>
    %cst_36 = arith.constant dense<0.000000e+00> : vector<16xf32>
    %89 = vector.multi_reduction <add>, %88, %cst_36 [1] : vector<16x16xf32> to vector<16xf32>
    %90 = vector.shape_cast %89 : vector<16xf32> to vector<16x1xf32>
    %91 = tpu.reciprocal %90 {approx = true} : vector<16x1xf32> -> vector<16x1xf32>
    %92 = vector.broadcast %91 : vector<16x1xf32> to vector<16x16xf32>
    %93 = arith.mulf %88, %92 : vector<16x16xf32>
    %94 = arith.truncf %93 : vector<16x16xf32> to vector<16x16xbf16>
    %95 = vector.extract_strided_slice %26 {offsets = [0, 48], sizes = [16, 16], strides = [1, 1]} : vector<16x128xbf16> to vector<16x16xbf16>
    %cst_37 = arith.constant dense<0.000000e+00> : vector<16x16xf32>
    %96 = tpu.matmul %94, %95, %cst_37 {dimension_numbers = #tpu.dot_dimension_numbers<[1], [0], [0], [1], [0, 0, 1, 1], [], []>} : vector<16x16xbf16>, vector<16x16xbf16>, vector<16x16xf32> -> vector<16x16xf32>
    %97 = arith.truncf %96 : vector<16x16xf32> to vector<16x16xbf16>
    %c0_38 = arith.constant 0 : index
    %c48 = arith.constant 48 : index
    %98 = vector.load %arg8[%c0_38, %c48] : memref<16x128xbf16, #tpu.memory_space<vmem>>, vector<16x16xbf16>
    tpu.vector_store %arg8[%c0_38, %c48], %97 {strides = array<i32>} : memref<16x128xbf16, #tpu.memory_space<vmem>>, vector<16x16xbf16>,
    %99 = vector.extract_strided_slice %24 {offsets = [0, 64], sizes = [16, 16], strides = [1, 1]} : vector<16x128xbf16> to vector<16x16xbf16>
    %100 = vector.extract_strided_slice %25 {offsets = [0, 64], sizes = [16, 16], strides = [1, 1]} : vector<16x128xbf16> to vector<16x16xbf16>
    %cst_39 = arith.constant dense<0.000000e+00> : vector<16x16xf32>
    %101 = tpu.matmul %99, %100, %cst_39 {dimension_numbers = #tpu.dot_dimension_numbers<[1], [1], [0], [0], [0, 0, 1, 0], [], []>} : vector<16x16xbf16>, vector<16x16xbf16>, vector<16x16xf32> -> vector<16x16xf32>
    %cst_40 = arith.constant dense<0xFF800000> : vector<16xf32>
    %102 = vector.multi_reduction <maximumf>, %101, %cst_40 [1] : vector<16x16xf32> to vector<16xf32>
    %103 = vector.shape_cast %102 : vector<16xf32> to vector<16x1xf32>
    %104 = vector.broadcast %103 : vector<16x1xf32> to vector<16x16xf32>
    %105 = arith.subf %101, %104 : vector<16x16xf32>
    %106 = math.exp %105 : vector<16x16xf32>
    %cst_41 = arith.constant dense<0.000000e+00> : vector<16xf32>
    %107 = vector.multi_reduction <add>, %106, %cst_41 [1] : vector<16x16xf32> to vector<16xf32>
    %108 = vector.shape_cast %107 : vector<16xf32> to vector<16x1xf32>
    %109 = tpu.reciprocal %108 {approx = true} : vector<16x1xf32> -> vector<16x1xf32>
    %110 = vector.broadcast %109 : vector<16x1xf32> to vector<16x16xf32>
    %111 = arith.mulf %106, %110 : vector<16x16xf32>
    %112 = arith.truncf %111 : vector<16x16xf32> to vector<16x16xbf16>
    %113 = vector.extract_strided_slice %26 {offsets = [0, 64], sizes = [16, 16], strides = [1, 1]} : vector<16x128xbf16> to vector<16x16xbf16>
    %cst_42 = arith.constant dense<0.000000e+00> : vector<16x16xf32>
    %114 = tpu.matmul %112, %113, %cst_42 {dimension_numbers = #tpu.dot_dimension_numbers<[1], [0], [0], [1], [0, 0, 1, 1], [], []>} : vector<16x16xbf16>, vector<16x16xbf16>, vector<16x16xf32> -> vector<16x16xf32>
    %115 = arith.truncf %114 : vector<16x16xf32> to vector<16x16xbf16>
    %c0_43 = arith.constant 0 : index
    %c64 = arith.constant 64 : index
    %116 = vector.load %arg8[%c0_43, %c64] : memref<16x128xbf16, #tpu.memory_space<vmem>>, vector<16x16xbf16>
    tpu.vector_store %arg8[%c0_43, %c64], %115 {strides = array<i32>} : memref<16x128xbf16, #tpu.memory_space<vmem>>, vector<16x16xbf16>,
    %117 = vector.extract_strided_slice %24 {offsets = [0, 80], sizes = [16, 16], strides = [1, 1]} : vector<16x128xbf16> to vector<16x16xbf16>
    %118 = vector.extract_strided_slice %25 {offsets = [0, 80], sizes = [16, 16], strides = [1, 1]} : vector<16x128xbf16> to vector<16x16xbf16>
    %cst_44 = arith.constant dense<0.000000e+00> : vector<16x16xf32>
    %119 = tpu.matmul %117, %118, %cst_44 {dimension_numbers = #tpu.dot_dimension_numbers<[1], [1], [0], [0], [0, 0, 1, 0], [], []>} : vector<16x16xbf16>, vector<16x16xbf16>, vector<16x16xf32> -> vector<16x16xf32>
    %cst_45 = arith.constant dense<0xFF800000> : vector<16xf32>
    %120 = vector.multi_reduction <maximumf>, %119, %cst_45 [1] : vector<16x16xf32> to vector<16xf32>
    %121 = vector.shape_cast %120 : vector<16xf32> to vector<16x1xf32>
    %122 = vector.broadcast %121 : vector<16x1xf32> to vector<16x16xf32>
    %123 = arith.subf %119, %122 : vector<16x16xf32>
    %124 = math.exp %123 : vector<16x16xf32>
    %cst_46 = arith.constant dense<0.000000e+00> : vector<16xf32>
    %125 = vector.multi_reduction <add>, %124, %cst_46 [1] : vector<16x16xf32> to vector<16xf32>
    %126 = vector.shape_cast %125 : vector<16xf32> to vector<16x1xf32>
    %127 = tpu.reciprocal %126 {approx = true} : vector<16x1xf32> -> vector<16x1xf32>
    %128 = vector.broadcast %127 : vector<16x1xf32> to vector<16x16xf32>
    %129 = arith.mulf %124, %128 : vector<16x16xf32>
    %130 = arith.truncf %129 : vector<16x16xf32> to vector<16x16xbf16>
    %131 = vector.extract_strided_slice %26 {offsets = [0, 80], sizes = [16, 16], strides = [1, 1]} : vector<16x128xbf16> to vector<16x16xbf16>
    %cst_47 = arith.constant dense<0.000000e+00> : vector<16x16xf32>
    %132 = tpu.matmul %130, %131, %cst_47 {dimension_numbers = #tpu.dot_dimension_numbers<[1], [0], [0], [1], [0, 0, 1, 1], [], []>} : vector<16x16xbf16>, vector<16x16xbf16>, vector<16x16xf32> -> vector<16x16xf32>
    %133 = arith.truncf %132 : vector<16x16xf32> to vector<16x16xbf16>
    %c0_48 = arith.constant 0 : index
    %c80 = arith.constant 80 : index
    %134 = vector.load %arg8[%c0_48, %c80] : memref<16x128xbf16, #tpu.memory_space<vmem>>, vector<16x16xbf16>
    tpu.vector_store %arg8[%c0_48, %c80], %133 {strides = array<i32>} : memref<16x128xbf16, #tpu.memory_space<vmem>>, vector<16x16xbf16>,
    %135 = vector.extract_strided_slice %24 {offsets = [0, 96], sizes = [16, 16], strides = [1, 1]} : vector<16x128xbf16> to vector<16x16xbf16>
    %136 = vector.extract_strided_slice %25 {offsets = [0, 96], sizes = [16, 16], strides = [1, 1]} : vector<16x128xbf16> to vector<16x16xbf16>
    %cst_49 = arith.constant dense<0.000000e+00> : vector<16x16xf32>
    %137 = tpu.matmul %135, %136, %cst_49 {dimension_numbers = #tpu.dot_dimension_numbers<[1], [1], [0], [0], [0, 0, 1, 0], [], []>} : vector<16x16xbf16>, vector<16x16xbf16>, vector<16x16xf32> -> vector<16x16xf32>
    %cst_50 = arith.constant dense<0xFF800000> : vector<16xf32>
    %138 = vector.multi_reduction <maximumf>, %137, %cst_50 [1] : vector<16x16xf32> to vector<16xf32>
    %139 = vector.shape_cast %138 : vector<16xf32> to vector<16x1xf32>
    %140 = vector.broadcast %139 : vector<16x1xf32> to vector<16x16xf32>
    %141 = arith.subf %137, %140 : vector<16x16xf32>
    %142 = math.exp %141 : vector<16x16xf32>
    %cst_51 = arith.constant dense<0.000000e+00> : vector<16xf32>
    %143 = vector.multi_reduction <add>, %142, %cst_51 [1] : vector<16x16xf32> to vector<16xf32>
    %144 = vector.shape_cast %143 : vector<16xf32> to vector<16x1xf32>
    %145 = tpu.reciprocal %144 {approx = true} : vector<16x1xf32> -> vector<16x1xf32>
    %146 = vector.broadcast %145 : vector<16x1xf32> to vector<16x16xf32>
    %147 = arith.mulf %142, %146 : vector<16x16xf32>
    %148 = arith.truncf %147 : vector<16x16xf32> to vector<16x16xbf16>
    %149 = vector.extract_strided_slice %26 {offsets = [0, 96], sizes = [16, 16], strides = [1, 1]} : vector<16x128xbf16> to vector<16x16xbf16>
    %cst_52 = arith.constant dense<0.000000e+00> : vector<16x16xf32>
    %150 = tpu.matmul %148, %149, %cst_52 {dimension_numbers = #tpu.dot_dimension_numbers<[1], [0], [0], [1], [0, 0, 1, 1], [], []>} : vector<16x16xbf16>, vector<16x16xbf16>, vector<16x16xf32> -> vector<16x16xf32>
    %151 = arith.truncf %150 : vector<16x16xf32> to vector<16x16xbf16>
    %c0_53 = arith.constant 0 : index
    %c96 = arith.constant 96 : index
    %152 = vector.load %arg8[%c0_53, %c96] : memref<16x128xbf16, #tpu.memory_space<vmem>>, vector<16x16xbf16>
    tpu.vector_store %arg8[%c0_53, %c96], %151 {strides = array<i32>} : memref<16x128xbf16, #tpu.memory_space<vmem>>, vector<16x16xbf16>,
    %153 = vector.extract_strided_slice %24 {offsets = [0, 112], sizes = [16, 16], strides = [1, 1]} : vector<16x128xbf16> to vector<16x16xbf16>
    %154 = vector.extract_strided_slice %25 {offsets = [0, 112], sizes = [16, 16], strides = [1, 1]} : vector<16x128xbf16> to vector<16x16xbf16>
    %cst_54 = arith.constant dense<0.000000e+00> : vector<16x16xf32>
    %155 = tpu.matmul %153, %154, %cst_54 {dimension_numbers = #tpu.dot_dimension_numbers<[1], [1], [0], [0], [0, 0, 1, 0], [], []>} : vector<16x16xbf16>, vector<16x16xbf16>, vector<16x16xf32> -> vector<16x16xf32>
    %cst_55 = arith.constant dense<0xFF800000> : vector<16xf32>
    %156 = vector.multi_reduction <maximumf>, %155, %cst_55 [1] : vector<16x16xf32> to vector<16xf32>
    %157 = vector.shape_cast %156 : vector<16xf32> to vector<16x1xf32>
    %158 = vector.broadcast %157 : vector<16x1xf32> to vector<16x16xf32>
    %159 = arith.subf %155, %158 : vector<16x16xf32>
    %160 = math.exp %159 : vector<16x16xf32>
    %cst_56 = arith.constant dense<0.000000e+00> : vector<16xf32>
    %161 = vector.multi_reduction <add>, %160, %cst_56 [1] : vector<16x16xf32> to vector<16xf32>
    %162 = vector.shape_cast %161 : vector<16xf32> to vector<16x1xf32>
    %163 = tpu.reciprocal %162 {approx = true} : vector<16x1xf32> -> vector<16x1xf32>
    %164 = vector.broadcast %163 : vector<16x1xf32> to vector<16x16xf32>
    %165 = arith.mulf %160, %164 : vector<16x16xf32>
    %166 = arith.truncf %165 : vector<16x16xf32> to vector<16x16xbf16>
    %167 = vector.extract_strided_slice %26 {offsets = [0, 112], sizes = [16, 16], strides = [1, 1]} : vector<16x128xbf16> to vector<16x16xbf16>
    %cst_57 = arith.constant dense<0.000000e+00> : vector<16x16xf32>
    %168 = tpu.matmul %166, %167, %cst_57 {dimension_numbers = #tpu.dot_dimension_numbers<[1], [0], [0], [1], [0, 0, 1, 1], [], []>} : vector<16x16xbf16>, vector<16x16xbf16>, vector<16x16xf32> -> vector<16x16xf32>
    %169 = arith.truncf %168 : vector<16x16xf32> to vector<16x16xbf16>
    %c0_58 = arith.constant 0 : index
    %c112 = arith.constant 112 : index
    %170 = vector.load %arg8[%c0_58, %c112] : memref<16x128xbf16, #tpu.memory_space<vmem>>, vector<16x16xbf16>
    tpu.vector_store %arg8[%c0_58, %c112], %169 {strides = array<i32>} : memref<16x128xbf16, #tpu.memory_space<vmem>>, vector<16x16xbf16>,
    %c0_59 = arith.constant 0 : index
    %c0_60 = arith.constant 0 : index
    %171 = vector.load %arg8[%c0_59, %c0_60] : memref<16x128xbf16, #tpu.memory_space<vmem>>, vector<16x128xbf16>
    %c0_61 = arith.constant 0 : index
    %c0_62 = arith.constant 0 : index
    %172 = vector.load %arg5[%c0_61, %c0_62] : memref<128x128xbf16, #tpu.memory_space<vmem>>, vector<128x128xbf16>
    %cst_63 = arith.constant dense<0.000000e+00> : vector<16x128xf32>
    %173 = tpu.matmul %171, %172, %cst_63 {dimension_numbers = #tpu.dot_dimension_numbers<[1], [0], [0], [1], [0, 0, 1, 1], [], []>} : vector<16x128xbf16>, vector<128x128xbf16>, vector<16x128xf32> -> vector<16x128xf32>
    %c3 = arith.constant 3 : index
    %c0_64 = arith.constant 0 : index
    %174 = vector.load %arg6[%c3, %c0_64] : memref<8x128xf32, #tpu.memory_space<vmem>>, vector<1x128xf32>
    %175 = vector.broadcast %174 : vector<1x128xf32> to vector<16x128xf32>
    %176 = arith.addf %173, %175 : vector<16x128xf32>
    %c0_65 = arith.constant 0 : index
    %c0_66 = arith.constant 0 : index
    %c0_67 = arith.constant 0 : index
    %177 = vector.load %arg1[%c0_65, %c0_66, %c0_67] : memref<1x16x128xbf16, #tpu.memory_space<vmem>>, vector<1x16x128xbf16>
    %178 = vector.shape_cast %177 : vector<1x16x128xbf16> to vector<16x128xbf16>
    %179 = arith.extf %178 : vector<16x128xbf16> to vector<16x128xf32>
    %180 = arith.addf %179, %176 : vector<16x128xf32>
    %cst_68 = arith.constant dense<0.000000e+00> : vector<16xf32>
    %181 = vector.multi_reduction <add>, %180, %cst_68 [1] : vector<16x128xf32> to vector<16xf32>
    %182 = vector.shape_cast %181 : vector<16xf32> to vector<16x1xf32>
    %cst_69 = arith.constant 1.280000e+02 : f32
    %183 = vector.broadcast %cst_69 : f32 to vector<16x1xf32>
    %184 = arith.divf %182, %183 : vector<16x1xf32>
    %185 = vector.broadcast %184 : vector<16x1xf32> to vector<16x128xf32>
    %186 = arith.subf %180, %185 : vector<16x128xf32>
    %187 = vector.broadcast %184 : vector<16x1xf32> to vector<16x128xf32>
    %188 = arith.subf %180, %187 : vector<16x128xf32>
    %189 = arith.mulf %186, %188 : vector<16x128xf32>
    %cst_70 = arith.constant dense<0.000000e+00> : vector<16xf32>
    %190 = vector.multi_reduction <add>, %189, %cst_70 [1] : vector<16x128xf32> to vector<16xf32>
    %191 = vector.shape_cast %190 : vector<16xf32> to vector<16x1xf32>
    %cst_71 = arith.constant 1.280000e+02 : f32
    %192 = vector.broadcast %cst_71 : f32 to vector<16x1xf32>
    %193 = arith.divf %191, %192 : vector<16x1xf32>
    %194 = vector.broadcast %184 : vector<16x1xf32> to vector<16x128xf32>
    %195 = arith.subf %180, %194 : vector<16x128xf32>
    %cst_72 = arith.constant 9.99999974E-6 : f32
    %196 = vector.broadcast %cst_72 : f32 to vector<16x1xf32>
    %197 = arith.addf %193, %196 : vector<16x1xf32>
    %198 = math.rsqrt %197 : vector<16x1xf32>
    %199 = vector.broadcast %198 : vector<16x1xf32> to vector<16x128xf32>
    %200 = arith.mulf %195, %199 : vector<16x128xf32>
    %c4 = arith.constant 4 : index
    %c0_73 = arith.constant 0 : index
    %201 = vector.load %arg6[%c4, %c0_73] : memref<8x128xf32, #tpu.memory_space<vmem>>, vector<1x128xf32>
    %202 = vector.broadcast %201 : vector<1x128xf32> to vector<16x128xf32>
    %203 = arith.mulf %200, %202 : vector<16x128xf32>
    %c5 = arith.constant 5 : index
    %c0_74 = arith.constant 0 : index
    %204 = vector.load %arg6[%c5, %c0_74] : memref<8x128xf32, #tpu.memory_space<vmem>>, vector<1x128xf32>
    %205 = vector.broadcast %204 : vector<1x128xf32> to vector<16x128xf32>
    %206 = arith.addf %203, %205 : vector<16x128xf32>
    %207 = arith.truncf %206 : vector<16x128xf32> to vector<16x128xbf16>
    %c0_75 = arith.constant 0 : index
    %c0_76 = arith.constant 0 : index
    %c0_77 = arith.constant 0 : index
    %208 = vector.load %arg7[%c0_75, %c0_76, %c0_77] : memref<1x16x128xbf16, #tpu.memory_space<vmem>>, vector<1x16x128xbf16>
    %209 = vector.shape_cast %208 : vector<1x16x128xbf16> to vector<16x128xbf16>
    %210 = vector.shape_cast %207 : vector<16x128xbf16> to vector<1x16x128xbf16>
    tpu.vector_store %arg7[%c0_75, %c0_76, %c0_77], %210 {strides = array<i32>} : memref<1x16x128xbf16, #tpu.memory_space<vmem>>, vector<1x16x128xbf16>,
    return
  }
  func.func @transform_0(%arg0: i32) -> (i32, i32, i32) {
    %c0_i32 = arith.constant 0 : i32
    %c0_i32_0 = arith.constant 0 : i32
    %c0_i32_1 = arith.constant 0 : i32
    return %arg0, %c0_i32, %c0_i32_0 : i32, i32, i32
  }
  func.func @transform_1(%arg0: i32) -> (i32, i32, i32) {
    %c0_i32 = arith.constant 0 : i32
    %c0_i32_0 = arith.constant 0 : i32
    %c0_i32_1 = arith.constant 0 : i32
    %c0_i32_2 = arith.constant 0 : i32
    return %c0_i32, %c0_i32_0, %c0_i32_1 : i32, i32, i32
  }
  func.func @transform_2(%arg0: i32) -> (i32, i32) {
    %c0_i32 = arith.constant 0 : i32
    %c0_i32_0 = arith.constant 0 : i32
    %c0_i32_1 = arith.constant 0 : i32
    return %c0_i32, %c0_i32_0 : i32, i32
  }
  func.func @transform_3(%arg0: i32) -> (i32, i32) {
    %c0_i32 = arith.constant 0 : i32
    %c0_i32_0 = arith.constant 0 : i32
    %c0_i32_1 = arith.constant 0 : i32
    return %c0_i32, %c0_i32_0 : i32, i32
  }
  func.func @transform_4(%arg0: i32) -> (i32, i32) {
    %c0_i32 = arith.constant 0 : i32
    %c0_i32_0 = arith.constant 0 : i32
    %c0_i32_1 = arith.constant 0 : i32
    return %c0_i32, %c0_i32_0 : i32, i32
  }
  func.func @transform_5(%arg0: i32) -> (i32, i32) {
    %c0_i32 = arith.constant 0 : i32
    %c0_i32_0 = arith.constant 0 : i32
    %c0_i32_1 = arith.constant 0 : i32
    return %c0_i32, %c0_i32_0 : i32, i32
  }
  func.func @transform_6(%arg0: i32) -> (i32, i32, i32) {
    %c0_i32 = arith.constant 0 : i32
    %c0_i32_0 = arith.constant 0 : i32
    %c0_i32_1 = arith.constant 0 : i32
    return %arg0, %c0_i32, %c0_i32_0 : i32, i32, i32
  }
}

module attributes {stable_mosaic.version = 11 : i64} {
  func.func @_ffn_add_ln_kernel(%arg0: i32, %arg1: memref<16x128xbf16, #tpu.memory_space<vmem>>, %arg2: memref<128x256xbf16, #tpu.memory_space<vmem>>, %arg3: memref<1x256xf32, #tpu.memory_space<vmem>>, %arg4: memref<256x128xbf16, #tpu.memory_space<vmem>>, %arg5: memref<8x128xf32, #tpu.memory_space<vmem>>, %arg6: memref<16x128xf32, #tpu.memory_space<vmem>>) attributes {dimension_semantics = [#tpu.dimension_semantics<parallel>], iteration_bounds = array<i64: 2>, scalar_prefetch = 0 : i64, scratch_operands = 0 : i64, tpu.core_type = #tpu.core_type<tc>, window_params = [{transform_indices = @transform_0, window_bounds = array<i64: 16, 128>}, {pipeline_mode = #tpu.pipeline_mode<synchronous>, transform_indices = @transform_1, window_bounds = array<i64: 128, 256>}, {pipeline_mode = #tpu.pipeline_mode<synchronous>, transform_indices = @transform_2, window_bounds = array<i64: 1, 256>}, {pipeline_mode = #tpu.pipeline_mode<synchronous>, transform_indices = @transform_3, window_bounds = array<i64: 256, 128>}, {pipeline_mode = #tpu.pipeline_mode<synchronous>, transform_indices = @transform_4, window_bounds = array<i64: 8, 128>}, {transform_indices = @transform_5, window_bounds = array<i64: 16, 128>}]} {
    %c0 = arith.constant 0 : index
    %c0_0 = arith.constant 0 : index
    %0 = vector.load %arg1[%c0, %c0_0] : memref<16x128xbf16, #tpu.memory_space<vmem>>, vector<16x128xbf16>
    %c0_1 = arith.constant 0 : index
    %c0_2 = arith.constant 0 : index
    %1 = vector.load %arg2[%c0_1, %c0_2] : memref<128x256xbf16, #tpu.memory_space<vmem>>, vector<128x256xbf16>
    %cst = arith.constant dense<0.000000e+00> : vector<16x256xf32>
    %2 = tpu.matmul %0, %1, %cst {dimension_numbers = #tpu.dot_dimension_numbers<[1], [0], [0], [1], [0, 0, 1, 1], [], []>} : vector<16x128xbf16>, vector<128x256xbf16>, vector<16x256xf32> -> vector<16x256xf32>
    %c0_3 = arith.constant 0 : index
    %c0_4 = arith.constant 0 : index
    %3 = vector.load %arg3[%c0_3, %c0_4] : memref<1x256xf32, #tpu.memory_space<vmem>>, vector<1x256xf32>
    %4 = vector.broadcast %3 : vector<1x256xf32> to vector<16x256xf32>
    %5 = arith.addf %2, %4 : vector<16x256xf32>
    %cst_5 = arith.constant 0.000000e+00 : f32
    %6 = vector.broadcast %cst_5 : f32 to vector<16x256xf32>
    %7 = arith.maximumf %5, %6 : vector<16x256xf32>
    %8 = arith.truncf %7 : vector<16x256xf32> to vector<16x256xbf16>
    %c0_6 = arith.constant 0 : index
    %c0_7 = arith.constant 0 : index
    %9 = vector.load %arg4[%c0_6, %c0_7] : memref<256x128xbf16, #tpu.memory_space<vmem>>, vector<256x128xbf16>
    %cst_8 = arith.constant dense<0.000000e+00> : vector<16x128xf32>
    %10 = tpu.matmul %8, %9, %cst_8 {dimension_numbers = #tpu.dot_dimension_numbers<[1], [0], [0], [1], [0, 0, 1, 1], [], []>} : vector<16x256xbf16>, vector<256x128xbf16>, vector<16x128xf32> -> vector<16x128xf32>
    %c0_9 = arith.constant 0 : index
    %c0_10 = arith.constant 0 : index
    %11 = vector.load %arg5[%c0_9, %c0_10] : memref<8x128xf32, #tpu.memory_space<vmem>>, vector<1x128xf32>
    %12 = vector.broadcast %11 : vector<1x128xf32> to vector<16x128xf32>
    %13 = arith.addf %10, %12 : vector<16x128xf32>
    %14 = arith.extf %0 : vector<16x128xbf16> to vector<16x128xf32>
    %15 = arith.addf %14, %13 : vector<16x128xf32>
    %cst_11 = arith.constant dense<0.000000e+00> : vector<16xf32>
    %16 = vector.multi_reduction <add>, %15, %cst_11 [1] : vector<16x128xf32> to vector<16xf32>
    %17 = vector.shape_cast %16 : vector<16xf32> to vector<16x1xf32>
    %cst_12 = arith.constant 1.280000e+02 : f32
    %18 = vector.broadcast %cst_12 : f32 to vector<16x1xf32>
    %19 = arith.divf %17, %18 : vector<16x1xf32>
    %20 = vector.broadcast %19 : vector<16x1xf32> to vector<16x128xf32>
    %21 = arith.subf %15, %20 : vector<16x128xf32>
    %22 = vector.broadcast %19 : vector<16x1xf32> to vector<16x128xf32>
    %23 = arith.subf %15, %22 : vector<16x128xf32>
    %24 = arith.mulf %21, %23 : vector<16x128xf32>
    %cst_13 = arith.constant dense<0.000000e+00> : vector<16xf32>
    %25 = vector.multi_reduction <add>, %24, %cst_13 [1] : vector<16x128xf32> to vector<16xf32>
    %26 = vector.shape_cast %25 : vector<16xf32> to vector<16x1xf32>
    %cst_14 = arith.constant 1.280000e+02 : f32
    %27 = vector.broadcast %cst_14 : f32 to vector<16x1xf32>
    %28 = arith.divf %26, %27 : vector<16x1xf32>
    %29 = vector.broadcast %19 : vector<16x1xf32> to vector<16x128xf32>
    %30 = arith.subf %15, %29 : vector<16x128xf32>
    %cst_15 = arith.constant 9.99999974E-6 : f32
    %31 = vector.broadcast %cst_15 : f32 to vector<16x1xf32>
    %32 = arith.addf %28, %31 : vector<16x1xf32>
    %33 = math.rsqrt %32 : vector<16x1xf32>
    %34 = vector.broadcast %33 : vector<16x1xf32> to vector<16x128xf32>
    %35 = arith.mulf %30, %34 : vector<16x128xf32>
    %c1 = arith.constant 1 : index
    %c0_16 = arith.constant 0 : index
    %36 = vector.load %arg5[%c1, %c0_16] : memref<8x128xf32, #tpu.memory_space<vmem>>, vector<1x128xf32>
    %37 = vector.broadcast %36 : vector<1x128xf32> to vector<16x128xf32>
    %38 = arith.mulf %35, %37 : vector<16x128xf32>
    %c2 = arith.constant 2 : index
    %c0_17 = arith.constant 0 : index
    %39 = vector.load %arg5[%c2, %c0_17] : memref<8x128xf32, #tpu.memory_space<vmem>>, vector<1x128xf32>
    %40 = vector.broadcast %39 : vector<1x128xf32> to vector<16x128xf32>
    %41 = arith.addf %38, %40 : vector<16x128xf32>
    %cst_18 = arith.constant dense<0.000000e+00> : vector<16xf32>
    %42 = vector.multi_reduction <add>, %41, %cst_18 [1] : vector<16x128xf32> to vector<16xf32>
    %43 = vector.shape_cast %42 : vector<16xf32> to vector<16x1xf32>
    %cst_19 = arith.constant 1.280000e+02 : f32
    %44 = vector.broadcast %cst_19 : f32 to vector<16x1xf32>
    %45 = arith.divf %43, %44 : vector<16x1xf32>
    %46 = vector.broadcast %45 : vector<16x1xf32> to vector<16x128xf32>
    %47 = arith.subf %41, %46 : vector<16x128xf32>
    %48 = vector.broadcast %45 : vector<16x1xf32> to vector<16x128xf32>
    %49 = arith.subf %41, %48 : vector<16x128xf32>
    %50 = arith.mulf %47, %49 : vector<16x128xf32>
    %cst_20 = arith.constant dense<0.000000e+00> : vector<16xf32>
    %51 = vector.multi_reduction <add>, %50, %cst_20 [1] : vector<16x128xf32> to vector<16xf32>
    %52 = vector.shape_cast %51 : vector<16xf32> to vector<16x1xf32>
    %cst_21 = arith.constant 1.280000e+02 : f32
    %53 = vector.broadcast %cst_21 : f32 to vector<16x1xf32>
    %54 = arith.divf %52, %53 : vector<16x1xf32>
    %55 = vector.broadcast %45 : vector<16x1xf32> to vector<16x128xf32>
    %56 = arith.subf %41, %55 : vector<16x128xf32>
    %cst_22 = arith.constant 9.99999974E-6 : f32
    %57 = vector.broadcast %cst_22 : f32 to vector<16x1xf32>
    %58 = arith.addf %54, %57 : vector<16x1xf32>
    %59 = math.rsqrt %58 : vector<16x1xf32>
    %60 = vector.broadcast %59 : vector<16x1xf32> to vector<16x128xf32>
    %61 = arith.mulf %56, %60 : vector<16x128xf32>
    %c3 = arith.constant 3 : index
    %c0_23 = arith.constant 0 : index
    %62 = vector.load %arg5[%c3, %c0_23] : memref<8x128xf32, #tpu.memory_space<vmem>>, vector<1x128xf32>
    %63 = vector.broadcast %62 : vector<1x128xf32> to vector<16x128xf32>
    %64 = arith.mulf %61, %63 : vector<16x128xf32>
    %c4 = arith.constant 4 : index
    %c0_24 = arith.constant 0 : index
    %65 = vector.load %arg5[%c4, %c0_24] : memref<8x128xf32, #tpu.memory_space<vmem>>, vector<1x128xf32>
    %66 = vector.broadcast %65 : vector<1x128xf32> to vector<16x128xf32>
    %67 = arith.addf %64, %66 : vector<16x128xf32>
    %c0_25 = arith.constant 0 : index
    %c0_26 = arith.constant 0 : index
    %68 = vector.load %arg6[%c0_25, %c0_26] : memref<16x128xf32, #tpu.memory_space<vmem>>, vector<16x128xf32>
    tpu.vector_store %arg6[%c0_25, %c0_26], %67 {strides = array<i32>} : memref<16x128xf32, #tpu.memory_space<vmem>>, vector<16x128xf32>,
    return
  }
  func.func @transform_0(%arg0: i32) -> (i32, i32) {
    %c0_i32 = arith.constant 0 : i32
    %c0_i32_0 = arith.constant 0 : i32
    return %arg0, %c0_i32 : i32, i32
  }
  func.func @transform_1(%arg0: i32) -> (i32, i32) {
    %c0_i32 = arith.constant 0 : i32
    %c0_i32_0 = arith.constant 0 : i32
    %c0_i32_1 = arith.constant 0 : i32
    return %c0_i32, %c0_i32_0 : i32, i32
  }
  func.func @transform_2(%arg0: i32) -> (i32, i32) {
    %c0_i32 = arith.constant 0 : i32
    %c0_i32_0 = arith.constant 0 : i32
    %c0_i32_1 = arith.constant 0 : i32
    return %c0_i32, %c0_i32_0 : i32, i32
  }
  func.func @transform_3(%arg0: i32) -> (i32, i32) {
    %c0_i32 = arith.constant 0 : i32
    %c0_i32_0 = arith.constant 0 : i32
    %c0_i32_1 = arith.constant 0 : i32
    return %c0_i32, %c0_i32_0 : i32, i32
  }
  func.func @transform_4(%arg0: i32) -> (i32, i32) {
    %c0_i32 = arith.constant 0 : i32
    %c0_i32_0 = arith.constant 0 : i32
    %c0_i32_1 = arith.constant 0 : i32
    return %c0_i32, %c0_i32_0 : i32, i32
  }
  func.func @transform_5(%arg0: i32) -> (i32, i32) {
    %c0_i32 = arith.constant 0 : i32
    %c0_i32_0 = arith.constant 0 : i32
    return %arg0, %c0_i32 : i32, i32
  }
}

</mosaic_0001>

<bundles_post_ra>
// kernel: transformer_forward.11
= control target key start
LH: loop header
LB: loop body
LE: loop exit
PB: predicated region body
PF: predicated region fallthrough
CT: control target
= control target key end

     0   :  { %s1132_s18 = smov 0   ;;  %s1324_s0 = inlined_call_operand.vmem [shape: bf16[128,128], index: 0, kind: input, shape index: {}]   ;;  %s1325_s1 = inlined_call_operand.vmem [shape: bf16[128,256], index: 1, kind: input, shape index: {}]   ;;  %s1326_s2 = inlined_call_operand.vmem [shape: f32[1,256], index: 2, kind: input, shape index: {}]   ;;  %s1327_s3 = inlined_call_operand.vmem [shape: bf16[256,128], index: 3, kind: input, shape index: {}]   ;;  %s1328_s4 = inlined_call_operand.vmem [shape: f32[8,128], index: 4, kind: input, shape index: {}]   ;;  %s1329_s5 = inlined_call_operand.vmem [shape: bf16[128,128], index: 5, kind: output, shape index: {}]  }
   0x1 LB: > { %s891_s19 = sadd.s32 4294967295, %s1099_s18   ;;  %p895_p0 = scmp.ge.s32.totalorder %s1099_s18, 1  ;;  %s1099_s18 = sphi %s1132_s18, %s15_s18  }
   0x2   : > { %p188_p1 = scmp.lt.s32.totalorder %s1099_s18, 3 }
   0x4   : > { %p189_p2 = pnand %p895_p0, %p188_p1 }
   0x5   : > { %s896_s9 = sshll.u32 (!%p189_p2), %s891_s19, 3 }
   0x6   : > { %192 = sbr.rel (%p189_p2) target bundleno = 788 (0x314), region = 40  ;;  %p217_p3 = scmp.lt.s32.totalorder (!%p189_p2), %s896_s9, 15 }
   0xb   : > { %v1029_v0 = vld [vmem:[%s1325_s1 + $0x74] ss:$8 sps:$4 sm:$0xff]   ;;  %v1031_v1 = vld [vmem:[%s1325_s1 + $0x70] ss:$8 sps:$4 sm:$0xff]   ;;  %v1101_v2 = vmov 0   ;;  %s1331_s9 = smov (!%p217_p3, %s896_s9), 15  ;;  %v255_v37 = vlaneseq }
   0xc   : > { %401 = vmatprep.mubr.bf16.mxu0 %v1101_v2  ;;  %369 = vmatprep.subr.bf16.mxu0 %v1029_v0  ;;  %v1032_v3 = vld [vmem:[%s1325_s1 + $0x64] ss:$8 sps:$4 sm:$0xff]   ;;  %v1034_v4 = vld [vmem:[%s1325_s1 + $0x60] ss:$8 sps:$4 sm:$0xff]   ;;  %v1035_v5 = vld [vmem:[%s1325_s1 + $0x54] ss:$8 sps:$4 sm:$0xff]  }
   0xd   : > { %370 = vmatpush1.bf16.msra.mxu0 %v1031_v1  ;;  %v1037_v6 = vld [vmem:[%s1325_s1 + $0x50] ss:$8 sps:$4 sm:$0xff]   ;;  %v1038_v7 = vld [vmem:[%s1325_s1 + $0x44] ss:$8 sps:$4 sm:$0xff]   ;;  %v1040_v8 = vld [vmem:[%s1325_s1 + $0x40] ss:$8 sps:$4 sm:$0xff]  }
   0xe   : > { %371 = vmatprep.subr.bf16.mxu0 %v1032_v3  ;;  %v1041_v9 = vld [vmem:[%s1325_s1 + $0x34] ss:$8 sps:$4 sm:$0xff]   ;;  %v1043_v11 = vld [vmem:[%s1325_s1 + $0x30] ss:$8 sps:$4 sm:$0xff]   ;;  %v1044_v13 = vld [vmem:[%s1325_s1 + $0x24] ss:$8 sps:$4 sm:$0xff]  }
   0xf   : > { %v1057_v10 = vld [vmem:[%s1327_s3 + $0x78] sm:$0xff]   ;;  %v1059_v14 = vld [vmem:[%s1327_s3 + $0x70] sm:$0xff]   ;;  %v1061_v16 = vld [vmem:[%s1327_s3 + $0x68] sm:$0xff]   ;;  %s897_s15 = sshll.u32 %s1331_s9, 2  ;;  %v256_v38 = vshrl.u32 %v255_v37, 7 }
  0x10   : > { %v1058_v12 = vld [vmem:[%s1327_s3 + $0x38] sm:$0xff]   ;;  %980 = vmatprep.subr.bf16.mxu1 %v1057_v10  ;;  %v1060_v15 = vld [vmem:[%s1327_s3 + $0x30] sm:$0xff]   ;;  %v1046_v17 = vld [vmem:[%s1325_s1 + $0x20] ss:$8 sps:$4 sm:$0xff]   ;;  %s220_s25 = scalar_lea.vmem %s1324_s0, %s897_s15  ;;  %s1310_s30 = scalar_lea.vmem %s1329_s5, %s897_s15 }
  0x11   : > { %372 = vmatpush1.bf16.msra.mxu0 %v1034_v4  ;;  %981 = vmatpush3.bf16.msra.mxu1 %v1058_v12  ;;  %v1047_v18 = vld [vmem:[%s1325_s1 + $0x14] ss:$8 sps:$4 sm:$0xff]   ;;  %v1062_v19 = vld [vmem:[%s1327_s3 + $0x28] sm:$0xff]   ;;  %v1063_v20 = vld [vmem:[%s1327_s3 + $0x60] sm:$0xff]   ;;  %v261_v39 = vsub.s32 1, %v256_v38  ;;  %v257_v40 = vsub.s32 0, %v256_v38 }
  0x12   : > { %373 = vmatprep.subr.bf16.mxu0 %v1035_v5  ;;  %982 = vmatprep.subr.bf16.mxu1 %v1059_v14  ;;  %v1049_v21 = vld [vmem:[%s1325_s1 + $0x10] ss:$8 sps:$4 sm:$0xff]   ;;  %v1064_v22 = vld [vmem:[%s1327_s3 + $0x20] sm:$0xff]   ;;  %v1231_v28 = vld [vmem:[%s220_s25 + $0x8] sm:$0xff]  }
  0x13   : > { %v1050_v23 = vld [vmem:[%s1325_s1 + $0x4] ss:$8 sps:$4 sm:$0xff]   ;;  %v1065_v24 = vld [vmem:[%s1327_s3 + $0x58] sm:$0xff]   ;;  %v1052_v25 = vld [vmem:[%s1325_s1] ss:$8 sps:$4 sm:$0xff]  }
  0x14   : > { %v1224_v26 = vld [vmem:[%s220_s25] sm:$0xff]   ;;  %v1066_v27 = vld [vmem:[%s1327_s3 + $0x18] sm:$0xff]   ;;  %v1235_v29 = vld [vmem:[%s220_s25 + $0x10] sm:$0xff]  }
  0x15   : > { %374 = vmatpush1.bf16.msra.mxu0 %v1037_v6  ;;  %983 = vmatpush3.bf16.msra.mxu1 %v1060_v15  ;;  %v1239_v30 = vld [vmem:[%s220_s25 + $0x18] sm:$0xff]   ;;  %v1067_v31 = vld [vmem:[%s1327_s3 + $0x50] sm:$0xff]   ;;  %v1069_v33 = vld [vmem:[%s1327_s3 + $0x48] sm:$0xff]  }
  0x16   : > { %375 = vmatprep.subr.bf16.mxu0 %v1038_v7  ;;  %984 = vmatprep.subr.bf16.mxu1 %v1061_v16  ;;  %v1068_v32 = vld [vmem:[%s1327_s3 + $0x10] sm:$0xff]   ;;  %v1070_v34 = vld [vmem:[%s1327_s3 + $0x8] sm:$0xff]   ;;  %v1071_v35 = vld [vmem:[%s1327_s3 + $0x40] sm:$0xff]  }
  0x17   : > { %v1072_v36 = vld [vmem:[%s1327_s3] sm:$0xff]  }
  0x18   : > { %v253_v41 = vld [vmem:[%s1326_s2] sm:$0x3] }
  0x19   : > { %376 = vmatpush1.bf16.msra.mxu0 %v1040_v8  ;;  %985 = vmatpush3.bf16.msra.mxu1 %v1062_v19  ;;  %v262_v43 = vrot.slane %v253_v41, %v261_v39  ;;  %v258_v44 = vrot.slane %v253_v41, %v257_v40  ;;  %v920_v41 = vld [vmem:[%s1328_s4] ss:$0 sm:$0xff] }
  0x1a   : > { %377 = vmatprep.subr.bf16.mxu0 %v1041_v9  ;;  %986 = vmatprep.subr.bf16.mxu1 %v1063_v20 }
  0x1d   : > { %378 = vmatpush1.bf16.msra.mxu0 %v1043_v11  ;;  %987 = vmatpush3.bf16.msra.mxu1 %v1064_v22 }
  0x1e   : > { %379 = vmatprep.subr.bf16.mxu0 %v1044_v13  ;;  %988 = vmatprep.subr.bf16.mxu1 %v1065_v24 }
  0x21   : > { %380 = vmatpush1.bf16.msra.mxu0 %v1046_v17  ;;  %989 = vmatpush3.bf16.msra.mxu1 %v1066_v27 }
  0x22   : > { %381 = vmatprep.subr.bf16.mxu0 %v1047_v18  ;;  %990 = vmatprep.subr.bf16.mxu1 %v1067_v31 }
  0x25   : > { %382 = vmatpush1.bf16.msra.mxu0 %v1049_v21  ;;  %991 = vmatpush3.bf16.msra.mxu1 %v1068_v32 }
  0x26   : > { %383 = vmatprep.subr.bf16.mxu0 %v1050_v23  ;;  %992 = vmatprep.subr.bf16.mxu1 %v1069_v33 }
  0x29   : > { %384 = vmatpush1.bf16.msra.mxu0 %v1052_v25  ;;  %993 = vmatpush3.bf16.msra.mxu1 %v1070_v34 }
  0x2a   : > { %994 = vmatprep.subr.bf16.mxu1 %v1071_v35 }
  0x2c   : > { %402 = vmatmul.mubr.bf16.vlgmr.msra.gmra.mxu0 %v1224_v26 }
  0x2d   : > { %411 = vmatprep.mubr.bf16.mxu0 %v1101_v2  ;;  %995 = vmatpush3.bf16.msra.mxu1 %v1072_v36 }
  0x34   : > { %412 = vmatmul.mubr.bf16.gmra.mxu0 %v1231_v28 }
  0x35   : > { %421 = vmatprep.mubr.bf16.mxu0 %v1101_v2 }
  0x3c   : > { %422 = vmatmul.mubr.bf16.gmra.mxu0 %v1235_v29 }
  0x3d   : > { %431 = vmatprep.mubr.bf16.mxu0 %v1101_v2 }
  0x44   : > { %432 = vmatmul.mubr.bf16.gmra.mxu0 %v1239_v30 }
  0xec   : > { %v403_v42 = vpop.f32.mrf.mxu0 }
  0xed   : > { %v404_v49 = vadd.f32 %v403_v42, %v258_v44 }
  0xee   : > { %v405_v45 = vpop.f32.mrf.mxu0 }
  0xef   : > { %v406_v47 = vadd.f32 %v405_v45, %v262_v43  ;;  %v442_v56 = vmax.f32 %v404_v49, 0.0 }
  0xf0   : > { %v407_v46 = vpop.f32.mrf.mxu0 }
  0xf1   : > { %v408_v48 = vadd.f32 %v407_v46, %v258_v44  ;;  %v443_v54 = vmax.f32 %v406_v47, 0.0 }
  0xf2   : > { %v409_v50 = vpop.f32.mrf.mxu0 }
  0xf3   : > { %v410_v51 = vadd.f32 %v409_v50, %v262_v43  ;;  %v444_v52 = vmax.f32 %v408_v48, 0.0  ;;  %v665_v50 = vunpack.c.h.bf16 %v1224_v26 }
  0xf4   : > { %v413_v53 = vpop.f32.mrf.mxu0 }
  0xf5   : > { %v445_v55 = vmax.f32 %v410_v51, 0.0  ;;  %v458_v59 = vpack.c.bf16 %v444_v52, %v442_v56  ;;  %v414_v63 = vadd.f32 %v413_v53, %v258_v44  ;;  %v666_v56 = vunpack.c.l.bf16 %v1231_v28 }
  0xf6   : > { %v415_v57 = vpop.f32.mrf.mxu0 }
  0xf7   : > { %v459_v58 = vpack.c.bf16 %v445_v55, %v443_v54  ;;  %v416_v61 = vadd.f32 %v415_v57, %v262_v43  ;;  %v446_v6 = vmax.f32 %v414_v63, 0.0 }
  0xf8   : > { %v417_v60 = vpop.f32.mrf.mxu0 }
  0xf9   : > { %v418_v62 = vadd.f32 %v417_v60, %v258_v44  ;;  %631 = vmatprep.mubr.bf16.mxu1 %v459_v58  ;;  %v447_v4 = vmax.f32 %v416_v61, 0.0 }
  0xfa   : > { %v419_v0 = vpop.f32.mrf.mxu0  ;;  %632 = vmatmul.mubr.bf16.vlgmr.msra.gmra.mxu1 %v458_v59 }
  0xfb   : > { %v420_v1 = vadd.f32 %v419_v0, %v262_v43  ;;  %v448_v2 = vmax.f32 %v418_v62, 0.0  ;;  %v667_v62 = vunpack.c.h.bf16 %v1231_v28 }
  0xfc   : > { %v423_v3 = vpop.f32.mrf.mxu0 }
  0xfd   : > { %v449_v5 = vmax.f32 %v420_v1, 0.0  ;;  %v460_v9 = vpack.c.bf16 %v448_v2, %v446_v6  ;;  %v424_v13 = vadd.f32 %v423_v3, %v258_v44  ;;  %v668_v3 = vunpack.c.l.bf16 %v1235_v29 }
  0xfe   : > { %v425_v7 = vpop.f32.mrf.mxu0 }
  0xff   : > { %v461_v8 = vpack.c.bf16 %v449_v5, %v447_v4  ;;  %v426_v11 = vadd.f32 %v425_v7, %v262_v43  ;;  %v450_v20 = vmax.f32 %v424_v13, 0.0 }
 0x100   : > { %v427_v10 = vpop.f32.mrf.mxu0 }
 0x101   : > { %v428_v12 = vadd.f32 %v427_v10, %v258_v44  ;;  %639 = vmatprep.mubr.bf16.mxu1 %v461_v8  ;;  %v451_v18 = vmax.f32 %v426_v11, 0.0 }
 0x102   : > { %v429_v14 = vpop.f32.mrf.mxu0  ;;  %640 = vmatmul.mubr.bf16.gmra.mxu1 %v460_v9  ;;  %v669_v9 = vunpack.c.h.bf16 %v1235_v29 }
 0x103   : > { %v430_v15 = vadd.f32 %v429_v14, %v262_v43  ;;  %v452_v16 = vmax.f32 %v428_v12, 0.0  ;;  %v670_v14 = vunpack.c.l.bf16 %v1239_v30 }
 0x104   : > { %v433_v17 = vpop.f32.mrf.mxu0 }
 0x105   : > { %v453_v19 = vmax.f32 %v430_v15, 0.0  ;;  %v462_v23 = vpack.c.bf16 %v452_v16, %v450_v20  ;;  %v434_v31 = vadd.f32 %v433_v17, %v258_v44  ;;  %v671_v20 = vunpack.c.h.bf16 %v1239_v30 }
 0x106   : > { %v435_v21 = vpop.f32.mrf.mxu0 }
 0x107   : > { %v463_v22 = vpack.c.bf16 %v453_v19, %v451_v18  ;;  %v436_v25 = vadd.f32 %v435_v21, %v262_v43  ;;  %v454_v37 = vmax.f32 %v434_v31, 0.0 }
 0x108   : > { %v437_v24 = vpop.f32.mrf.mxu0 }
 0x109   : > { %v438_v27 = vadd.f32 %v437_v24, %v258_v44  ;;  %647 = vmatprep.mubr.bf16.mxu1 %v463_v22  ;;  %v455_v35 = vmax.f32 %v436_v25, 0.0  ;;  %v664_v44 = vunpack.c.l.bf16 %v1224_v26 }
 0x10a   : > { %v439_v32 = vpop.f32.mrf.mxu0  ;;  %648 = vmatmul.mubr.bf16.gmra.mxu1 %v462_v23 }
 0x10b   : > { %v440_v33 = vadd.f32 %v439_v32, %v262_v43  ;;  %v456_v34 = vmax.f32 %v438_v27, 0.0 }
 0x10d   : > { %v457_v36 = vmax.f32 %v440_v33, 0.0  ;;  %v464_v39 = vpack.c.bf16 %v456_v34, %v454_v37 }
 0x10f   : > { %v465_v38 = vpack.c.bf16 %v457_v36, %v455_v35 }
 0x111   : > { %655 = vmatprep.mubr.bf16.mxu1 %v465_v38 }
 0x112   : > { %656 = vmatmul.mubr.bf16.gmra.mxu1 %v464_v39 }
 0x1ba   : > { %v996_v40 = vpop.f32.mrf.mxu1 }
 0x1bc   : > { %v997_v42 = vpop.f32.mrf.mxu1 }
 0x1bd   : > { %v998_v45 = vadd.f32 %v997_v42, %v996_v40 }
 0x1be   : > { %v999_v46 = vpop.f32.mrf.mxu1 }
 0x1bf   : > { %v634_v47 = vadd.f32 %v998_v45, %v920_v41 }
 0x1c0   : > { %v1000_v43 = vpop.f32.mrf.mxu1 }
 0x1c1   : > { %v1001_v48 = vadd.f32 %v1000_v43, %v999_v46  ;;  %v672_v49 = vadd.f32 %v664_v44, %v634_v47 }
 0x1c2   : > { %v1002_v51 = vpop.f32.mrf.mxu1 }
 0x1c3   : > { %v637_v52 = vadd.f32 %v1001_v48, %v920_v41  ;;  %680 = vadd.xlane.f32.xlu0 %v672_v49 }
 0x1c4   : > { %v1003_v53 = vpop.f32.mrf.mxu1 }
 0x1c5   : > { %v1004_v54 = vadd.f32 %v1003_v53, %v1002_v51  ;;  %v673_v55 = vadd.f32 %v665_v50, %v637_v52 }
 0x1c6   : > { %v1005_v57 = vpop.f32.mrf.mxu1 }
 0x1c7   : > { %v642_v58 = vadd.f32 %v1004_v54, %v920_v41  ;;  %682 = vadd.xlane.f32.xlu0 %v673_v55 }
 0x1c8   : > { %v1006_v59 = vpop.f32.mrf.mxu1 }
 0x1c9   : > { %v1007_v60 = vadd.f32 %v1006_v59, %v1005_v57  ;;  %v674_v61 = vadd.f32 %v666_v56, %v642_v58 }
 0x1ca   : > { %v1008_v63 = vpop.f32.mrf.mxu1 }
 0x1cb   : > { %v645_v0 = vadd.f32 %v1007_v60, %v920_v41  ;;  %684 = vadd.xlane.f32.xlu1 %v674_v61 }
 0x1cc   : > { %v1009_v26 = vpop.f32.mrf.mxu1 }
 0x1cd   : > { %v1010_v1 = vadd.f32 %v1009_v26, %v1008_v63  ;;  %v675_v2 = vadd.f32 %v667_v62, %v645_v0 }
 0x1ce   : > { %v1011_v4 = vpop.f32.mrf.mxu1 }
 0x1cf   : > { %v650_v5 = vadd.f32 %v1010_v1, %v920_v41  ;;  %686 = vadd.xlane.f32.xlu1 %v675_v2 }
 0x1d0   : > { %v1012_v6 = vpop.f32.mrf.mxu1 }
 0x1d1   : > { %v1013_v7 = vadd.f32 %v1012_v6, %v1011_v4  ;;  %v676_v8 = vadd.f32 %v668_v3, %v650_v5 }
 0x1d2   : > { %v1014_v10 = vpop.f32.mrf.mxu1 }
 0x1d3   : > { %v653_v11 = vadd.f32 %v1013_v7, %v920_v41  ;;  %688 = vadd.xlane.f32.xlu0 %v676_v8 }
 0x1d4   : > { %v1015_v28 = vpop.f32.mrf.mxu1 }
 0x1d5   : > { %v1016_v12 = vadd.f32 %v1015_v28, %v1014_v10  ;;  %v677_v13 = vadd.f32 %v669_v9, %v653_v11  ;;  %v937_v9 = vld [vmem:[%s1328_s4 + $0x1] ss:$0 sm:$0xff] }
 0x1d6   : > { %v1017_v15 = vpop.f32.mrf.mxu1 }
 0x1d7   : > { %v658_v16 = vadd.f32 %v1016_v12, %v920_v41  ;;  %690 = vadd.xlane.f32.xlu1 %v677_v13 }
 0x1d8   : > { %v1018_v17 = vpop.f32.mrf.mxu1 }
 0x1d9   : > { %v1019_v18 = vadd.f32 %v1018_v17, %v1017_v15  ;;  %v678_v19 = vadd.f32 %v670_v14, %v658_v16  ;;  %v938_v15 = vld [vmem:[%s1328_s4 + $0x2] ss:$0 sm:$0xff] }
 0x1db   : > { %v661_v21 = vadd.f32 %v1019_v18, %v920_v41  ;;  %692 = vadd.xlane.f32.xlu0 %v678_v19 }
 0x1dd   : > { %v679_v22 = vadd.f32 %v671_v20, %v661_v21 }
 0x1df   : > { %694 = vadd.xlane.f32.xlu1 %v679_v22 }
 0x24c   : > { %v681_v29 = vpop.xlane.xlu0 %680 }
 0x24d   : > { %v697_v23 = vmul.f32 0.0078125, %v681_v29 }
 0x24f   : > { %v705_v24 = vsub.f32 %v672_v49, %v697_v23 }
 0x250   : > { %v683_v25 = vpop.xlane.xlu0 %682 }
 0x251   : > { %v698_v27 = vmul.f32 0.0078125, %v683_v25  ;;  %v713_v31 = vmul.f32 %v705_v24, %v705_v24 }
 0x253   : > { %v706_v32 = vsub.f32 %v673_v55, %v698_v27  ;;  %721 = vadd.xlane.f32.xlu0 %v713_v31 }
 0x254   : > { %v685_v33 = vpop.xlane.xlu1 %684 }
 0x255   : > { %v699_v34 = vmul.f32 0.0078125, %v685_v33  ;;  %v714_v35 = vmul.f32 %v706_v32, %v706_v32 }
 0x257   : > { %v1274_v36 = vsub.f32 %v674_v61, %v699_v34  ;;  %723 = vadd.xlane.f32.xlu1 %v714_v35 }
 0x258   : > { %v687_v37 = vpop.xlane.xlu1 %686 }
 0x259   : > { %v700_v30 = vmul.f32 0.0078125, %v687_v37  ;;  %v715_v38 = vmul.f32 %v1274_v36, %v1274_v36 }
 0x25b   : > { %v1278_v39 = vsub.f32 %v675_v2, %v700_v30  ;;  %725 = vadd.xlane.f32.xlu0 %v715_v38 }
 0x25c   : > { %v689_v40 = vpop.xlane.xlu0 %688 }
 0x25d   : > { %v701_v41 = vmul.f32 0.0078125, %v689_v40  ;;  %v716_v42 = vmul.f32 %v1278_v39, %v1278_v39 }
 0x25f   : > { %v1282_v45 = vsub.f32 %v676_v8, %v701_v41  ;;  %727 = vadd.xlane.f32.xlu1 %v716_v42 }
 0x260   : > { %v691_v44 = vpop.xlane.xlu1 %690 }
 0x261   : > { %v702_v46 = vmul.f32 0.0078125, %v691_v44  ;;  %v717_v47 = vmul.f32 %v1282_v45, %v1282_v45 }
 0x263   : > { %v1286_v43 = vsub.f32 %v677_v13, %v702_v46  ;;  %729 = vadd.xlane.f32.xlu0 %v717_v47 }
 0x264   : > { %v693_v48 = vpop.xlane.xlu0 %692 }
 0x265   : > { %v703_v49 = vmul.f32 0.0078125, %v693_v48  ;;  %v718_v50 = vmul.f32 %v1286_v43, %v1286_v43 }
 0x267   : > { %v1290_v51 = vsub.f32 %v678_v19, %v703_v49  ;;  %731 = vadd.xlane.f32.xlu1 %v718_v50 }
 0x268   : > { %v695_v52 = vpop.xlane.xlu1 %694 }
 0x269   : > { %v704_v53 = vmul.f32 0.0078125, %v695_v52  ;;  %v719_v54 = vmul.f32 %v1290_v51, %v1290_v51 }
 0x26b   : > { %v1294_v55 = vsub.f32 %v679_v22, %v704_v53  ;;  %733 = vadd.xlane.f32.xlu0 %v719_v54 }
 0x26d   : > { %v720_v56 = vmul.f32 %v1294_v55, %v1294_v55 }
 0x26f   : > { %735 = vadd.xlane.f32.xlu1 %v720_v56 }
 0x2dc   : > { %v722_v57 = vpop.xlane.xlu0 %721 }
 0x2dd   : > { %v737_v58 = vmul.f32 0.0078125, %v722_v57 }
 0x2df   : > { %v745_v59 = vadd.f32 1e-05, %v737_v58 }
 0x2e0   : > { %v724_v60 = vpop.xlane.xlu1 %723 }
 0x2e1   : > { %1077 = vrsqrt.f32 %v745_v59  ;;  %v738_v61 = vmul.f32 0.0078125, %v724_v60 }
 0x2e3   : > { %v746_v62 = vadd.f32 1e-05, %v738_v61 }
 0x2e4   : > { %v726_v63 = vpop.xlane.xlu0 %725 }
 0x2e5   : > { %1079 = vrsqrt.f32 %v746_v62  ;;  %v739_v0 = vmul.f32 0.0078125, %v726_v63 }
 0x2e7   : > { %v747_v26 = vadd.f32 1e-05, %v739_v0 }
 0x2e8   : > { %v728_v1 = vpop.xlane.xlu1 %727 }
 0x2e9   : > { %1081 = vrsqrt.f32 %v747_v26  ;;  %v740_v2 = vmul.f32 0.0078125, %v728_v1 }
 0x2eb   : > { %v748_v3 = vadd.f32 1e-05, %v740_v2 }
 0x2ec   : > { %v730_v4 = vpop.xlane.xlu0 %729 }
 0x2ed   : > { %1083 = vrsqrt.f32 %v748_v3  ;;  %v741_v5 = vmul.f32 0.0078125, %v730_v4 }
 0x2ee   : > { %v1078_v6 = vpop.eup %1077 }
 0x2ef   : > { %v761_v7 = vmul.f32 %v1078_v6, %v705_v24  ;;  %v749_v8 = vadd.f32 1e-05, %v741_v5 }
 0x2f0   : > { %v732_v10 = vpop.xlane.xlu1 %731 }
 0x2f1   : > { %1085 = vrsqrt.f32 %v749_v8  ;;  %v742_v11 = vmul.f32 0.0078125, %v732_v10  ;;  %v774_v12 = vmul.f32 %v937_v9, %v761_v7 }
 0x2f2   : > { %v1080_v28 = vpop.eup %1079 }
 0x2f3   : > { %v762_v13 = vmul.f32 %v1080_v28, %v706_v32  ;;  %v750_v14 = vadd.f32 1e-05, %v742_v11  ;;  %v787_v20 = vadd.f32 %v938_v15, %v774_v12 }
 0x2f4   : > { %v734_v16 = vpop.xlane.xlu0 %733 }
 0x2f5   : > { %v775_v17 = vmul.f32 %v937_v9, %v762_v13  ;;  %1087 = vrsqrt.f32 %v750_v14  ;;  %v743_v18 = vmul.f32 0.0078125, %v734_v16 }
 0x2f6   : > { %v1082_v19 = vpop.eup %1081 }
 0x2f7   : > { %v788_v21 = vadd.f32 %v938_v15, %v775_v17  ;;  %v763_v22 = vmul.f32 %v1082_v19, %v1274_v36  ;;  %v751_v29 = vadd.f32 1e-05, %v743_v18 }
 0x2f8   : > { %v736_v23 = vpop.xlane.xlu1 %735 }
 0x2f9   : > { %v960_v24 = vpack.c.bf16 %v788_v21, %v787_v20  ;;  %1089 = vrsqrt.f32 %v751_v29  ;;  %v744_v25 = vmul.f32 0.0078125, %v736_v23  ;;  %v776_v31 = vmul.f32 %v937_v9, %v763_v22 }
 0x2fa   : > { %v1084_v27 = vpop.eup %1083 }
 0x2fb   : > { %961 = vst [vmem:[%s1310_s30] sm:$0xff] %v960_v24   ;;  %v764_v32 = vmul.f32 %v1084_v27, %v1278_v39  ;;  %v752_v33 = vadd.f32 1e-05, %v744_v25  ;;  %v789_v36 = vadd.f32 %v938_v15, %v776_v31 }
 0x2fd   : > { %v777_v34 = vmul.f32 %v937_v9, %v764_v32  ;;  %1091 = vrsqrt.f32 %v752_v33 }
 0x2fe   : > { %v1086_v35 = vpop.eup %1085 }
 0x2ff   : > { %v790_v37 = vadd.f32 %v938_v15, %v777_v34  ;;  %v765_v30 = vmul.f32 %v1086_v35, %v1282_v45 }
 0x301   : > { %v965_v38 = vpack.c.bf16 %v790_v37, %v789_v36  ;;  %v778_v41 = vmul.f32 %v937_v9, %v765_v30 }
 0x302   : > { %v1088_v40 = vpop.eup %1087 }
 0x303   : > { %977 = vst [vmem:[%s1310_s30 + $0x8] sm:$0xff] %v965_v38   ;;  %v766_v42 = vmul.f32 %v1088_v40, %v1286_v43  ;;  %v791_v47 = vadd.f32 %v938_v15, %v778_v41 }
 0x305   : > { %v779_v44 = vmul.f32 %v937_v9, %v766_v42 }
 0x306   : > { %v1090_v46 = vpop.eup %1089 }
 0x307   : > { %v792_v39 = vadd.f32 %v938_v15, %v779_v44  ;;  %v767_v48 = vmul.f32 %v1090_v46, %v1290_v51 }
 0x309   : > { %v970_v49 = vpack.c.bf16 %v792_v39, %v791_v47  ;;  %v780_v52 = vmul.f32 %v937_v9, %v767_v48 }
 0x30a   : > { %v1092_v50 = vpop.eup %1091 }
 0x30b   : > { %978 = vst [vmem:[%s1310_s30 + $0x10] sm:$0xff] %v970_v49   ;;  %v768_v53 = vmul.f32 %v1092_v50, %v1294_v55  ;;  %v793_v54 = vadd.f32 %v938_v15, %v780_v52 }
 0x30d   : > { %v781_v45 = vmul.f32 %v937_v9, %v768_v53 }
 0x30f   : > { %v794_v56 = vadd.f32 %v938_v15, %v781_v45 }
 0x311   : > { %v975_v57 = vpack.c.bf16 %v794_v56, %v793_v54 }
 0x313   : > { %979 = vst [vmem:[%s1310_s30 + $0x18] sm:$0xff] %v975_v57  }
 0x314 PF: > { %s15_s18 = sadd.s32 1, %s1099_s18  }
 0x315   : > { %p12_p4 = scmp.ge.s32.totalorder %s15_s18, 4  }
 0x317   :  { %14 = sbr.rel (!%p12_p4) target bundleno = 1 (0x1), region = 70 }

// kernel: transformer_forward.14
= control target key start
LH: loop header
LB: loop body
LE: loop exit
PB: predicated region body
PF: predicated region fallthrough
CT: control target
= control target key end

     0   :  { %11 = vsyncpa [#allocation4], 0  ;;  %s2862_s0 = inlined_call_operand.vmem [shape: bf16[2,16,128], index: 0, kind: input, shape index: {}]   ;;  %s2863_s1 = inlined_call_operand.vmem [shape: bf16[1,16,128], index: 1, kind: input, shape index: {}]   ;;  %s2864_s2 = inlined_call_operand.hbm [shape: bf16[128,256], index: 2, kind: input, shape index: {}]   ;;  %s2865_s3 = inlined_call_operand.vmem [shape: bf16[128,128], index: 3, kind: input, shape index: {}]   ;;  %s2866_s4 = inlined_call_operand.hbm [shape: bf16[128,128], index: 4, kind: input, shape index: {}]   ;;  %s2867_s5 = inlined_call_operand.vmem [shape: f32[8,128], index: 5, kind: input, shape index: {}]   ;;  %s2868_s6 = inlined_call_operand.vmem [shape: bf16[2,16,128], index: 6, kind: output, shape index: {}]  }
   0x1   :  { %12 = vsyncpa [#allocation6], 0  ;;  %s2475_s21 = smov 0  }
   0x2 LB: > { %s2424_s22 = smov [#allocation3]   ;;  %s2481_s24 = sadd.s32 4294967295, %s2422_s21   ;;  %s2422_s21 = sphi %s2475_s21, %s18_s21  }
   0x3   : > { %s195_s23 = sshll.u32 %s2424_s22, 4  ;;  %p1900_p0 = scmp.ge.s32.totalorder %s2422_s21, 1  ;;  %s196_s23 = int_to_ptr.vmem [resolvable:$true] %s195_s23 }
   0x4   : > { %p180_p1 = scmp.lt.s32.totalorder %s2422_s21, 3  ;;  %p2218_p3 = scmp.eq.s32.totalorder %s2481_s24, 0 }
   0x5   : > { %s2425_s26 = smov [#allocation5]   ;;  %s2367_s29 = scalar_lea.vmem %s196_s23, 2048 }
   0x6   : > { %p2485_p2 = pnand %p1900_p0, %p180_p1  ;;  %s211_s27 = sshll.u32 %s2425_s26, 4  ;;  %s212_s27 = int_to_ptr.vmem [resolvable:$true] %s211_s27 }
   0x7   : > { %p2368_p7 = scmp.ne.s32.totalorder %s196_s23, %s2367_s29  ;;  %p2375_p10 = scmp.lt.s32.totalorder %s196_s23, %s196_s23 }
   0x8   : > { %p2211_p4 = pneg %p2485_p2  ;;  %p2376_p11 = scmp.lt.s32.totalorder %s2367_s29, %s2367_s29 }
   0xa   : > { %p2494_p5 = pnand %p2218_p3, %p2211_p4  ;;  %p2377_p12 = por %p2376_p11, %p2375_p10 }
   0xc   : > { %p2358_p6 = pneg %p2494_p5 }
   0xe   : > { %p2370_p8 = pnand %p2368_p7, %p2358_p6 }
  0x10   : > { %p2371_p9 = pneg %p2370_p8 }
  0x12   : > { %p2378_p13 = pnand %p2377_p12, %p2371_p9 }
  0x14   : > { %2381 = shalt.err (!%p2378_p13)
}
  0x15   : > { %s2426_s30 = smov 128   ;;  %s2427_s7 = smov 8  }
  0x16   : > { %2214 = dma.hbm_to_vmem [thread:$0]  (!%p2494_p5), %s2864_s2, 2048, %s196_s23, [#allocation4], %s2426_s30, %s2426_s30, %s2427_s7  }
  0x17   : > { %s2393_s10 = scalar_lea.vmem %s212_s27, 1024  ;;  %p2401_p7 = scmp.lt.s32.totalorder %s212_s27, %s212_s27 }
  0x18   : > { %p2394_p0 = scmp.ne.s32.totalorder %s212_s27, %s2393_s10  ;;  %p2402_p8 = scmp.lt.s32.totalorder %s2393_s10, %s2393_s10 }
  0x1a   : > { %p2396_p1 = pnand %p2394_p0, %p2358_p6  ;;  %p2403_p10 = por %p2402_p8, %p2401_p7 }
  0x1c   : > { %p2397_p4 = pneg %p2396_p1 }
  0x1e   : > { %p2404_p9 = pnand %p2403_p10, %p2397_p4 }
  0x20   : > { %2407 = shalt.err (!%p2404_p9)
}
  0x21   : > { %s2428_s11 = smov 64   ;;  %s2429_s12 = smov 4  }
  0x22   : > { %2217 = dma.hbm_to_vmem [thread:$0]  (!%p2494_p5), %s2866_s4, 1024, %s212_s27, [#allocation6], %s2428_s11, %s2428_s11, %s2429_s12  }
  0x23   : > { %238 = sbr.rel (%p2485_p2) target bundleno = 2248 (0x8c8), region = 44 }
  0x28   : > { %2413 = dma.done.wait (%p2218_p3), [#allocation4], 2048  }
  0x29   : > { %2415 = vsyncadd (%p2218_p3), [#allocation4], 4294965248 }
  0x2a   : > { %2417 = dma.done.wait (%p2218_p3), [#allocation6], 1024  }
  0x2b   : > { %2419 = vsyncadd (%p2218_p3), [#allocation6], 4294966272  ;;  %v2430_v0 = vmov 0   ;;  %v2431_v1 = vmov 0.0   ;;  %v2246_v2 = vld [vmem:[#allocation3 + $0x74] ss:$8 sps:$4 sm:$0xff]  }
  0x2c   : > { %426 = vmatprep.mubr.bf16.mxu0 %v2430_v0  ;;  %2067 = vmatprep.subr.bf16.mxu1 %v2431_v1  ;;  %v2248_v3 = vld [vmem:[#allocation3 + $0x70] ss:$8 sps:$4 sm:$0xff]   ;;  %v2249_v4 = vld [vmem:[#allocation3 + $0x64] ss:$8 sps:$4 sm:$0xff]   ;;  %v2251_v5 = vld [vmem:[#allocation3 + $0x60] ss:$8 sps:$4 sm:$0xff]  }
  0x2d   : > { %394 = vmatprep.subr.bf16.mxu0 %v2246_v2  ;;  %v2252_v6 = vld [vmem:[#allocation3 + $0x54] ss:$8 sps:$4 sm:$0xff]   ;;  %p272_p2 = scmp.lt.s32.totalorder %s2481_s24, 1  ;;  %v2254_v7 = vld [vmem:[#allocation3 + $0x50] ss:$8 sps:$4 sm:$0xff]   ;;  %v2271_v12 = vld [vmem:[%s2865_s3 + $0x30] sm:$0xff]  }
  0x2e   : > { %395 = vmatpush1.bf16.msra.mxu0 %v2248_v3  ;;  %v2255_v8 = vld [vmem:[#allocation3 + $0x44] ss:$8 sps:$4 sm:$0xff]   ;;  %v2257_v9 = vld [vmem:[#allocation3 + $0x40] ss:$8 sps:$4 sm:$0xff]   ;;  %v2258_v10 = vld [vmem:[#allocation3 + $0x34] ss:$8 sps:$4 sm:$0xff]  }
  0x2f   : > { %396 = vmatprep.subr.bf16.mxu0 %v2249_v4  ;;  %s2872_s24 = smov (!%p272_p2, %s2481_s24), 1  ;;  %v2270_v11 = vld [vmem:[%s2865_s3 + $0x38] sm:$0xff]   ;;  %v2261_v14 = vld [vmem:[#allocation3 + $0x24] ss:$8 sps:$4 sm:$0xff]   ;;  %v2263_v15 = vld [vmem:[#allocation3 + $0x20] ss:$8 sps:$4 sm:$0xff]  }
  0x30   : > { %s1988_s17 = sshll.u32 %s2872_s24, 3  ;;  %2068 = vmatpush3.bf16.msra.mxu1 %v2270_v11  ;;  %v2260_v13 = vld [vmem:[#allocation3 + $0x30] ss:$8 sps:$4 sm:$0xff]   ;;  %v2272_v16 = vld [vmem:[%s2865_s3 + $0x28] sm:$0xff]   ;;  %v2264_v17 = vld [vmem:[#allocation3 + $0x14] ss:$8 sps:$4 sm:$0xff]  }
  0x31   : > { %2069 = vmatprep.subr.bf16.mxu1 %v2431_v1  ;;  %s2544_s23 = scalar_lea.vmem %s2862_s0, %s1988_s17  ;;  %v2273_v18 = vld [vmem:[%s2865_s3 + $0x20] sm:$0xff]   ;;  %v2267_v24 = vld [vmem:[#allocation3 + $0x4] ss:$8 sps:$4 sm:$0xff]   ;;  %v2274_v27 = vld [vmem:[%s2865_s3 + $0x18] sm:$0xff]   ;;  %vm2432_vm0 = vmmov 0   ;;  %vm569_vm1 = vcmask 130048   ;;  %s281_s18 = scalar_lea.vmem %s2868_s6, %s1988_s17 }
  0x32   : > { %397 = vmatpush1.bf16.msra.mxu0 %v2251_v5  ;;  %v2266_v19 = vld [vmem:[#allocation3 + $0x10] ss:$8 sps:$4 sm:$0xff]   ;;  %v287_v21 = vld [vmem:[%s2544_s23 + $0x4] sm:$0xf]  ;;  %v2269_v28 = vld [vmem:[#allocation3] ss:$8 sps:$4 sm:$0xff]   ;;  %2083 = vmatprep.mubr.msk.bf16.mxu1 %vm2432_vm0, %v2431_v1 }
  0x33   : > { %398 = vmatprep.subr.bf16.mxu0 %v2252_v6  ;;  %v286_v20 = vld [vmem:[%s2544_s23] sm:$0xf]  ;;  %v289_v23 = vld [vmem:[%s2863_s1 + $0x4] sm:$0xf]  ;;  %v2275_v30 = vld [vmem:[%s2865_s3 + $0x10] sm:$0xff]   ;;  %s2433_s27 = smov 112  }
  0x34   : > { %2070 = vmatpush3.bf16.msra.mxu1 %v2271_v12  ;;  %v288_v22 = vld [vmem:[%s2863_s1] sm:$0xf]  ;;  %v291_v26 = vadd.bf16 %v289_v23, %v287_v21  ;;  %v2276_v31 = vld [vmem:[%s2865_s3 + $0x8] sm:$0xff]   ;;  %v1931_v33 = vcombine.low %v286_v20, %v287_v21  ;;  %s2434_s28 = smov 80   ;;  %s2435_s29 = smov 64   ;;  %vm692_vm2 = vcmask 125952  }
  0x35   : > { %2071 = vmatprep.subr.bf16.mxu1 %v2431_v1  ;;  %v290_v25 = vadd.bf16 %v288_v22, %v286_v20  ;;  %v2277_v32 = vld [vmem:[%s2865_s3] sm:$0xff]   ;;  %s2436_s30 = smov 48   ;;  %s2437_s7 = smov 32   ;;  %vm831_vm3 = vcmask 257152   ;;  %vm967_vm4 = vcmask 388352   ;;  %vm1103_vm5 = vcmask 519552  }
  0x36   : > { %399 = vmatpush1.bf16.msra.mxu0 %v2254_v7  ;;  %v1929_v36 = vld [vmem:[%s2867_s5 + $0x1] ss:$0 sm:$0xff]  ;;  %v1928_v41 = vld [vmem:[%s2867_s5] ss:$0 sm:$0xff]  ;;  %v1930_v49 = vld [vmem:[%s2867_s5 + $0x2] ss:$0 sm:$0xff] }
  0x37   : > { %400 = vmatprep.subr.bf16.mxu0 %v2255_v8  ;;  %v1911_v29 = vcombine.low %v290_v25, %v291_v26  ;;  %s2438_s8 = smov 16   ;;  %s2439_s9 = smov 96   ;;  %vm1239_vm6 = vcmask 650752   ;;  %vm1375_vm7 = vcmask 781952   ;;  %vm1511_vm8 = vcmask 913152  }
  0x38   : > { %2072 = vmatpush3.bf16.msra.mxu1 %v2272_v16  ;;  %vm1647_vm9 = vcmask 1044352  }
  0x39   : > { %2073 = vmatprep.subr.bf16.mxu1 %v2431_v1 }
  0x3a   : > { %401 = vmatpush1.bf16.msra.mxu0 %v2257_v9 }
  0x3b   : > { %402 = vmatprep.subr.bf16.mxu0 %v2258_v10 }
  0x3c   : > { %2074 = vmatpush3.bf16.msra.mxu1 %v2273_v18 }
  0x3d   : > { %2075 = vmatprep.subr.bf16.mxu1 %v2431_v1 }
  0x3e   : > { %403 = vmatpush1.bf16.msra.mxu0 %v2260_v13 }
  0x3f   : > { %404 = vmatprep.subr.bf16.mxu0 %v2261_v14 }
  0x40   : > { %2076 = vmatpush3.bf16.msra.mxu1 %v2274_v27 }
  0x41   : > { %2077 = vmatprep.subr.bf16.mxu1 %v2431_v1 }
  0x42   : > { %405 = vmatpush1.bf16.msra.mxu0 %v2263_v15 }
  0x43   : > { %406 = vmatprep.subr.bf16.mxu0 %v2264_v17 }
  0x44   : > { %2078 = vmatpush3.bf16.msra.mxu1 %v2275_v30 }
  0x45   : > { %2079 = vmatprep.subr.bf16.mxu1 %v2431_v1 }
  0x46   : > { %407 = vmatpush1.bf16.msra.mxu0 %v2266_v19 }
  0x47   : > { %408 = vmatprep.subr.bf16.mxu0 %v2267_v24 }
  0x48   : > { %2080 = vmatpush3.bf16.msra.mxu1 %v2276_v31 }
  0x49   : > { %2081 = vmatprep.subr.bf16.mxu1 %v2431_v1 }
  0x4a   : > { %409 = vmatpush1.bf16.msra.mxu0 %v2269_v28 }
  0x4b   : > { %2111 = vmatprep.subr.bf16.mxu0 %v2431_v1 }
  0x4c   : > { %2082 = vmatpush3.bf16.msra.mxu1 %v2277_v32 }
  0x4d   : > { %427 = vmatmul.mubr.bf16.vlgmr.msra.gmra.mxu0 %v1911_v29  ;;  %2087 = vmatprep.subr.bf16.mxu1 %v2431_v1 }
  0x4e   : > { %2113 = vmatprep.mubr.msk.bf16.mxu0 %vm2432_vm0, %v2431_v1 }
  0x4f   : > { %2084 = vmatmul.mubr.bf16.vlgmr.msra.gmra.mxu1 %v1931_v33 }
  0x50   : > { %2089 = vmatprep.mubr.msk.bf16.mxu1 %vm2432_vm0, %v2431_v1 }
 0x10d   : > { %v428_v34 = vpop.f32.mrf.mxu0 }
 0x10e   : > { %v441_v44 = vadd.f32 %v1928_v41, %v428_v34 }
 0x10f   : > { %v430_v35 = vpop.f32.mrf.mxu0  ;;  %v559_v50 = vpop.f32.mrf.mxu1 }
 0x110   : > { %v449_v39 = vadd.f32 %v1929_v36, %v430_v35  ;;  %v443_v47 = vmul.f32 0.25, %v441_v44  ;;  %v560_v52 = vadd.f32 %v1930_v49, %v559_v50 }
 0x111   : > { %v432_v37 = vpop.f32.mrf.mxu0  ;;  %v2085_v51 = vpop.f32.mrf.mxu1 }
 0x112   : > { %v442_v42 = vadd.f32 %v1928_v41, %v432_v37 }
 0x113   : > { %v434_v38 = vpop.f32.mrf.mxu0  ;;  %v562_v53 = vpop.f32.mrf.mxu1 }
 0x114   : > { %v450_v40 = vadd.f32 %v1929_v36, %v434_v38  ;;  %v444_v46 = vmul.f32 0.25, %v442_v42  ;;  %v563_v54 = vadd.f32 %v1930_v49, %v562_v53 }
 0x115   : > { %v2086_v55 = vpop.f32.mrf.mxu1 }
 0x116   : > { %v567_v43 = vpack.c.bf16 %v450_v40, %v449_v39  ;;  %v566_v48 = vpack.c.bf16 %v444_v46, %v443_v47  ;;  %v2600_v56 = vpack.c.bf16 %v563_v54, %v560_v52 }
 0x118   : > { %v574_v45 = vsel %vm569_vm1, %v567_v43, 0 }
 0x119   : > { %2088 = vmatpush3.bf16.xpose.msra.mxu1 %v574_v45 }
 0x11a   : > { %2093 = vmatprep.subr.bf16.mxu1 %v2431_v1 }
 0x120   : > { %2090 = vmatmul.mubr.msk.bf16.vlgmr.msra.gmra.mxu1 %vm569_vm1, %v566_v48 }
 0x121   : > { %2095 = vmatprep.mubr.msk.bf16.mxu1 %vm2432_vm0, %v2431_v1  ;;  %2094 = vmatpush3.bf16.msra.mxu1 %v2600_v56 }
 0x122   : > { %2099 = vmatprep.subr.bf16.mxu1 %v2431_v1 }
 0x1e0   : > { %v610_v57 = vpop.f32.mrf.mxu1 }
 0x1e1   : > { %v617_v58 = vsel %vm569_vm1, %v610_v57, -inf }
 0x1e2   : > { %618 = vmax.xlane.f32.xlu0 %v617_v58  ;;  %v2091_v59 = vpop.f32.mrf.mxu1 }
 0x1e4   : > { %v613_v60 = vpop.f32.mrf.mxu1 }
 0x1e5   : > { %v620_v61 = vsel %vm569_vm1, %v613_v60, -inf }
 0x1e6   : > { %621 = vmax.xlane.f32.xlu0 %v620_v61  ;;  %v2092_v62 = vpop.f32.mrf.mxu1 }
 0x1fc   : > { %699 = vrot.lane.b32.xlu0 %v567_v43, %s2433_s27 }
 0x200   : > { %972 = vrot.lane.b32.xlu0 %v567_v43, %s2434_s28 }
 0x204   : > { %1108 = vrot.lane.b32.xlu0 %v567_v43, %s2435_s29 }
 0x208   : > { %1244 = vrot.lane.b32.xlu0 %v567_v43, %s2436_s30 }
 0x20c   : > { %1380 = vrot.lane.b32.xlu0 %v567_v43, %s2437_s7 }
 0x210   : > { %1516 = vrot.lane.b32.xlu0 %v567_v43, %s2438_s8 }
 0x26b   : > { %v619_v63 = vpop.xlane.xlu0 %618 }
 0x26c   : > { %v623_v0 = vsub.f32 %v610_v57, %v619_v63 }
 0x26e   : > { %v625_v2 = vmul.f32 1.442695, %v623_v0 }
 0x26f   : > { %v622_v3 = vpop.xlane.xlu0 %621 }
 0x270   : > { %2288 = vpow2.f32 %v625_v2  ;;  %v624_v4 = vsub.f32 %v613_v60, %v622_v3 }
 0x272   : > { %v627_v5 = vmul.f32 1.442695, %v624_v4 }
 0x273   : > { %v700_v13 = vpop.permute.xlu0 %699 }
 0x274   : > { %2290 = vpow2.f32 %v627_v5  ;;  %v705_v24 = vsel %vm569_vm1, %v700_v13, 0 }
 0x277   : > { %v973_v18 = vpop.permute.xlu0 %972 }
 0x278   : > { %v978_v22 = vsel %vm569_vm1, %v973_v18, 0 }
 0x27b   : > { %v1109_v25 = vpop.permute.xlu0 %1108 }
 0x27c   : > { %v1114_v27 = vsel %vm569_vm1, %v1109_v25, 0 }
 0x27d   : > { %v2289_v6 = vpop.eup %2288 }
 0x27e   : > { %v629_v7 = vsel %vm569_vm1, %v2289_v6, 0.0 }
 0x27f   : > { %630 = vadd.xlane.f32.xlu1 %v629_v7  ;;  %v1245_v28 = vpop.permute.xlu0 %1244 }
 0x280   : > { %v1250_v30 = vsel %vm569_vm1, %v1245_v28, 0 }
 0x281   : > { %v2291_v8 = vpop.eup %2290 }
 0x282   : > { %v632_v9 = vsel %vm569_vm1, %v2291_v8, 0.0 }
 0x283   : > { %633 = vadd.xlane.f32.xlu1 %v632_v9  ;;  %v1381_v31 = vpop.permute.xlu0 %1380 }
 0x284   : > { %v1386_v33 = vsel %vm569_vm1, %v1381_v31, 0 }
 0x287   : > { %v1517_v34 = vpop.permute.xlu0 %1516 }
 0x288   : > { %v1522_v36 = vsel %vm569_vm1, %v1517_v34, 0 }
 0x294   : > { %696 = vrot.lane.b32.xlu1 %v566_v48, %s2433_s27 }
 0x298   : > { %836 = vrot.lane.b32.xlu1 %v567_v43, %s2439_s9 }
 0x29c   : > { %834 = vrot.lane.b32.xlu1 %v566_v48, %s2439_s9 }
 0x2a0   : > { %970 = vrot.lane.b32.xlu1 %v566_v48, %s2434_s28 }
 0x2a4   : > { %1106 = vrot.lane.b32.xlu1 %v566_v48, %s2435_s29 }
 0x2a8   : > { %1242 = vrot.lane.b32.xlu1 %v566_v48, %s2436_s30 }
 0x2ac   : > { %1378 = vrot.lane.b32.xlu1 %v566_v48, %s2437_s7 }
 0x2b0   : > { %1514 = vrot.lane.b32.xlu1 %v566_v48, %s2438_s8 }
 0x308   : > { %v631_v10 = vpop.xlane.xlu1 %630 }
 0x309   : > { %2292 = vrcp.f32 %v631_v10 }
 0x30c   : > { %v634_v11 = vpop.xlane.xlu1 %633 }
 0x30d   : > { %2294 = vrcp.f32 %v634_v11 }
 0x310   : > { %v697_v12 = vpop.permute.xlu1 %696 }
 0x314   : > { %v837_v14 = vpop.permute.xlu1 %836 }
 0x315   : > { %v842_v15 = vsel %vm569_vm1, %v837_v14, 0 }
 0x316   : > { %2112 = vmatpush3.bf16.xpose.msra.mxu0 %v842_v15  ;;  %v2293_v16 = vpop.eup %2292 }
 0x317   : > { %2123 = vmatprep.subr.bf16.mxu0 %v2431_v1  ;;  %v637_v19 = vmul.f32 %v2293_v16, %v2289_v6 }
 0x318   : > { %v835_v21 = vpop.permute.xlu1 %834 }
 0x31a   : > { %v2295_v17 = vpop.eup %2294 }
 0x31b   : > { %v638_v20 = vmul.f32 %v2295_v17, %v2291_v8 }
 0x31c   : > { %v971_v26 = vpop.permute.xlu1 %970 }
 0x31d   : > { %2114 = vmatmul.mubr.msk.bf16.vlgmr.msra.gmra.mxu0 %vm569_vm1, %v835_v21  ;;  %v639_v23 = vpack.c.bf16 %v638_v20, %v637_v19 }
 0x31e   : > { %2124 = vmatpush3.bf16.xpose.msra.mxu0 %v978_v22  ;;  %2125 = vmatprep.mubr.msk.bf16.mxu0 %vm2432_vm0, %v2431_v1 }
 0x31f   : > { %2096 = vmatmul.mubr.msk.bf16.vlgmr.msra.gmra.mxu1 %vm569_vm1, %v639_v23  ;;  %2135 = vmatprep.subr.bf16.mxu0 %v2431_v1 }
 0x320   : > { %2100 = vmatpush3.bf16.xpose.msra.mxu1 %v705_v24  ;;  %2101 = vmatprep.mubr.msk.bf16.mxu1 %vm2432_vm0, %v2431_v1  ;;  %v1107_v29 = vpop.permute.xlu1 %1106 }
 0x321   : > { %2105 = vmatprep.subr.bf16.mxu1 %v2431_v1 }
 0x324   : > { %v1243_v32 = vpop.permute.xlu1 %1242 }
 0x325   : > { %2126 = vmatmul.mubr.msk.bf16.vlgmr.msra.gmra.mxu0 %vm569_vm1, %v971_v26 }
 0x326   : > { %2136 = vmatpush3.bf16.xpose.msra.mxu0 %v1114_v27  ;;  %2137 = vmatprep.mubr.msk.bf16.mxu0 %vm2432_vm0, %v2431_v1 }
 0x327   : > { %2102 = vmatmul.mubr.msk.bf16.vlgmr.msra.gmra.mxu1 %vm569_vm1, %v697_v12  ;;  %2147 = vmatprep.subr.bf16.mxu0 %v2431_v1 }
 0x328   : > { %2107 = vmatprep.mubr.msk.bf16.mxu1 %vm2432_vm0, %v2431_v1  ;;  %v1379_v35 = vpop.permute.xlu1 %1378 }
 0x32c   : > { %v1515_v37 = vpop.permute.xlu1 %1514 }
 0x32d   : > { %2138 = vmatmul.mubr.msk.bf16.vlgmr.msra.gmra.mxu0 %vm569_vm1, %v1107_v29 }
 0x32e   : > { %2148 = vmatpush3.bf16.xpose.msra.mxu0 %v1250_v30  ;;  %2149 = vmatprep.mubr.msk.bf16.mxu0 %vm2432_vm0, %v2431_v1 }
 0x32f   : > { %2159 = vmatprep.subr.bf16.mxu0 %v2431_v1 }
 0x335   : > { %2150 = vmatmul.mubr.msk.bf16.vlgmr.msra.gmra.mxu0 %vm569_vm1, %v1243_v32 }
 0x336   : > { %2160 = vmatpush3.bf16.xpose.msra.mxu0 %v1386_v33  ;;  %2161 = vmatprep.mubr.msk.bf16.mxu0 %vm2432_vm0, %v2431_v1 }
 0x337   : > { %2171 = vmatprep.subr.bf16.mxu0 %v2431_v1 }
 0x33d   : > { %2162 = vmatmul.mubr.msk.bf16.vlgmr.msra.gmra.mxu0 %vm569_vm1, %v1379_v35 }
 0x33e   : > { %2172 = vmatpush3.bf16.xpose.msra.mxu0 %v1522_v36  ;;  %2173 = vmatprep.mubr.msk.bf16.mxu0 %vm2432_vm0, %v2431_v1 }
 0x33f   : > { %2183 = vmatprep.subr.bf16.mxu0 %v2431_v1 }
 0x345   : > { %2174 = vmatmul.mubr.msk.bf16.vlgmr.msra.gmra.mxu0 %vm569_vm1, %v1515_v37 }
 0x346   : > { %2199 = vmatprep.mubr.msk.bf16.mxu0 %vm2432_vm0, %v2431_v1 }
 0x3dd   : > { %v2660_v38 = vpop.f32.mrf.mxu0 }
 0x3de   : > { %v885_v57 = vsel %vm569_vm1, %v2660_v38, -inf }
 0x3df   : > { %v677_v39 = vpop.f32.mrf.mxu1  ;;  %v2115_v40 = vpop.f32.mrf.mxu0 }
 0x3e0   : > { %v1990_v41 = vpack.c.bf16 %v677_v39, %v677_v39 }
 0x3e1   : > { %v2097_v42 = vpop.f32.mrf.mxu1  ;;  %v2662_v43 = vpop.f32.mrf.mxu0 }
 0x3e2   : > { %693 = vst.msk [vmem:[#allocation2] sm:$0xf] %vm692_vm2, %v1990_v41  ;;  %v888_v62 = vsel %vm569_vm1, %v2662_v43, -inf }
 0x3e3   : > { %v680_v44 = vpop.f32.mrf.mxu1  ;;  %v2116_v45 = vpop.f32.mrf.mxu0 }
 0x3e4   : > { %v1991_v46 = vpack.c.bf16 %v680_v44, %v680_v44 }
 0x3e5   : > { %v2098_v47 = vpop.f32.mrf.mxu1  ;;  %v2664_v48 = vpop.f32.mrf.mxu0 }
 0x3e6   : > { %694 = vst.msk [vmem:[#allocation2 + $0x4] sm:$0xf] %vm692_vm2, %v1991_v46  ;;  %v1021_v3 = vsel %vm569_vm1, %v2664_v48, -inf }
 0x3e7   : > { %v2666_v49 = vpop.f32.mrf.mxu1  ;;  %v2127_v50 = vpop.f32.mrf.mxu0 }
 0x3e8   : > { %v748_v51 = vsel %vm569_vm1, %v2666_v49, -inf }
 0x3e9   : > { %v1017_v52 = vpop.f32.mrf.mxu0  ;;  %749 = vmax.xlane.f32.xlu0 %v748_v51  ;;  %v2103_v53 = vpop.f32.mrf.mxu1 }
 0x3ea   : > { %v1024_v63 = vsel %vm569_vm1, %v1017_v52, -inf }
 0x3eb   : > { %v2670_v54 = vpop.f32.mrf.mxu1  ;;  %v2128_v55 = vpop.f32.mrf.mxu0 }
 0x3ec   : > { %v751_v58 = vsel %vm569_vm1, %v2670_v54, -inf }
 0x3ed   : > { %v2676_v59 = vpop.f32.mrf.mxu0  ;;  %886 = vmax.xlane.f32.xlu0 %v885_v57  ;;  %752 = vmax.xlane.f32.xlu1 %v751_v58  ;;  %v2104_v60 = vpop.f32.mrf.mxu1 }
 0x3ee   : > { %v1157_v7 = vsel %vm569_vm1, %v2676_v59, -inf }
 0x3ef   : > { %v2139_v61 = vpop.f32.mrf.mxu0 }
 0x3f1   : > { %v1153_v0 = vpop.f32.mrf.mxu0  ;;  %889 = vmax.xlane.f32.xlu0 %v888_v62  ;;  %1025 = vmax.xlane.f32.xlu1 %v1024_v63 }
 0x3f2   : > { %v1160_v4 = vsel %vm569_vm1, %v1153_v0, -inf }
 0x3f3   : > { %v2140_v2 = vpop.f32.mrf.mxu0 }
 0x3f5   : > { %v2684_v5 = vpop.f32.mrf.mxu0  ;;  %1022 = vmax.xlane.f32.xlu0 %v1021_v3  ;;  %1161 = vmax.xlane.f32.xlu1 %v1160_v4 }
 0x3f6   : > { %v1293_v11 = vsel %vm569_vm1, %v2684_v5, -inf }
 0x3f7   : > { %v2151_v6 = vpop.f32.mrf.mxu0 }
 0x3f9   : > { %v1289_v8 = vpop.f32.mrf.mxu0  ;;  %1158 = vmax.xlane.f32.xlu0 %v1157_v7 }
 0x3fa   : > { %v1296_v9 = vsel %vm569_vm1, %v1289_v8, -inf }
 0x3fb   : > { %v2152_v10 = vpop.f32.mrf.mxu0  ;;  %1297 = vmax.xlane.f32.xlu1 %v1296_v9 }
 0x3fd   : > { %v2691_v12 = vpop.f32.mrf.mxu0  ;;  %1294 = vmax.xlane.f32.xlu0 %v1293_v11 }
 0x3fe   : > { %v1429_v14 = vsel %vm569_vm1, %v2691_v12, -inf }
 0x3ff   : > { %v2163_v13 = vpop.f32.mrf.mxu0 }
 0x401   : > { %v2695_v15 = vpop.f32.mrf.mxu0  ;;  %1430 = vmax.xlane.f32.xlu0 %v1429_v14 }
 0x402   : > { %v1432_v16 = vsel %vm569_vm1, %v2695_v15, -inf }
 0x403   : > { %v2164_v17 = vpop.f32.mrf.mxu0  ;;  %1433 = vmax.xlane.f32.xlu1 %v1432_v16 }
 0x405   : > { %v2699_v18 = vpop.f32.mrf.mxu0 }
 0x406   : > { %v1565_v19 = vsel %vm569_vm1, %v2699_v18, -inf }
 0x407   : > { %v2175_v20 = vpop.f32.mrf.mxu0  ;;  %1566 = vmax.xlane.f32.xlu0 %v1565_v19 }
 0x409   : > { %v2703_v21 = vpop.f32.mrf.mxu0 }
 0x40a   : > { %v1568_v22 = vsel %vm569_vm1, %v2703_v21, -inf }
 0x40b   : > { %v2176_v23 = vpop.f32.mrf.mxu0  ;;  %1569 = vmax.xlane.f32.xlu1 %v1568_v22 }
 0x472   : > { %v750_v24 = vpop.xlane.xlu0 %749 }
 0x473   : > { %v754_v40 = vsub.f32 %v2666_v49, %v750_v24 }
 0x475   : > { %v756_v45 = vmul.f32 1.442695, %v754_v40 }
 0x476   : > { %v887_v25 = vpop.xlane.xlu0 %886  ;;  %v753_v26 = vpop.xlane.xlu1 %752 }
 0x477   : > { %v891_v27 = vsub.f32 %v2660_v38, %v887_v25  ;;  %v755_v49 = vsub.f32 %v2670_v54, %v753_v26 }
 0x479   : > { %v893_v28 = vmul.f32 1.442695, %v891_v27  ;;  %v758_v58 = vmul.f32 1.442695, %v755_v49 }
 0x47a   : > { %v890_v29 = vpop.xlane.xlu0 %889  ;;  %v1026_v30 = vpop.xlane.xlu1 %1025 }
 0x47b   : > { %2296 = vpow2.f32 %v893_v28  ;;  %v892_v31 = vsub.f32 %v2662_v43, %v890_v29  ;;  %v1028_v32 = vsub.f32 %v1017_v52, %v1026_v30 }
 0x47d   : > { %v895_v33 = vmul.f32 1.442695, %v892_v31  ;;  %v1031_v34 = vmul.f32 1.442695, %v1028_v32 }
 0x47e   : > { %v1023_v35 = vpop.xlane.xlu0 %1022  ;;  %v1162_v36 = vpop.xlane.xlu1 %1161 }
 0x47f   : > { %2298 = vpow2.f32 %v895_v33  ;;  %v1027_v37 = vsub.f32 %v2664_v48, %v1023_v35  ;;  %v1164_v39 = vsub.f32 %v1153_v0, %v1162_v36 }
 0x480   : > { %2300 = vpow2.f32 %v1031_v34 }
 0x481   : > { %v1029_v41 = vmul.f32 1.442695, %v1027_v37  ;;  %v1167_v38 = vmul.f32 1.442695, %v1164_v39 }
 0x482   : > { %v1159_v42 = vpop.xlane.xlu0 %1158 }
 0x483   : > { %2302 = vpow2.f32 %v1029_v41  ;;  %v1163_v44 = vsub.f32 %v2676_v59, %v1159_v42 }
 0x484   : > { %v1298_v43 = vpop.xlane.xlu1 %1297  ;;  %2304 = vpow2.f32 %v1167_v38 }
 0x485   : > { %v1165_v46 = vmul.f32 1.442695, %v1163_v44  ;;  %v1300_v47 = vsub.f32 %v1289_v8, %v1298_v43 }
 0x486   : > { %v1295_v50 = vpop.xlane.xlu0 %1294 }
 0x487   : > { %2306 = vpow2.f32 %v1165_v46  ;;  %v1299_v51 = vsub.f32 %v2684_v5, %v1295_v50  ;;  %v1303_v52 = vmul.f32 1.442695, %v1300_v47 }
 0x488   : > { %v2713_v48 = vpop.eup %2296  ;;  %2308 = vpow2.f32 %v756_v45 }
 0x489   : > { %v1301_v53 = vmul.f32 1.442695, %v1299_v51  ;;  %v897_v55 = vsel %vm569_vm1, %v2713_v48, 0.0 }
 0x48a   : > { %898 = vadd.xlane.f32.xlu0 %v897_v55  ;;  %v1431_v13 = vpop.xlane.xlu0 %1430 }
 0x48b   : > { %2310 = vpow2.f32 %v1301_v53  ;;  %v1435_v14 = vsub.f32 %v2691_v12, %v1431_v13 }
 0x48c   : > { %v2718_v57 = vpop.eup %2298  ;;  %2312 = vpow2.f32 %v1303_v52  ;;  %v1434_v17 = vpop.xlane.xlu1 %1433 }
 0x48d   : > { %v900_v59 = vsel %vm569_vm1, %v2718_v57, 0.0  ;;  %v2722_v60 = vpop.eup %2300  ;;  %2314 = vpow2.f32 %v758_v58  ;;  %v1437_v16 = vmul.f32 1.442695, %v1435_v14  ;;  %v1436_v19 = vsub.f32 %v2695_v15, %v1434_v17 }
 0x48e   : > { %901 = vadd.xlane.f32.xlu1 %v900_v59  ;;  %v1036_v62 = vsel %vm569_vm1, %v2722_v60, 0.0 }
 0x48f   : > { %2316 = vpow2.f32 %v1437_v16  ;;  %v1439_v22 = vmul.f32 1.442695, %v1436_v19 }
 0x490   : > { %v2724_v61 = vpop.eup %2302  ;;  %v1567_v20 = vpop.xlane.xlu0 %1566 }
 0x491   : > { %v1033_v54 = vsel %vm569_vm1, %v2724_v61, 0.0  ;;  %v2730_v63 = vpop.eup %2304  ;;  %v1571_v23 = vsub.f32 %v2699_v18, %v1567_v20  ;;  %2318 = vpow2.f32 %v1439_v22 }
 0x492   : > { %1034 = vadd.xlane.f32.xlu0 %v1033_v54  ;;  %1037 = vadd.xlane.f32.xlu1 %v1036_v62  ;;  %v1172_v4 = vsel %vm569_vm1, %v2730_v63, 0.0 }
 0x493   : > { %v1573_v25 = vmul.f32 1.442695, %v1571_v23 }
 0x494   : > { %v2732_v0 = vpop.eup %2306  ;;  %v1570_v24 = vpop.xlane.xlu1 %1569 }
 0x495   : > { %v2734_v2 = vpop.eup %2308  ;;  %v1169_v3 = vsel %vm569_vm1, %v2732_v0, 0.0  ;;  %v1572_v26 = vsub.f32 %v2703_v21, %v1570_v24  ;;  %2320 = vpow2.f32 %v1573_v25 }
 0x496   : > { %1170 = vadd.xlane.f32.xlu0 %v1169_v3  ;;  %1173 = vadd.xlane.f32.xlu1 %v1172_v4  ;;  %v760_v6 = vsel %vm569_vm1, %v2734_v2, 0.0 }
 0x497   : > { %v1575_v27 = vmul.f32 1.442695, %v1572_v26 }
 0x498   : > { %v2740_v5 = vpop.eup %2310 }
 0x499   : > { %v1305_v7 = vsel %vm569_vm1, %v2740_v5, 0.0  ;;  %v2746_v8 = vpop.eup %2312  ;;  %2322 = vpow2.f32 %v1575_v27 }
 0x49a   : > { %761 = vadd.xlane.f32.xlu0 %v760_v6  ;;  %1306 = vadd.xlane.f32.xlu1 %v1305_v7  ;;  %v1308_v9 = vsel %vm569_vm1, %v2746_v8, 0.0  ;;  %v2315_v10 = vpop.eup %2314 }
 0x49b   : > { %v763_v11 = vsel %vm569_vm1, %v2315_v10, 0.0 }
 0x49c   : > { %v2759_v28 = vpop.eup %2316 }
 0x49d   : > { %v1441_v12 = vsel %vm569_vm1, %v2759_v28, 0.0 }
 0x49e   : > { %1309 = vadd.xlane.f32.xlu1 %v1308_v9  ;;  %v2763_v29 = vpop.eup %2318 }
 0x49f   : > { %v1444_v15 = vsel %vm569_vm1, %v2763_v29, 0.0 }
 0x4a2   : > { %764 = vadd.xlane.f32.xlu1 %v763_v11  ;;  %v2767_v18 = vpop.eup %2320 }
 0x4a3   : > { %v1577_v21 = vsel %vm569_vm1, %v2767_v18, 0.0 }
 0x4a6   : > { %v2771_v30 = vpop.eup %2322 }
 0x4a7   : > { %v1580_v31 = vsel %vm569_vm1, %v2771_v30, 0.0 }
 0x4b0   : > { %772 = vrot.lane.b32.xlu0 %v2600_v56, %s2433_s27 }
 0x4b3   : > { %908 = vrot.lane.b32.xlu1 %v2600_v56, %s2439_s9 }
 0x4cf   : > { %1442 = vadd.xlane.f32.xlu0 %v1441_v12 }
 0x4d7   : > { %1445 = vadd.xlane.f32.xlu1 %v1444_v15 }
 0x4db   : > { %1578 = vadd.xlane.f32.xlu1 %v1577_v21 }
 0x4df   : > { %1581 = vadd.xlane.f32.xlu1 %v1580_v31 }
 0x4e5   : > { %1044 = vrot.lane.b32.xlu0 %v2600_v56, %s2434_s28 }
 0x4e9   : > { %1316 = vrot.lane.b32.xlu0 %v2600_v56, %s2436_s30 }
 0x4ed   : > { %1452 = vrot.lane.b32.xlu0 %v2600_v56, %s2437_s7 }
 0x4f0   : > { %1180 = vrot.lane.b32.xlu1 %v2600_v56, %s2435_s29 }
 0x4f1   : > { %1588 = vrot.lane.b32.xlu0 %v2600_v56, %s2438_s8 }
 0x513   : > { %v899_v32 = vpop.xlane.xlu0 %898 }
 0x517   : > { %v902_v33 = vpop.xlane.xlu1 %901 }
 0x51b   : > { %v1035_v34 = vpop.xlane.xlu0 %1034  ;;  %v1038_v35 = vpop.xlane.xlu1 %1037 }
 0x51f   : > { %v1171_v36 = vpop.xlane.xlu0 %1170  ;;  %v1174_v37 = vpop.xlane.xlu1 %1173 }
 0x523   : > { %v762_v39 = vpop.xlane.xlu0 %761  ;;  %v1307_v40 = vpop.xlane.xlu1 %1306 }
 0x524   : > { %2324 = vrcp.f32 %v762_v39 }
 0x527   : > { %v773_v41 = vpop.permute.xlu0 %772  ;;  %v1310_v38 = vpop.xlane.xlu1 %1309 }
 0x528   : > { %2106 = vmatpush3.bf16.msra.mxu1 %v773_v41 }
 0x529   : > { %2117 = vmatprep.subr.bf16.mxu1 %v2431_v1 }
 0x52b   : > { %v765_v42 = vpop.xlane.xlu1 %764 }
 0x52c   : > { %2326 = vrcp.f32 %v765_v42 }
 0x52d   : > { %2328 = vrcp.f32 %v902_v33 }
 0x52e   : > { %2330 = vrcp.f32 %v899_v32 }
 0x52f   : > { %v909_v50 = vpop.permute.xlu1 %908  ;;  %2332 = vrcp.f32 %v1035_v34 }
 0x530   : > { %2334 = vrcp.f32 %v1038_v35 }
 0x531   : > { %v2325_v44 = vpop.eup %2324  ;;  %2336 = vrcp.f32 %v1171_v36 }
 0x532   : > { %v768_v45 = vmul.f32 %v2325_v44, %v2734_v2  ;;  %2338 = vrcp.f32 %v1174_v37  ;;  %v2279_v44 = vld [vmem:[#allocation5 + $0x38] sm:$0xff]  }
 0x533   : > { %2340 = vrcp.f32 %v1310_v38  ;;  %2184 = vmatpush3.bf16.msra.mxu0 %v2279_v44 }
 0x534   : > { %2342 = vrcp.f32 %v1307_v40  ;;  %2185 = vmatprep.subr.bf16.mxu0 %v2431_v1 }
 0x539   : > { %v2327_v56 = vpop.eup %2326 }
 0x53a   : > { %v769_v43 = vmul.f32 %v2327_v56, %v2315_v10  ;;  %v2329_v47 = vpop.eup %2328  ;;  %v2280_v56 = vld [vmem:[#allocation5 + $0x30] sm:$0xff]  }
 0x53b   : > { %v2331_v51 = vpop.eup %2330  ;;  %v906_v49 = vmul.f32 %v2329_v47, %v2718_v57  ;;  %2186 = vmatpush3.bf16.msra.mxu0 %v2280_v56  ;;  %v2281_v47 = vld [vmem:[#allocation5 + $0x28] sm:$0xff]  }
 0x53c   : > { %v770_v46 = vpack.c.bf16 %v769_v43, %v768_v45  ;;  %v905_v52 = vmul.f32 %v2331_v51, %v2713_v48  ;;  %v2333_v55 = vpop.eup %2332  ;;  %2187 = vmatprep.subr.bf16.mxu0 %v2431_v1 }
 0x53d   : > { %v2335_v58 = vpop.eup %2334  ;;  %v1041_v54 = vmul.f32 %v2333_v55, %v2724_v61 }
 0x53e   : > { %2108 = vmatmul.mubr.msk.bf16.vlgmr.msra.gmra.mxu1 %vm569_vm1, %v770_v46  ;;  %v907_v53 = vpack.c.bf16 %v906_v49, %v905_v52  ;;  %v1042_v57 = vmul.f32 %v2335_v58, %v2722_v60  ;;  %v2337_v4 = vpop.eup %2336  ;;  %v2282_v52 = vld [vmem:[#allocation5 + $0x20] sm:$0xff]  }
 0x53f   : > { %2118 = vmatpush3.bf16.msra.mxu1 %v909_v50  ;;  %2119 = vmatprep.mubr.msk.bf16.mxu1 %vm2432_vm0, %v2431_v1  ;;  %v2339_v6 = vpop.eup %2338  ;;  %v1177_v60 = vmul.f32 %v2337_v4, %v2732_v0 }
 0x540   : > { %2129 = vmatprep.subr.bf16.mxu1 %v2431_v1  ;;  %v1043_v48 = vpack.c.bf16 %v1042_v57, %v1041_v54  ;;  %v1178_v61 = vmul.f32 %v2339_v6, %v2730_v63  ;;  %v2341_v11 = vpop.eup %2340  ;;  %2188 = vmatpush3.bf16.msra.mxu0 %v2281_v47  ;;  %v2285_v6 = vld [vmem:[#allocation5 + $0x8] sm:$0xff]  }
 0x541   : > { %v2343_v14 = vpop.eup %2342  ;;  %v1314_v63 = vmul.f32 %v2341_v11, %v2746_v8  ;;  %2189 = vmatprep.subr.bf16.mxu0 %v2431_v1 }
 0x542   : > { %v1179_v10 = vpack.c.bf16 %v1178_v61, %v1177_v60  ;;  %v1313_v0 = vmul.f32 %v2343_v14, %v2740_v5  ;;  %v2286_v60 = vld [vmem:[#allocation5] sm:$0xff]  }
 0x544   : > { %v1315_v16 = vpack.c.bf16 %v1314_v63, %v1313_v0  ;;  %2190 = vmatpush3.bf16.msra.mxu0 %v2282_v52 }
 0x545   : > { %2191 = vmatprep.subr.bf16.mxu0 %v2431_v1 }
 0x546   : > { %2120 = vmatmul.mubr.msk.bf16.vlgmr.msra.gmra.mxu1 %vm569_vm1, %v907_v53 }
 0x547   : > { %2131 = vmatprep.mubr.msk.bf16.mxu1 %vm2432_vm0, %v2431_v1 }
 0x558   : > { %v1443_v59 = vpop.xlane.xlu0 %1442 }
 0x55c   : > { %v1045_v62 = vpop.permute.xlu0 %1044 }
 0x55d   : > { %2130 = vmatpush3.bf16.msra.mxu1 %v1045_v62 }
 0x55e   : > { %2141 = vmatprep.subr.bf16.mxu1 %v2431_v1 }
 0x560   : > { %2132 = vmatmul.mubr.msk.bf16.vlgmr.msra.gmra.mxu1 %vm569_vm1, %v1043_v48  ;;  %v1446_v2 = vpop.xlane.xlu1 %1445  ;;  %v1317_v13 = vpop.permute.xlu0 %1316  ;;  %v2284_v48 = vld [vmem:[#allocation5 + $0x10] sm:$0xff]  }
 0x561   : > { %2143 = vmatprep.mubr.msk.bf16.mxu1 %vm2432_vm0, %v2431_v1  ;;  %2344 = vrcp.f32 %v1446_v2 }
 0x562   : > { %2346 = vrcp.f32 %v1443_v59  ;;  %v2283_v59 = vld [vmem:[#allocation5 + $0x18] sm:$0xff]  }
 0x563   : > { %2192 = vmatpush3.bf16.msra.mxu0 %v2283_v59 }
 0x564   : > { %v1579_v3 = vpop.xlane.xlu1 %1578  ;;  %v1453_v19 = vpop.permute.xlu0 %1452  ;;  %2193 = vmatprep.subr.bf16.mxu0 %v2431_v1 }
 0x567   : > { %2194 = vmatpush3.bf16.msra.mxu0 %v2284_v48 }
 0x568   : > { %v1582_v7 = vpop.xlane.xlu1 %1581  ;;  %v1589_v25 = vpop.permute.xlu0 %1588  ;;  %2195 = vmatprep.subr.bf16.mxu0 %v2431_v1 }
 0x569   : > { %2348 = vrcp.f32 %v1582_v7 }
 0x56a   : > { %2350 = vrcp.f32 %v1579_v3 }
 0x56b   : > { %2196 = vmatpush3.bf16.msra.mxu0 %v2285_v6 }
 0x56c   : > { %v1181_v9 = vpop.permute.xlu1 %1180  ;;  %2197 = vmatprep.subr.bf16.mxu0 %v2431_v1 }
 0x56d   : > { %2142 = vmatpush3.bf16.msra.mxu1 %v1181_v9 }
 0x56e   : > { %2153 = vmatprep.subr.bf16.mxu1 %v2431_v1  ;;  %v2345_v17 = vpop.eup %2344 }
 0x56f   : > { %v2347_v20 = vpop.eup %2346  ;;  %v1450_v22 = vmul.f32 %v2345_v17, %v2763_v29  ;;  %2198 = vmatpush3.bf16.msra.mxu0 %v2286_v60 }
 0x570   : > { %2144 = vmatmul.mubr.msk.bf16.vlgmr.msra.gmra.mxu1 %vm569_vm1, %v1179_v10  ;;  %v1449_v23 = vmul.f32 %v2347_v20, %v2759_v28 }
 0x571   : > { %2154 = vmatpush3.bf16.msra.mxu1 %v1317_v13  ;;  %2155 = vmatprep.mubr.msk.bf16.mxu1 %vm2432_vm0, %v2431_v1 }
 0x572   : > { %2165 = vmatprep.subr.bf16.mxu1 %v2431_v1  ;;  %v1451_v8 = vpack.c.bf16 %v1450_v22, %v1449_v23 }
 0x576   : > { %v2349_v24 = vpop.eup %2348 }
 0x577   : > { %v2351_v5 = vpop.eup %2350  ;;  %v1586_v26 = vmul.f32 %v2349_v24, %v2771_v30 }
 0x578   : > { %2156 = vmatmul.mubr.msk.bf16.vlgmr.msra.gmra.mxu1 %vm569_vm1, %v1315_v16  ;;  %v1585_v27 = vmul.f32 %v2351_v5, %v2767_v18 }
 0x579   : > { %2166 = vmatpush3.bf16.msra.mxu1 %v1453_v19  ;;  %2167 = vmatprep.mubr.msk.bf16.mxu1 %vm2432_vm0, %v2431_v1 }
 0x57a   : > { %2177 = vmatprep.subr.bf16.mxu1 %v2431_v1  ;;  %v1587_v12 = vpack.c.bf16 %v1586_v26, %v1585_v27 }
 0x580   : > { %2168 = vmatmul.mubr.msk.bf16.vlgmr.msra.gmra.mxu1 %vm569_vm1, %v1451_v8 }
 0x581   : > { %2178 = vmatpush3.bf16.msra.mxu1 %v1589_v25  ;;  %2179 = vmatprep.mubr.msk.bf16.mxu1 %vm2432_vm0, %v2431_v1 }
 0x588   : > { %2180 = vmatmul.mubr.msk.bf16.vlgmr.msra.gmra.mxu1 %vm569_vm1, %v1587_v12 }
 0x5fe   : > { %v812_v29 = vpop.f32.mrf.mxu1 }
 0x5ff   : > { %v1992_v15 = vpack.c.bf16 %v812_v29, %v812_v29 }
 0x600   : > { %v2109_v28 = vpop.f32.mrf.mxu1 }
 0x601   : > { %825 = vrot.lane.b32.xlu1 %v1992_v15, %s2438_s8  ;;  %v2009_v15 = vld [vmem:[%s2544_s23] sm:$0xff]  }
 0x602   : > { %v815_v21 = vpop.f32.mrf.mxu1  ;;  %v1972_v28 = vld [vmem:[%s2867_s5 + $0x3] ss:$0 sm:$0xff] }
 0x603   : > { %v1993_v31 = vpack.c.bf16 %v815_v21, %v815_v21  ;;  %v2010_v21 = vunpack.c.l.bf16 %v2009_v15 }
 0x604   : > { %v2110_v32 = vpop.f32.mrf.mxu1 }
 0x605   : > { %827 = vrot.lane.b32.xlu0 %v1993_v31, %s2438_s8 }
 0x606   : > { %v948_v33 = vpop.f32.mrf.mxu1 }
 0x607   : > { %v1994_v34 = vpack.c.bf16 %v948_v33, %v948_v33 }
 0x608   : > { %v2121_v35 = vpop.f32.mrf.mxu1 }
 0x609   : > { %961 = vrot.lane.b32.xlu1 %v1994_v34, %s2437_s7  ;;  %v2011_v35 = vunpack.c.h.bf16 %v2009_v15 }
 0x60a   : > { %v951_v30 = vpop.f32.mrf.mxu1 }
 0x60b   : > { %v1995_v18 = vpack.c.bf16 %v951_v30, %v951_v30 }
 0x60c   : > { %v2122_v36 = vpop.f32.mrf.mxu1 }
 0x60d   : > { %963 = vrot.lane.b32.xlu0 %v1995_v18, %s2437_s7 }
 0x620   : > { %v1084_v37 = vpop.f32.mrf.mxu1 }
 0x621   : > { %v1996_v39 = vpack.c.bf16 %v1084_v37, %v1084_v37 }
 0x622   : > { %v2133_v40 = vpop.f32.mrf.mxu1 }
 0x623   : > { %1097 = vrot.lane.b32.xlu1 %v1996_v39, %s2436_s30 }
 0x624   : > { %v1087_v41 = vpop.f32.mrf.mxu1 }
 0x625   : > { %v1997_v38 = vpack.c.bf16 %v1087_v41, %v1087_v41 }
 0x626   : > { %v2134_v42 = vpop.f32.mrf.mxu1 }
 0x627   : > { %1099 = vrot.lane.b32.xlu0 %v1997_v38, %s2436_s30 }
 0x630   : > { %v1220_v45 = vpop.f32.mrf.mxu1 }
 0x631   : > { %v1998_v43 = vpack.c.bf16 %v1220_v45, %v1220_v45 }
 0x632   : > { %v2145_v46 = vpop.f32.mrf.mxu1 }
 0x633   : > { %1233 = vrot.lane.b32.xlu1 %v1998_v43, %s2435_s29 }
 0x634   : > { %v1223_v50 = vpop.f32.mrf.mxu1 }
 0x635   : > { %v1999_v51 = vpack.c.bf16 %v1223_v50, %v1223_v50 }
 0x636   : > { %v2146_v49 = vpop.f32.mrf.mxu1 }
 0x637   : > { %1235 = vrot.lane.b32.xlu0 %v1999_v51, %s2435_s29 }
 0x638   : > { %v1356_v53 = vpop.f32.mrf.mxu1 }
 0x639   : > { %v2000_v55 = vpack.c.bf16 %v1356_v53, %v1356_v53 }
 0x63a   : > { %v2157_v58 = vpop.f32.mrf.mxu1 }
 0x63b   : > { %1369 = vrot.lane.b32.xlu1 %v2000_v55, %s2434_s28  ;;  %v1982_v55 = vld [vmem:[%s2867_s5 + $0x4] ss:$0 sm:$0xff] }
 0x63c   : > { %v1359_v54 = vpop.f32.mrf.mxu1 }
 0x63d   : > { %v2001_v57 = vpack.c.bf16 %v1359_v54, %v1359_v54 }
 0x63e   : > { %v2158_v62 = vpop.f32.mrf.mxu1 }
 0x63f   : > { %1371 = vrot.lane.b32.xlu0 %v2001_v57, %s2434_s28  ;;  %v1983_v57 = vld [vmem:[%s2867_s5 + $0x5] ss:$0 sm:$0xff] }
 0x640   : > { %v1492_v2 = vpop.f32.mrf.mxu1 }
 0x641   : > { %v2002_v3 = vpack.c.bf16 %v1492_v2, %v1492_v2 }
 0x642   : > { %v2169_v4 = vpop.f32.mrf.mxu1 }
 0x643   : > { %1505 = vrot.lane.b32.xlu1 %v2002_v3, %s2439_s9 }
 0x644   : > { %v1495_v7 = vpop.f32.mrf.mxu1 }
 0x645   : > { %v2003_v61 = vpack.c.bf16 %v1495_v7, %v1495_v7 }
 0x646   : > { %v2170_v9 = vpop.f32.mrf.mxu1 }
 0x647   : > { %1507 = vrot.lane.b32.xlu0 %v2003_v61, %s2439_s9 }
 0x648   : > { %v1628_v10 = vpop.f32.mrf.mxu1 }
 0x649   : > { %v2004_v11 = vpack.c.bf16 %v1628_v10, %v1628_v10 }
 0x64a   : > { %v2181_v13 = vpop.f32.mrf.mxu1 }
 0x64b   : > { %1641 = vrot.lane.b32.xlu1 %v2004_v11, %s2433_s27 }
 0x64c   : > { %v1631_v14 = vpop.f32.mrf.mxu1 }
 0x64d   : > { %v2005_v63 = vpack.c.bf16 %v1631_v14, %v1631_v14 }
 0x64e   : > { %v2182_v0 = vpop.f32.mrf.mxu1 }
 0x64f   : > { %1643 = vrot.lane.b32.xlu0 %v2005_v63, %s2433_s27 }
 0x673   : > { %v826_v16 = vpop.permute.xlu1 %825 }
 0x674   : > { %832 = vst.msk [vmem:[#allocation2] sm:$0xf] %vm831_vm3, %v826_v16 }
 0x677   : > { %v828_v17 = vpop.permute.xlu0 %827 }
 0x678   : > { %833 = vst.msk [vmem:[#allocation2 + $0x4] sm:$0xf] %vm831_vm3, %v828_v17 }
 0x67b   : > { %v962_v1 = vpop.permute.xlu1 %961 }
 0x67c   : > { %968 = vst.msk [vmem:[#allocation2] sm:$0xf] %vm967_vm4, %v962_v1 }
 0x67f   : > { %v964_v19 = vpop.permute.xlu0 %963 }
 0x680   : > { %969 = vst.msk [vmem:[#allocation2 + $0x4] sm:$0xf] %vm967_vm4, %v964_v19 }
 0x695   : > { %v1098_v20 = vpop.permute.xlu1 %1097 }
 0x696   : > { %1104 = vst.msk [vmem:[#allocation2] sm:$0xf] %vm1103_vm5, %v1098_v20 }
 0x699   : > { %v1100_v22 = vpop.permute.xlu0 %1099 }
 0x69a   : > { %1105 = vst.msk [vmem:[#allocation2 + $0x4] sm:$0xf] %vm1103_vm5, %v1100_v22 }
 0x6a5   : > { %v1234_v23 = vpop.permute.xlu1 %1233 }
 0x6a6   : > { %1240 = vst.msk [vmem:[#allocation2] sm:$0xf] %vm1239_vm6, %v1234_v23 }
 0x6a9   : > { %v1236_v8 = vpop.permute.xlu0 %1235 }
 0x6aa   : > { %1241 = vst.msk [vmem:[#allocation2 + $0x4] sm:$0xf] %vm1239_vm6, %v1236_v8 }
 0x6ad   : > { %v1370_v24 = vpop.permute.xlu1 %1369 }
 0x6ae   : > { %1376 = vst.msk [vmem:[#allocation2] sm:$0xf] %vm1375_vm7, %v1370_v24 }
 0x6b1   : > { %v1372_v25 = vpop.permute.xlu0 %1371 }
 0x6b2   : > { %1377 = vst.msk [vmem:[#allocation2 + $0x4] sm:$0xf] %vm1375_vm7, %v1372_v25 }
 0x6b5   : > { %v1506_v5 = vpop.permute.xlu1 %1505 }
 0x6b6   : > { %1512 = vst.msk [vmem:[#allocation2] sm:$0xf] %vm1511_vm8, %v1506_v5 }
 0x6b9   : > { %v1508_v26 = vpop.permute.xlu0 %1507 }
 0x6ba   : > { %1513 = vst.msk [vmem:[#allocation2 + $0x4] sm:$0xf] %vm1511_vm8, %v1508_v26 }
 0x6bd   : > { %v1642_v27 = vpop.permute.xlu1 %1641 }
 0x6be   : > { %1648 = vst.msk [vmem:[#allocation2] sm:$0xf] %vm1647_vm9, %v1642_v27 }
 0x6c1   : > { %v1644_v12 = vpop.permute.xlu0 %1643 }
 0x6c2   : > { %1649 = vst.msk [vmem:[#allocation2 + $0x4] sm:$0xf] %vm1647_vm9, %v1644_v12 }
 0x6c9   : > { %v2287_v29 = vld [vmem:[#allocation2] sm:$0xff]  }
 0x6ca   : > { %2200 = vmatmul.mubr.bf16.vlgmr.msra.gmra.mxu0 %v2287_v29 }
 0x78a   : > { %v1761_v31 = vpop.f32.mrf.mxu0 }
 0x78b   : > { %v1762_v32 = vadd.f32 %v1972_v28, %v1761_v31 }
 0x78c   : > { %v2201_v33 = vpop.f32.mrf.mxu0 }
 0x78d   : > { %v1772_v34 = vadd.f32 %v2010_v21, %v1762_v32 }
 0x78e   : > { %v1764_v30 = vpop.f32.mrf.mxu0 }
 0x78f   : > { %v1765_v18 = vadd.f32 %v1972_v28, %v1764_v30  ;;  %1774 = vadd.xlane.f32.xlu1 %v1772_v34 }
 0x790   : > { %v2202_v36 = vpop.f32.mrf.mxu0 }
 0x791   : > { %v1773_v37 = vadd.f32 %v2011_v35, %v1765_v18 }
 0x793   : > { %1776 = vadd.xlane.f32.xlu0 %v1773_v37 }
 0x818   : > { %v1775_v39 = vpop.xlane.xlu1 %1774 }
 0x819   : > { %v1779_v40 = vmul.f32 0.0078125, %v1775_v39 }
 0x81b   : > { %v1781_v41 = vsub.f32 %v1772_v34, %v1779_v40 }
 0x81c   : > { %v1777_v38 = vpop.xlane.xlu0 %1776 }
 0x81d   : > { %v1780_v42 = vmul.f32 0.0078125, %v1777_v38  ;;  %v1783_v44 = vmul.f32 %v1781_v41, %v1781_v41 }
 0x81f   : > { %v1782_v56 = vsub.f32 %v1773_v37, %v1780_v42  ;;  %1785 = vadd.xlane.f32.xlu0 %v1783_v44 }
 0x821   : > { %v1784_v45 = vmul.f32 %v1782_v56, %v1782_v56 }
 0x823   : > { %1787 = vadd.xlane.f32.xlu0 %v1784_v45 }
 0x8a8   : > { %v1786_v43 = vpop.xlane.xlu0 %1785 }
 0x8a9   : > { %v1789_v46 = vmul.f32 0.0078125, %v1786_v43 }
 0x8ab   : > { %v1791_v47 = vadd.f32 1e-05, %v1789_v46 }
 0x8ac   : > { %v1788_v50 = vpop.xlane.xlu0 %1787 }
 0x8ad   : > { %2352 = vrsqrt.f32 %v1791_v47  ;;  %v1790_v51 = vmul.f32 0.0078125, %v1788_v50 }
 0x8af   : > { %v1792_v49 = vadd.f32 1e-05, %v1790_v51 }
 0x8b1   : > { %2354 = vrsqrt.f32 %v1792_v49 }
 0x8ba   : > { %v2353_v52 = vpop.eup %2352 }
 0x8bb   : > { %v1795_v53 = vmul.f32 %v2353_v52, %v1781_v41 }
 0x8bd   : > { %v1802_v59 = vmul.f32 %v1982_v55, %v1795_v53 }
 0x8be   : > { %v2355_v58 = vpop.eup %2354 }
 0x8bf   : > { %v1796_v54 = vmul.f32 %v2355_v58, %v1782_v56  ;;  %v1809_v48 = vadd.f32 %v1983_v57, %v1802_v59 }
 0x8c1   : > { %v1803_v62 = vmul.f32 %v1982_v55, %v1796_v54 }
 0x8c3   : > { %v1810_v2 = vadd.f32 %v1983_v57, %v1803_v62 }
 0x8c5   : > { %v2015_v3 = vpack.c.bf16 %v1810_v2, %v1809_v48 }
 0x8c7   : > { %2016 = vst [vmem:[%s281_s18] sm:$0xff] %v2015_v3  }
 0x8c8 PF: > { %s18_s21 = sadd.s32 1, %s2422_s21  }
 0x8c9   : > { %p15_p3 = scmp.ge.s32.totalorder %s18_s21, 4  }
 0x8cb   :  { %17 = sbr.rel (!%p15_p3) target bundleno = 2 (0x2), region = 83 }
 0x8d0   :  { %1842 = vsyncpa [#allocation4], 1 }
 0x8d1   :  { %1844 = vsyncpa [#allocation4 + $0x1], 1 }
 0x8d2   :  { %1845 = vsyncpa [#allocation6], 1 }

// kernel: transformer_forward.15
= control target key start
LH: loop header
LB: loop body
LE: loop exit
PB: predicated region body
PF: predicated region fallthrough
CT: control target
= control target key end

     0   :  { %s3113_s30 = smov 0   ;;  %s3764_s0 = inlined_call_operand.vmem [shape: bf16[2,16,128], index: 0, kind: input, shape index: {}]   ;;  %s3765_s1 = inlined_call_operand.vmem [shape: bf16[1,16,128], index: 1, kind: input, shape index: {}]   ;;  %s3766_s2 = inlined_call_operand.vmem [shape: bf16[2,64,128], index: 2, kind: input, shape index: {}]   ;;  %s3767_s3 = inlined_call_operand.vmem [shape: bf16[2,64,128], index: 3, kind: input, shape index: {}]   ;;  %s3768_s4 = inlined_call_operand.vmem [shape: f32[2,1,64], index: 4, kind: input, shape index: {}]   ;;  %s3769_s5 = inlined_call_operand.vmem [shape: bf16[128,256], index: 5, kind: input, shape index: {}]   ;;  %s3770_s6 = inlined_call_operand.vmem [shape: bf16[128,128], index: 6, kind: input, shape index: {}]   ;;  %s3771_s7 = inlined_call_operand.vmem [shape: bf16[128,128], index: 7, kind: input, shape index: {}]   ;;  %s3772_s8 = inlined_call_operand.vmem [shape: f32[8,128], index: 8, kind: input, shape index: {}]   ;;  %s3773_s9 = inlined_call_operand.vmem [shape: bf16[2,16,128], index: 9, kind: output, shape index: {}]  }
   0x1 LB: > { %s2392_s10 = sadd.s32 4294967295, %s3052_s30   ;;  %p2396_p0 = scmp.ge.s32.totalorder %s3052_s30, 1  ;;  %s3052_s30 = sphi %s3113_s30, %s19_s30  }
   0x2   : > { %p315_p1 = scmp.lt.s32.totalorder %s3052_s30, 3 }
   0x4   : > { %p316_p2 = pnand %p2396_p0, %p315_p1 }
   0x5   : > { %p364_p3 = scmp.lt.s32.totalorder (!%p316_p2), %s2392_s10, 1  ;;  %s3056_s27 = smov (!%p316_p2), 112  }
   0x6   : > { %319 = sbr.rel (%p316_p2) target bundleno = 5445 (0x1545), region = 56  ;;  %s3057_s14 = smov (!%p316_p2), 96  }
   0x7   : > { %s3058_s15 = smov (!%p316_p2), 80   ;;  %s3059_s16 = smov (!%p316_p2), 64  }
   0x8   : > { %s3060_s17 = smov (!%p316_p2), 48   ;;  %s3061_s18 = smov (!%p316_p2), 32  }
   0x9   : > { %s3062_s19 = smov (!%p316_p2), 16  }
   0xb   : > { %v2940_v0 = vld [vmem:[%s3769_s5 + $0x74] ss:$8 sps:$4 sm:$0xff]   ;;  %v2941_v1 = vld [vmem:[%s3769_s5 + $0x64] ss:$8 sps:$4 sm:$0xff]   ;;  %v3054_v4 = vmov 0.0   ;;  %s3775_s10 = smov (!%p364_p3, %s2392_s10), 1 }
   0xc   : > { %2663 = vmatprep.subr.bf16.mxu1 %v2940_v0  ;;  %v2942_v2 = vld [vmem:[%s3769_s5 + $0x54] ss:$8 sps:$4 sm:$0xff]   ;;  %v2943_v3 = vld [vmem:[%s3769_s5 + $0x44] ss:$8 sps:$4 sm:$0xff]   ;;  %2643 = vmatprep.subr.bf16.mxu0 %v3054_v4  ;;  %v2948_v5 = vld [vmem:[%s3769_s5 + $0x70] ss:$8 sps:$4 sm:$0xff]   ;;  %s3322_s26 = scalar_lea.vmem %s3768_s4, %s3775_s10 }
   0xd   : > { %2664 = vmatpush3.bf16.msra.mxu1 %v2940_v0  ;;  %2644 = vmatpush3.bf16.msra.mxu0 %v2948_v5  ;;  %v2949_v6 = vld [vmem:[%s3769_s5 + $0x60] ss:$8 sps:$4 sm:$0xff]   ;;  %v2944_v7 = vld [vmem:[%s3769_s5 + $0x34] ss:$8 sps:$4 sm:$0xff]   ;;  %s2491_s25 = sshll.u32 %s3775_s10, 5  ;;  %vm3055_vm0 = vmmov 0  }
   0xe   : > { %2665 = vmatprep.subr.bf16.mxu1 %v2941_v1  ;;  %2645 = vmatprep.subr.bf16.mxu0 %v3054_v4  ;;  %s3150_s28 = scalar_lea.vmem %s3766_s2, %s2491_s25  ;;  %s3155_s12 = scalar_lea.vmem %s3767_s3, %s2491_s25  ;;  %v2950_v13 = vld [vmem:[%s3769_s5 + $0x50] ss:$8 sps:$4 sm:$0xff]   ;;  %v2945_v14 = vld [vmem:[%s3769_s5 + $0x24] ss:$8 sps:$4 sm:$0xff]   ;;  %v2951_v17 = vld [vmem:[%s3769_s5 + $0x40] ss:$8 sps:$4 sm:$0xff]  }
   0xf   : > { %2659 = vmatprep.mubr.msk.bf16.mxu0 %vm3055_vm0, %v3054_v4  ;;  %v3160_v8 = vld [vmem:[%s3150_s28] sm:$0xf]  ;;  %v3163_v9 = vld [vmem:[%s3150_s28 + $0x4] sm:$0xf]  ;;  %v2946_v18 = vld [vmem:[%s3769_s5 + $0x14] ss:$8 sps:$4 sm:$0xff]  }
  0x10   : > { %v405_v10 = vld [vmem:[%s3155_s12] sm:$0xf]  ;;  %v406_v11 = vld [vmem:[%s3155_s12 + $0x4] sm:$0xf]  ;;  %v3183_v19 = vld [vmem:[%s3150_s28 + $0x8] sm:$0xf] }
  0x11   : > { %2666 = vmatpush3.bf16.msra.mxu1 %v2941_v1  ;;  %v413_v12 = vadd.bf16 %v405_v10, %v3160_v8  ;;  %2646 = vmatpush3.bf16.msra.mxu0 %v2949_v6  ;;  %v414_v15 = vadd.bf16 %v406_v11, %v3163_v9  ;;  %v3186_v20 = vld [vmem:[%s3150_s28 + $0xc] sm:$0xf]  ;;  %v407_v21 = vld [vmem:[%s3155_s12 + $0x8] sm:$0xf]  ;;  %v3195_v24 = vld [vmem:[%s3150_s28 + $0x10] sm:$0xf] }
  0x12   : > { %2667 = vmatprep.subr.bf16.mxu1 %v2942_v2  ;;  %2647 = vmatprep.subr.bf16.mxu0 %v3054_v4  ;;  %v408_v22 = vld [vmem:[%s3155_s12 + $0xc] sm:$0xf]  ;;  %v3198_v25 = vld [vmem:[%s3150_s28 + $0x14] sm:$0xf]  ;;  %v2952_v26 = vld [vmem:[%s3769_s5 + $0x30] ss:$8 sps:$4 sm:$0xff]   ;;  %v415_v30 = vadd.bf16 %v407_v21, %v3183_v19 }
  0x13   : > { %v2416_v16 = vcombine.low %v413_v12, %v414_v15  ;;  %v2947_v23 = vld [vmem:[%s3769_s5 + $0x4] ss:$8 sps:$4 sm:$0xff]   ;;  %s2490_s25 = sshll.u32 %s3775_s10, 3  ;;  %v409_v27 = vld [vmem:[%s3155_s12 + $0x10] sm:$0xf]  ;;  %v416_v31 = vadd.bf16 %v408_v22, %v3186_v20  ;;  %vm868_vm1 = vcmask 130048  }
  0x14   : > { %v410_v28 = vld [vmem:[%s3155_s12 + $0x14] sm:$0xf]  ;;  %v2953_v29 = vld [vmem:[%s3769_s5 + $0x20] ss:$8 sps:$4 sm:$0xff]   ;;  %s3217_s13 = scalar_lea.vmem %s3764_s0, %s2490_s25  ;;  %v417_v32 = vadd.bf16 %v409_v27, %v3195_v24  ;;  %v3223_v34 = vld [vmem:[%s3150_s28 + $0x18] sm:$0xf]  ;;  %s386_s24 = scalar_lea.vmem %s3773_s9, %s2490_s25 }
  0x15   : > { %2668 = vmatpush3.bf16.msra.mxu1 %v2942_v2  ;;  %2648 = vmatpush3.bf16.msra.mxu0 %v2950_v13  ;;  %v418_v33 = vadd.bf16 %v410_v28, %v3198_v25  ;;  %v3226_v35 = vld [vmem:[%s3150_s28 + $0x1c] sm:$0xf]  ;;  %v411_v36 = vld [vmem:[%s3155_s12 + $0x18] sm:$0xf]  ;;  %v391_v39 = vld [vmem:[%s3217_s13] sm:$0xf]  ;;  %v2417_v43 = vcombine.low %v415_v30, %v416_v31 }
  0x16   : > { %2669 = vmatprep.subr.bf16.mxu1 %v2943_v3  ;;  %2679 = vmatprep.mubr.bf16.mxu1 %v2416_v16  ;;  %v412_v37 = vld [vmem:[%s3155_s12 + $0x1c] sm:$0xf]  ;;  %v2954_v38 = vld [vmem:[%s3769_s5 + $0x10] ss:$8 sps:$4 sm:$0xff]   ;;  %v392_v40 = vld [vmem:[%s3217_s13 + $0x4] sm:$0xf]  ;;  %v419_v45 = vadd.bf16 %v411_v36, %v3223_v34 }
  0x17   : > { %2649 = vmatprep.subr.bf16.mxu0 %v3054_v4  ;;  %v393_v41 = vld [vmem:[%s3765_s1] sm:$0xf]  ;;  %v394_v42 = vld [vmem:[%s3765_s1 + $0x4] sm:$0xf]  ;;  %v2418_v44 = vcombine.low %v417_v32, %v418_v33  ;;  %v420_v46 = vadd.bf16 %v412_v37, %v3226_v35  ;;  %v2956_v30 = vld [vmem:[%s3770_s6 + $0x38] sm:$0xff]   ;;  %v2429_v32 = vcombine.low %v3160_v8, %v3163_v9  ;;  %vm925_vm2 = vcmask 523264  }
  0x18   : > { %v395_v47 = vadd.bf16 %v393_v41, %v391_v39  ;;  %v396_v48 = vadd.bf16 %v394_v42, %v392_v40  ;;  %v2955_v49 = vld [vmem:[%s3769_s5] ss:$8 sps:$4 sm:$0xff]   ;;  %v2957_v31 = vld [vmem:[%s3770_s6 + $0x30] sm:$0xff]   ;;  %v2960_v8 = vld [vmem:[%s3770_s6 + $0x18] sm:$0xff]   ;;  %v2430_v39 = vcombine.low %v3183_v19, %v3186_v20  ;;  %v2431_v40 = vcombine.low %v3195_v24, %v3198_v25 }
  0x19   : > { %2670 = vmatpush3.bf16.msra.mxu1 %v2943_v3  ;;  %2650 = vmatpush3.bf16.msra.mxu0 %v2951_v17  ;;  %v2419_v50 = vcombine.low %v419_v45, %v420_v46  ;;  %v2415_v60 = vld [vmem:[%s3772_s8 + $0x1] ss:$0 sm:$0xff]  ;;  %v2958_v33 = vld [vmem:[%s3770_s6 + $0x28] sm:$0xff]   ;;  %v2961_v9 = vld [vmem:[%s3770_s6 + $0x10] sm:$0xff]   ;;  %v2432_v41 = vcombine.low %v3223_v34, %v3226_v35  ;;  %vm1001_vm3 = vcmask 125952   ;;  %vm1170_vm4 = vcmask 257152  }
  0x1a   : > { %2671 = vmatprep.subr.bf16.mxu1 %v2944_v7  ;;  %2651 = vmatprep.subr.bf16.mxu0 %v3054_v4  ;;  %v2406_v51 = vcombine.low %v395_v47, %v396_v48  ;;  %v2959_v36 = vld [vmem:[%s3770_s6 + $0x20] sm:$0xff]   ;;  %v2962_v37 = vld [vmem:[%s3770_s6 + $0x8] sm:$0xff]   ;;  %vm1330_vm5 = vcmask 388352   ;;  %vm1490_vm6 = vcmask 519552   ;;  %vm1650_vm7 = vcmask 650752  }
  0x1b   : > { %v3325_v19 = vld [vmem:[%s3322_s26] ss:$0 sm:$0xff]  ;;  %vm1810_vm8 = vcmask 781952   ;;  %vm1970_vm9 = vcmask 913152   ;;  %vm2130_vm10 = vcmask 1044352  }
  0x1d   : > { %2672 = vmatpush3.bf16.msra.mxu1 %v2944_v7  ;;  %2652 = vmatpush3.bf16.msra.mxu0 %v2952_v26 }
  0x1e   : > { %2673 = vmatprep.subr.bf16.mxu1 %v2945_v14  ;;  %2653 = vmatprep.subr.bf16.mxu0 %v3054_v4 }
  0x21   : > { %2674 = vmatpush3.bf16.msra.mxu1 %v2945_v14  ;;  %2654 = vmatpush3.bf16.msra.mxu0 %v2953_v29 }
  0x22   : > { %2675 = vmatprep.subr.bf16.mxu1 %v2946_v18  ;;  %2655 = vmatprep.subr.bf16.mxu0 %v3054_v4 }
  0x25   : > { %2676 = vmatpush3.bf16.msra.mxu1 %v2946_v18  ;;  %2656 = vmatpush3.bf16.msra.mxu0 %v2954_v38  ;;  %v2405_v18 = vld [vmem:[%s3772_s8] ss:$0 sm:$0xff] }
  0x26   : > { %2677 = vmatprep.subr.bf16.mxu1 %v2947_v23  ;;  %2657 = vmatprep.subr.bf16.mxu0 %v3054_v4  ;;  %v2963_v38 = vld [vmem:[%s3770_s6] sm:$0xff]  }
  0x29   : > { %2678 = vmatpush3.bf16.msra.mxu1 %v2947_v23  ;;  %2658 = vmatpush3.bf16.msra.mxu0 %v2955_v49  ;;  %v2428_v49 = vld [vmem:[%s3772_s8 + $0x2] ss:$0 sm:$0xff] }
  0x2a   : > { %2711 = vmatprep.subr.bf16.mxu1 %v3054_v4  ;;  %2687 = vmatprep.subr.bf16.mxu0 %v2956_v30 }
  0x2c   : > { %2680 = vmatmul.mubr.bf16.vlgmr.msra.gmra.mxu1 %v2417_v43  ;;  %2660 = vmatmul.mubr.bf16.vlgmr.msra.gmra.mxu0 %v2406_v51 }
  0x2d   : > { %2683 = vmatprep.mubr.bf16.mxu1 %v2418_v44  ;;  %2703 = vmatprep.mubr.bf16.mxu0 %v2429_v32 }
  0x2e   : > { %2688 = vmatpush3.bf16.msra.mxu0 %v2956_v30 }
  0x2f   : > { %2689 = vmatprep.subr.bf16.mxu0 %v2957_v31 }
  0x32   : > { %2690 = vmatpush3.bf16.msra.mxu0 %v2957_v31 }
  0x33   : > { %2691 = vmatprep.subr.bf16.mxu0 %v2958_v33 }
  0x34   : > { %2684 = vmatmul.mubr.bf16.gmra.mxu1 %v2419_v50 }
  0x35   : > { %2719 = vmatprep.mubr.msk.bf16.mxu1 %vm3055_vm0, %v3054_v4 }
  0x36   : > { %2692 = vmatpush3.bf16.msra.mxu0 %v2958_v33 }
  0x37   : > { %2693 = vmatprep.subr.bf16.mxu0 %v2959_v36 }
  0x3a   : > { %2694 = vmatpush3.bf16.msra.mxu0 %v2959_v36 }
  0x3b   : > { %2695 = vmatprep.subr.bf16.mxu0 %v2960_v8 }
  0x3e   : > { %2696 = vmatpush3.bf16.msra.mxu0 %v2960_v8 }
  0x3f   : > { %2697 = vmatprep.subr.bf16.mxu0 %v2961_v9 }
  0x42   : > { %2698 = vmatpush3.bf16.msra.mxu0 %v2961_v9 }
  0x43   : > { %2699 = vmatprep.subr.bf16.mxu0 %v2962_v37 }
  0x46   : > { %2700 = vmatpush3.bf16.msra.mxu0 %v2962_v37 }
  0x47   : > { %2701 = vmatprep.subr.bf16.mxu0 %v2963_v38 }
  0x4a   : > { %2702 = vmatpush3.bf16.msra.mxu0 %v2963_v38 }
  0x4b   : > { %2747 = vmatprep.subr.bf16.mxu0 %v3054_v4 }
  0x4d   : > { %2704 = vmatmul.mubr.bf16.vlgmr.msra.gmra.mxu0 %v2430_v39 }
  0x4e   : > { %2707 = vmatprep.mubr.bf16.mxu0 %v2431_v40 }
  0x55   : > { %2708 = vmatmul.mubr.bf16.gmra.mxu0 %v2432_v41 }
  0x56   : > { %2755 = vmatprep.mubr.msk.bf16.mxu0 %vm3055_vm0, %v3054_v4 }
  0xec   : > { %v2681_v52 = vpop.f32.mrf.mxu1  ;;  %v529_v57 = vpop.f32.mrf.mxu0 }
  0xed   : > { %v673_v13 = vadd.f32 %v2681_v52, %v2415_v60  ;;  %v530_v22 = vadd.f32 %v2405_v18, %v529_v57 }
  0xee   : > { %v664_v53 = vpop.f32.mrf.mxu1  ;;  %v2661_v59 = vpop.f32.mrf.mxu0 }
  0xef   : > { %v665_v17 = vadd.f32 %v2415_v60, %v664_v53  ;;  %v536_v27 = vmul.f32 0.25, %v530_v22 }
  0xf0   : > { %v2682_v54 = vpop.f32.mrf.mxu1  ;;  %v532_v62 = vpop.f32.mrf.mxu0 }
  0xf1   : > { %v676_v11 = vadd.f32 %v2682_v54, %v2415_v60  ;;  %v533_v23 = vadd.f32 %v2405_v18, %v532_v62 }
  0xf2   : > { %v667_v55 = vpop.f32.mrf.mxu1  ;;  %v2662_v2 = vpop.f32.mrf.mxu0 }
  0xf3   : > { %v3264_v14 = vpack.c.bf16 %v676_v11, %v673_v13  ;;  %v668_v15 = vadd.f32 %v2415_v60, %v667_v55  ;;  %v537_v28 = vmul.f32 0.25, %v533_v23 }
  0xf4   : > { %v2685_v56 = vpop.f32.mrf.mxu1 }
  0xf5   : > { %v689_v63 = vadd.f32 %v2685_v56, %v2415_v60  ;;  %v876_v16 = vsel %vm868_vm1, %v3264_v14, 0  ;;  %v3272_v21 = vpack.c.bf16 %v668_v15, %v665_v17  ;;  %v3277_v29 = vpack.c.bf16 %v537_v28, %v536_v27 }
  0xf6   : > { %v680_v58 = vpop.f32.mrf.mxu1 }
  0xf7   : > { %v681_v7 = vadd.f32 %v2415_v60, %v680_v58  ;;  %v873_v26 = vsel %vm868_vm1, %v3272_v21, 0 }
  0xf8   : > { %v2686_v61 = vpop.f32.mrf.mxu1 }
  0xf9   : > { %v692_v0 = vadd.f32 %v2686_v61, %v2415_v60 }
  0xfa   : > { %v683_v1 = vpop.f32.mrf.mxu1 }
  0xfb   : > { %v3254_v3 = vpack.c.bf16 %v692_v0, %v689_v63  ;;  %v684_v5 = vadd.f32 %v2415_v60, %v683_v1 }
  0xfd   : > { %v882_v6 = vsel %vm868_vm1, %v3254_v3, 0  ;;  %v3259_v10 = vpack.c.bf16 %v684_v5, %v681_v7 }
  0xfe   : > { %2712 = vmatpush3.bf16.xpose.msra.mxu1 %v882_v6 }
  0xff   : > { %2713 = vmatprep.subr.bf16.mxu1 %v3054_v4  ;;  %v879_v12 = vsel %vm868_vm1, %v3259_v10, 0 }
 0x106   : > { %2714 = vmatpush3.bf16.xpose.msra.mxu1 %v879_v12 }
 0x107   : > { %2715 = vmatprep.subr.bf16.mxu1 %v3054_v4 }
 0x10d   : > { %v2705_v45 = vpop.f32.mrf.mxu0 }
 0x10e   : > { %2716 = vmatpush3.bf16.xpose.msra.mxu1 %v876_v16  ;;  %v830_v1 = vadd.f32 %v2705_v45, %v2428_v49 }
 0x10f   : > { %2717 = vmatprep.subr.bf16.mxu1 %v3054_v4  ;;  %v821_v46 = vpop.f32.mrf.mxu0 }
 0x110   : > { %v822_v6 = vadd.f32 %v2428_v49, %v821_v46 }
 0x111   : > { %v2706_v47 = vpop.f32.mrf.mxu0 }
 0x112   : > { %v833_v2 = vadd.f32 %v2706_v47, %v2428_v49 }
 0x113   : > { %v824_v48 = vpop.f32.mrf.mxu0 }
 0x114   : > { %v3344_v7 = vpack.c.bf16 %v833_v2, %v830_v1  ;;  %v825_v11 = vadd.f32 %v2428_v49, %v824_v48 }
 0x115   : > { %v2709_v50 = vpop.f32.mrf.mxu0 }
 0x116   : > { %2718 = vmatpush3.bf16.xpose.msra.mxu1 %v873_v26  ;;  %v846_v54 = vadd.f32 %v2709_v50, %v2428_v49  ;;  %v3348_v12 = vpack.c.bf16 %v825_v11, %v822_v6 }
 0x117   : > { %2723 = vmatprep.subr.bf16.mxu1 %v3054_v4  ;;  %v837_v53 = vpop.f32.mrf.mxu0 }
 0x118   : > { %v838_v58 = vadd.f32 %v2428_v49, %v837_v53 }
 0x119   : > { %v2710_v56 = vpop.f32.mrf.mxu0 }
 0x11a   : > { %v849_v59 = vadd.f32 %v2710_v56, %v2428_v49 }
 0x11b   : > { %v840_v61 = vpop.f32.mrf.mxu0 }
 0x11c   : > { %v3338_v62 = vpack.c.bf16 %v849_v59, %v846_v54  ;;  %v841_v63 = vadd.f32 %v2428_v49, %v840_v61 }
 0x11d   : > { %2720 = vmatmul.mubr.msk.bf16.vlgmr.msra.gmra.mxu1 %vm868_vm1, %v3277_v29 }
 0x11e   : > { %2731 = vmatprep.mubr.msk.bf16.mxu1 %vm3055_vm0, %v3054_v4  ;;  %v3340_v5 = vpack.c.bf16 %v841_v63, %v838_v58  ;;  %2724 = vmatpush3.bf16.msra.mxu1 %v3338_v62 }
 0x11f   : > { %2725 = vmatprep.subr.bf16.mxu1 %v3054_v4 }
 0x122   : > { %2726 = vmatpush3.bf16.msra.mxu1 %v3340_v5 }
 0x123   : > { %2727 = vmatprep.subr.bf16.mxu1 %v3054_v4 }
 0x126   : > { %2728 = vmatpush3.bf16.msra.mxu1 %v3344_v7 }
 0x127   : > { %2729 = vmatprep.subr.bf16.mxu1 %v3054_v4 }
 0x12a   : > { %2730 = vmatpush3.bf16.msra.mxu1 %v3348_v12 }
 0x12b   : > { %2735 = vmatprep.subr.bf16.mxu1 %v3054_v4 }
 0x1dd   : > { %v918_v20 = vpop.f32.mrf.mxu1 }
 0x1de   : > { %v919_v24 = vadd.f32 %v3325_v19, %v918_v20 }
 0x1df   : > { %v2721_v25 = vpop.f32.mrf.mxu1 }
 0x1e0   : > { %v926_v42 = vsel %vm925_vm2, %v919_v24, -inf }
 0x1e1   : > { %927 = vmax.xlane.f32.xlu0 %v926_v42  ;;  %v921_v34 = vpop.f32.mrf.mxu1 }
 0x1e2   : > { %v922_v35 = vadd.f32 %v3325_v19, %v921_v34 }
 0x1e3   : > { %v2722_v43 = vpop.f32.mrf.mxu1 }
 0x1e4   : > { %v929_v44 = vsel %vm925_vm2, %v922_v35, -inf }
 0x1e5   : > { %930 = vmax.xlane.f32.xlu0 %v929_v44 }
 0x1fb   : > { %1017 = vrot.lane.b32.xlu0 %v3254_v3, %s3056_s27 }
 0x1ff   : > { %1005 = vrot.lane.b32.xlu0 %v3277_v29, %s3056_s27 }
 0x26a   : > { %v928_v51 = vpop.xlane.xlu0 %927 }
 0x26b   : > { %v932_v52 = vsub.f32 %v919_v24, %v928_v51 }
 0x26d   : > { %v934_v55 = vmul.f32 1.442695, %v932_v52 }
 0x26e   : > { %v931_v57 = vpop.xlane.xlu0 %930 }
 0x26f   : > { %2977 = vpow2.f32 %v934_v55  ;;  %v933_v60 = vsub.f32 %v922_v35, %v931_v57 }
 0x271   : > { %v936_v0 = vmul.f32 1.442695, %v933_v60 }
 0x272   : > { %v1018_v30 = vpop.permute.xlu0 %1017 }
 0x273   : > { %2979 = vpow2.f32 %v936_v0  ;;  %v1032_v32 = vsel %vm868_vm1, %v1018_v30, 0 }
 0x276   : > { %v1006_v39 = vpop.permute.xlu0 %1005 }
 0x27c   : > { %v2978_v13 = vpop.eup %2977 }
 0x27d   : > { %v938_v15 = vsel %vm925_vm2, %v2978_v13, 0.0 }
 0x27e   : > { %939 = vadd.xlane.f32.xlu1 %v938_v15 }
 0x280   : > { %v2980_v16 = vpop.eup %2979 }
 0x281   : > { %v941_v17 = vsel %vm925_vm2, %v2980_v16, 0.0 }
 0x282   : > { %942 = vadd.xlane.f32.xlu1 %v941_v17 }
 0x293   : > { %1015 = vrot.lane.b32.xlu1 %v3259_v10, %s3056_s27 }
 0x297   : > { %1013 = vrot.lane.b32.xlu1 %v3264_v14, %s3056_s27 }
 0x29b   : > { %1011 = vrot.lane.b32.xlu1 %v3272_v21, %s3056_s27 }
 0x307   : > { %v940_v18 = vpop.xlane.xlu1 %939 }
 0x308   : > { %2981 = vrcp.f32 %v940_v18 }
 0x30b   : > { %v943_v22 = vpop.xlane.xlu1 %942 }
 0x30c   : > { %2983 = vrcp.f32 %v943_v22 }
 0x30f   : > { %v1016_v33 = vpop.permute.xlu1 %1015 }
 0x310   : > { %v1029_v36 = vsel %vm868_vm1, %v1016_v33, 0 }
 0x313   : > { %v1014_v8 = vpop.permute.xlu1 %1013 }
 0x314   : > { %v1026_v9 = vsel %vm868_vm1, %v1014_v8, 0 }
 0x315   : > { %v2982_v23 = vpop.eup %2981 }
 0x316   : > { %v946_v27 = vmul.f32 %v2982_v23, %v2978_v13 }
 0x317   : > { %v1012_v37 = vpop.permute.xlu1 %1011 }
 0x318   : > { %v1023_v38 = vsel %vm868_vm1, %v1012_v37, 0 }
 0x319   : > { %v2984_v26 = vpop.eup %2983 }
 0x31a   : > { %v947_v28 = vmul.f32 %v2984_v26, %v2980_v16 }
 0x31c   : > { %v948_v31 = vpack.c.bf16 %v947_v28, %v946_v27 }
 0x31e   : > { %2732 = vmatmul.mubr.msk.bf16.vlgmr.msra.gmra.mxu1 %vm925_vm2, %v948_v31 }
 0x31f   : > { %2736 = vmatpush3.bf16.xpose.msra.mxu1 %v1032_v32  ;;  %2743 = vmatprep.mubr.msk.bf16.mxu1 %vm3055_vm0, %v3054_v4 }
 0x320   : > { %2737 = vmatprep.subr.bf16.mxu1 %v3054_v4 }
 0x327   : > { %2738 = vmatpush3.bf16.xpose.msra.mxu1 %v1029_v36 }
 0x328   : > { %2739 = vmatprep.subr.bf16.mxu1 %v3054_v4 }
 0x32f   : > { %2740 = vmatpush3.bf16.xpose.msra.mxu1 %v1026_v9 }
 0x330   : > { %2741 = vmatprep.subr.bf16.mxu1 %v3054_v4 }
 0x337   : > { %2742 = vmatpush3.bf16.xpose.msra.mxu1 %v1023_v38 }
 0x338   : > { %2771 = vmatprep.subr.bf16.mxu1 %v3054_v4 }
 0x33e   : > { %2744 = vmatmul.mubr.msk.bf16.vlgmr.msra.gmra.mxu1 %vm868_vm1, %v1006_v39 }
 0x33f   : > { %2779 = vmatprep.mubr.msk.bf16.mxu1 %vm3055_vm0, %v3054_v4 }
 0x3de   : > { %v986_v40 = vpop.f32.mrf.mxu1 }
 0x3df   : > { %v2494_v41 = vpack.c.bf16 %v986_v40, %v986_v40 }
 0x3e0   : > { %v2733_v20 = vpop.f32.mrf.mxu1 }
 0x3e1   : > { %1002 = vst.msk [vmem:[#allocation2] sm:$0xf] %vm1001_vm3, %v2494_v41 }
 0x3e2   : > { %v989_v24 = vpop.f32.mrf.mxu1 }
 0x3e3   : > { %v2495_v25 = vpack.c.bf16 %v989_v24, %v989_v24 }
 0x3e4   : > { %v2734_v42 = vpop.f32.mrf.mxu1 }
 0x3e5   : > { %1003 = vst.msk [vmem:[#allocation2 + $0x4] sm:$0xf] %vm1001_vm3, %v2495_v25 }
 0x3fe   : > { %v1068_v34 = vpop.f32.mrf.mxu1 }
 0x3ff   : > { %v1069_v35 = vadd.f32 %v3325_v19, %v1068_v34 }
 0x400   : > { %v2745_v43 = vpop.f32.mrf.mxu1 }
 0x401   : > { %v1075_v44 = vsel %vm925_vm2, %v1069_v35, -inf }
 0x402   : > { %1076 = vmax.xlane.f32.xlu1 %v1075_v44  ;;  %v1071_v45 = vpop.f32.mrf.mxu1 }
 0x403   : > { %v1072_v46 = vadd.f32 %v3325_v19, %v1071_v45 }
 0x404   : > { %v2746_v47 = vpop.f32.mrf.mxu1 }
 0x405   : > { %v1078_v48 = vsel %vm925_vm2, %v1072_v46, -inf }
 0x406   : > { %1079 = vmax.xlane.f32.xlu0 %v1078_v48 }
 0x413   : > { %1108 = vrot.lane.b32.xlu1 %v3338_v62, %s3056_s27 }
 0x417   : > { %1104 = vrot.lane.b32.xlu1 %v3344_v7, %s3056_s27 }
 0x41b   : > { %1102 = vrot.lane.b32.xlu1 %v3348_v12, %s3056_s27 }
 0x41f   : > { %1181 = vrot.lane.b32.xlu1 %v3254_v3, %s3057_s14 }
 0x423   : > { %1177 = vrot.lane.b32.xlu1 %v3264_v14, %s3057_s14 }
 0x427   : > { %1173 = vrot.lane.b32.xlu1 %v3277_v29, %s3057_s14 }
 0x48b   : > { %v1077_v49 = vpop.xlane.xlu1 %1076 }
 0x48c   : > { %v1081_v50 = vsub.f32 %v1069_v35, %v1077_v49 }
 0x48e   : > { %v1083_v51 = vmul.f32 1.442695, %v1081_v50 }
 0x48f   : > { %v1109_v52 = vpop.permute.xlu1 %1108  ;;  %v1080_v53 = vpop.xlane.xlu0 %1079 }
 0x490   : > { %2985 = vpow2.f32 %v1083_v51  ;;  %v1082_v54 = vsub.f32 %v1072_v46, %v1080_v53  ;;  %2748 = vmatpush3.bf16.msra.mxu0 %v1109_v52 }
 0x491   : > { %2749 = vmatprep.subr.bf16.mxu0 %v3054_v4 }
 0x492   : > { %v1085_v55 = vmul.f32 1.442695, %v1082_v54 }
 0x493   : > { %v1105_v63 = vpop.permute.xlu1 %1104 }
 0x494   : > { %2987 = vpow2.f32 %v1085_v55 }
 0x497   : > { %v1103_v1 = vpop.permute.xlu1 %1102 }
 0x49b   : > { %v1182_v15 = vpop.permute.xlu1 %1181 }
 0x49c   : > { %v1196_v17 = vsel %vm868_vm1, %v1182_v15, 0 }
 0x49d   : > { %v2986_v56 = vpop.eup %2985 }
 0x49e   : > { %v1087_v57 = vsel %vm925_vm2, %v2986_v56, 0.0 }
 0x49f   : > { %1088 = vadd.xlane.f32.xlu0 %v1087_v57  ;;  %v1178_v23 = vpop.permute.xlu1 %1177 }
 0x4a0   : > { %v1190_v26 = vsel %vm868_vm1, %v1178_v23, 0 }
 0x4a1   : > { %v2988_v58 = vpop.eup %2987 }
 0x4a2   : > { %v1090_v59 = vsel %vm925_vm2, %v2988_v58, 0.0 }
 0x4a3   : > { %1091 = vadd.xlane.f32.xlu0 %v1090_v59  ;;  %v1174_v30 = vpop.permute.xlu1 %1173 }
 0x4b9   : > { %1106 = vrot.lane.b32.xlu0 %v3340_v5, %s3056_s27 }
 0x4bd   : > { %1179 = vrot.lane.b32.xlu0 %v3259_v10, %s3057_s14 }
 0x4c1   : > { %1175 = vrot.lane.b32.xlu0 %v3272_v21, %s3057_s14 }
 0x528   : > { %v1089_v60 = vpop.xlane.xlu0 %1088 }
 0x529   : > { %2989 = vrcp.f32 %v1089_v60 }
 0x52c   : > { %v1092_v61 = vpop.xlane.xlu0 %1091 }
 0x52d   : > { %2991 = vrcp.f32 %v1092_v61 }
 0x530   : > { %v1107_v0 = vpop.permute.xlu0 %1106 }
 0x531   : > { %2750 = vmatpush3.bf16.msra.mxu0 %v1107_v0 }
 0x532   : > { %2751 = vmatprep.subr.bf16.mxu0 %v3054_v4 }
 0x534   : > { %v1180_v18 = vpop.permute.xlu0 %1179 }
 0x535   : > { %2752 = vmatpush3.bf16.msra.mxu0 %v1105_v63  ;;  %v1193_v22 = vsel %vm868_vm1, %v1180_v18, 0 }
 0x536   : > { %2753 = vmatprep.subr.bf16.mxu0 %v3054_v4  ;;  %v2990_v2 = vpop.eup %2989 }
 0x537   : > { %v1095_v11 = vmul.f32 %v2990_v2, %v2986_v56 }
 0x538   : > { %v1176_v27 = vpop.permute.xlu0 %1175 }
 0x539   : > { %2754 = vmatpush3.bf16.msra.mxu0 %v1103_v1  ;;  %v1187_v28 = vsel %vm868_vm1, %v1176_v27, 0 }
 0x53a   : > { %v2992_v6 = vpop.eup %2991  ;;  %2759 = vmatprep.subr.bf16.mxu0 %v3054_v4 }
 0x53b   : > { %v1096_v13 = vmul.f32 %v2992_v6, %v2988_v58 }
 0x53d   : > { %v1097_v16 = vpack.c.bf16 %v1096_v13, %v1095_v11 }
 0x53f   : > { %2756 = vmatmul.mubr.msk.bf16.vlgmr.msra.gmra.mxu0 %vm925_vm2, %v1097_v16 }
 0x540   : > { %2760 = vmatpush3.bf16.xpose.msra.mxu0 %v1196_v17  ;;  %2767 = vmatprep.mubr.msk.bf16.mxu0 %vm3055_vm0, %v3054_v4 }
 0x541   : > { %2761 = vmatprep.subr.bf16.mxu0 %v3054_v4 }
 0x548   : > { %2762 = vmatpush3.bf16.xpose.msra.mxu0 %v1193_v22 }
 0x549   : > { %2763 = vmatprep.subr.bf16.mxu0 %v3054_v4 }
 0x550   : > { %2764 = vmatpush3.bf16.xpose.msra.mxu0 %v1190_v26 }
 0x551   : > { %2765 = vmatprep.subr.bf16.mxu0 %v3054_v4 }
 0x558   : > { %2766 = vmatpush3.bf16.xpose.msra.mxu0 %v1187_v28 }
 0x559   : > { %2795 = vmatprep.subr.bf16.mxu0 %v3054_v4 }
 0x55f   : > { %2768 = vmatmul.mubr.msk.bf16.vlgmr.msra.gmra.mxu0 %vm868_vm1, %v1174_v30 }
 0x560   : > { %2803 = vmatprep.mubr.msk.bf16.mxu0 %vm3055_vm0, %v3054_v4 }
 0x5ff   : > { %v3418_v31 = vpop.f32.mrf.mxu0 }
 0x601   : > { %v2757_v32 = vpop.f32.mrf.mxu0 }
 0x603   : > { %v3420_v33 = vpop.f32.mrf.mxu0 }
 0x605   : > { %v2758_v36 = vpop.f32.mrf.mxu0 }
 0x61f   : > { %v1232_v8 = vpop.f32.mrf.mxu0 }
 0x620   : > { %v1233_v9 = vadd.f32 %v3325_v19, %v1232_v8 }
 0x621   : > { %v2769_v37 = vpop.f32.mrf.mxu0 }
 0x622   : > { %v1239_v38 = vsel %vm925_vm2, %v1233_v9, -inf }
 0x623   : > { %1240 = vmax.xlane.f32.xlu0 %v1239_v38  ;;  %v1235_v39 = vpop.f32.mrf.mxu0 }
 0x624   : > { %v1236_v40 = vadd.f32 %v3325_v19, %v1235_v39 }
 0x625   : > { %v2770_v41 = vpop.f32.mrf.mxu0 }
 0x626   : > { %v1242_v20 = vsel %vm925_vm2, %v1236_v40, -inf }
 0x627   : > { %1243 = vmax.xlane.f32.xlu1 %v1242_v20 }
 0x638   : > { %1266 = vrot.lane.b32.xlu1 %v3340_v5, %s3057_s14 }
 0x639   : > { %1268 = vrot.lane.b32.xlu0 %v3338_v62, %s3057_s14 }
 0x63c   : > { %1264 = vrot.lane.b32.xlu1 %v3344_v7, %s3057_s14 }
 0x640   : > { %1262 = vrot.lane.b32.xlu1 %v3348_v12, %s3057_s14 }
 0x644   : > { %1339 = vrot.lane.b32.xlu1 %v3259_v10, %s3058_s15 }
 0x648   : > { %1335 = vrot.lane.b32.xlu1 %v3272_v21, %s3058_s15 }
 0x6ac   : > { %v1241_v24 = vpop.xlane.xlu0 %1240 }
 0x6ad   : > { %v1245_v25 = vsub.f32 %v1233_v9, %v1241_v24 }
 0x6af   : > { %v1247_v42 = vmul.f32 1.442695, %v1245_v25 }
 0x6b0   : > { %v1269_v34 = vpop.permute.xlu0 %1268  ;;  %v1244_v35 = vpop.xlane.xlu1 %1243 }
 0x6b1   : > { %2993 = vpow2.f32 %v1247_v42  ;;  %v1246_v43 = vsub.f32 %v1236_v40, %v1244_v35  ;;  %2772 = vmatpush3.bf16.msra.mxu1 %v1269_v34 }
 0x6b2   : > { %2773 = vmatprep.subr.bf16.mxu1 %v3054_v4 }
 0x6b3   : > { %v1249_v44 = vmul.f32 1.442695, %v1246_v43 }
 0x6b4   : > { %v1267_v45 = vpop.permute.xlu1 %1266 }
 0x6b5   : > { %2995 = vpow2.f32 %v1249_v44  ;;  %2774 = vmatpush3.bf16.msra.mxu1 %v1267_v45 }
 0x6b6   : > { %2775 = vmatprep.subr.bf16.mxu1 %v3054_v4 }
 0x6b8   : > { %v1265_v46 = vpop.permute.xlu1 %1264 }
 0x6b9   : > { %2776 = vmatpush3.bf16.msra.mxu1 %v1265_v46 }
 0x6ba   : > { %2777 = vmatprep.subr.bf16.mxu1 %v3054_v4 }
 0x6bc   : > { %v1263_v47 = vpop.permute.xlu1 %1262 }
 0x6bd   : > { %2778 = vmatpush3.bf16.msra.mxu1 %v1263_v47 }
 0x6be   : > { %v2994_v48 = vpop.eup %2993  ;;  %2783 = vmatprep.subr.bf16.mxu1 %v3054_v4 }
 0x6bf   : > { %v1251_v49 = vsel %vm925_vm2, %v2994_v48, 0.0 }
 0x6c0   : > { %1252 = vadd.xlane.f32.xlu0 %v1251_v49  ;;  %v1340_v61 = vpop.permute.xlu1 %1339 }
 0x6c1   : > { %v1353_v63 = vsel %vm868_vm1, %v1340_v61, 0 }
 0x6c2   : > { %v2996_v50 = vpop.eup %2995 }
 0x6c3   : > { %v1254_v51 = vsel %vm925_vm2, %v2996_v50, 0.0 }
 0x6c4   : > { %1255 = vadd.xlane.f32.xlu0 %v1254_v51  ;;  %v1336_v2 = vpop.permute.xlu1 %1335 }
 0x6c5   : > { %v1347_v6 = vsel %vm868_vm1, %v1336_v2, 0 }
 0x6da   : > { %1341 = vrot.lane.b32.xlu0 %v3254_v3, %s3058_s15 }
 0x6de   : > { %1337 = vrot.lane.b32.xlu0 %v3264_v14, %s3058_s15 }
 0x6e2   : > { %1333 = vrot.lane.b32.xlu0 %v3277_v29, %s3058_s15 }
 0x749   : > { %v1253_v52 = vpop.xlane.xlu0 %1252 }
 0x74a   : > { %2997 = vrcp.f32 %v1253_v52 }
 0x74d   : > { %v1256_v53 = vpop.xlane.xlu0 %1255 }
 0x74e   : > { %2999 = vrcp.f32 %v1256_v53 }
 0x751   : > { %v1342_v58 = vpop.permute.xlu0 %1341 }
 0x752   : > { %v1356_v60 = vsel %vm868_vm1, %v1342_v58, 0 }
 0x755   : > { %v1338_v0 = vpop.permute.xlu0 %1337 }
 0x756   : > { %v1350_v1 = vsel %vm868_vm1, %v1338_v0, 0 }
 0x757   : > { %v2998_v54 = vpop.eup %2997 }
 0x758   : > { %v1259_v56 = vmul.f32 %v2998_v54, %v2994_v48 }
 0x759   : > { %v1334_v11 = vpop.permute.xlu0 %1333 }
 0x75b   : > { %v3000_v55 = vpop.eup %2999 }
 0x75c   : > { %v1260_v57 = vmul.f32 %v3000_v55, %v2996_v50 }
 0x75e   : > { %v1261_v59 = vpack.c.bf16 %v1260_v57, %v1259_v56 }
 0x760   : > { %2780 = vmatmul.mubr.msk.bf16.vlgmr.msra.gmra.mxu1 %vm925_vm2, %v1261_v59 }
 0x761   : > { %2784 = vmatpush3.bf16.xpose.msra.mxu1 %v1356_v60  ;;  %2791 = vmatprep.mubr.msk.bf16.mxu1 %vm3055_vm0, %v3054_v4 }
 0x762   : > { %2785 = vmatprep.subr.bf16.mxu1 %v3054_v4 }
 0x769   : > { %2786 = vmatpush3.bf16.xpose.msra.mxu1 %v1353_v63 }
 0x76a   : > { %2787 = vmatprep.subr.bf16.mxu1 %v3054_v4 }
 0x771   : > { %2788 = vmatpush3.bf16.xpose.msra.mxu1 %v1350_v1 }
 0x772   : > { %2789 = vmatprep.subr.bf16.mxu1 %v3054_v4 }
 0x779   : > { %2790 = vmatpush3.bf16.xpose.msra.mxu1 %v1347_v6 }
 0x77a   : > { %2819 = vmatprep.subr.bf16.mxu1 %v3054_v4 }
 0x780   : > { %2792 = vmatmul.mubr.msk.bf16.vlgmr.msra.gmra.mxu1 %vm868_vm1, %v1334_v11 }
 0x781   : > { %2827 = vmatprep.mubr.msk.bf16.mxu1 %vm3055_vm0, %v3054_v4 }
 0x820   : > { %v3464_v13 = vpop.f32.mrf.mxu1 }
 0x822   : > { %v2781_v15 = vpop.f32.mrf.mxu1 }
 0x824   : > { %v3466_v16 = vpop.f32.mrf.mxu1 }
 0x826   : > { %v2782_v17 = vpop.f32.mrf.mxu1 }
 0x840   : > { %v1392_v18 = vpop.f32.mrf.mxu1 }
 0x841   : > { %v1393_v22 = vadd.f32 %v3325_v19, %v1392_v18 }
 0x842   : > { %v2793_v23 = vpop.f32.mrf.mxu1 }
 0x843   : > { %v1399_v26 = vsel %vm925_vm2, %v1393_v22, -inf }
 0x844   : > { %1400 = vmax.xlane.f32.xlu1 %v1399_v26  ;;  %v1395_v27 = vpop.f32.mrf.mxu1 }
 0x845   : > { %v1396_v28 = vadd.f32 %v3325_v19, %v1395_v27 }
 0x846   : > { %v2794_v30 = vpop.f32.mrf.mxu1 }
 0x847   : > { %v1402_v32 = vsel %vm925_vm2, %v1396_v28, -inf }
 0x848   : > { %1403 = vmax.xlane.f32.xlu0 %v1402_v32 }
 0x855   : > { %1428 = vrot.lane.b32.xlu1 %v3338_v62, %s3058_s15 }
 0x859   : > { %1424 = vrot.lane.b32.xlu1 %v3344_v7, %s3058_s15 }
 0x85d   : > { %1422 = vrot.lane.b32.xlu1 %v3348_v12, %s3058_s15 }
 0x861   : > { %1501 = vrot.lane.b32.xlu1 %v3254_v3, %s3059_s16 }
 0x865   : > { %1497 = vrot.lane.b32.xlu1 %v3264_v14, %s3059_s16 }
 0x869   : > { %1493 = vrot.lane.b32.xlu1 %v3277_v29, %s3059_s16 }
 0x8cd   : > { %v1401_v36 = vpop.xlane.xlu1 %1400 }
 0x8ce   : > { %v1405_v8 = vsub.f32 %v1393_v22, %v1401_v36 }
 0x8d0   : > { %v1407_v9 = vmul.f32 1.442695, %v1405_v8 }
 0x8d1   : > { %v1429_v37 = vpop.permute.xlu1 %1428  ;;  %v1404_v38 = vpop.xlane.xlu0 %1403 }
 0x8d2   : > { %3001 = vpow2.f32 %v1407_v9  ;;  %v1406_v39 = vsub.f32 %v1396_v28, %v1404_v38  ;;  %2796 = vmatpush3.bf16.msra.mxu0 %v1429_v37 }
 0x8d3   : > { %2797 = vmatprep.subr.bf16.mxu0 %v3054_v4 }
 0x8d4   : > { %v1409_v40 = vmul.f32 1.442695, %v1406_v39 }
 0x8d5   : > { %v1425_v35 = vpop.permute.xlu1 %1424 }
 0x8d6   : > { %3003 = vpow2.f32 %v1409_v40 }
 0x8d9   : > { %v1423_v44 = vpop.permute.xlu1 %1422 }
 0x8dd   : > { %v1502_v49 = vpop.permute.xlu1 %1501 }
 0x8de   : > { %v1516_v51 = vsel %vm868_vm1, %v1502_v49, 0 }
 0x8df   : > { %v3002_v41 = vpop.eup %3001 }
 0x8e0   : > { %v1411_v20 = vsel %vm925_vm2, %v3002_v41, 0.0 }
 0x8e1   : > { %1412 = vadd.xlane.f32.xlu0 %v1411_v20  ;;  %v1498_v54 = vpop.permute.xlu1 %1497 }
 0x8e2   : > { %v1510_v55 = vsel %vm868_vm1, %v1498_v54, 0 }
 0x8e3   : > { %v3004_v24 = vpop.eup %3003 }
 0x8e4   : > { %v1414_v25 = vsel %vm925_vm2, %v3004_v24, 0.0 }
 0x8e5   : > { %1415 = vadd.xlane.f32.xlu0 %v1414_v25  ;;  %v1494_v58 = vpop.permute.xlu1 %1493 }
 0x8fb   : > { %1426 = vrot.lane.b32.xlu0 %v3340_v5, %s3058_s15 }
 0x8ff   : > { %1499 = vrot.lane.b32.xlu0 %v3259_v10, %s3059_s16 }
 0x903   : > { %1495 = vrot.lane.b32.xlu0 %v3272_v21, %s3059_s16 }
 0x96a   : > { %v1413_v42 = vpop.xlane.xlu0 %1412 }
 0x96b   : > { %3005 = vrcp.f32 %v1413_v42 }
 0x96e   : > { %v1416_v34 = vpop.xlane.xlu0 %1415 }
 0x96f   : > { %3007 = vrcp.f32 %v1416_v34 }
 0x972   : > { %v1427_v43 = vpop.permute.xlu0 %1426 }
 0x973   : > { %2798 = vmatpush3.bf16.msra.mxu0 %v1427_v43 }
 0x974   : > { %2799 = vmatprep.subr.bf16.mxu0 %v3054_v4 }
 0x976   : > { %v1500_v52 = vpop.permute.xlu0 %1499 }
 0x977   : > { %2800 = vmatpush3.bf16.msra.mxu0 %v1425_v35  ;;  %v1513_v53 = vsel %vm868_vm1, %v1500_v52, 0 }
 0x978   : > { %2801 = vmatprep.subr.bf16.mxu0 %v3054_v4  ;;  %v3006_v45 = vpop.eup %3005 }
 0x979   : > { %v1419_v47 = vmul.f32 %v3006_v45, %v3002_v41 }
 0x97a   : > { %v1496_v56 = vpop.permute.xlu0 %1495 }
 0x97b   : > { %2802 = vmatpush3.bf16.msra.mxu0 %v1423_v44  ;;  %v1507_v57 = vsel %vm868_vm1, %v1496_v56, 0 }
 0x97c   : > { %v3008_v46 = vpop.eup %3007  ;;  %2807 = vmatprep.subr.bf16.mxu0 %v3054_v4 }
 0x97d   : > { %v1420_v48 = vmul.f32 %v3008_v46, %v3004_v24 }
 0x97f   : > { %v1421_v50 = vpack.c.bf16 %v1420_v48, %v1419_v47 }
 0x981   : > { %2804 = vmatmul.mubr.msk.bf16.vlgmr.msra.gmra.mxu0 %vm925_vm2, %v1421_v50 }
 0x982   : > { %2808 = vmatpush3.bf16.xpose.msra.mxu0 %v1516_v51  ;;  %2815 = vmatprep.mubr.msk.bf16.mxu0 %vm3055_vm0, %v3054_v4 }
 0x983   : > { %2809 = vmatprep.subr.bf16.mxu0 %v3054_v4 }
 0x98a   : > { %2810 = vmatpush3.bf16.xpose.msra.mxu0 %v1513_v53 }
 0x98b   : > { %2811 = vmatprep.subr.bf16.mxu0 %v3054_v4 }
 0x992   : > { %2812 = vmatpush3.bf16.xpose.msra.mxu0 %v1510_v55 }
 0x993   : > { %2813 = vmatprep.subr.bf16.mxu0 %v3054_v4 }
 0x99a   : > { %2814 = vmatpush3.bf16.xpose.msra.mxu0 %v1507_v57 }
 0x99b   : > { %2843 = vmatprep.subr.bf16.mxu0 %v3054_v4 }
 0x9a1   : > { %2816 = vmatmul.mubr.msk.bf16.vlgmr.msra.gmra.mxu0 %vm868_vm1, %v1494_v58 }
 0x9a2   : > { %2851 = vmatprep.mubr.msk.bf16.mxu0 %vm3055_vm0, %v3054_v4 }
 0xa41   : > { %v3510_v59 = vpop.f32.mrf.mxu0 }
 0xa43   : > { %v2805_v60 = vpop.f32.mrf.mxu0 }
 0xa45   : > { %v3512_v61 = vpop.f32.mrf.mxu0 }
 0xa47   : > { %v2806_v63 = vpop.f32.mrf.mxu0 }
 0xa61   : > { %v1552_v0 = vpop.f32.mrf.mxu0 }
 0xa62   : > { %v1553_v1 = vadd.f32 %v3325_v19, %v1552_v0 }
 0xa63   : > { %v2817_v2 = vpop.f32.mrf.mxu0 }
 0xa64   : > { %v1559_v6 = vsel %vm925_vm2, %v1553_v1, -inf }
 0xa65   : > { %1560 = vmax.xlane.f32.xlu0 %v1559_v6  ;;  %v1555_v11 = vpop.f32.mrf.mxu0 }
 0xa66   : > { %v1556_v15 = vadd.f32 %v3325_v19, %v1555_v11 }
 0xa67   : > { %v2818_v17 = vpop.f32.mrf.mxu0 }
 0xa68   : > { %v1562_v18 = vsel %vm925_vm2, %v1556_v15, -inf }
 0xa69   : > { %1563 = vmax.xlane.f32.xlu1 %v1562_v18 }
 0xa7a   : > { %1586 = vrot.lane.b32.xlu1 %v3340_v5, %s3059_s16 }
 0xa7b   : > { %1588 = vrot.lane.b32.xlu0 %v3338_v62, %s3059_s16 }
 0xa7e   : > { %1584 = vrot.lane.b32.xlu1 %v3344_v7, %s3059_s16 }
 0xa82   : > { %1582 = vrot.lane.b32.xlu1 %v3348_v12, %s3059_s16 }
 0xa86   : > { %1659 = vrot.lane.b32.xlu1 %v3259_v10, %s3060_s17 }
 0xa8a   : > { %1655 = vrot.lane.b32.xlu1 %v3272_v21, %s3060_s17 }
 0xaee   : > { %v1561_v22 = vpop.xlane.xlu0 %1560 }
 0xaef   : > { %v1565_v23 = vsub.f32 %v1553_v1, %v1561_v22 }
 0xaf1   : > { %v1567_v26 = vmul.f32 1.442695, %v1565_v23 }
 0xaf2   : > { %v1589_v27 = vpop.permute.xlu0 %1588  ;;  %v1564_v28 = vpop.xlane.xlu1 %1563 }
 0xaf3   : > { %3009 = vpow2.f32 %v1567_v26  ;;  %v1566_v30 = vsub.f32 %v1556_v15, %v1564_v28  ;;  %2820 = vmatpush3.bf16.msra.mxu1 %v1589_v27 }
 0xaf4   : > { %2821 = vmatprep.subr.bf16.mxu1 %v3054_v4 }
 0xaf5   : > { %v1569_v32 = vmul.f32 1.442695, %v1566_v30 }
 0xaf6   : > { %v1587_v36 = vpop.permute.xlu1 %1586 }
 0xaf7   : > { %3011 = vpow2.f32 %v1569_v32  ;;  %2822 = vmatpush3.bf16.msra.mxu1 %v1587_v36 }
 0xaf8   : > { %2823 = vmatprep.subr.bf16.mxu1 %v3054_v4 }
 0xafa   : > { %v1585_v8 = vpop.permute.xlu1 %1584 }
 0xafb   : > { %2824 = vmatpush3.bf16.msra.mxu1 %v1585_v8 }
 0xafc   : > { %2825 = vmatprep.subr.bf16.mxu1 %v3054_v4 }
 0xafe   : > { %v1583_v9 = vpop.permute.xlu1 %1582 }
 0xaff   : > { %2826 = vmatpush3.bf16.msra.mxu1 %v1583_v9 }
 0xb00   : > { %v3010_v37 = vpop.eup %3009  ;;  %2831 = vmatprep.subr.bf16.mxu1 %v3054_v4 }
 0xb01   : > { %v1571_v38 = vsel %vm925_vm2, %v3010_v37, 0.0 }
 0xb02   : > { %1572 = vadd.xlane.f32.xlu0 %v1571_v38  ;;  %v1660_v45 = vpop.permute.xlu1 %1659 }
 0xb03   : > { %v1673_v46 = vsel %vm868_vm1, %v1660_v45, 0 }
 0xb04   : > { %v3012_v39 = vpop.eup %3011 }
 0xb05   : > { %v1574_v40 = vsel %vm925_vm2, %v3012_v39, 0.0 }
 0xb06   : > { %1575 = vadd.xlane.f32.xlu0 %v1574_v40  ;;  %v1656_v49 = vpop.permute.xlu1 %1655 }
 0xb07   : > { %v1667_v50 = vsel %vm868_vm1, %v1656_v49, 0 }
 0xb1c   : > { %1661 = vrot.lane.b32.xlu0 %v3254_v3, %s3060_s17 }
 0xb20   : > { %1657 = vrot.lane.b32.xlu0 %v3264_v14, %s3060_s17 }
 0xb24   : > { %1653 = vrot.lane.b32.xlu0 %v3277_v29, %s3060_s17 }
 0xb8b   : > { %v1573_v41 = vpop.xlane.xlu0 %1572 }
 0xb8c   : > { %3013 = vrcp.f32 %v1573_v41 }
 0xb8f   : > { %v1576_v20 = vpop.xlane.xlu0 %1575 }
 0xb90   : > { %3015 = vrcp.f32 %v1576_v20 }
 0xb93   : > { %v1662_v35 = vpop.permute.xlu0 %1661 }
 0xb94   : > { %v1676_v44 = vsel %vm868_vm1, %v1662_v35, 0 }
 0xb97   : > { %v1658_v47 = vpop.permute.xlu0 %1657 }
 0xb98   : > { %v1670_v48 = vsel %vm868_vm1, %v1658_v47, 0 }
 0xb99   : > { %v3014_v24 = vpop.eup %3013 }
 0xb9a   : > { %v1579_v42 = vmul.f32 %v3014_v24, %v3010_v37 }
 0xb9b   : > { %v1654_v51 = vpop.permute.xlu0 %1653 }
 0xb9d   : > { %v3016_v25 = vpop.eup %3015 }
 0xb9e   : > { %v1580_v34 = vmul.f32 %v3016_v25, %v3012_v39 }
 0xba0   : > { %v1581_v43 = vpack.c.bf16 %v1580_v34, %v1579_v42 }
 0xba2   : > { %2828 = vmatmul.mubr.msk.bf16.vlgmr.msra.gmra.mxu1 %vm925_vm2, %v1581_v43 }
 0xba3   : > { %2832 = vmatpush3.bf16.xpose.msra.mxu1 %v1676_v44  ;;  %2839 = vmatprep.mubr.msk.bf16.mxu1 %vm3055_vm0, %v3054_v4 }
 0xba4   : > { %2833 = vmatprep.subr.bf16.mxu1 %v3054_v4 }
 0xbab   : > { %2834 = vmatpush3.bf16.xpose.msra.mxu1 %v1673_v46 }
 0xbac   : > { %2835 = vmatprep.subr.bf16.mxu1 %v3054_v4 }
 0xbb3   : > { %2836 = vmatpush3.bf16.xpose.msra.mxu1 %v1670_v48 }
 0xbb4   : > { %2837 = vmatprep.subr.bf16.mxu1 %v3054_v4 }
 0xbbb   : > { %2838 = vmatpush3.bf16.xpose.msra.mxu1 %v1667_v50 }
 0xbbc   : > { %2867 = vmatprep.subr.bf16.mxu1 %v3054_v4 }
 0xbc2   : > { %2840 = vmatmul.mubr.msk.bf16.vlgmr.msra.gmra.mxu1 %vm868_vm1, %v1654_v51 }
 0xbc3   : > { %2875 = vmatprep.mubr.msk.bf16.mxu1 %vm3055_vm0, %v3054_v4 }
 0xc62   : > { %v3556_v52 = vpop.f32.mrf.mxu1 }
 0xc64   : > { %v2829_v53 = vpop.f32.mrf.mxu1 }
 0xc66   : > { %v3558_v54 = vpop.f32.mrf.mxu1 }
 0xc68   : > { %v2830_v55 = vpop.f32.mrf.mxu1 }
 0xc82   : > { %v1712_v56 = vpop.f32.mrf.mxu1 }
 0xc83   : > { %v1713_v57 = vadd.f32 %v3325_v19, %v1712_v56 }
 0xc84   : > { %v2841_v58 = vpop.f32.mrf.mxu1 }
 0xc85   : > { %v1719_v60 = vsel %vm925_vm2, %v1713_v57, -inf }
 0xc86   : > { %1720 = vmax.xlane.f32.xlu1 %v1719_v60  ;;  %v1715_v63 = vpop.f32.mrf.mxu1 }
 0xc87   : > { %v1716_v0 = vadd.f32 %v3325_v19, %v1715_v63 }
 0xc88   : > { %v2842_v1 = vpop.f32.mrf.mxu1 }
 0xc89   : > { %v1722_v2 = vsel %vm925_vm2, %v1716_v0, -inf }
 0xc8a   : > { %1723 = vmax.xlane.f32.xlu0 %v1722_v2 }
 0xc97   : > { %1748 = vrot.lane.b32.xlu1 %v3338_v62, %s3060_s17 }
 0xc9b   : > { %1744 = vrot.lane.b32.xlu1 %v3344_v7, %s3060_s17 }
 0xc9f   : > { %1742 = vrot.lane.b32.xlu1 %v3348_v12, %s3060_s17 }
 0xca3   : > { %1821 = vrot.lane.b32.xlu1 %v3254_v3, %s3061_s18 }
 0xca7   : > { %1817 = vrot.lane.b32.xlu1 %v3264_v14, %s3061_s18 }
 0xcab   : > { %1813 = vrot.lane.b32.xlu1 %v3277_v29, %s3061_s18 }
 0xd0f   : > { %v1721_v6 = vpop.xlane.xlu1 %1720 }
 0xd10   : > { %v1725_v11 = vsub.f32 %v1713_v57, %v1721_v6 }
 0xd12   : > { %v1727_v15 = vmul.f32 1.442695, %v1725_v11 }
 0xd13   : > { %v1749_v17 = vpop.permute.xlu1 %1748  ;;  %v1724_v18 = vpop.xlane.xlu0 %1723 }
 0xd14   : > { %3017 = vpow2.f32 %v1727_v15  ;;  %v1726_v22 = vsub.f32 %v1716_v0, %v1724_v18  ;;  %2844 = vmatpush3.bf16.msra.mxu0 %v1749_v17 }
 0xd15   : > { %2845 = vmatprep.subr.bf16.mxu0 %v3054_v4 }
 0xd16   : > { %v1729_v23 = vmul.f32 1.442695, %v1726_v22 }
 0xd17   : > { %v1745_v8 = vpop.permute.xlu1 %1744 }
 0xd18   : > { %3019 = vpow2.f32 %v1729_v23 }
 0xd1b   : > { %v1743_v37 = vpop.permute.xlu1 %1742 }
 0xd1f   : > { %v1822_v20 = vpop.permute.xlu1 %1821 }
 0xd20   : > { %v1836_v25 = vsel %vm868_vm1, %v1822_v20, 0 }
 0xd21   : > { %v3018_v26 = vpop.eup %3017 }
 0xd22   : > { %v1731_v27 = vsel %vm925_vm2, %v3018_v26, 0.0 }
 0xd23   : > { %1732 = vadd.xlane.f32.xlu0 %v1731_v27  ;;  %v1818_v35 = vpop.permute.xlu1 %1817 }
 0xd24   : > { %v1830_v43 = vsel %vm868_vm1, %v1818_v35, 0 }
 0xd25   : > { %v3020_v28 = vpop.eup %3019 }
 0xd26   : > { %v1734_v30 = vsel %vm925_vm2, %v3020_v28, 0.0 }
 0xd27   : > { %1735 = vadd.xlane.f32.xlu0 %v1734_v30  ;;  %v1814_v46 = vpop.permute.xlu1 %1813 }
 0xd3d   : > { %1746 = vrot.lane.b32.xlu0 %v3340_v5, %s3060_s17 }
 0xd41   : > { %1819 = vrot.lane.b32.xlu0 %v3259_v10, %s3061_s18 }
 0xd45   : > { %1815 = vrot.lane.b32.xlu0 %v3272_v21, %s3061_s18 }
 0xdac   : > { %v1733_v32 = vpop.xlane.xlu0 %1732 }
 0xdad   : > { %3021 = vrcp.f32 %v1733_v32 }
 0xdb0   : > { %v1736_v36 = vpop.xlane.xlu0 %1735 }
 0xdb1   : > { %3023 = vrcp.f32 %v1736_v36 }
 0xdb4   : > { %v1747_v9 = vpop.permute.xlu0 %1746 }
 0xdb5   : > { %2846 = vmatpush3.bf16.msra.mxu0 %v1747_v9 }
 0xdb6   : > { %2847 = vmatprep.subr.bf16.mxu0 %v3054_v4 }
 0xdb8   : > { %v1820_v42 = vpop.permute.xlu0 %1819 }
 0xdb9   : > { %2848 = vmatpush3.bf16.msra.mxu0 %v1745_v8  ;;  %v1833_v34 = vsel %vm868_vm1, %v1820_v42, 0 }
 0xdba   : > { %2849 = vmatprep.subr.bf16.mxu0 %v3054_v4  ;;  %v3022_v38 = vpop.eup %3021 }
 0xdbb   : > { %v1739_v40 = vmul.f32 %v3022_v38, %v3018_v26 }
 0xdbc   : > { %v1816_v44 = vpop.permute.xlu0 %1815 }
 0xdbd   : > { %2850 = vmatpush3.bf16.msra.mxu0 %v1743_v37  ;;  %v1827_v45 = vsel %vm868_vm1, %v1816_v44, 0 }
 0xdbe   : > { %v3024_v39 = vpop.eup %3023  ;;  %2855 = vmatprep.subr.bf16.mxu0 %v3054_v4 }
 0xdbf   : > { %v1740_v41 = vmul.f32 %v3024_v39, %v3020_v28 }
 0xdc1   : > { %v1741_v24 = vpack.c.bf16 %v1740_v41, %v1739_v40 }
 0xdc3   : > { %2852 = vmatmul.mubr.msk.bf16.vlgmr.msra.gmra.mxu0 %vm925_vm2, %v1741_v24 }
 0xdc4   : > { %2856 = vmatpush3.bf16.xpose.msra.mxu0 %v1836_v25  ;;  %2863 = vmatprep.mubr.msk.bf16.mxu0 %vm3055_vm0, %v3054_v4 }
 0xdc5   : > { %2857 = vmatprep.subr.bf16.mxu0 %v3054_v4 }
 0xdcc   : > { %2858 = vmatpush3.bf16.xpose.msra.mxu0 %v1833_v34 }
 0xdcd   : > { %2859 = vmatprep.subr.bf16.mxu0 %v3054_v4 }
 0xdd4   : > { %2860 = vmatpush3.bf16.xpose.msra.mxu0 %v1830_v43  ;;  %v3045_v43 = vld [vmem:[%s3322_s26] ss:$0 sm:$0xff] }
 0xdd5   : > { %2861 = vmatprep.subr.bf16.mxu0 %v3054_v4 }
 0xddc   : > { %2862 = vmatpush3.bf16.xpose.msra.mxu0 %v1827_v45 }
 0xddd   : > { %2891 = vmatprep.subr.bf16.mxu0 %v3054_v4 }
 0xde3   : > { %2864 = vmatmul.mubr.msk.bf16.vlgmr.msra.gmra.mxu0 %vm868_vm1, %v1814_v46 }
 0xde4   : > { %2899 = vmatprep.mubr.msk.bf16.mxu0 %vm3055_vm0, %v3054_v4 }
 0xe83   : > { %v3602_v47 = vpop.f32.mrf.mxu0 }
 0xe85   : > { %v2853_v48 = vpop.f32.mrf.mxu0 }
 0xe87   : > { %v3604_v49 = vpop.f32.mrf.mxu0 }
 0xe89   : > { %v2854_v50 = vpop.f32.mrf.mxu0 }
 0xea3   : > { %v1872_v51 = vpop.f32.mrf.mxu0 }
 0xea4   : > { %v1873_v53 = vadd.f32 %v3325_v19, %v1872_v51 }
 0xea5   : > { %v2865_v55 = vpop.f32.mrf.mxu0 }
 0xea6   : > { %v1879_v56 = vsel %vm925_vm2, %v1873_v53, -inf  ;;  %v2496_v55 = vpack.c.bf16 %v3418_v31, %v3418_v31 }
 0xea7   : > { %1880 = vmax.xlane.f32.xlu0 %v1879_v56  ;;  %v1875_v57 = vpop.f32.mrf.mxu0  ;;  %v2498_v56 = vpack.c.bf16 %v3464_v13, %v3464_v13 }
 0xea8   : > { %v1876_v58 = vadd.f32 %v3325_v19, %v1875_v57  ;;  %v2500_v57 = vpack.c.bf16 %v3510_v59, %v3510_v59 }
 0xea9   : > { %v2866_v60 = vpop.f32.mrf.mxu0 }
 0xeaa   : > { %v1882_v63 = vsel %vm925_vm2, %v1876_v58, -inf }
 0xeab   : > { %1883 = vmax.xlane.f32.xlu1 %v1882_v63 }
 0xebc   : > { %1906 = vrot.lane.b32.xlu1 %v3340_v5, %s3061_s18 }
 0xebd   : > { %1908 = vrot.lane.b32.xlu0 %v3338_v62, %s3061_s18 }
 0xec0   : > { %1904 = vrot.lane.b32.xlu1 %v3344_v7, %s3061_s18 }
 0xec4   : > { %1902 = vrot.lane.b32.xlu1 %v3348_v12, %s3061_s18 }
 0xec8   : > { %1979 = vrot.lane.b32.xlu1 %v3259_v10, %s3062_s19 }
 0xecc   : > { %1975 = vrot.lane.b32.xlu1 %v3272_v21, %s3062_s19 }
 0xf30   : > { %v1881_v19 = vpop.xlane.xlu0 %1880 }
 0xf31   : > { %v1885_v0 = vsub.f32 %v1873_v53, %v1881_v19 }
 0xf33   : > { %v1887_v1 = vmul.f32 1.442695, %v1885_v0 }
 0xf34   : > { %v1909_v2 = vpop.permute.xlu0 %1908  ;;  %v1884_v6 = vpop.xlane.xlu1 %1883 }
 0xf35   : > { %3025 = vpow2.f32 %v1887_v1  ;;  %v1886_v11 = vsub.f32 %v1876_v58, %v1884_v6  ;;  %2868 = vmatpush3.bf16.msra.mxu1 %v1909_v2 }
 0xf36   : > { %2869 = vmatprep.subr.bf16.mxu1 %v3054_v4 }
 0xf37   : > { %v1889_v15 = vmul.f32 1.442695, %v1886_v11 }
 0xf38   : > { %v1907_v17 = vpop.permute.xlu1 %1906 }
 0xf39   : > { %3027 = vpow2.f32 %v1889_v15  ;;  %2870 = vmatpush3.bf16.msra.mxu1 %v1907_v17 }
 0xf3a   : > { %2871 = vmatprep.subr.bf16.mxu1 %v3054_v4 }
 0xf3c   : > { %v1905_v10 = vpop.permute.xlu1 %1904 }
 0xf3d   : > { %2872 = vmatpush3.bf16.msra.mxu1 %v1905_v10 }
 0xf3e   : > { %2873 = vmatprep.subr.bf16.mxu1 %v3054_v4 }
 0xf40   : > { %v1903_v21 = vpop.permute.xlu1 %1902 }
 0xf41   : > { %2874 = vmatpush3.bf16.msra.mxu1 %v1903_v21 }
 0xf42   : > { %v3026_v18 = vpop.eup %3025  ;;  %2879 = vmatprep.subr.bf16.mxu1 %v3054_v4 }
 0xf43   : > { %v1891_v22 = vsel %vm925_vm2, %v3026_v18, 0.0 }
 0xf44   : > { %1892 = vadd.xlane.f32.xlu0 %v1891_v22  ;;  %v2497_v22 = vpack.c.bf16 %v3420_v33, %v3420_v33 }
 0xf46   : > { %v3028_v23 = vpop.eup %3027 }
 0xf47   : > { %v1894_v26 = vsel %vm925_vm2, %v3028_v23, 0.0 }
 0xf48   : > { %1895 = vadd.xlane.f32.xlu0 %v1894_v26  ;;  %v2501_v26 = vpack.c.bf16 %v3512_v61, %v3512_v61 }
 0xf5e   : > { %1981 = vrot.lane.b32.xlu0 %v3254_v3, %s3062_s19  ;;  %v1980_v3 = vpop.permute.xlu1 %1979 }
 0xf62   : > { %1977 = vrot.lane.b32.xlu0 %v3264_v14, %s3062_s19  ;;  %v1993_v14 = vsel %vm868_vm1, %v1980_v3, 0  ;;  %v1976_v40 = vpop.permute.xlu1 %1975 }
 0xf63   : > { %v1987_v41 = vsel %vm868_vm1, %v1976_v40, 0  ;;  %v2970_v40 = vld [vmem:[%s3771_s7 + $0x28] sm:$0xff]  }
 0xf66   : > { %1973 = vrot.lane.b32.xlu0 %v3277_v29, %s3062_s19 }
 0xfcd   : > { %v1893_v27 = vpop.xlane.xlu0 %1892 }
 0xfce   : > { %3029 = vrcp.f32 %v1893_v27  ;;  %v2503_v27 = vpack.c.bf16 %v3558_v54, %v3558_v54 }
 0xfd1   : > { %v1896_v28 = vpop.xlane.xlu0 %1895 }
 0xfd2   : > { %3031 = vrcp.f32 %v1896_v28 }
 0xfd5   : > { %v1982_v9 = vpop.permute.xlu0 %1981 }
 0xfd6   : > { %v1996_v38 = vsel %vm868_vm1, %v1982_v9, 0 }
 0xfd9   : > { %v1978_v29 = vpop.permute.xlu0 %1977 }
 0xfda   : > { %v1990_v39 = vsel %vm868_vm1, %v1978_v29, 0  ;;  %v2968_v29 = vld [vmem:[%s3771_s7 + $0x38] sm:$0xff]  }
 0xfdb   : > { %v3030_v30 = vpop.eup %3029 }
 0xfdc   : > { %v1899_v36 = vmul.f32 %v3030_v30, %v3026_v18 }
 0xfdd   : > { %v1974_v20 = vpop.permute.xlu0 %1973 }
 0xfdf   : > { %v3032_v32 = vpop.eup %3031 }
 0xfe0   : > { %v1900_v8 = vmul.f32 %v3032_v32, %v3028_v23  ;;  %v2499_v23 = vpack.c.bf16 %v3466_v16, %v3466_v16 }
 0xfe2   : > { %v1901_v37 = vpack.c.bf16 %v1900_v8, %v1899_v36 }
 0xfe4   : > { %2876 = vmatmul.mubr.msk.bf16.vlgmr.msra.gmra.mxu1 %vm925_vm2, %v1901_v37 }
 0xfe5   : > { %2880 = vmatpush3.bf16.xpose.msra.mxu1 %v1996_v38  ;;  %2887 = vmatprep.mubr.msk.bf16.mxu1 %vm3055_vm0, %v3054_v4 }
 0xfe6   : > { %2881 = vmatprep.subr.bf16.mxu1 %v3054_v4 }
 0xfed   : > { %2882 = vmatpush3.bf16.xpose.msra.mxu1 %v1993_v14 }
 0xfee   : > { %2883 = vmatprep.subr.bf16.mxu1 %v3054_v4 }
 0xff5   : > { %2884 = vmatpush3.bf16.xpose.msra.mxu1 %v1990_v39  ;;  %v2969_v39 = vld [vmem:[%s3771_s7 + $0x30] sm:$0xff]  }
 0xff6   : > { %2885 = vmatprep.subr.bf16.mxu1 %v3054_v4 }
 0xffd   : > { %2886 = vmatpush3.bf16.xpose.msra.mxu1 %v1987_v41  ;;  %v2971_v41 = vld [vmem:[%s3771_s7 + $0x20] sm:$0xff]  }
0x1004   : > { %2888 = vmatmul.mubr.msk.bf16.vlgmr.msra.gmra.mxu1 %vm868_vm1, %v1974_v20  ;;  %v2972_v20 = vld [vmem:[%s3771_s7 + $0x18] sm:$0xff]  }
0x10a4   : > { %v1951_v24 = vpop.f32.mrf.mxu1 }
0x10a6   : > { %v2877_v25 = vpop.f32.mrf.mxu1 }
0x10a7   : > { %v2974_v25 = vld [vmem:[%s3771_s7 + $0x8] sm:$0xff]  }
0x10a8   : > { %v3645_v42 = vpop.f32.mrf.mxu1 }
0x10a9   : > { %v2507_v33 = vpack.c.bf16 %v3645_v42, %v3645_v42  ;;  %v2975_v42 = vld [vmem:[%s3771_s7] sm:$0xff]  }
0x10aa   : > { %v2878_v34 = vpop.f32.mrf.mxu1 }
0x10c4   : > { %v2032_v35 = vpop.f32.mrf.mxu1 }
0x10c5   : > { %v2033_v44 = vadd.f32 %v3045_v43, %v2032_v35 }
0x10c6   : > { %v2889_v45 = vpop.f32.mrf.mxu1 }
0x10c7   : > { %v2039_v46 = vsel %vm925_vm2, %v2033_v44, -inf }
0x10c8   : > { %2040 = vmax.xlane.f32.xlu1 %v2039_v46  ;;  %v2035_v48 = vpop.f32.mrf.mxu1 }
0x10c9   : > { %v2036_v50 = vadd.f32 %v3045_v43, %v2035_v48 }
0x10ca   : > { %v2890_v51 = vpop.f32.mrf.mxu1 }
0x10cb   : > { %v2042_v53 = vsel %vm925_vm2, %v2036_v50, -inf }
0x10cc   : > { %2043 = vmax.xlane.f32.xlu0 %v2042_v53  ;;  %v2474_v53 = vld [vmem:[%s3772_s8 + $0x3] ss:$0 sm:$0xff] }
0x10d9   : > { %2068 = vrot.lane.b32.xlu1 %v3338_v62, %s3062_s19  ;;  %v2502_v62 = vpack.c.bf16 %v3556_v52, %v3556_v52 }
0x10dd   : > { %2064 = vrot.lane.b32.xlu1 %v3344_v7, %s3062_s19  ;;  %v2504_v7 = vpack.c.bf16 %v3602_v47, %v3602_v47 }
0x10e1   : > { %2062 = vrot.lane.b32.xlu1 %v3348_v12, %s3062_s19  ;;  %v2506_v12 = vpack.c.bf16 %v1951_v24, %v1951_v24  ;;  %v2973_v24 = vld [vmem:[%s3771_s7 + $0x10] sm:$0xff]  }
0x10e5   : > { %1164 = vrot.lane.b32.xlu1 %v2496_v55, %s3062_s19 }
0x10e9   : > { %1324 = vrot.lane.b32.xlu1 %v2498_v56, %s3061_s18 }
0x10ed   : > { %1484 = vrot.lane.b32.xlu1 %v2500_v57, %s3060_s17 }
0x10f1   : > { %1644 = vrot.lane.b32.xlu1 %v2502_v62, %s3059_s16 }
0x10f5   : > { %1804 = vrot.lane.b32.xlu1 %v2504_v7, %s3058_s15 }
0x10f9   : > { %1964 = vrot.lane.b32.xlu1 %v2506_v12, %s3057_s14 }
0x1151   : > { %v2041_v31 = vpop.xlane.xlu1 %2040 }
0x1152   : > { %v2045_v13 = vsub.f32 %v2033_v44, %v2041_v31 }
0x1154   : > { %v2047_v58 = vmul.f32 1.442695, %v2045_v13 }
0x1155   : > { %v2069_v60 = vpop.permute.xlu1 %2068  ;;  %v2044_v59 = vpop.xlane.xlu0 %2043 }
0x1156   : > { %3033 = vpow2.f32 %v2047_v58  ;;  %v2046_v63 = vsub.f32 %v2036_v50, %v2044_v59  ;;  %2892 = vmatpush3.bf16.msra.mxu0 %v2069_v60 }
0x1157   : > { %2893 = vmatprep.subr.bf16.mxu0 %v3054_v4 }
0x1158   : > { %v2049_v52 = vmul.f32 1.442695, %v2046_v63 }
0x1159   : > { %v2065_v19 = vpop.permute.xlu1 %2064 }
0x115a   : > { %3035 = vpow2.f32 %v2049_v52 }
0x115d   : > { %v2063_v0 = vpop.permute.xlu1 %2062 }
0x1161   : > { %v1165_v47 = vpop.permute.xlu1 %1164 }
0x1162   : > { %1171 = vst.msk [vmem:[#allocation2] sm:$0xf] %vm1170_vm4, %v1165_v47 }
0x1163   : > { %v3034_v1 = vpop.eup %3033 }
0x1164   : > { %v2051_v2 = vsel %vm925_vm2, %v3034_v1, 0.0 }
0x1165   : > { %v1325_v6 = vpop.permute.xlu1 %1324  ;;  %2052 = vadd.xlane.f32.xlu0 %v2051_v2 }
0x1166   : > { %1331 = vst.msk [vmem:[#allocation2] sm:$0xf] %vm1330_vm5, %v1325_v6 }
0x1167   : > { %v3036_v11 = vpop.eup %3035 }
0x1168   : > { %v2054_v15 = vsel %vm925_vm2, %v3036_v11, 0.0 }
0x1169   : > { %v1485_v17 = vpop.permute.xlu1 %1484  ;;  %2055 = vadd.xlane.f32.xlu0 %v2054_v15 }
0x116a   : > { %1491 = vst.msk [vmem:[#allocation2] sm:$0xf] %vm1490_vm6, %v1485_v17 }
0x116d   : > { %v1645_v10 = vpop.permute.xlu1 %1644 }
0x116e   : > { %1651 = vst.msk [vmem:[#allocation2] sm:$0xf] %vm1650_vm7, %v1645_v10 }
0x1171   : > { %v1805_v21 = vpop.permute.xlu1 %1804 }
0x1172   : > { %1811 = vst.msk [vmem:[#allocation2] sm:$0xf] %vm1810_vm8, %v1805_v21 }
0x1175   : > { %v1965_v18 = vpop.permute.xlu1 %1964 }
0x1176   : > { %1971 = vst.msk [vmem:[#allocation2] sm:$0xf] %vm1970_vm9, %v1965_v18 }
0x117f   : > { %2066 = vrot.lane.b32.xlu0 %v3340_v5, %s3062_s19  ;;  %v2505_v5 = vpack.c.bf16 %v3604_v49, %v3604_v49 }
0x1183   : > { %1166 = vrot.lane.b32.xlu0 %v2497_v22, %s3062_s19 }
0x1187   : > { %1326 = vrot.lane.b32.xlu0 %v2499_v23, %s3061_s18  ;;  %v2484_v23 = vld [vmem:[%s3772_s8 + $0x4] ss:$0 sm:$0xff] }
0x118b   : > { %1486 = vrot.lane.b32.xlu0 %v2501_v26, %s3060_s17 }
0x118f   : > { %1646 = vrot.lane.b32.xlu0 %v2503_v27, %s3059_s16 }
0x1193   : > { %1806 = vrot.lane.b32.xlu0 %v2505_v5, %s3058_s15 }
0x1197   : > { %1966 = vrot.lane.b32.xlu0 %v2507_v33, %s3057_s14  ;;  %v2485_v33 = vld [vmem:[%s3772_s8 + $0x5] ss:$0 sm:$0xff] }
0x11ee   : > { %v2053_v16 = vpop.xlane.xlu0 %2052 }
0x11ef   : > { %3037 = vrcp.f32 %v2053_v16 }
0x11f2   : > { %v2056_v61 = vpop.xlane.xlu0 %2055 }
0x11f3   : > { %3039 = vrcp.f32 %v2056_v61 }
0x11f6   : > { %v2067_v28 = vpop.permute.xlu0 %2066 }
0x11f7   : > { %2894 = vmatpush3.bf16.msra.mxu0 %v2067_v28 }
0x11f8   : > { %2895 = vmatprep.subr.bf16.mxu0 %v3054_v4 }
0x11fa   : > { %v1167_v54 = vpop.permute.xlu0 %1166 }
0x11fb   : > { %1172 = vst.msk [vmem:[#allocation2 + $0x4] sm:$0xf] %vm1170_vm4, %v1167_v54  ;;  %2896 = vmatpush3.bf16.msra.mxu0 %v2065_v19 }
0x11fc   : > { %2897 = vmatprep.subr.bf16.mxu0 %v3054_v4  ;;  %v3038_v49 = vpop.eup %3037 }
0x11fd   : > { %v2059_v36 = vmul.f32 %v3038_v49, %v3034_v1 }
0x11fe   : > { %v1327_v30 = vpop.permute.xlu0 %1326 }
0x11ff   : > { %1332 = vst.msk [vmem:[#allocation2 + $0x4] sm:$0xf] %vm1330_vm5, %v1327_v30  ;;  %2898 = vmatpush3.bf16.msra.mxu0 %v2063_v0 }
0x1200   : > { %v3040_v32 = vpop.eup %3039  ;;  %2903 = vmatprep.subr.bf16.mxu0 %v3054_v4 }
0x1201   : > { %v2060_v8 = vmul.f32 %v3040_v32, %v3036_v11 }
0x1202   : > { %v1487_v9 = vpop.permute.xlu0 %1486 }
0x1203   : > { %1492 = vst.msk [vmem:[#allocation2 + $0x4] sm:$0xf] %vm1490_vm6, %v1487_v9  ;;  %v2061_v37 = vpack.c.bf16 %v2060_v8, %v2059_v36 }
0x1205   : > { %2900 = vmatmul.mubr.msk.bf16.vlgmr.msra.gmra.mxu0 %vm925_vm2, %v2061_v37 }
0x1206   : > { %v1647_v38 = vpop.permute.xlu0 %1646  ;;  %2919 = vmatprep.mubr.msk.bf16.mxu0 %vm3055_vm0, %v3054_v4  ;;  %2904 = vmatpush3.bf16.msra.mxu0 %v2968_v29 }
0x1207   : > { %1652 = vst.msk [vmem:[#allocation2 + $0x4] sm:$0xf] %vm1650_vm7, %v1647_v38  ;;  %2905 = vmatprep.subr.bf16.mxu0 %v3054_v4 }
0x120a   : > { %v1807_v3 = vpop.permute.xlu0 %1806  ;;  %2906 = vmatpush3.bf16.msra.mxu0 %v2969_v39 }
0x120b   : > { %1812 = vst.msk [vmem:[#allocation2 + $0x4] sm:$0xf] %vm1810_vm8, %v1807_v3  ;;  %2907 = vmatprep.subr.bf16.mxu0 %v3054_v4 }
0x120e   : > { %v1967_v14 = vpop.permute.xlu0 %1966  ;;  %2908 = vmatpush3.bf16.msra.mxu0 %v2970_v40 }
0x120f   : > { %1972 = vst.msk [vmem:[#allocation2 + $0x4] sm:$0xf] %vm1970_vm9, %v1967_v14  ;;  %2909 = vmatprep.subr.bf16.mxu0 %v3054_v4 }
0x1212   : > { %2910 = vmatpush3.bf16.msra.mxu0 %v2971_v41 }
0x1213   : > { %2911 = vmatprep.subr.bf16.mxu0 %v3054_v4 }
0x1216   : > { %2912 = vmatpush3.bf16.msra.mxu0 %v2972_v20 }
0x1217   : > { %2913 = vmatprep.subr.bf16.mxu0 %v3054_v4 }
0x121a   : > { %2914 = vmatpush3.bf16.msra.mxu0 %v2973_v24 }
0x121b   : > { %2915 = vmatprep.subr.bf16.mxu0 %v3054_v4 }
0x121e   : > { %2916 = vmatpush3.bf16.msra.mxu0 %v2974_v25 }
0x121f   : > { %2917 = vmatprep.subr.bf16.mxu0 %v3054_v4  ;;  %v2513_v4 = vld [vmem:[%s3217_s13] sm:$0xff]  }
0x1220   : > { %v2514_v55 = vunpack.c.l.bf16 %v2513_v4  ;;  %v2515_v12 = vunpack.c.h.bf16 %v2513_v4 }
0x1222   : > { %2918 = vmatpush3.bf16.msra.mxu0 %v2975_v42 }
0x12c5   : > { %v2111_v34 = vpop.f32.mrf.mxu0 }
0x12c6   : > { %v2508_v35 = vpack.c.bf16 %v2111_v34, %v2111_v34 }
0x12c7   : > { %v2901_v43 = vpop.f32.mrf.mxu0 }
0x12c8   : > { %2124 = vrot.lane.b32.xlu1 %v2508_v35, %s3056_s27 }
0x12c9   : > { %v2114_v44 = vpop.f32.mrf.mxu0 }
0x12ca   : > { %v2509_v45 = vpack.c.bf16 %v2114_v44, %v2114_v44 }
0x12cb   : > { %v2902_v46 = vpop.f32.mrf.mxu0 }
0x12cc   : > { %2126 = vrot.lane.b32.xlu0 %v2509_v45, %s3056_s27 }
0x133a   : > { %v2125_v48 = vpop.permute.xlu1 %2124 }
0x133b   : > { %2131 = vst.msk [vmem:[#allocation2] sm:$0xf] %vm2130_vm10, %v2125_v48 }
0x133e   : > { %v2127_v50 = vpop.permute.xlu0 %2126 }
0x133f   : > { %2132 = vst.msk [vmem:[#allocation2 + $0x4] sm:$0xf] %vm2130_vm10, %v2127_v50 }
0x1346   : > { %v2976_v51 = vld [vmem:[#allocation2] sm:$0xff]  }
0x1347   : > { %2920 = vmatmul.mubr.bf16.vlgmr.msra.gmra.mxu0 %v2976_v51 }
0x1407   : > { %v2244_v56 = vpop.f32.mrf.mxu0 }
0x1408   : > { %v2245_v57 = vadd.f32 %v2474_v53, %v2244_v56 }
0x1409   : > { %v2921_v62 = vpop.f32.mrf.mxu0 }
0x140a   : > { %v2255_v7 = vadd.f32 %v2514_v55, %v2245_v57 }
0x140b   : > { %v2247_v31 = vpop.f32.mrf.mxu0 }
0x140c   : > { %v2248_v13 = vadd.f32 %v2474_v53, %v2247_v31  ;;  %2257 = vadd.xlane.f32.xlu1 %v2255_v7 }
0x140d   : > { %v2922_v58 = vpop.f32.mrf.mxu0 }
0x140e   : > { %v2256_v60 = vadd.f32 %v2515_v12, %v2248_v13 }
0x1410   : > { %2259 = vadd.xlane.f32.xlu0 %v2256_v60 }
0x1495   : > { %v2258_v59 = vpop.xlane.xlu1 %2257 }
0x1496   : > { %v2262_v63 = vmul.f32 0.0078125, %v2258_v59 }
0x1498   : > { %v2264_v52 = vsub.f32 %v2255_v7, %v2262_v63 }
0x1499   : > { %v2260_v19 = vpop.xlane.xlu0 %2259 }
0x149a   : > { %v2266_v0 = vmul.f32 %v2264_v52, %v2264_v52  ;;  %v2263_v47 = vmul.f32 0.0078125, %v2260_v19 }
0x149c   : > { %v2265_v1 = vsub.f32 %v2256_v60, %v2263_v47  ;;  %2268 = vadd.xlane.f32.xlu0 %v2266_v0 }
0x149e   : > { %v2267_v2 = vmul.f32 %v2265_v1, %v2265_v1 }
0x14a0   : > { %2270 = vadd.xlane.f32.xlu0 %v2267_v2 }
0x1525   : > { %v2269_v6 = vpop.xlane.xlu0 %2268 }
0x1526   : > { %v2272_v11 = vmul.f32 0.0078125, %v2269_v6 }
0x1528   : > { %v2274_v15 = vadd.f32 1e-05, %v2272_v11 }
0x1529   : > { %v2271_v17 = vpop.xlane.xlu0 %2270 }
0x152a   : > { %3041 = vrsqrt.f32 %v2274_v15  ;;  %v2273_v10 = vmul.f32 0.0078125, %v2271_v17 }
0x152c   : > { %v2275_v21 = vadd.f32 1e-05, %v2273_v10 }
0x152e   : > { %3043 = vrsqrt.f32 %v2275_v21 }
0x1537   : > { %v3042_v18 = vpop.eup %3041 }
0x1538   : > { %v2278_v22 = vmul.f32 %v3042_v18, %v2264_v52 }
0x153a   : > { %v2285_v27 = vmul.f32 %v2484_v23, %v2278_v22 }
0x153b   : > { %v3044_v26 = vpop.eup %3043 }
0x153c   : > { %v2279_v5 = vmul.f32 %v3044_v26, %v2265_v1  ;;  %v2292_v61 = vadd.f32 %v2485_v33, %v2285_v27 }
0x153e   : > { %v2286_v16 = vmul.f32 %v2484_v23, %v2279_v5 }
0x1540   : > { %v2293_v28 = vadd.f32 %v2485_v33, %v2286_v16 }
0x1542   : > { %v2519_v54 = vpack.c.bf16 %v2293_v28, %v2292_v61 }
0x1544   : > { %2520 = vst [vmem:[%s386_s24] sm:$0xff] %v2519_v54  }
0x1545 PF: > { %s19_s30 = sadd.s32 1, %s3052_s30  }
0x1546   : > { %p16_p4 = scmp.ge.s32.totalorder %s19_s30, 4  }
0x1548   :  { %18 = sbr.rel (!%p16_p4) target bundleno = 1 (0x1), region = 95 }

// kernel: transformer_forward.16
= control target key start
LH: loop header
LB: loop body
LE: loop exit
PB: predicated region body
PF: predicated region fallthrough
CT: control target
= control target key end

     0   :  { %s847_s18 = smov 0   ;;  %s979_s0 = inlined_call_operand.vmem [shape: bf16[32,128], index: 0, kind: input, shape index: {}]   ;;  %s980_s1 = inlined_call_operand.vmem [shape: bf16[128,256], index: 1, kind: input, shape index: {}]   ;;  %s981_s2 = inlined_call_operand.vmem [shape: f32[1,256], index: 2, kind: input, shape index: {}]   ;;  %s982_s3 = inlined_call_operand.vmem [shape: bf16[256,128], index: 3, kind: input, shape index: {}]   ;;  %s983_s4 = inlined_call_operand.vmem [shape: f32[8,128], index: 4, kind: input, shape index: {}]   ;;  %s984_s5 = inlined_call_operand.vmem [shape: bf16[32,128], index: 5, kind: output, shape index: {}]  }
   0x1 LB: > { %s675_s19 = sadd.s32 4294967295, %s814_s18   ;;  %p679_p0 = scmp.ge.s32.totalorder %s814_s18, 1  ;;  %s814_s18 = sphi %s847_s18, %s15_s18  }
   0x2   : > { %p188_p1 = scmp.lt.s32.totalorder %s814_s18, 3 }
   0x4   : > { %p189_p2 = pnand %p679_p0, %p188_p1 }
   0x5   : > { %s680_s9 = sshll.u32 (!%p189_p2), %s675_s19, 1 }
   0x6   : > { %192 = sbr.rel (%p189_p2) target bundleno = 764 (0x2fc), region = 40  ;;  %p217_p3 = scmp.lt.s32.totalorder (!%p189_p2), %s680_s9, 3 }
   0xb   : > { %v762_v0 = vld [vmem:[%s980_s1 + $0x74] ss:$8 sps:$4 sm:$0xff]   ;;  %v764_v1 = vld [vmem:[%s980_s1 + $0x70] ss:$8 sps:$4 sm:$0xff]   ;;  %v816_v2 = vmov 0   ;;  %s986_s9 = smov (!%p217_p3, %s680_s9), 3  ;;  %v249_v34 = vlaneseq }
   0xc   : > { %377 = vmatprep.mubr.bf16.mxu0 %v816_v2  ;;  %345 = vmatprep.subr.bf16.mxu0 %v762_v0  ;;  %v765_v3 = vld [vmem:[%s980_s1 + $0x64] ss:$8 sps:$4 sm:$0xff]   ;;  %v767_v4 = vld [vmem:[%s980_s1 + $0x60] ss:$8 sps:$4 sm:$0xff]   ;;  %v768_v5 = vld [vmem:[%s980_s1 + $0x54] ss:$8 sps:$4 sm:$0xff]  }
   0xd   : > { %346 = vmatpush1.bf16.msra.mxu0 %v764_v1  ;;  %v770_v6 = vld [vmem:[%s980_s1 + $0x50] ss:$8 sps:$4 sm:$0xff]   ;;  %v771_v7 = vld [vmem:[%s980_s1 + $0x44] ss:$8 sps:$4 sm:$0xff]   ;;  %v773_v8 = vld [vmem:[%s980_s1 + $0x40] ss:$8 sps:$4 sm:$0xff]  }
   0xe   : > { %347 = vmatprep.subr.bf16.mxu0 %v765_v3  ;;  %v774_v9 = vld [vmem:[%s980_s1 + $0x34] ss:$8 sps:$4 sm:$0xff]   ;;  %v776_v12 = vld [vmem:[%s980_s1 + $0x30] ss:$8 sps:$4 sm:$0xff]   ;;  %v791_v15 = vld [vmem:[%s982_s3 + $0x68] sm:$0xff]   ;;  %s681_s17 = sshll.u32 %s986_s9, 2 }
   0xf   : > { %v787_v10 = vld [vmem:[%s982_s3 + $0x78] sm:$0xff]   ;;  %v789_v13 = vld [vmem:[%s982_s3 + $0x70] sm:$0xff]   ;;  %v777_v16 = vld [vmem:[%s980_s1 + $0x24] ss:$8 sps:$4 sm:$0xff]   ;;  %s220_s25 = scalar_lea.vmem %s979_s0, %s681_s17  ;;  %v250_v35 = vshrl.u32 %v249_v34, 7  ;;  %s226_s30 = scalar_lea.vmem %s984_s5, %s681_s17 }
  0x10   : > { %v788_v11 = vld [vmem:[%s982_s3 + $0x38] sm:$0xff]   ;;  %731 = vmatprep.subr.bf16.mxu1 %v787_v10  ;;  %v790_v14 = vld [vmem:[%s982_s3 + $0x30] sm:$0xff]   ;;  %v779_v17 = vld [vmem:[%s980_s1 + $0x20] ss:$8 sps:$4 sm:$0xff]  }
  0x11   : > { %348 = vmatpush1.bf16.msra.mxu0 %v767_v4  ;;  %732 = vmatpush3.bf16.msra.mxu1 %v788_v11  ;;  %v780_v18 = vld [vmem:[%s980_s1 + $0x14] ss:$8 sps:$4 sm:$0xff]   ;;  %v792_v19 = vld [vmem:[%s982_s3 + $0x28] sm:$0xff]   ;;  %v793_v20 = vld [vmem:[%s982_s3 + $0x60] sm:$0xff]   ;;  %v255_v36 = vsub.s32 1, %v250_v35  ;;  %v251_v37 = vsub.s32 0, %v250_v35 }
  0x12   : > { %349 = vmatprep.subr.bf16.mxu0 %v768_v5  ;;  %733 = vmatprep.subr.bf16.mxu1 %v789_v13  ;;  %v794_v21 = vld [vmem:[%s982_s3 + $0x20] sm:$0xff]   ;;  %v782_v22 = vld [vmem:[%s980_s1 + $0x10] ss:$8 sps:$4 sm:$0xff]   ;;  %v799_v30 = vld [vmem:[%s982_s3 + $0x48] sm:$0xff]  }
  0x13   : > { %v795_v23 = vld [vmem:[%s982_s3 + $0x58] sm:$0xff]   ;;  %v783_v24 = vld [vmem:[%s980_s1 + $0x4] ss:$8 sps:$4 sm:$0xff]   ;;  %v785_v26 = vld [vmem:[%s980_s1] ss:$8 sps:$4 sm:$0xff]  }
  0x14   : > { %v796_v25 = vld [vmem:[%s982_s3 + $0x18] sm:$0xff]   ;;  %v229_v27 = vld [vmem:[%s220_s25] sm:$0xff]   ;;  %v797_v28 = vld [vmem:[%s982_s3 + $0x50] sm:$0xff]  }
  0x15   : > { %350 = vmatpush1.bf16.msra.mxu0 %v770_v6  ;;  %734 = vmatpush3.bf16.msra.mxu1 %v790_v14  ;;  %v798_v29 = vld [vmem:[%s982_s3 + $0x10] sm:$0xff]   ;;  %v800_v31 = vld [vmem:[%s982_s3 + $0x8] sm:$0xff]   ;;  %v801_v32 = vld [vmem:[%s982_s3 + $0x40] sm:$0xff]   ;;  %v568_v59 = vunpack.c.l.bf16 %v229_v27  ;;  %v569_v1 = vunpack.c.h.bf16 %v229_v27 }
  0x16   : > { %351 = vmatprep.subr.bf16.mxu0 %v771_v7  ;;  %735 = vmatprep.subr.bf16.mxu1 %v791_v15  ;;  %v802_v33 = vld [vmem:[%s982_s3] sm:$0xff]  }
  0x17   : > { %v247_v38 = vld [vmem:[%s981_s2] sm:$0x3] }
  0x18   : > { %v256_v40 = vrot.slane %v247_v38, %v255_v36  ;;  %v252_v41 = vrot.slane %v247_v38, %v251_v37  ;;  %v701_v56 = vld [vmem:[%s983_s4] ss:$0 sm:$0xff] }
  0x19   : > { %352 = vmatpush1.bf16.msra.mxu0 %v773_v8  ;;  %736 = vmatpush3.bf16.msra.mxu1 %v792_v19 }
  0x1a   : > { %353 = vmatprep.subr.bf16.mxu0 %v774_v9  ;;  %737 = vmatprep.subr.bf16.mxu1 %v793_v20  ;;  %v718_v20 = vld [vmem:[%s983_s4 + $0x1] ss:$0 sm:$0xff] }
  0x1d   : > { %354 = vmatpush1.bf16.msra.mxu0 %v776_v12  ;;  %738 = vmatpush3.bf16.msra.mxu1 %v794_v21 }
  0x1e   : > { %355 = vmatprep.subr.bf16.mxu0 %v777_v16  ;;  %739 = vmatprep.subr.bf16.mxu1 %v795_v23 }
  0x21   : > { %356 = vmatpush1.bf16.msra.mxu0 %v779_v17  ;;  %740 = vmatpush3.bf16.msra.mxu1 %v796_v25 }
  0x22   : > { %357 = vmatprep.subr.bf16.mxu0 %v780_v18  ;;  %741 = vmatprep.subr.bf16.mxu1 %v797_v28 }
  0x25   : > { %358 = vmatpush1.bf16.msra.mxu0 %v782_v22  ;;  %742 = vmatpush3.bf16.msra.mxu1 %v798_v29 }
  0x26   : > { %359 = vmatprep.subr.bf16.mxu0 %v783_v24  ;;  %743 = vmatprep.subr.bf16.mxu1 %v799_v30  ;;  %v719_v24 = vld [vmem:[%s983_s4 + $0x2] ss:$0 sm:$0xff] }
  0x29   : > { %360 = vmatpush1.bf16.msra.mxu0 %v785_v26  ;;  %744 = vmatpush3.bf16.msra.mxu1 %v800_v31 }
  0x2a   : > { %745 = vmatprep.subr.bf16.mxu1 %v801_v32 }
  0x2c   : > { %378 = vmatmul.mubr.bf16.vlgmr.msra.gmra.mxu0 %v229_v27 }
  0x2d   : > { %746 = vmatpush3.bf16.msra.mxu1 %v802_v33 }
  0xec   : > { %v379_v39 = vpop.f32.mrf.mxu0 }
  0xed   : > { %v380_v46 = vadd.f32 %v379_v39, %v252_v41 }
  0xee   : > { %v381_v42 = vpop.f32.mrf.mxu0 }
  0xef   : > { %v382_v44 = vadd.f32 %v381_v42, %v256_v40  ;;  %v388_v52 = vmax.f32 %v380_v46, 0.0 }
  0xf0   : > { %v383_v43 = vpop.f32.mrf.mxu0 }
  0xf1   : > { %v384_v45 = vadd.f32 %v383_v43, %v252_v41  ;;  %v389_v50 = vmax.f32 %v382_v44, 0.0 }
  0xf2   : > { %v385_v47 = vpop.f32.mrf.mxu0 }
  0xf3   : > { %v386_v48 = vadd.f32 %v385_v47, %v256_v40  ;;  %v390_v49 = vmax.f32 %v384_v45, 0.0 }
  0xf5   : > { %v391_v51 = vmax.f32 %v386_v48, 0.0  ;;  %v392_v54 = vpack.c.bf16 %v390_v49, %v388_v52 }
  0xf7   : > { %v393_v53 = vpack.c.bf16 %v391_v51, %v389_v50 }
  0xf9   : > { %559 = vmatprep.mubr.bf16.mxu1 %v393_v53 }
  0xfa   : > { %560 = vmatmul.mubr.bf16.vlgmr.msra.gmra.mxu1 %v392_v54 }
 0x1ba   : > { %v747_v55 = vpop.f32.mrf.mxu1 }
 0x1bc   : > { %v748_v57 = vpop.f32.mrf.mxu1 }
 0x1bd   : > { %v749_v58 = vadd.f32 %v748_v57, %v747_v55 }
 0x1be   : > { %v750_v60 = vpop.f32.mrf.mxu1 }
 0x1bf   : > { %v562_v61 = vadd.f32 %v749_v58, %v701_v56 }
 0x1c0   : > { %v751_v62 = vpop.f32.mrf.mxu1 }
 0x1c1   : > { %v752_v63 = vadd.f32 %v751_v62, %v750_v60  ;;  %v570_v0 = vadd.f32 %v568_v59, %v562_v61 }
 0x1c3   : > { %v565_v2 = vadd.f32 %v752_v63, %v701_v56  ;;  %572 = vadd.xlane.f32.xlu0 %v570_v0 }
 0x1c5   : > { %v571_v3 = vadd.f32 %v569_v1, %v565_v2 }
 0x1c7   : > { %574 = vadd.xlane.f32.xlu0 %v571_v3 }
 0x24c   : > { %v573_v4 = vpop.xlane.xlu0 %572 }
 0x24d   : > { %v577_v5 = vmul.f32 0.0078125, %v573_v4 }
 0x24f   : > { %v579_v6 = vsub.f32 %v570_v0, %v577_v5 }
 0x250   : > { %v575_v7 = vpop.xlane.xlu0 %574 }
 0x251   : > { %v578_v8 = vmul.f32 0.0078125, %v575_v7  ;;  %v581_v9 = vmul.f32 %v579_v6, %v579_v6 }
 0x253   : > { %v580_v10 = vsub.f32 %v571_v3, %v578_v8  ;;  %583 = vadd.xlane.f32.xlu1 %v581_v9 }
 0x255   : > { %v582_v11 = vmul.f32 %v580_v10, %v580_v10 }
 0x257   : > { %585 = vadd.xlane.f32.xlu1 %v582_v11 }
 0x2dc   : > { %v584_v12 = vpop.xlane.xlu1 %583 }
 0x2dd   : > { %v587_v13 = vmul.f32 0.0078125, %v584_v12 }
 0x2df   : > { %v589_v14 = vadd.f32 1e-05, %v587_v13 }
 0x2e0   : > { %v586_v15 = vpop.xlane.xlu1 %585 }
 0x2e1   : > { %804 = vrsqrt.f32 %v589_v14  ;;  %v588_v16 = vmul.f32 0.0078125, %v586_v15 }
 0x2e3   : > { %v590_v17 = vadd.f32 1e-05, %v588_v16 }
 0x2e5   : > { %806 = vrsqrt.f32 %v590_v17 }
 0x2ee   : > { %v805_v18 = vpop.eup %804 }
 0x2ef   : > { %v593_v19 = vmul.f32 %v805_v18, %v579_v6 }
 0x2f1   : > { %v600_v22 = vmul.f32 %v718_v20, %v593_v19 }
 0x2f2   : > { %v807_v21 = vpop.eup %806 }
 0x2f3   : > { %v594_v23 = vmul.f32 %v807_v21, %v580_v10  ;;  %v607_v26 = vadd.f32 %v719_v24, %v600_v22 }
 0x2f5   : > { %v601_v25 = vmul.f32 %v718_v20, %v594_v23 }
 0x2f7   : > { %v608_v27 = vadd.f32 %v719_v24, %v601_v25 }
 0x2f9   : > { %v729_v28 = vpack.c.bf16 %v608_v27, %v607_v26 }
 0x2fb   : > { %730 = vst [vmem:[%s226_s30] sm:$0xff] %v729_v28  }
 0x2fc PF: > { %s15_s18 = sadd.s32 1, %s814_s18  }
 0x2fd   : > { %p12_p4 = scmp.ge.s32.totalorder %s15_s18, 4  }
 0x2ff   :  { %14 = sbr.rel (!%p12_p4) target bundleno = 1 (0x1), region = 70 }

// kernel: transformer_forward.10
= control target key start
LH: loop header
LB: loop body
LE: loop exit
PB: predicated region body
PF: predicated region fallthrough
CT: control target
= control target key end

     0   :  { %s5076_s24 = smov 0   ;;  %s6422_s0 = inlined_call_operand.vmem [shape: bf16[2,64,128], index: 0, kind: input, shape index: {}]   ;;  %s6423_s1 = inlined_call_operand.vmem [shape: bf16[2,64,128], index: 1, kind: input, shape index: {}]   ;;  %s6424_s2 = inlined_call_operand.vmem [shape: f32[2,1,64], index: 2, kind: input, shape index: {}]   ;;  %s6425_s3 = inlined_call_operand.vmem [shape: bf16[128,256], index: 3, kind: input, shape index: {}]   ;;  %s6426_s4 = inlined_call_operand.vmem [shape: bf16[128,128], index: 4, kind: input, shape index: {}]   ;;  %s6427_s5 = inlined_call_operand.vmem [shape: bf16[128,128], index: 5, kind: input, shape index: {}]   ;;  %s6428_s6 = inlined_call_operand.vmem [shape: f32[8,128], index: 6, kind: input, shape index: {}]   ;;  %s6429_s7 = inlined_call_operand.vmem [shape: bf16[2,64,128], index: 7, kind: output, shape index: {}]  }
   0x1 LB: > { %s3877_s25 = sadd.s32 4294967295, %s5026_s24   ;;  %p3881_p0 = scmp.ge.s32.totalorder %s5026_s24, 1  ;;  %s5026_s24 = sphi %s5076_s24, %s17_s24  }
   0x2   : > { %p255_p1 = scmp.lt.s32.totalorder %s5026_s24, 3 }
   0x4   : > { %p256_p2 = pnand %p3881_p0, %p255_p1 }
   0x6   : > { %259 = sbr.rel (%p256_p2) target bundleno = 5177 (0x1439), region = 48 }
   0xb   : > { %v4698_v0 = vld [vmem:[%s6425_s3 + $0x74] ss:$8 sps:$4 sm:$0xff]   ;;  %v4700_v1 = vld [vmem:[%s6425_s3 + $0x70] ss:$8 sps:$4 sm:$0xff]   ;;  %v5028_v2 = vmov 0   ;;  %p295_p3 = scmp.lt.s32.totalorder %s3877_s25, 1 }
   0xc   : > { %493 = vmatprep.mubr.bf16.mxu0 %v5028_v2  ;;  %461 = vmatprep.subr.bf16.mxu0 %v4698_v0  ;;  %v4701_v3 = vld [vmem:[%s6425_s3 + $0x64] ss:$8 sps:$4 sm:$0xff]   ;;  %v4703_v4 = vld [vmem:[%s6425_s3 + $0x60] ss:$8 sps:$4 sm:$0xff]   ;;  %v4704_v5 = vld [vmem:[%s6425_s3 + $0x54] ss:$8 sps:$4 sm:$0xff]  }
   0xd   : > { %462 = vmatpush1.bf16.msra.mxu0 %v4700_v1  ;;  %v4706_v6 = vld [vmem:[%s6425_s3 + $0x50] ss:$8 sps:$4 sm:$0xff]   ;;  %v4707_v7 = vld [vmem:[%s6425_s3 + $0x44] ss:$8 sps:$4 sm:$0xff]   ;;  %v4709_v8 = vld [vmem:[%s6425_s3 + $0x40] ss:$8 sps:$4 sm:$0xff]  }
   0xe   : > { %463 = vmatprep.subr.bf16.mxu0 %v4701_v3  ;;  %s6461_s25 = smov (!%p295_p3, %s3877_s25), 1  ;;  %v4710_v9 = vld [vmem:[%s6425_s3 + $0x34] ss:$8 sps:$4 sm:$0xff]   ;;  %v4712_v10 = vld [vmem:[%s6425_s3 + $0x30] ss:$8 sps:$4 sm:$0xff]   ;;  %vm742_vm0 = vcmask 130048  }
   0xf   : > { %s5118_s23 = sshll.u32 %s6461_s25, 5  ;;  %v4713_v11 = vld [vmem:[%s6425_s3 + $0x24] ss:$8 sps:$4 sm:$0xff]   ;;  %v4715_v12 = vld [vmem:[%s6425_s3 + $0x20] ss:$8 sps:$4 sm:$0xff]   ;;  %s5275_s27 = scalar_lea.vmem %s6424_s2, %s6461_s25  ;;  %vm832_vm1 = vcmask 523264  }
  0x10   : > { %v4716_v13 = vld [vmem:[%s6425_s3 + $0x14] ss:$8 sps:$4 sm:$0xff]   ;;  %s5133_s11 = scalar_lea.vmem %s6422_s0, %s5118_s23  ;;  %s5139_s14 = scalar_lea.vmem %s6423_s1, %s5118_s23  ;;  %v4718_v14 = vld [vmem:[%s6425_s3 + $0x10] ss:$8 sps:$4 sm:$0xff]   ;;  %v4719_v19 = vld [vmem:[%s6425_s3 + $0x4] ss:$8 sps:$4 sm:$0xff]  }
  0x11   : > { %464 = vmatpush1.bf16.msra.mxu0 %v4703_v4  ;;  %v5145_v15 = vld [vmem:[%s5133_s11] sm:$0xf]  ;;  %v5148_v16 = vld [vmem:[%s5133_s11 + $0x4] sm:$0xf]  ;;  %v5161_v24 = vld [vmem:[%s5133_s11 + $0x8] sm:$0xf]  ;;  %s312_s17 = scalar_lea.vmem %s6429_s7, %s5118_s23 }
  0x12   : > { %465 = vmatprep.subr.bf16.mxu0 %v4704_v5  ;;  %v325_v17 = vld [vmem:[%s5139_s14] sm:$0xf]  ;;  %v326_v18 = vld [vmem:[%s5139_s14 + $0x4] sm:$0xf]  ;;  %v5164_v25 = vld [vmem:[%s5133_s11 + $0xc] sm:$0xf] }
  0x13   : > { %v333_v20 = vadd.bf16 %v325_v17, %v5145_v15  ;;  %v334_v21 = vadd.bf16 %v326_v18, %v5148_v16  ;;  %v4721_v22 = vld [vmem:[%s6425_s3] ss:$8 sps:$4 sm:$0xff]   ;;  %v328_v27 = vld [vmem:[%s5139_s14 + $0xc] sm:$0xf]  ;;  %v5172_v31 = vld [vmem:[%s5133_s11 + $0x10] sm:$0xf] }
  0x14   : > { %v327_v26 = vld [vmem:[%s5139_s14 + $0x8] sm:$0xf]  ;;  %v336_v29 = vadd.bf16 %v328_v27, %v5164_v25  ;;  %v5175_v32 = vld [vmem:[%s5133_s11 + $0x14] sm:$0xf]  ;;  %v329_v33 = vld [vmem:[%s5139_s14 + $0x10] sm:$0xf] }
  0x15   : > { %466 = vmatpush1.bf16.msra.mxu0 %v4706_v6  ;;  %v3888_v23 = vcombine.low %v333_v20, %v334_v21  ;;  %v335_v28 = vadd.bf16 %v327_v26, %v5161_v24  ;;  %v330_v34 = vld [vmem:[%s5139_s14 + $0x14] sm:$0xf]  ;;  %v337_v35 = vadd.bf16 %v329_v33, %v5172_v31  ;;  %v5183_v38 = vld [vmem:[%s5133_s11 + $0x18] sm:$0xf]  ;;  %v5186_v39 = vld [vmem:[%s5133_s11 + $0x1c] sm:$0xf] }
  0x16   : > { %467 = vmatprep.subr.bf16.mxu0 %v4707_v7  ;;  %v338_v36 = vadd.bf16 %v330_v34, %v5175_v32  ;;  %v331_v40 = vld [vmem:[%s5139_s14 + $0x18] sm:$0xf]  ;;  %v332_v41 = vld [vmem:[%s5139_s14 + $0x1c] sm:$0xf]  ;;  %v3908_v45 = vld [vmem:[%s6428_s6] ss:$0 sm:$0xff] }
  0x17   : > { %v3889_v30 = vcombine.low %v335_v28, %v336_v29  ;;  %v339_v42 = vadd.bf16 %v331_v40, %v5183_v38  ;;  %v340_v43 = vadd.bf16 %v332_v41, %v5186_v39  ;;  %s5029_s25 = smov 112   ;;  %s5030_s30 = smov 96   ;;  %vm1034_vm2 = vcmask 125952  }
  0x18   : > { %v3890_v37 = vcombine.low %v337_v35, %v338_v36  ;;  %s5031_s8 = smov 80   ;;  %s5032_s9 = smov 64   ;;  %vm1389_vm3 = vcmask 257152   ;;  %vm1732_vm4 = vcmask 388352   ;;  %vm2075_vm5 = vcmask 519552  }
  0x19   : > { %468 = vmatpush1.bf16.msra.mxu0 %v4709_v8  ;;  %v3891_v44 = vcombine.low %v339_v42, %v340_v43  ;;  %v4722_v43 = vld [vmem:[%s6426_s4 + $0x38] sm:$0xff]   ;;  %s5033_s10 = smov 48   ;;  %s5034_s12 = smov 32   ;;  %vm2418_vm6 = vcmask 650752   ;;  %vm2761_vm7 = vcmask 781952   ;;  %vm3104_vm8 = vcmask 913152  }
  0x1a   : > { %469 = vmatprep.subr.bf16.mxu0 %v4710_v9  ;;  %4346 = vmatprep.subr.bf16.mxu1 %v4722_v43  ;;  %s5035_s13 = smov 16   ;;  %vm3447_vm9 = vcmask 1044352  }
  0x1b   : > { %4347 = vmatpush3.bf16.msra.mxu1 %v4722_v43 }
  0x1d   : > { %470 = vmatpush1.bf16.msra.mxu0 %v4712_v10 }
  0x1e   : > { %471 = vmatprep.subr.bf16.mxu0 %v4713_v11 }
  0x21   : > { %472 = vmatpush1.bf16.msra.mxu0 %v4715_v12 }
  0x22   : > { %473 = vmatprep.subr.bf16.mxu0 %v4716_v13 }
  0x25   : > { %474 = vmatpush1.bf16.msra.mxu0 %v4718_v14 }
  0x26   : > { %475 = vmatprep.subr.bf16.mxu0 %v4719_v19 }
  0x29   : > { %476 = vmatpush1.bf16.msra.mxu0 %v4721_v22 }
  0x2c   : > { %494 = vmatmul.mubr.bf16.vlgmr.msra.gmra.mxu0 %v3888_v23 }
  0x2d   : > { %503 = vmatprep.mubr.bf16.mxu0 %v5028_v2 }
  0x34   : > { %504 = vmatmul.mubr.bf16.gmra.mxu0 %v3889_v30 }
  0x35   : > { %513 = vmatprep.mubr.bf16.mxu0 %v5028_v2 }
  0x3c   : > { %514 = vmatmul.mubr.bf16.gmra.mxu0 %v3890_v37 }
  0x3d   : > { %523 = vmatprep.mubr.bf16.mxu0 %v5028_v2  ;;  %v3909_v2 = vld [vmem:[%s6428_s6 + $0x1] ss:$0 sm:$0xff] }
  0x44   : > { %524 = vmatmul.mubr.bf16.gmra.mxu0 %v3891_v44  ;;  %v4723_v44 = vld [vmem:[%s6426_s4 + $0x30] sm:$0xff]  }
  0x45   : > { %4348 = vmatprep.subr.bf16.mxu1 %v4723_v44 }
  0x46   : > { %4349 = vmatpush3.bf16.msra.mxu1 %v4723_v44 }
  0xec   : > { %v495_v46 = vpop.f32.mrf.mxu0 }
  0xed   : > { %v538_v48 = vadd.f32 %v3908_v45, %v495_v46  ;;  %v4724_v46 = vld [vmem:[%s6426_s4 + $0x28] sm:$0xff]  }
  0xee   : > { %v497_v47 = vpop.f32.mrf.mxu0  ;;  %4350 = vmatprep.subr.bf16.mxu1 %v4724_v46 }
  0xef   : > { %v546_v52 = vmul.f32 0.25, %v538_v48  ;;  %v558_v18 = vadd.f32 %v3909_v2, %v497_v47  ;;  %v4725_v47 = vld [vmem:[%s6426_s4 + $0x20] sm:$0xff]   ;;  %4351 = vmatpush3.bf16.msra.mxu1 %v4724_v46  ;;  %v4728_v48 = vld [vmem:[%s6426_s4 + $0x8] sm:$0xff]  }
  0xf0   : > { %v499_v49 = vpop.f32.mrf.mxu0  ;;  %4352 = vmatprep.subr.bf16.mxu1 %v4725_v47 }
  0xf1   : > { %v539_v50 = vadd.f32 %v3908_v45, %v499_v49  ;;  %v4729_v49 = vld [vmem:[%s6426_s4] sm:$0xff]  }
  0xf2   : > { %v501_v51 = vpop.f32.mrf.mxu0 }
  0xf3   : > { %v547_v53 = vmul.f32 0.25, %v539_v50  ;;  %v559_v17 = vadd.f32 %v3909_v2, %v501_v51  ;;  %4353 = vmatpush3.bf16.msra.mxu1 %v4725_v47  ;;  %v3912_v50 = vcombine.low %v5161_v24, %v5164_v25  ;;  %v3913_v51 = vcombine.low %v5172_v31, %v5175_v32 }
  0xf4   : > { %v505_v54 = vpop.f32.mrf.mxu0 }
  0xf5   : > { %v5196_v55 = vpack.c.bf16 %v547_v53, %v546_v52  ;;  %v5219_v19 = vpack.c.bf16 %v559_v17, %v558_v18  ;;  %v540_v23 = vadd.f32 %v3908_v45, %v505_v54  ;;  %v3914_v52 = vcombine.low %v5183_v38, %v5186_v39  ;;  %v5278_v53 = vld [vmem:[%s5275_s27] ss:$0 sm:$0xff] }
  0xf6   : > { %v507_v56 = vpop.f32.mrf.mxu0 }
  0xf7   : > { %4378 = vmatprep.mubr.msk.bf16.mxu0 %vm742_vm0, %v5196_v55  ;;  %v560_v12 = vadd.f32 %v3909_v2, %v507_v56  ;;  %v756_v26 = vsel %vm742_vm0, %v5219_v19, 0  ;;  %v548_v30 = vmul.f32 0.25, %v540_v23 }
  0xf8   : > { %v509_v57 = vpop.f32.mrf.mxu0 }
  0xf9   : > { %v541_v21 = vadd.f32 %v3908_v45, %v509_v57 }
  0xfa   : > { %v511_v58 = vpop.f32.mrf.mxu0 }
  0xfb   : > { %v561_v11 = vadd.f32 %v3909_v2, %v511_v58  ;;  %v549_v28 = vmul.f32 0.25, %v541_v21 }
  0xfc   : > { %v515_v59 = vpop.f32.mrf.mxu0 }
  0xfd   : > { %v5213_v13 = vpack.c.bf16 %v561_v11, %v560_v12  ;;  %v542_v27 = vadd.f32 %v3908_v45, %v515_v59  ;;  %v5227_v34 = vpack.c.bf16 %v549_v28, %v548_v30  ;;  %v3910_v30 = vld [vmem:[%s6428_s6 + $0x2] ss:$0 sm:$0xff] }
  0xfe   : > { %v517_v60 = vpop.f32.mrf.mxu0 }
  0xff   : > { %v562_v7 = vadd.f32 %v3909_v2, %v517_v60  ;;  %v759_v20 = vsel %vm742_vm0, %v5213_v13, 0  ;;  %v550_v33 = vmul.f32 0.25, %v542_v27 }
 0x100   : > { %v519_v61 = vpop.f32.mrf.mxu0 }
 0x101   : > { %v543_v22 = vadd.f32 %v3908_v45, %v519_v61 }
 0x102   : > { %v521_v62 = vpop.f32.mrf.mxu0 }
 0x103   : > { %v563_v4 = vadd.f32 %v3909_v2, %v521_v62  ;;  %v551_v29 = vmul.f32 0.25, %v543_v22 }
 0x104   : > { %v525_v63 = vpop.f32.mrf.mxu0 }
 0x105   : > { %v5205_v9 = vpack.c.bf16 %v563_v4, %v562_v7  ;;  %v5229_v36 = vpack.c.bf16 %v551_v29, %v550_v33  ;;  %v544_v37 = vadd.f32 %v3908_v45, %v525_v63 }
 0x106   : > { %v527_v0 = vpop.f32.mrf.mxu0 }
 0x107   : > { %v564_v5 = vadd.f32 %v3909_v2, %v527_v0  ;;  %v762_v14 = vsel %vm742_vm0, %v5205_v9, 0  ;;  %v552_v41 = vmul.f32 0.25, %v544_v37 }
 0x108   : > { %v529_v1 = vpop.f32.mrf.mxu0 }
 0x109   : > { %v545_v35 = vadd.f32 %v3908_v45, %v529_v1  ;;  %v3911_v45 = vcombine.low %v5145_v15, %v5148_v16  ;;  %v4726_v15 = vld [vmem:[%s6426_s4 + $0x18] sm:$0xff]   ;;  %v4727_v16 = vld [vmem:[%s6426_s4 + $0x10] sm:$0xff]  }
 0x10a   : > { %v531_v3 = vpop.f32.mrf.mxu0  ;;  %4354 = vmatprep.subr.bf16.mxu1 %v4726_v15 }
 0x10b   : > { %v565_v6 = vadd.f32 %v3909_v2, %v531_v3  ;;  %v553_v40 = vmul.f32 0.25, %v545_v35  ;;  %4362 = vmatprep.mubr.bf16.mxu1 %v3911_v45  ;;  %4355 = vmatpush3.bf16.msra.mxu1 %v4726_v15 }
 0x10c   : > { %4356 = vmatprep.subr.bf16.mxu1 %v4727_v16 }
 0x10d   : > { %v5203_v8 = vpack.c.bf16 %v565_v6, %v564_v5  ;;  %v5235_v42 = vpack.c.bf16 %v553_v40, %v552_v41 }
 0x10f   : > { %4650 = vmatprep.subr.msk.bf16.mxu0 %vm742_vm0, %v5203_v8  ;;  %v765_v10 = vsel %vm742_vm0, %v5203_v8, 0  ;;  %4357 = vmatpush3.bf16.msra.mxu1 %v4727_v16 }
 0x110   : > { %4371 = vmatpush3.bf16.xpose.msra.mxu0 %v765_v10  ;;  %4358 = vmatprep.subr.bf16.mxu1 %v4728_v48 }
 0x111   : > { %4651 = vmatprep.subr.msk.bf16.mxu0 %vm742_vm0, %v5205_v9 }
 0x113   : > { %4359 = vmatpush3.bf16.msra.mxu1 %v4728_v48 }
 0x114   : > { %4360 = vmatprep.subr.bf16.mxu1 %v4729_v49 }
 0x117   : > { %4361 = vmatpush3.bf16.msra.mxu1 %v4729_v49 }
 0x118   : > { %4373 = vmatpush3.bf16.xpose.msra.mxu0 %v762_v14 }
 0x119   : > { %4652 = vmatprep.subr.msk.bf16.mxu0 %vm742_vm0, %v5213_v13 }
 0x11a   : > { %4363 = vmatmul.mubr.bf16.vlgmr.msra.gmra.mxu1 %v3912_v50 }
 0x11b   : > { %4366 = vmatprep.mubr.bf16.mxu1 %v3913_v51 }
 0x120   : > { %4375 = vmatpush3.bf16.xpose.msra.mxu0 %v759_v20 }
 0x121   : > { %4653 = vmatprep.subr.msk.bf16.mxu0 %vm742_vm0, %v5219_v19 }
 0x122   : > { %4367 = vmatmul.mubr.bf16.gmra.mxu1 %v3914_v52 }
 0x128   : > { %4377 = vmatpush3.bf16.xpose.msra.mxu0 %v756_v26 }
 0x12f   : > { %4379 = vmatmul.mubr.msk.bf16.vlgmr.msra.gmra.mxu0 %vm742_vm0, %v5227_v34 }
 0x130   : > { %4382 = vmatprep.mubr.msk.bf16.mxu0 %vm742_vm0, %v5229_v36 }
 0x137   : > { %4383 = vmatmul.mubr.msk.bf16.gmra.mxu0 %vm742_vm0, %v5235_v42 }
 0x1da   : > { %v4364_v11 = vpop.f32.mrf.mxu1 }
 0x1db   : > { %v701_v15 = vadd.f32 %v4364_v11, %v3910_v30 }
 0x1dc   : > { %v692_v14 = vpop.f32.mrf.mxu1 }
 0x1de   : > { %v4365_v20 = vpop.f32.mrf.mxu1 }
 0x1df   : > { %v704_v16 = vadd.f32 %v4365_v20, %v3910_v30 }
 0x1e0   : > { %v695_v26 = vpop.f32.mrf.mxu1 }
 0x1e1   : > { %v5321_v51 = vpack.c.bf16 %v704_v16, %v701_v15 }
 0x1e2   : > { %v4368_v33 = vpop.f32.mrf.mxu1 }
 0x1e3   : > { %v717_v43 = vadd.f32 %v4368_v33, %v3910_v30 }
 0x1e4   : > { %v708_v40 = vpop.f32.mrf.mxu1 }
 0x1e5   : > { %v709_v45 = vadd.f32 %v3910_v30, %v708_v40 }
 0x1e6   : > { %v4369_v44 = vpop.f32.mrf.mxu1 }
 0x1e7   : > { %v720_v46 = vadd.f32 %v4369_v44, %v3910_v30 }
 0x1e8   : > { %v711_v47 = vpop.f32.mrf.mxu1 }
 0x1e9   : > { %v5315_v48 = vpack.c.bf16 %v720_v46, %v717_v43  ;;  %v712_v49 = vadd.f32 %v3910_v30, %v711_v47 }
 0x1eb   : > { %v5317_v50 = vpack.c.bf16 %v712_v49, %v709_v45  ;;  %4386 = vmatprep.subr.bf16.mxu1 %v5315_v48 }
 0x1ec   : > { %4387 = vmatpush3.bf16.msra.mxu1 %v5315_v48 }
 0x1ed   : > { %4388 = vmatprep.subr.bf16.mxu1 %v5317_v50 }
 0x1ef   : > { %v4380_v54 = vpop.f32.mrf.mxu0 }
 0x1f0   : > { %v810_v24 = vadd.f32 %v4380_v54, %v5278_v53  ;;  %v693_v54 = vadd.f32 %v3910_v30, %v692_v14  ;;  %4389 = vmatpush3.bf16.msra.mxu1 %v5317_v50 }
 0x1f1   : > { %v801_v25 = vpop.f32.mrf.mxu0  ;;  %4390 = vmatprep.subr.bf16.mxu1 %v5321_v51 }
 0x1f2   : > { %v802_v31 = vadd.f32 %v5278_v53, %v801_v25  ;;  %v839_v32 = vsel %vm832_vm1, %v810_v24, -inf }
 0x1f3   : > { %840 = vmax.xlane.f32.xlu1 %v839_v32  ;;  %v4381_v38 = vpop.f32.mrf.mxu0 }
 0x1f4   : > { %v813_v39 = vadd.f32 %v4381_v38, %v5278_v53  ;;  %v833_v56 = vsel %vm832_vm1, %v802_v31, -inf  ;;  %4391 = vmatpush3.bf16.msra.mxu1 %v5321_v51 }
 0x1f5   : > { %v804_v57 = vpop.f32.mrf.mxu0  ;;  %834 = vmax.xlane.f32.xlu0 %v833_v56 }
 0x1f6   : > { %v805_v58 = vadd.f32 %v5278_v53, %v804_v57  ;;  %v842_v59 = vsel %vm832_vm1, %v813_v39, -inf }
 0x1f7   : > { %843 = vmax.xlane.f32.xlu1 %v842_v59  ;;  %v4384_v60 = vpop.f32.mrf.mxu0 }
 0x1f8   : > { %v836_v61 = vsel %vm832_vm1, %v805_v58, -inf  ;;  %v5292_v1 = vadd.f32 %v4384_v60, %v5278_v53 }
 0x1f9   : > { %v817_v62 = vpop.f32.mrf.mxu0  ;;  %837 = vmax.xlane.f32.xlu0 %v836_v61 }
 0x1fa   : > { %v5289_v63 = vadd.f32 %v5278_v53, %v817_v62  ;;  %v851_v7 = vsel %vm832_vm1, %v5292_v1, -inf }
 0x1fb   : > { %v4385_v0 = vpop.f32.mrf.mxu0 }
 0x1fc   : > { %v5295_v2 = vadd.f32 %v4385_v0, %v5278_v53  ;;  %v845_v3 = vsel %vm832_vm1, %v5289_v63, -inf }
 0x1fd   : > { %v820_v4 = vpop.f32.mrf.mxu0  ;;  %846 = vmax.xlane.f32.xlu0 %v845_v3 }
 0x1fe   : > { %v5300_v5 = vadd.f32 %v5278_v53, %v820_v4  ;;  %v854_v6 = vsel %vm832_vm1, %v5295_v2, -inf }
 0x1ff   : > { %855 = vmax.xlane.f32.xlu1 %v854_v6 }
 0x200   : > { %v848_v10 = vsel %vm832_vm1, %v5300_v5, -inf }
 0x201   : > { %852 = vmax.xlane.f32.xlu0 %v851_v7 }
 0x203   : > { %849 = vmax.xlane.f32.xlu1 %v848_v10 }
 0x214   : > { %1063 = vrot.lane.b32.xlu1 %v5205_v9, %s5029_s25 }
 0x218   : > { %1061 = vrot.lane.b32.xlu1 %v5213_v13, %s5029_s25 }
 0x27c   : > { %v841_v12 = vpop.xlane.xlu1 %840 }
 0x27d   : > { %v859_v17 = vsub.f32 %v810_v24, %v841_v12  ;;  %v696_v24 = vadd.f32 %v3910_v30, %v695_v26 }
 0x27e   : > { %v835_v18 = vpop.xlane.xlu0 %834 }
 0x27f   : > { %v869_v21 = vmul.f32 1.442695, %v859_v17  ;;  %v857_v22 = vsub.f32 %v802_v31, %v835_v18  ;;  %v5334_v38 = vpack.c.bf16 %v696_v24, %v693_v54 }
 0x280   : > { %v844_v23 = vpop.xlane.xlu1 %843 }
 0x281   : > { %4746 = vpow2.f32 %v869_v21  ;;  %v865_v27 = vmul.f32 1.442695, %v857_v22  ;;  %v860_v28 = vsub.f32 %v813_v39, %v844_v23  ;;  %4392 = vmatprep.subr.bf16.mxu1 %v5334_v38 }
 0x282   : > { %v838_v29 = vpop.xlane.xlu0 %837  ;;  %4393 = vmatpush3.bf16.msra.mxu1 %v5334_v38 }
 0x283   : > { %4748 = vpow2.f32 %v865_v27  ;;  %v871_v35 = vmul.f32 1.442695, %v860_v28  ;;  %v858_v37 = vsub.f32 %v805_v58, %v838_v29 }
 0x285   : > { %4750 = vpow2.f32 %v871_v35  ;;  %v867_v41 = vmul.f32 1.442695, %v858_v37 }
 0x286   : > { %v847_v59 = vpop.xlane.xlu0 %846 }
 0x287   : > { %4752 = vpow2.f32 %v867_v41  ;;  %v861_v0 = vsub.f32 %v5289_v63, %v847_v59 }
 0x288   : > { %v856_v61 = vpop.xlane.xlu1 %855 }
 0x289   : > { %v864_v3 = vsub.f32 %v5295_v2, %v856_v61  ;;  %v873_v7 = vmul.f32 1.442695, %v861_v0 }
 0x28a   : > { %v853_v60 = vpop.xlane.xlu0 %852 }
 0x28b   : > { %v863_v62 = vsub.f32 %v5292_v1, %v853_v60  ;;  %v879_v10 = vmul.f32 1.442695, %v864_v3 }
 0x28c   : > { %v850_v6 = vpop.xlane.xlu1 %849 }
 0x28d   : > { %v877_v4 = vmul.f32 1.442695, %v863_v62  ;;  %v862_v11 = vsub.f32 %v5300_v5, %v850_v6 }
 0x28e   : > { %v5324_v52 = vpop.eup %4746 }
 0x28f   : > { %v887_v25 = vsel %vm832_vm1, %v5324_v52, 0.0  ;;  %4754 = vpow2.f32 %v877_v4  ;;  %v875_v12 = vmul.f32 1.442695, %v862_v11 }
 0x290   : > { %v5328_v31 = vpop.eup %4748  ;;  %888 = vadd.xlane.f32.xlu0 %v887_v25  ;;  %4756 = vpow2.f32 %v873_v7  ;;  %v1064_v21 = vpop.permute.xlu1 %1063 }
 0x291   : > { %v881_v56 = vsel %vm832_vm1, %v5328_v31, 0.0  ;;  %4758 = vpow2.f32 %v879_v10  ;;  %v1086_v49 = vsel %vm742_vm0, %v1064_v21, 0 }
 0x292   : > { %v5332_v32 = vpop.eup %4750  ;;  %4760 = vpow2.f32 %v875_v12 }
 0x293   : > { %v890_v39 = vsel %vm832_vm1, %v5332_v32, 0.0 }
 0x294   : > { %v5340_v57 = vpop.eup %4752  ;;  %891 = vadd.xlane.f32.xlu1 %v890_v39  ;;  %882 = vadd.xlane.f32.xlu0 %v881_v56  ;;  %v1062_v22 = vpop.permute.xlu1 %1061 }
 0x295   : > { %v884_v58 = vsel %vm832_vm1, %v5340_v57, 0.0  ;;  %v1083_v54 = vsel %vm742_vm0, %v1062_v22, 0 }
 0x298   : > { %885 = vadd.xlane.f32.xlu1 %v884_v58 }
 0x29c   : > { %v5355_v14 = vpop.eup %4754 }
 0x29d   : > { %v5357_v17 = vpop.eup %4756  ;;  %v899_v63 = vsel %vm832_vm1, %v5355_v14, 0.0 }
 0x29e   : > { %v5361_v1 = vpop.eup %4758  ;;  %v893_v5 = vsel %vm832_vm1, %v5357_v17, 0.0 }
 0x29f   : > { %v902_v2 = vsel %vm832_vm1, %v5361_v1, 0.0  ;;  %v5367_v18 = vpop.eup %4760 }
 0x2a0   : > { %v896_v20 = vsel %vm832_vm1, %v5367_v18, 0.0 }
 0x2a9   : > { %1412 = vrot.lane.b32.xlu1 %v5203_v8, %s5030_s30 }
 0x2aa   : > { %1065 = vrot.lane.b32.xlu0 %v5203_v8, %s5029_s25 }
 0x2c9   : > { %900 = vadd.xlane.f32.xlu0 %v899_v63 }
 0x2cd   : > { %903 = vadd.xlane.f32.xlu1 %v902_v2  ;;  %894 = vadd.xlane.f32.xlu0 %v893_v5 }
 0x2d1   : > { %897 = vadd.xlane.f32.xlu1 %v896_v20 }
 0x2e2   : > { %1410 = vrot.lane.b32.xlu1 %v5205_v9, %s5030_s30 }
 0x2e3   : > { %1059 = vrot.lane.b32.xlu0 %v5219_v19, %s5029_s25 }
 0x2e6   : > { %1049 = vrot.lane.b32.xlu1 %v5227_v34, %s5029_s25 }
 0x2e7   : > { %1047 = vrot.lane.b32.xlu0 %v5196_v55, %s5029_s25 }
 0x2ea   : > { %1051 = vrot.lane.b32.xlu1 %v5229_v36, %s5029_s25 }
 0x2eb   : > { %1408 = vrot.lane.b32.xlu0 %v5213_v13, %s5030_s30 }
 0x2ee   : > { %1406 = vrot.lane.b32.xlu1 %v5219_v19, %s5030_s30 }
 0x2ef   : > { %1053 = vrot.lane.b32.xlu0 %v5235_v42, %s5029_s25 }
 0x2f2   : > { %1400 = vrot.lane.b32.xlu1 %v5227_v34, %s5030_s30 }
 0x2f3   : > { %1398 = vrot.lane.b32.xlu0 %v5196_v55, %s5030_s30 }
 0x2f6   : > { %1404 = vrot.lane.b32.xlu1 %v5235_v42, %s5030_s30 }
 0x2f7   : > { %1402 = vrot.lane.b32.xlu0 %v5229_v36, %s5030_s30 }
 0x319   : > { %v889_v23 = vpop.xlane.xlu0 %888 }
 0x31d   : > { %v892_v26 = vpop.xlane.xlu1 %891  ;;  %v883_v27 = vpop.xlane.xlu0 %882 }
 0x31e   : > { %4762 = vrcp.f32 %v892_v26 }
 0x31f   : > { %4764 = vrcp.f32 %v883_v27 }
 0x320   : > { %4766 = vrcp.f32 %v889_v23 }
 0x321   : > { %v886_v28 = vpop.xlane.xlu1 %885  ;;  %v1066_v29 = vpop.permute.xlu0 %1065 }
 0x322   : > { %4768 = vrcp.f32 %v886_v28  ;;  %4654 = vmatprep.subr.msk.bf16.mxu1 %vm742_vm0, %v1066_v29  ;;  %v1089_v16 = vsel %vm742_vm0, %v1066_v29, 0 }
 0x325   : > { %v1413_v30 = vpop.permute.xlu1 %1412 }
 0x326   : > { %4658 = vmatprep.subr.msk.bf16.mxu0 %vm742_vm0, %v1413_v30  ;;  %v1436_v33 = vsel %vm742_vm0, %v1413_v30, 0 }
 0x327   : > { %4435 = vmatpush3.bf16.xpose.msra.mxu0 %v1436_v33 }
 0x32b   : > { %v4763_v35 = vpop.eup %4762 }
 0x32c   : > { %v4765_v37 = vpop.eup %4764  ;;  %v916_v43 = vmul.f32 %v4763_v35, %v5332_v32 }
 0x32d   : > { %v4767_v40 = vpop.eup %4766  ;;  %v913_v44 = vmul.f32 %v4765_v37, %v5328_v31 }
 0x32e   : > { %v915_v46 = vmul.f32 %v4767_v40, %v5324_v52 }
 0x32f   : > { %v4769_v41 = vpop.eup %4768 }
 0x330   : > { %v914_v45 = vmul.f32 %v4769_v41, %v5340_v57  ;;  %v922_v15 = vpack.c.bf16 %v916_v43, %v915_v46 }
 0x332   : > { %v921_v47 = vpack.c.bf16 %v914_v45, %v913_v44 }
 0x334   : > { %4394 = vmatprep.mubr.msk.bf16.mxu1 %vm832_vm1, %v921_v47 }
 0x335   : > { %4395 = vmatmul.mubr.msk.bf16.vlgmr.msra.gmra.mxu1 %vm832_vm1, %v922_v15 }
 0x336   : > { %4403 = vmatpush3.bf16.xpose.msra.mxu1 %v1089_v16 }
 0x337   : > { %4655 = vmatprep.subr.msk.bf16.mxu1 %vm742_vm0, %v1064_v21 }
 0x33e   : > { %4405 = vmatpush3.bf16.xpose.msra.mxu1 %v1086_v49 }
 0x33f   : > { %4656 = vmatprep.subr.msk.bf16.mxu1 %vm742_vm0, %v1062_v22 }
 0x346   : > { %4407 = vmatpush3.bf16.xpose.msra.mxu1 %v1083_v54 }
 0x352   : > { %v901_v52 = vpop.xlane.xlu0 %900 }
 0x356   : > { %v904_v24 = vpop.xlane.xlu1 %903  ;;  %v895_v25 = vpop.xlane.xlu0 %894 }
 0x357   : > { %4770 = vrcp.f32 %v904_v24 }
 0x358   : > { %4772 = vrcp.f32 %v895_v25 }
 0x359   : > { %4774 = vrcp.f32 %v901_v52 }
 0x35a   : > { %v898_v31 = vpop.xlane.xlu1 %897  ;;  %v1060_v32 = vpop.permute.xlu0 %1059 }
 0x35b   : > { %4776 = vrcp.f32 %v898_v31  ;;  %4657 = vmatprep.subr.msk.bf16.mxu1 %vm742_vm0, %v1060_v32  ;;  %v1080_v39 = vsel %vm742_vm0, %v1060_v32, 0 }
 0x35c   : > { %4409 = vmatpush3.bf16.xpose.msra.mxu1 %v1080_v39 }
 0x35e   : > { %v1411_v56 = vpop.permute.xlu1 %1410  ;;  %v1048_v57 = vpop.permute.xlu0 %1047 }
 0x35f   : > { %4659 = vmatprep.subr.msk.bf16.mxu0 %vm742_vm0, %v1411_v56  ;;  %v1433_v58 = vsel %vm742_vm0, %v1411_v56, 0 }
 0x360   : > { %4437 = vmatpush3.bf16.xpose.msra.mxu0 %v1433_v58 }
 0x362   : > { %v1050_v59 = vpop.permute.xlu1 %1049  ;;  %v1409_v60 = vpop.permute.xlu0 %1408 }
 0x363   : > { %4660 = vmatprep.subr.msk.bf16.mxu0 %vm742_vm0, %v1409_v60  ;;  %v1430_v6 = vsel %vm742_vm0, %v1409_v60, 0 }
 0x364   : > { %v4771_v61 = vpop.eup %4770 }
 0x365   : > { %v4773_v62 = vpop.eup %4772  ;;  %v920_v10 = vmul.f32 %v4771_v61, %v5361_v1 }
 0x366   : > { %v1052_v0 = vpop.permute.xlu1 %1051  ;;  %v1054_v3 = vpop.permute.xlu0 %1053  ;;  %v917_v11 = vmul.f32 %v4773_v62, %v5357_v17 }
 0x367   : > { %v4775_v4 = vpop.eup %4774 }
 0x368   : > { %v4777_v7 = vpop.eup %4776  ;;  %4439 = vmatpush3.bf16.xpose.msra.mxu0 %v1430_v6  ;;  %v919_v5 = vmul.f32 %v4775_v4, %v5355_v14 }
 0x369   : > { %v918_v12 = vmul.f32 %v4777_v7, %v5367_v18 }
 0x36a   : > { %v1407_v63 = vpop.permute.xlu1 %1406  ;;  %v1399_v2 = vpop.permute.xlu0 %1398  ;;  %v924_v21 = vpack.c.bf16 %v920_v10, %v919_v5 }
 0x36b   : > { %4661 = vmatprep.subr.msk.bf16.mxu0 %vm742_vm0, %v1407_v63  ;;  %4442 = vmatprep.mubr.msk.bf16.mxu0 %vm742_vm0, %v1399_v2  ;;  %v923_v20 = vpack.c.bf16 %v918_v12, %v917_v11  ;;  %v1427_v17 = vsel %vm742_vm0, %v1407_v63, 0 }
 0x36d   : > { %4398 = vmatprep.mubr.msk.bf16.mxu1 %vm832_vm1, %v923_v20 }
 0x36e   : > { %4399 = vmatmul.mubr.msk.bf16.gmra.mxu1 %vm832_vm1, %v924_v21  ;;  %v1401_v1 = vpop.permute.xlu1 %1400  ;;  %v1403_v18 = vpop.permute.xlu0 %1402 }
 0x36f   : > { %4410 = vmatprep.mubr.msk.bf16.mxu1 %vm742_vm0, %v1048_v57 }
 0x370   : > { %4441 = vmatpush3.bf16.xpose.msra.mxu0 %v1427_v17 }
 0x372   : > { %v1405_v14 = vpop.permute.xlu1 %1404 }
 0x376   : > { %4411 = vmatmul.mubr.msk.bf16.vlgmr.msra.gmra.mxu1 %vm742_vm0, %v1050_v59 }
 0x377   : > { %4414 = vmatprep.mubr.msk.bf16.mxu1 %vm742_vm0, %v1052_v0  ;;  %4443 = vmatmul.mubr.msk.bf16.vlgmr.msra.gmra.mxu0 %vm742_vm0, %v1401_v1 }
 0x378   : > { %4446 = vmatprep.mubr.msk.bf16.mxu0 %vm742_vm0, %v1403_v18 }
 0x37e   : > { %4415 = vmatmul.mubr.msk.bf16.gmra.mxu1 %vm742_vm0, %v1054_v3 }
 0x37f   : > { %4447 = vmatmul.mubr.msk.bf16.gmra.mxu0 %vm742_vm0, %v1405_v14 }
 0x3f5   : > { %v4396_v22 = vpop.f32.mrf.mxu1 }
 0x3f6   : > { %v4082_v23 = vpack.c.bf16 %v4396_v22, %v4396_v22 }
 0x3f7   : > { %v971_v26 = vpop.f32.mrf.mxu1 }
 0x3f8   : > { %1037 = vst.msk [vmem:[#allocation2 + $0x8] sm:$0xf] %vm1034_vm2, %v4082_v23  ;;  %v4080_v27 = vpack.c.bf16 %v971_v26, %v971_v26 }
 0x3f9   : > { %v4397_v28 = vpop.f32.mrf.mxu1 }
 0x3fa   : > { %1035 = vst.msk [vmem:[#allocation2] sm:$0xf] %vm1034_vm2, %v4080_v27  ;;  %v4083_v29 = vpack.c.bf16 %v4397_v28, %v4397_v28 }
 0x3fb   : > { %v974_v30 = vpop.f32.mrf.mxu1 }
 0x3fc   : > { %1038 = vst.msk [vmem:[#allocation2 + $0xc] sm:$0xf] %vm1034_vm2, %v4083_v29  ;;  %v4081_v33 = vpack.c.bf16 %v974_v30, %v974_v30 }
 0x3fe   : > { %1036 = vst.msk [vmem:[#allocation2 + $0x4] sm:$0xf] %vm1034_vm2, %v4081_v33 }
 0x42e   : > { %v4400_v35 = vpop.f32.mrf.mxu1 }
 0x42f   : > { %v4086_v37 = vpack.c.bf16 %v4400_v35, %v4400_v35 }
 0x430   : > { %v987_v40 = vpop.f32.mrf.mxu1 }
 0x431   : > { %1041 = vst.msk [vmem:[#allocation2 + $0x18] sm:$0xf] %vm1034_vm2, %v4086_v37  ;;  %v4084_v41 = vpack.c.bf16 %v987_v40, %v987_v40 }
 0x432   : > { %v4401_v43 = vpop.f32.mrf.mxu1 }
 0x433   : > { %1039 = vst.msk [vmem:[#allocation2 + $0x10] sm:$0xf] %vm1034_vm2, %v4084_v41  ;;  %v4087_v44 = vpack.c.bf16 %v4401_v43, %v4401_v43 }
 0x434   : > { %v990_v45 = vpop.f32.mrf.mxu1 }
 0x435   : > { %1042 = vst.msk [vmem:[#allocation2 + $0x1c] sm:$0xf] %vm1034_vm2, %v4087_v44  ;;  %v4085_v46 = vpack.c.bf16 %v990_v45, %v990_v45 }
 0x436   : > { %v4412_v47 = vpop.f32.mrf.mxu1 }
 0x437   : > { %1040 = vst.msk [vmem:[#allocation2 + $0x14] sm:$0xf] %vm1034_vm2, %v4085_v46  ;;  %v4444_v15 = vpop.f32.mrf.mxu0  ;;  %v5461_v3 = vadd.f32 %v4412_v47, %v5278_v53 }
 0x438   : > { %v1125_v16 = vpop.f32.mrf.mxu1  ;;  %v5443_v24 = vadd.f32 %v4444_v15, %v5278_v53 }
 0x439   : > { %v1472_v49 = vpop.f32.mrf.mxu0  ;;  %v5469_v12 = vadd.f32 %v5278_v53, %v1125_v16  ;;  %v1162_v5 = vsel %vm832_vm1, %v5461_v3, -inf }
 0x43a   : > { %v5440_v54 = vadd.f32 %v5278_v53, %v1472_v49  ;;  %v4413_v31 = vpop.f32.mrf.mxu1  ;;  %v1509_v59 = vsel %vm832_vm1, %v5443_v24, -inf }
 0x43b   : > { %v4445_v52 = vpop.f32.mrf.mxu0  ;;  %v5478_v21 = vadd.f32 %v4413_v31, %v5278_v53  ;;  %v1156_v18 = vsel %vm832_vm1, %v5469_v12, -inf }
 0x43c   : > { %v1503_v25 = vsel %vm832_vm1, %v5440_v54, -inf  ;;  %v5451_v57 = vadd.f32 %v4445_v52, %v5278_v53  ;;  %v1128_v60 = vpop.f32.mrf.mxu1 }
 0x43d   : > { %v1475_v32 = vpop.f32.mrf.mxu0  ;;  %1504 = vmax.xlane.f32.xlu0 %v1503_v25  ;;  %v5472_v63 = vadd.f32 %v5278_v53, %v1128_v60  ;;  %v1165_v27 = vsel %vm832_vm1, %v5478_v21, -inf }
 0x43e   : > { %v5448_v39 = vadd.f32 %v5278_v53, %v1475_v32  ;;  %v1512_v4 = vsel %vm832_vm1, %v5451_v57, -inf  ;;  %v4416_v7 = vpop.f32.mrf.mxu1 }
 0x43f   : > { %v4448_v56 = vpop.f32.mrf.mxu0  ;;  %v1159_v1 = vsel %vm832_vm1, %v5472_v63, -inf  ;;  %v5488_v22 = vadd.f32 %v4416_v7, %v5278_v53 }
 0x440   : > { %v1506_v58 = vsel %vm832_vm1, %v5448_v39, -inf  ;;  %v1141_v20 = vpop.f32.mrf.mxu1  ;;  %v5508_v37 = vadd.f32 %v4448_v56, %v5278_v53 }
 0x441   : > { %1507 = vmax.xlane.f32.xlu1 %v1506_v58  ;;  %1510 = vmax.xlane.f32.xlu0 %v1509_v59  ;;  %v1488_v61 = vpop.f32.mrf.mxu0  ;;  %v5498_v29 = vadd.f32 %v5278_v53, %v1141_v20  ;;  %v1174_v35 = vsel %vm832_vm1, %v5488_v22, -inf }
 0x442   : > { %v5458_v62 = vadd.f32 %v5278_v53, %v1488_v61  ;;  %v4417_v14 = vpop.f32.mrf.mxu1  ;;  %v1521_v43 = vsel %vm832_vm1, %v5508_v37, -inf }
 0x443   : > { %v4449_v0 = vpop.f32.mrf.mxu0  ;;  %v5491_v23 = vadd.f32 %v4417_v14, %v5278_v53  ;;  %v1168_v41 = vsel %vm832_vm1, %v5498_v29, -inf }
 0x444   : > { %v1515_v6 = vsel %vm832_vm1, %v5458_v62, -inf  ;;  %v5481_v17 = vadd.f32 %v4449_v0, %v5278_v53  ;;  %v1144_v28 = vpop.f32.mrf.mxu1 }
 0x445   : > { %1513 = vmax.xlane.f32.xlu1 %v1512_v4  ;;  %v1491_v10 = vpop.f32.mrf.mxu0  ;;  %1516 = vmax.xlane.f32.xlu0 %v1515_v6  ;;  %v5501_v30 = vadd.f32 %v5278_v53, %v1144_v28  ;;  %v1177_v33 = vsel %vm832_vm1, %v5491_v23, -inf }
 0x446   : > { %v1492_v11 = vadd.f32 %v5278_v53, %v1491_v10  ;;  %v1524_v26 = vsel %vm832_vm1, %v5481_v17, -inf }
 0x447   : > { %v1171_v40 = vsel %vm832_vm1, %v5501_v30, -inf }
 0x448   : > { %v1518_v2 = vsel %vm832_vm1, %v1492_v11, -inf }
 0x449   : > { %1519 = vmax.xlane.f32.xlu1 %v1518_v2  ;;  %1163 = vmax.xlane.f32.xlu0 %v1162_v5 }
 0x44d   : > { %1160 = vmax.xlane.f32.xlu1 %v1159_v1  ;;  %1157 = vmax.xlane.f32.xlu0 %v1156_v18 }
 0x451   : > { %1525 = vmax.xlane.f32.xlu1 %v1524_v26  ;;  %1166 = vmax.xlane.f32.xlu0 %v1165_v27 }
 0x455   : > { %1178 = vmax.xlane.f32.xlu1 %v1177_v33  ;;  %1175 = vmax.xlane.f32.xlu0 %v1174_v35 }
 0x459   : > { %1172 = vmax.xlane.f32.xlu1 %v1171_v40  ;;  %1169 = vmax.xlane.f32.xlu0 %v1168_v41 }
 0x45d   : > { %1522 = vmax.xlane.f32.xlu0 %v1521_v43 }
 0x473   : > { %1258 = vrot.lane.b32.xlu0 %v5315_v48, %s5029_s25 }
 0x477   : > { %1254 = vrot.lane.b32.xlu0 %v5321_v51, %s5029_s25 }
 0x47b   : > { %1252 = vrot.lane.b32.xlu0 %v5334_v38, %s5029_s25 }
 0x47f   : > { %1601 = vrot.lane.b32.xlu0 %v5315_v48, %s5030_s30 }
 0x483   : > { %1597 = vrot.lane.b32.xlu0 %v5321_v51, %s5030_s30 }
 0x4c6   : > { %v1505_v53 = vpop.xlane.xlu0 %1504 }
 0x4c7   : > { %v1527_v44 = vsub.f32 %v5440_v54, %v1505_v53 }
 0x4c9   : > { %v1535_v45 = vmul.f32 1.442695, %v1527_v44 }
 0x4ca   : > { %v1508_v46 = vpop.xlane.xlu1 %1507  ;;  %v1511_v47 = vpop.xlane.xlu0 %1510 }
 0x4cb   : > { %4778 = vpow2.f32 %v1535_v45  ;;  %v1528_v15 = vsub.f32 %v5448_v39, %v1508_v46  ;;  %v1529_v16 = vsub.f32 %v5443_v24, %v1511_v47 }
 0x4cd   : > { %v1537_v49 = vmul.f32 1.442695, %v1528_v15  ;;  %v1539_v52 = vmul.f32 1.442695, %v1529_v16 }
 0x4ce   : > { %v1514_v25 = vpop.xlane.xlu1 %1513  ;;  %v5529_v31 = vpop.xlane.xlu0 %1516 }
 0x4cf   : > { %4780 = vpow2.f32 %v1537_v49  ;;  %v1530_v32 = vsub.f32 %v5451_v57, %v1514_v25 }
 0x4d0   : > { %4782 = vpow2.f32 %v1539_v52 }
 0x4d1   : > { %v1541_v56 = vmul.f32 1.442695, %v1530_v32 }
 0x4d2   : > { %v1520_v58 = vpop.xlane.xlu1 %1519  ;;  %v1164_v54 = vpop.xlane.xlu0 %1163 }
 0x4d3   : > { %v1532_v59 = vsub.f32 %v1492_v11, %v1520_v58  ;;  %v1182_v60 = vsub.f32 %v5461_v3, %v1164_v54  ;;  %4784 = vpow2.f32 %v1541_v56  ;;  %v1531_v58 = vsub.f32 %v5458_v62, %v5529_v31 }
 0x4d5   : > { %v1545_v61 = vmul.f32 1.442695, %v1532_v59  ;;  %v1192_v39 = vmul.f32 1.442695, %v1182_v60  ;;  %v1543_v54 = vmul.f32 1.442695, %v1531_v58 }
 0x4d6   : > { %v1158_v0 = vpop.xlane.xlu0 %1157  ;;  %v1161_v11 = vpop.xlane.xlu1 %1160 }
 0x4d7   : > { %4786 = vpow2.f32 %v1545_v61  ;;  %v1180_v24 = vsub.f32 %v5469_v12, %v1158_v0  ;;  %v1181_v61 = vsub.f32 %v5472_v63, %v1161_v11 }
 0x4d8   : > { %v5534_v4 = vpop.eup %4778  ;;  %4788 = vpow2.f32 %v1192_v39 }
 0x4d9   : > { %v1188_v6 = vmul.f32 1.442695, %v1180_v24  ;;  %v1551_v57 = vsel %vm832_vm1, %v5534_v4, 0.0  ;;  %v1190_v0 = vmul.f32 1.442695, %v1181_v61 }
 0x4da   : > { %1552 = vadd.xlane.f32.xlu1 %v1551_v57  ;;  %v1167_v7 = vpop.xlane.xlu0 %1166  ;;  %v1526_v26 = vpop.xlane.xlu1 %1525 }
 0x4db   : > { %4790 = vpow2.f32 %v1188_v6  ;;  %v1534_v41 = vsub.f32 %v5481_v17, %v1526_v26  ;;  %v1183_v59 = vsub.f32 %v5478_v21, %v1167_v7 }
 0x4dc   : > { %v5538_v10 = vpop.eup %4780 }
 0x4dd   : > { %v1554_v3 = vsel %vm832_vm1, %v5538_v10, 0.0  ;;  %v5542_v2 = vpop.eup %4782  ;;  %v1549_v46 = vmul.f32 1.442695, %v1534_v41  ;;  %v1194_v39 = vmul.f32 1.442695, %v1183_v59 }
 0x4de   : > { %1555 = vadd.xlane.f32.xlu1 %v1554_v3  ;;  %v1176_v12 = vpop.xlane.xlu0 %1175  ;;  %v1557_v1 = vsel %vm832_vm1, %v5542_v2, 0.0  ;;  %v1179_v60 = vpop.xlane.xlu1 %1178 }
 0x4df   : > { %v1186_v5 = vsub.f32 %v5488_v22, %v1176_v12  ;;  %v1187_v24 = vsub.f32 %v5491_v23, %v1179_v60 }
 0x4e0   : > { %v5547_v18 = vpop.eup %4784 }
 0x4e1   : > { %v1200_v20 = vmul.f32 1.442695, %v1186_v5  ;;  %v1560_v22 = vsel %vm832_vm1, %v5547_v18, 0.0  ;;  %v1202_v57 = vmul.f32 1.442695, %v1187_v24 }
 0x4e2   : > { %1558 = vadd.xlane.f32.xlu1 %v1557_v1  ;;  %v1170_v14 = vpop.xlane.xlu0 %1169  ;;  %v1173_v6 = vpop.xlane.xlu1 %1172 }
 0x4e3   : > { %v1184_v27 = vsub.f32 %v5498_v29, %v1170_v14  ;;  %4792 = vpow2.f32 %v1200_v20  ;;  %v1185_v62 = vsub.f32 %v5501_v30, %v1173_v6 }
 0x4e4   : > { %v5550_v28 = vpop.eup %4786 }
 0x4e5   : > { %v1196_v33 = vmul.f32 1.442695, %v1184_v27  ;;  %v1566_v35 = vsel %vm832_vm1, %v5550_v28, 0.0  ;;  %v5556_v40 = vpop.eup %4788  ;;  %v1198_v21 = vmul.f32 1.442695, %v1185_v62 }
 0x4e6   : > { %1567 = vadd.xlane.f32.xlu0 %v1566_v35  ;;  %1561 = vadd.xlane.f32.xlu1 %v1560_v22  ;;  %v1523_v43 = vpop.xlane.xlu0 %1522  ;;  %v1210_v44 = vsel %vm832_vm1, %v5556_v40, 0.0 }
 0x4e7   : > { %v1533_v53 = vsub.f32 %v5508_v37, %v1523_v43  ;;  %4794 = vpow2.f32 %v1196_v33 }
 0x4e8   : > { %v5562_v45 = vpop.eup %4790 }
 0x4e9   : > { %v1547_v29 = vmul.f32 1.442695, %v1533_v53  ;;  %v1204_v17 = vsel %vm832_vm1, %v5562_v45, 0.0 }
 0x4ea   : > { %1211 = vadd.xlane.f32.xlu0 %v1210_v44  ;;  %v1259_v47 = vpop.permute.xlu0 %1258 }
 0x4eb   : > { %4796 = vpow2.f32 %v1547_v29  ;;  %4418 = vmatprep.subr.bf16.mxu1 %v1259_v47 }
 0x4ec   : > { %4419 = vmatpush3.bf16.msra.mxu1 %v1259_v47  ;;  %4798 = vpow2.f32 %v1549_v46 }
 0x4ed   : > { %4800 = vpow2.f32 %v1543_v54 }
 0x4ee   : > { %1205 = vadd.xlane.f32.xlu0 %v1204_v17  ;;  %4802 = vpow2.f32 %v1194_v39  ;;  %v1255_v33 = vpop.permute.xlu0 %1254 }
 0x4ef   : > { %4804 = vpow2.f32 %v1190_v0 }
 0x4f0   : > { %v5566_v15 = vpop.eup %4792  ;;  %4806 = vpow2.f32 %v1202_v57 }
 0x4f1   : > { %v1222_v37 = vsel %vm832_vm1, %v5566_v15, 0.0  ;;  %4808 = vpow2.f32 %v1198_v21 }
 0x4f2   : > { %1223 = vadd.xlane.f32.xlu0 %v1222_v37  ;;  %v1253_v22 = vpop.permute.xlu0 %1252 }
 0x4f4   : > { %v5570_v16 = vpop.eup %4794 }
 0x4f5   : > { %v1216_v49 = vsel %vm832_vm1, %v5570_v16, 0.0 }
 0x4f6   : > { %1217 = vadd.xlane.f32.xlu0 %v1216_v49  ;;  %v1602_v41 = vpop.permute.xlu0 %1601 }
 0x4f7   : > { %1256 = vrot.lane.b32.xlu1 %v5317_v50, %s5029_s25 }
 0x4f8   : > { %v5576_v52 = vpop.eup %4796 }
 0x4f9   : > { %v1569_v25 = vsel %vm832_vm1, %v5576_v52, 0.0  ;;  %v5580_v32 = vpop.eup %4798 }
 0x4fa   : > { %1570 = vadd.xlane.f32.xlu0 %v1569_v25  ;;  %v1572_v56 = vsel %vm832_vm1, %v5580_v32, 0.0  ;;  %v5596_v63 = vpop.eup %4800  ;;  %v5624_v43 = vpop.permute.xlu0 %1597 }
 0x4fb   : > { %1599 = vrot.lane.b32.xlu1 %v5317_v50, %s5030_s30  ;;  %v1563_v23 = vsel %vm832_vm1, %v5596_v63, 0.0  ;;  %v4803_v31 = vpop.eup %4802 }
 0x4fc   : > { %v1213_v7 = vsel %vm832_vm1, %v4803_v31, 0.0  ;;  %v4805_v11 = vpop.eup %4804 }
 0x4fd   : > { %v1207_v30 = vsel %vm832_vm1, %v4805_v11, 0.0  ;;  %v5604_v3 = vpop.eup %4806 }
 0x4fe   : > { %1573 = vadd.xlane.f32.xlu0 %v1572_v56  ;;  %v1225_v12 = vsel %vm832_vm1, %v5604_v3, 0.0  ;;  %v5608_v5 = vpop.eup %4808 }
 0x4ff   : > { %v1219_v20 = vsel %vm832_vm1, %v5608_v5, 0.0 }
 0x514   : > { %1755 = vrot.lane.b32.xlu0 %v5203_v8, %s5031_s8 }
 0x518   : > { %1741 = vrot.lane.b32.xlu0 %v5196_v55, %s5031_s8 }
 0x51c   : > { %1745 = vrot.lane.b32.xlu0 %v5229_v36, %s5031_s8 }
 0x51f   : > { %1564 = vadd.xlane.f32.xlu1 %v1563_v23 }
 0x523   : > { %1214 = vadd.xlane.f32.xlu1 %v1213_v7 }
 0x527   : > { %1208 = vadd.xlane.f32.xlu1 %v1207_v30 }
 0x52b   : > { %1226 = vadd.xlane.f32.xlu1 %v1225_v12 }
 0x52f   : > { %1220 = vadd.xlane.f32.xlu1 %v1219_v20 }
 0x540   : > { %1595 = vrot.lane.b32.xlu1 %v5334_v38, %s5030_s30 }
 0x544   : > { %1753 = vrot.lane.b32.xlu1 %v5205_v9, %s5031_s8 }
 0x548   : > { %1751 = vrot.lane.b32.xlu1 %v5213_v13, %s5031_s8 }
 0x54c   : > { %1749 = vrot.lane.b32.xlu1 %v5219_v19, %s5031_s8 }
 0x550   : > { %1743 = vrot.lane.b32.xlu1 %v5227_v34, %s5031_s8 }
 0x554   : > { %1747 = vrot.lane.b32.xlu1 %v5235_v42, %s5031_s8 }
 0x563   : > { %v1553_v1 = vpop.xlane.xlu1 %1552 }
 0x567   : > { %v1556_v14 = vpop.xlane.xlu1 %1555 }
 0x56b   : > { %v1559_v26 = vpop.xlane.xlu1 %1558 }
 0x56f   : > { %v1562_v27 = vpop.xlane.xlu1 %1561  ;;  %v1568_v53 = vpop.xlane.xlu0 %1567 }
 0x573   : > { %v1257_v35 = vpop.permute.xlu1 %1256  ;;  %v1212_v29 = vpop.xlane.xlu0 %1211 }
 0x574   : > { %4420 = vmatprep.subr.bf16.mxu1 %v1257_v35 }
 0x575   : > { %4421 = vmatpush3.bf16.msra.mxu1 %v1257_v35 }
 0x576   : > { %4422 = vmatprep.subr.bf16.mxu1 %v1255_v33 }
 0x577   : > { %v1600_v44 = vpop.permute.xlu1 %1599  ;;  %v1206_v46 = vpop.xlane.xlu0 %1205 }
 0x579   : > { %4423 = vmatpush3.bf16.msra.mxu1 %v1255_v33 }
 0x57a   : > { %4424 = vmatprep.subr.bf16.mxu1 %v1253_v22 }
 0x57b   : > { %v1224_v37 = vpop.xlane.xlu0 %1223 }
 0x57d   : > { %4425 = vmatpush3.bf16.msra.mxu1 %v1253_v22 }
 0x57e   : > { %4450 = vmatprep.subr.bf16.mxu1 %v1602_v41 }
 0x57f   : > { %v1218_v25 = vpop.xlane.xlu0 %1217 }
 0x583   : > { %v1571_v61 = vpop.xlane.xlu0 %1570 }
 0x587   : > { %v1574_v12 = vpop.xlane.xlu0 %1573 }
 0x5a8   : > { %v1565_v47 = vpop.xlane.xlu1 %1564 }
 0x5ac   : > { %v1215_v17 = vpop.xlane.xlu1 %1214 }
 0x5ad   : > { %4810 = vrcp.f32 %v1215_v17 }
 0x5ae   : > { %4812 = vrcp.f32 %v1206_v46 }
 0x5af   : > { %4814 = vrcp.f32 %v1212_v29  ;;  %v1756_v29 = vpop.permute.xlu0 %1755 }
 0x5b0   : > { %v1209_v49 = vpop.xlane.xlu1 %1208 }
 0x5b1   : > { %4816 = vrcp.f32 %v1209_v49 }
 0x5b2   : > { %4818 = vrcp.f32 %v1553_v1 }
 0x5b3   : > { %4820 = vrcp.f32 %v1556_v14  ;;  %v1742_v49 = vpop.permute.xlu0 %1741 }
 0x5b4   : > { %v1227_v56 = vpop.xlane.xlu1 %1226 }
 0x5b5   : > { %4822 = vrcp.f32 %v1227_v56 }
 0x5b6   : > { %4824 = vrcp.f32 %v1218_v25 }
 0x5b7   : > { %4826 = vrcp.f32 %v1224_v37 }
 0x5b8   : > { %v1221_v58 = vpop.xlane.xlu1 %1220 }
 0x5b9   : > { %4828 = vrcp.f32 %v1221_v58 }
 0x5ba   : > { %v4811_v54 = vpop.eup %4810  ;;  %4830 = vrcp.f32 %v1562_v27 }
 0x5bb   : > { %v4813_v59 = vpop.eup %4812  ;;  %v1239_v0 = vmul.f32 %v4811_v54, %v4803_v31  ;;  %4832 = vrcp.f32 %v1565_v47 }
 0x5bc   : > { %v4815_v60 = vpop.eup %4814  ;;  %v1236_v24 = vmul.f32 %v4813_v59, %v5562_v45  ;;  %4834 = vrcp.f32 %v1559_v26  ;;  %v1746_v59 = vpop.permute.xlu0 %1745 }
 0x5bd   : > { %v1238_v57 = vmul.f32 %v4815_v60, %v5556_v40  ;;  %4836 = vrcp.f32 %v1568_v53 }
 0x5be   : > { %v4817_v39 = vpop.eup %4816  ;;  %4838 = vrcp.f32 %v1574_v12 }
 0x5bf   : > { %v1237_v6 = vmul.f32 %v4817_v39, %v4805_v11  ;;  %v4819_v62 = vpop.eup %4818  ;;  %v1245_v7 = vpack.c.bf16 %v1239_v0, %v1238_v57  ;;  %4840 = vrcp.f32 %v1571_v61 }
 0x5c0   : > { %v4821_v23 = vpop.eup %4820  ;;  %v1583_v33 = vmul.f32 %v4819_v62, %v5534_v4 }
 0x5c1   : > { %v1244_v21 = vpack.c.bf16 %v1237_v6, %v1236_v24  ;;  %v1584_v14 = vmul.f32 %v4821_v23, %v5538_v10 }
 0x5c2   : > { %v4823_v30 = vpop.eup %4822 }
 0x5c3   : > { %4426 = vmatprep.mubr.msk.bf16.mxu1 %vm832_vm1, %v1244_v21  ;;  %v4825_v20 = vpop.eup %4824  ;;  %v1243_v45 = vmul.f32 %v4823_v30, %v5604_v3  ;;  %v1591_v3 = vpack.c.bf16 %v1584_v14, %v1583_v33  ;;  %v5695_v14 = vld [vmem:[%s5275_s27] ss:$0 sm:$0xff] }
 0x5c4   : > { %4427 = vmatmul.mubr.msk.bf16.vlgmr.msra.gmra.mxu1 %vm832_vm1, %v1245_v7  ;;  %v4827_v31 = vpop.eup %4826  ;;  %v1240_v40 = vmul.f32 %v4825_v20, %v5570_v16 }
 0x5c5   : > { %4451 = vmatpush3.bf16.msra.mxu1 %v1602_v41  ;;  %v1242_v26 = vmul.f32 %v4827_v31, %v5566_v15 }
 0x5c6   : > { %v4829_v1 = vpop.eup %4828  ;;  %4452 = vmatprep.subr.bf16.mxu1 %v1600_v44 }
 0x5c7   : > { %v1241_v11 = vmul.f32 %v4829_v1, %v5608_v5  ;;  %v1247_v35 = vpack.c.bf16 %v1243_v45, %v1242_v26  ;;  %v4831_v22 = vpop.eup %4830  ;;  %v1596_v5 = vpop.permute.xlu1 %1595 }
 0x5c8   : > { %v4833_v41 = vpop.eup %4832  ;;  %v1586_v15 = vmul.f32 %v4831_v22, %v5547_v18 }
 0x5c9   : > { %4453 = vmatpush3.bf16.msra.mxu1 %v1600_v44  ;;  %v1246_v27 = vpack.c.bf16 %v1241_v11, %v1240_v40  ;;  %v4835_v16 = vpop.eup %4834  ;;  %v1587_v4 = vmul.f32 %v4833_v41, %v5596_v63 }
 0x5ca   : > { %4454 = vmatprep.subr.bf16.mxu1 %v5624_v43  ;;  %v4837_v10 = vpop.eup %4836  ;;  %v1585_v53 = vmul.f32 %v4835_v16, %v5542_v2 }
 0x5cb   : > { %4430 = vmatprep.mubr.msk.bf16.mxu1 %vm832_vm1, %v1246_v27  ;;  %v1588_v44 = vmul.f32 %v4837_v10, %v5550_v28  ;;  %v4839_v47 = vpop.eup %4838  ;;  %v1754_v18 = vpop.permute.xlu1 %1753 }
 0x5cc   : > { %4431 = vmatmul.mubr.msk.bf16.gmra.mxu1 %vm832_vm1, %v1247_v35  ;;  %v1592_v46 = vpack.c.bf16 %v1586_v15, %v1585_v53  ;;  %v4841_v37 = vpop.eup %4840  ;;  %v1590_v2 = vmul.f32 %v4839_v47, %v5580_v32  ;;  %v1776_v25 = vsel %vm742_vm0, %v1754_v18, 0 }
 0x5cd   : > { %4455 = vmatpush3.bf16.msra.mxu1 %v5624_v43  ;;  %4458 = vmatprep.mubr.msk.bf16.mxu1 %vm832_vm1, %v1591_v3  ;;  %v1593_v17 = vpack.c.bf16 %v1588_v44, %v1587_v4  ;;  %v1779_v43 = vsel %vm742_vm0, %v1756_v29, 0  ;;  %v1589_v28 = vmul.f32 %v4841_v37, %v5576_v52 }
 0x5ce   : > { %4456 = vmatprep.subr.bf16.mxu1 %v1596_v5 }
 0x5cf   : > { %v1594_v63 = vpack.c.bf16 %v1590_v2, %v1589_v28  ;;  %v1752_v56 = vpop.permute.xlu1 %1751 }
 0x5d0   : > { %v1773_v58 = vsel %vm742_vm0, %v1752_v56, 0 }
 0x5d1   : > { %4457 = vmatpush3.bf16.msra.mxu1 %v1596_v5 }
 0x5d2   : > { %4662 = vmatprep.subr.msk.bf16.mxu1 %vm742_vm0, %v1756_v29 }
 0x5d3   : > { %v1750_v54 = vpop.permute.xlu1 %1749 }
 0x5d4   : > { %4459 = vmatmul.mubr.msk.bf16.vlgmr.msra.gmra.mxu1 %vm832_vm1, %v1592_v46  ;;  %v1770_v52 = vsel %vm742_vm0, %v1750_v54, 0 }
 0x5d5   : > { %4467 = vmatpush3.bf16.xpose.msra.mxu1 %v1779_v43  ;;  %4462 = vmatprep.mubr.msk.bf16.mxu1 %vm832_vm1, %v1593_v17 }
 0x5d6   : > { %4663 = vmatprep.subr.msk.bf16.mxu1 %vm742_vm0, %v1754_v18 }
 0x5d7   : > { %v1744_v32 = vpop.permute.xlu1 %1743 }
 0x5db   : > { %v1748_v60 = vpop.permute.xlu1 %1747 }
 0x5dc   : > { %4463 = vmatmul.mubr.msk.bf16.gmra.mxu1 %vm832_vm1, %v1594_v63 }
 0x5dd   : > { %4469 = vmatpush3.bf16.xpose.msra.mxu1 %v1776_v25  ;;  %4474 = vmatprep.mubr.msk.bf16.mxu1 %vm742_vm0, %v1742_v49 }
 0x5de   : > { %4664 = vmatprep.subr.msk.bf16.mxu1 %vm742_vm0, %v1752_v56 }
 0x5e5   : > { %4471 = vmatpush3.bf16.xpose.msra.mxu1 %v1773_v58 }
 0x5e6   : > { %4665 = vmatprep.subr.msk.bf16.mxu1 %vm742_vm0, %v1750_v54 }
 0x5ed   : > { %4473 = vmatpush3.bf16.xpose.msra.mxu1 %v1770_v52 }
 0x5f4   : > { %4475 = vmatmul.mubr.msk.bf16.vlgmr.msra.gmra.mxu1 %vm742_vm0, %v1744_v32 }
 0x5f5   : > { %4478 = vmatprep.mubr.msk.bf16.mxu1 %vm742_vm0, %v1746_v59 }
 0x5fc   : > { %4479 = vmatmul.mubr.msk.bf16.gmra.mxu1 %vm742_vm0, %v1748_v60 }
 0x684   : > { %v5662_v61 = vpop.f32.mrf.mxu1 }
 0x686   : > { %v5664_v39 = vpop.f32.mrf.mxu1 }
 0x688   : > { %v5666_v0 = vpop.f32.mrf.mxu1 }
 0x68a   : > { %v5668_v24 = vpop.f32.mrf.mxu1 }
 0x68c   : > { %v5670_v6 = vpop.f32.mrf.mxu1 }
 0x68e   : > { %v5672_v57 = vpop.f32.mrf.mxu1 }
 0x690   : > { %v5674_v62 = vpop.f32.mrf.mxu1 }
 0x691   : > { %6430 = vst [vmem:[#allocation3_spill] sm:$0xff] %v5674_v62 }
 0x692   : > { %v5676_v21 = vpop.f32.mrf.mxu1 }
 0x693   : > { %6431 = vst [vmem:[#allocation4_spill] sm:$0xff] %v5676_v21 }
 0x694   : > { %v5678_v23 = vpop.f32.mrf.mxu1 }
 0x696   : > { %v5680_v7 = vpop.f32.mrf.mxu1 }
 0x698   : > { %v5682_v30 = vpop.f32.mrf.mxu1 }
 0x69a   : > { %v5684_v12 = vpop.f32.mrf.mxu1 }
 0x69c   : > { %v5686_v20 = vpop.f32.mrf.mxu1 }
 0x69e   : > { %v5688_v31 = vpop.f32.mrf.mxu1 }
 0x6a0   : > { %v5690_v1 = vpop.f32.mrf.mxu1 }
 0x6a1   : > { %6432 = vst [vmem:[#allocation5_spill] sm:$0xff] %v5690_v1 }
 0x6a2   : > { %v5692_v45 = vpop.f32.mrf.mxu1 }
 0x6a3   : > { %6433 = vst [vmem:[#allocation6_spill] sm:$0xff] %v5692_v45 }
 0x6b4   : > { %v4476_v40 = vpop.f32.mrf.mxu1 }
 0x6b5   : > { %v1824_v33 = vadd.f32 %v5695_v14, %v4476_v40 }
 0x6b6   : > { %v1815_v11 = vpop.f32.mrf.mxu1 }
 0x6b7   : > { %v1816_v26 = vadd.f32 %v5695_v14, %v1815_v11  ;;  %v1852_v10 = vsel %vm832_vm1, %v1824_v33, -inf }
 0x6b8   : > { %v4477_v27 = vpop.f32.mrf.mxu1 }
 0x6b9   : > { %v1846_v35 = vsel %vm832_vm1, %v1816_v26, -inf  ;;  %v1827_v16 = vadd.f32 %v5695_v14, %v4477_v27 }
 0x6ba   : > { %v1818_v22 = vpop.f32.mrf.mxu1  ;;  %1847 = vmax.xlane.f32.xlu0 %v1846_v35 }
 0x6bb   : > { %v1819_v3 = vadd.f32 %v5695_v14, %v1818_v22  ;;  %v1855_v44 = vsel %vm832_vm1, %v1827_v16, -inf }
 0x6bc   : > { %v4480_v41 = vpop.f32.mrf.mxu1 }
 0x6bd   : > { %v1849_v5 = vsel %vm832_vm1, %v1819_v3, -inf  ;;  %v1840_v53 = vadd.f32 %v5695_v14, %v4480_v41 }
 0x6be   : > { %1850 = vmax.xlane.f32.xlu1 %v1849_v5  ;;  %1853 = vmax.xlane.f32.xlu0 %v1852_v10  ;;  %v1831_v15 = vpop.f32.mrf.mxu1 }
 0x6bf   : > { %v1832_v43 = vadd.f32 %v5695_v14, %v1831_v15  ;;  %v1864_v37 = vsel %vm832_vm1, %v1840_v53, -inf }
 0x6c0   : > { %v4481_v4 = vpop.f32.mrf.mxu1 }
 0x6c1   : > { %v1843_v29 = vadd.f32 %v5695_v14, %v4481_v4  ;;  %v1858_v2 = vsel %vm832_vm1, %v1832_v43, -inf }
 0x6c2   : > { %1856 = vmax.xlane.f32.xlu0 %v1855_v44  ;;  %v1834_v46 = vpop.f32.mrf.mxu1 }
 0x6c3   : > { %v1835_v47 = vadd.f32 %v5695_v14, %v1834_v46  ;;  %v1867_v17 = vsel %vm832_vm1, %v1843_v29, -inf }
 0x6c4   : > { %1868 = vmax.xlane.f32.xlu1 %v1867_v17 }
 0x6c5   : > { %v1861_v18 = vsel %vm832_vm1, %v1835_v47, -inf }
 0x6c6   : > { %1865 = vmax.xlane.f32.xlu0 %v1864_v37 }
 0x6c8   : > { %1862 = vmax.xlane.f32.xlu1 %v1861_v18 }
 0x6ca   : > { %1859 = vmax.xlane.f32.xlu0 %v1858_v2 }
 0x6d9   : > { %1942 = vrot.lane.b32.xlu1 %v5317_v50, %s5031_s8 }
 0x6dd   : > { %1940 = vrot.lane.b32.xlu1 %v5321_v51, %s5031_s8 }
 0x6e0   : > { %1944 = vrot.lane.b32.xlu0 %v5315_v48, %s5031_s8 }
 0x6e1   : > { %1938 = vrot.lane.b32.xlu1 %v5334_v38, %s5031_s8 }
 0x743   : > { %v1848_v28 = vpop.xlane.xlu0 %1847 }
 0x744   : > { %v1870_v63 = vsub.f32 %v1816_v26, %v1848_v28 }
 0x746   : > { %v1878_v52 = vmul.f32 1.442695, %v1870_v63 }
 0x747   : > { %v1851_v49 = vpop.xlane.xlu1 %1850  ;;  %v1854_v25 = vpop.xlane.xlu0 %1853 }
 0x748   : > { %v1872_v56 = vsub.f32 %v1824_v33, %v1854_v25  ;;  %v1871_v58 = vsub.f32 %v1819_v3, %v1851_v49 }
 0x74a   : > { %v1882_v54 = vmul.f32 1.442695, %v1872_v56  ;;  %v1880_v40 = vmul.f32 1.442695, %v1871_v58 }
 0x74b   : > { %v1857_v32 = vpop.xlane.xlu0 %1856 }
 0x74c   : > { %v1873_v59 = vsub.f32 %v1827_v16, %v1857_v32  ;;  %4842 = vpow2.f32 %v1882_v54 }
 0x74d   : > { %v1869_v60 = vpop.xlane.xlu1 %1868  ;;  %4844 = vpow2.f32 %v1878_v52 }
 0x74e   : > { %v1884_v11 = vmul.f32 1.442695, %v1873_v59  ;;  %v1877_v27 = vsub.f32 %v1843_v29, %v1869_v60 }
 0x74f   : > { %v1866_v35 = vpop.xlane.xlu0 %1865 }
 0x750   : > { %4846 = vpow2.f32 %v1884_v11  ;;  %v1876_v22 = vsub.f32 %v1840_v53, %v1866_v35  ;;  %v1892_v5 = vmul.f32 1.442695, %v1877_v27 }
 0x751   : > { %v1863_v41 = vpop.xlane.xlu1 %1862  ;;  %4848 = vpow2.f32 %v1880_v40 }
 0x752   : > { %v1890_v26 = vmul.f32 1.442695, %v1876_v22  ;;  %v1875_v10 = vsub.f32 %v1835_v47, %v1863_v41 }
 0x753   : > { %v1860_v33 = vpop.xlane.xlu0 %1859 }
 0x754   : > { %4850 = vpow2.f32 %v1890_v26  ;;  %v1874_v3 = vsub.f32 %v1832_v43, %v1860_v33  ;;  %v1888_v16 = vmul.f32 1.442695, %v1875_v10 }
 0x755   : > { %v1943_v15 = vpop.permute.xlu1 %1942  ;;  %4852 = vpow2.f32 %v1892_v5 }
 0x756   : > { %v1886_v4 = vmul.f32 1.442695, %v1874_v3 }
 0x757   : > { %v1945_v44 = vpop.permute.xlu0 %1944 }
 0x758   : > { %4854 = vpow2.f32 %v1886_v4  ;;  %4482 = vmatprep.subr.bf16.mxu0 %v1945_v44 }
 0x759   : > { %4483 = vmatpush3.bf16.msra.mxu0 %v1945_v44  ;;  %v5721_v29 = vpop.eup %4842  ;;  %4856 = vpow2.f32 %v1888_v16  ;;  %v1941_v53 = vpop.permute.xlu1 %1940 }
 0x75a   : > { %4484 = vmatprep.subr.bf16.mxu0 %v1943_v15  ;;  %v1900_v46 = vsel %vm832_vm1, %v5721_v29, 0.0  ;;  %v4845_v47 = vpop.eup %4844 }
 0x75b   : > { %1901 = vadd.xlane.f32.xlu0 %v1900_v46  ;;  %v1894_v18 = vsel %vm832_vm1, %v4845_v47, 0.0 }
 0x75d   : > { %v4847_v17 = vpop.eup %4846  ;;  %4485 = vmatpush3.bf16.msra.mxu0 %v1943_v15  ;;  %v1939_v28 = vpop.permute.xlu1 %1938 }
 0x75e   : > { %4486 = vmatprep.subr.bf16.mxu0 %v1941_v53  ;;  %v1903_v43 = vsel %vm832_vm1, %v4847_v17, 0.0  ;;  %v4849_v37 = vpop.eup %4848 }
 0x75f   : > { %1904 = vadd.xlane.f32.xlu1 %v1903_v43  ;;  %1895 = vadd.xlane.f32.xlu0 %v1894_v18  ;;  %v1897_v63 = vsel %vm832_vm1, %v4849_v37, 0.0 }
 0x761   : > { %v5727_v2 = vpop.eup %4850  ;;  %4487 = vmatpush3.bf16.msra.mxu0 %v1941_v53 }
 0x762   : > { %4488 = vmatprep.subr.bf16.mxu0 %v1939_v28  ;;  %v1912_v49 = vsel %vm832_vm1, %v5727_v2, 0.0  ;;  %v4853_v25 = vpop.eup %4852 }
 0x763   : > { %1898 = vadd.xlane.f32.xlu1 %v1897_v63  ;;  %1913 = vadd.xlane.f32.xlu0 %v1912_v49  ;;  %v1915_v54 = vsel %vm832_vm1, %v4853_v25, 0.0 }
 0x765   : > { %v4855_v56 = vpop.eup %4854  ;;  %4489 = vmatpush3.bf16.msra.mxu0 %v1939_v28 }
 0x766   : > { %v1906_v58 = vsel %vm832_vm1, %v4855_v56, 0.0  ;;  %v4857_v52 = vpop.eup %4856 }
 0x767   : > { %1907 = vadd.xlane.f32.xlu1 %v1906_v58  ;;  %1916 = vadd.xlane.f32.xlu0 %v1915_v54  ;;  %v1909_v32 = vsel %vm832_vm1, %v4857_v52, 0.0 }
 0x76b   : > { %1910 = vadd.xlane.f32.xlu0 %v1909_v32 }
 0x778   : > { %2096 = vrot.lane.b32.xlu1 %v5205_v9, %s5032_s9 }
 0x77c   : > { %2094 = vrot.lane.b32.xlu1 %v5213_v13, %s5032_s9 }
 0x780   : > { %2092 = vrot.lane.b32.xlu1 %v5219_v19, %s5032_s9 }
 0x781   : > { %2098 = vrot.lane.b32.xlu0 %v5203_v8, %s5032_s9 }
 0x784   : > { %2086 = vrot.lane.b32.xlu1 %v5227_v34, %s5032_s9 }
 0x785   : > { %2084 = vrot.lane.b32.xlu0 %v5196_v55, %s5032_s9 }
 0x788   : > { %2090 = vrot.lane.b32.xlu1 %v5235_v42, %s5032_s9 }
 0x789   : > { %2088 = vrot.lane.b32.xlu0 %v5229_v36, %s5032_s9 }
 0x7e4   : > { %v1902_v59 = vpop.xlane.xlu0 %1901 }
 0x7e8   : > { %v1905_v60 = vpop.xlane.xlu1 %1904  ;;  %v1896_v40 = vpop.xlane.xlu0 %1895 }
 0x7e9   : > { %4858 = vrcp.f32 %v1905_v60 }
 0x7ea   : > { %4860 = vrcp.f32 %v1896_v40 }
 0x7eb   : > { %4862 = vrcp.f32 %v1902_v59 }
 0x7ec   : > { %v1899_v11 = vpop.xlane.xlu1 %1898  ;;  %v1914_v27 = vpop.xlane.xlu0 %1913 }
 0x7ed   : > { %4864 = vrcp.f32 %v1899_v11 }
 0x7f0   : > { %v1908_v35 = vpop.xlane.xlu1 %1907  ;;  %v1917_v22 = vpop.xlane.xlu0 %1916 }
 0x7f1   : > { %4866 = vrcp.f32 %v1917_v22 }
 0x7f2   : > { %4868 = vrcp.f32 %v1908_v35 }
 0x7f3   : > { %4870 = vrcp.f32 %v1914_v27 }
 0x7f4   : > { %v1911_v41 = vpop.xlane.xlu0 %1910  ;;  %v2097_v63 = vpop.permute.xlu1 %2096 }
 0x7f5   : > { %4872 = vrcp.f32 %v1911_v41  ;;  %v2119_v60 = vsel %vm742_vm0, %v2097_v63, 0 }
 0x7f6   : > { %v4859_v26 = vpop.eup %4858 }
 0x7f7   : > { %v4861_v5 = vpop.eup %4860  ;;  %v1929_v15 = vmul.f32 %v4859_v26, %v4847_v17 }
 0x7f8   : > { %v4863_v10 = vpop.eup %4862  ;;  %v2099_v33 = vpop.permute.xlu0 %2098  ;;  %v1926_v4 = vmul.f32 %v4861_v5, %v4845_v47 }
 0x7f9   : > { %4666 = vmatprep.subr.msk.bf16.mxu0 %vm742_vm0, %v2099_v33  ;;  %v1928_v44 = vmul.f32 %v4863_v10, %v5721_v29  ;;  %v2122_v18 = vsel %vm742_vm0, %v2099_v33, 0  ;;  %v2095_v40 = vpop.permute.xlu1 %2094 }
 0x7fa   : > { %v4865_v3 = vpop.eup %4864 }
 0x7fb   : > { %v1927_v16 = vmul.f32 %v4865_v3, %v4849_v37  ;;  %v1935_v46 = vpack.c.bf16 %v1929_v15, %v1928_v44 }
 0x7fc   : > { %v2085_v59 = vpop.permute.xlu0 %2084 }
 0x7fd   : > { %v1934_v53 = vpack.c.bf16 %v1927_v16, %v1926_v4 }
 0x7fe   : > { %v4867_v43 = vpop.eup %4866 }
 0x7ff   : > { %4490 = vmatprep.mubr.msk.bf16.mxu0 %vm832_vm1, %v1934_v53  ;;  %v4869_v28 = vpop.eup %4868  ;;  %v1933_v47 = vmul.f32 %v4867_v43, %v4853_v25  ;;  %v2116_v25 = vsel %vm742_vm0, %v2095_v40, 0 }
 0x800   : > { %4491 = vmatmul.mubr.msk.bf16.vlgmr.msra.gmra.mxu0 %vm832_vm1, %v1935_v46  ;;  %v4871_v49 = vpop.eup %4870  ;;  %v1930_v37 = vmul.f32 %v4869_v28, %v4855_v56  ;;  %v2093_v56 = vpop.permute.xlu1 %2092 }
 0x801   : > { %4499 = vmatpush3.bf16.xpose.msra.mxu0 %v2122_v18  ;;  %v1932_v29 = vmul.f32 %v4871_v49, %v5727_v2  ;;  %v2113_v2 = vsel %vm742_vm0, %v2093_v56, 0  ;;  %v2089_v11 = vpop.permute.xlu0 %2088 }
 0x802   : > { %4667 = vmatprep.subr.msk.bf16.mxu0 %vm742_vm0, %v2097_v63  ;;  %v4873_v17 = vpop.eup %4872 }
 0x803   : > { %v1931_v58 = vmul.f32 %v4873_v17, %v4857_v52  ;;  %v1937_v32 = vpack.c.bf16 %v1933_v47, %v1932_v29 }
 0x804   : > { %v2087_v52 = vpop.permute.xlu1 %2086 }
 0x805   : > { %v1936_v54 = vpack.c.bf16 %v1931_v58, %v1930_v37 }
 0x807   : > { %4494 = vmatprep.mubr.msk.bf16.mxu0 %vm832_vm1, %v1936_v54 }
 0x808   : > { %4495 = vmatmul.mubr.msk.bf16.gmra.mxu0 %vm832_vm1, %v1937_v32  ;;  %v2091_v27 = vpop.permute.xlu1 %2090 }
 0x809   : > { %4501 = vmatpush3.bf16.xpose.msra.mxu0 %v2119_v60  ;;  %4506 = vmatprep.mubr.msk.bf16.mxu0 %vm742_vm0, %v2085_v59 }
 0x80a   : > { %4668 = vmatprep.subr.msk.bf16.mxu0 %vm742_vm0, %v2095_v40 }
 0x811   : > { %4503 = vmatpush3.bf16.xpose.msra.mxu0 %v2116_v25 }
 0x812   : > { %4669 = vmatprep.subr.msk.bf16.mxu0 %vm742_vm0, %v2093_v56 }
 0x819   : > { %4505 = vmatpush3.bf16.xpose.msra.mxu0 %v2113_v2 }
 0x820   : > { %4507 = vmatmul.mubr.msk.bf16.vlgmr.msra.gmra.mxu0 %vm742_vm0, %v2087_v52 }
 0x821   : > { %4510 = vmatprep.mubr.msk.bf16.mxu0 %vm742_vm0, %v2089_v11 }
 0x828   : > { %4511 = vmatmul.mubr.msk.bf16.gmra.mxu0 %vm742_vm0, %v2091_v27 }
 0x8c0   : > { %v5769_v35 = vpop.f32.mrf.mxu0 }
 0x8c2   : > { %v5771_v22 = vpop.f32.mrf.mxu0 }
 0x8c4   : > { %v5773_v41 = vpop.f32.mrf.mxu0 }
 0x8c6   : > { %v5775_v26 = vpop.f32.mrf.mxu0 }
 0x8c8   : > { %v5777_v5 = vpop.f32.mrf.mxu0 }
 0x8ca   : > { %v5779_v10 = vpop.f32.mrf.mxu0 }
 0x8cc   : > { %v5781_v33 = vpop.f32.mrf.mxu0 }
 0x8cd   : > { %6434 = vst [vmem:[#allocation7_spill] sm:$0xff] %v5781_v33 }
 0x8ce   : > { %v5783_v3 = vpop.f32.mrf.mxu0 }
 0x8cf   : > { %6435 = vst [vmem:[#allocation8_spill] sm:$0xff] %v5783_v3 }
 0x8e0   : > { %v4508_v15 = vpop.f32.mrf.mxu0 }
 0x8e1   : > { %v2167_v53 = vadd.f32 %v5695_v14, %v4508_v15 }
 0x8e2   : > { %v2158_v4 = vpop.f32.mrf.mxu0 }
 0x8e3   : > { %v2159_v16 = vadd.f32 %v5695_v14, %v2158_v4  ;;  %v2195_v17 = vsel %vm832_vm1, %v2167_v53, -inf }
 0x8e4   : > { %v4509_v44 = vpop.f32.mrf.mxu0 }
 0x8e5   : > { %v2189_v46 = vsel %vm832_vm1, %v2159_v16, -inf  ;;  %v2170_v63 = vadd.f32 %v5695_v14, %v4509_v44 }
 0x8e6   : > { %v2161_v43 = vpop.f32.mrf.mxu0  ;;  %2190 = vmax.xlane.f32.xlu0 %v2189_v46 }
 0x8e7   : > { %v2162_v18 = vadd.f32 %v5695_v14, %v2161_v43  ;;  %v2198_v54 = vsel %vm832_vm1, %v2170_v63, -inf }
 0x8e8   : > { %v4512_v28 = vpop.f32.mrf.mxu0 }
 0x8e9   : > { %v2192_v49 = vsel %vm832_vm1, %v2162_v18, -inf  ;;  %v2183_v58 = vadd.f32 %v5695_v14, %v4512_v28 }
 0x8ea   : > { %2193 = vmax.xlane.f32.xlu1 %v2192_v49  ;;  %2196 = vmax.xlane.f32.xlu0 %v2195_v17  ;;  %v2174_v47 = vpop.f32.mrf.mxu0 }
 0x8eb   : > { %v2175_v40 = vadd.f32 %v5695_v14, %v2174_v47  ;;  %v2207_v25 = vsel %vm832_vm1, %v2183_v58, -inf }
 0x8ec   : > { %v4513_v37 = vpop.f32.mrf.mxu0 }
 0x8ed   : > { %v2186_v29 = vadd.f32 %v5695_v14, %v4513_v37  ;;  %v2201_v2 = vsel %vm832_vm1, %v2175_v40, -inf }
 0x8ee   : > { %2199 = vmax.xlane.f32.xlu0 %v2198_v54  ;;  %v2177_v32 = vpop.f32.mrf.mxu0 }
 0x8ef   : > { %v2178_v59 = vadd.f32 %v5695_v14, %v2177_v32  ;;  %v2210_v60 = vsel %vm832_vm1, %v2186_v29, -inf }
 0x8f0   : > { %2211 = vmax.xlane.f32.xlu1 %v2210_v60 }
 0x8f1   : > { %v2204_v56 = vsel %vm832_vm1, %v2178_v59, -inf }
 0x8f2   : > { %2208 = vmax.xlane.f32.xlu0 %v2207_v25 }
 0x8f4   : > { %2205 = vmax.xlane.f32.xlu1 %v2204_v56 }
 0x8f6   : > { %2202 = vmax.xlane.f32.xlu0 %v2201_v2 }
 0x905   : > { %2285 = vrot.lane.b32.xlu1 %v5317_v50, %s5032_s9 }
 0x909   : > { %2283 = vrot.lane.b32.xlu1 %v5321_v51, %s5032_s9 }
 0x90c   : > { %2287 = vrot.lane.b32.xlu0 %v5315_v48, %s5032_s9 }
 0x90d   : > { %2281 = vrot.lane.b32.xlu1 %v5334_v38, %s5032_s9 }
 0x96f   : > { %v2191_v52 = vpop.xlane.xlu0 %2190 }
 0x970   : > { %v2213_v11 = vsub.f32 %v2159_v16, %v2191_v52 }
 0x972   : > { %v2221_v43 = vmul.f32 1.442695, %v2213_v11 }
 0x973   : > { %v2194_v27 = vpop.xlane.xlu1 %2193  ;;  %v2197_v15 = vpop.xlane.xlu0 %2196 }
 0x974   : > { %v2215_v4 = vsub.f32 %v2167_v53, %v2197_v15  ;;  %v2214_v44 = vsub.f32 %v2162_v18, %v2194_v27 }
 0x976   : > { %v2225_v46 = vmul.f32 1.442695, %v2215_v4  ;;  %v2223_v47 = vmul.f32 1.442695, %v2214_v44 }
 0x977   : > { %v2200_v28 = vpop.xlane.xlu0 %2199 }
 0x978   : > { %v2216_v49 = vsub.f32 %v2170_v63, %v2200_v28  ;;  %4874 = vpow2.f32 %v2225_v46 }
 0x979   : > { %v2212_v17 = vpop.xlane.xlu1 %2211  ;;  %4876 = vpow2.f32 %v2221_v43 }
 0x97a   : > { %v2227_v37 = vmul.f32 1.442695, %v2216_v49  ;;  %v2220_v54 = vsub.f32 %v2186_v29, %v2212_v17 }
 0x97b   : > { %v2209_v32 = vpop.xlane.xlu0 %2208 }
 0x97c   : > { %4878 = vpow2.f32 %v2227_v37  ;;  %v2219_v60 = vsub.f32 %v2183_v58, %v2209_v32  ;;  %v2235_v56 = vmul.f32 1.442695, %v2220_v54 }
 0x97d   : > { %v2206_v25 = vpop.xlane.xlu1 %2205  ;;  %4880 = vpow2.f32 %v2223_v47 }
 0x97e   : > { %v2233_v16 = vmul.f32 1.442695, %v2219_v60  ;;  %v2218_v2 = vsub.f32 %v2178_v59, %v2206_v25 }
 0x97f   : > { %v2203_v53 = vpop.xlane.xlu0 %2202 }
 0x980   : > { %4882 = vpow2.f32 %v2233_v16  ;;  %v2217_v18 = vsub.f32 %v2175_v40, %v2203_v53  ;;  %v2231_v63 = vmul.f32 1.442695, %v2218_v2 }
 0x981   : > { %v2286_v52 = vpop.permute.xlu1 %2285  ;;  %4884 = vpow2.f32 %v2235_v56 }
 0x982   : > { %v2229_v11 = vmul.f32 1.442695, %v2217_v18 }
 0x983   : > { %v2288_v27 = vpop.permute.xlu0 %2287 }
 0x984   : > { %4886 = vpow2.f32 %v2229_v11  ;;  %4514 = vmatprep.subr.bf16.mxu1 %v2288_v27 }
 0x985   : > { %4515 = vmatpush3.bf16.msra.mxu1 %v2288_v27  ;;  %v5809_v29 = vpop.eup %4874  ;;  %4888 = vpow2.f32 %v2231_v63  ;;  %v2284_v58 = vpop.permute.xlu1 %2283 }
 0x986   : > { %4516 = vmatprep.subr.bf16.mxu1 %v2286_v52  ;;  %v2243_v15 = vsel %vm832_vm1, %v5809_v29, 0.0  ;;  %v4877_v59 = vpop.eup %4876 }
 0x987   : > { %2244 = vadd.xlane.f32.xlu0 %v2243_v15  ;;  %v2237_v46 = vsel %vm832_vm1, %v4877_v59, 0.0 }
 0x989   : > { %v4879_v4 = vpop.eup %4878  ;;  %4517 = vmatpush3.bf16.msra.mxu1 %v2286_v52  ;;  %v2282_v28 = vpop.permute.xlu1 %2281 }
 0x98a   : > { %4518 = vmatprep.subr.bf16.mxu1 %v2284_v58  ;;  %v2246_v40 = vsel %vm832_vm1, %v4879_v4, 0.0  ;;  %v4881_v44 = vpop.eup %4880 }
 0x98b   : > { %2247 = vadd.xlane.f32.xlu1 %v2246_v40  ;;  %2238 = vadd.xlane.f32.xlu0 %v2237_v46  ;;  %v2240_v49 = vsel %vm832_vm1, %v4881_v44, 0.0 }
 0x98d   : > { %v5815_v43 = vpop.eup %4882  ;;  %4519 = vmatpush3.bf16.msra.mxu1 %v2284_v58 }
 0x98e   : > { %4520 = vmatprep.subr.bf16.mxu1 %v2282_v28  ;;  %v2255_v17 = vsel %vm832_vm1, %v5815_v43, 0.0  ;;  %v4885_v47 = vpop.eup %4884 }
 0x98f   : > { %2241 = vadd.xlane.f32.xlu1 %v2240_v49  ;;  %2256 = vadd.xlane.f32.xlu0 %v2255_v17  ;;  %v2258_v32 = vsel %vm832_vm1, %v4885_v47, 0.0 }
 0x991   : > { %v4887_v37 = vpop.eup %4886  ;;  %4521 = vmatpush3.bf16.msra.mxu1 %v2282_v28 }
 0x992   : > { %v2249_v54 = vsel %vm832_vm1, %v4887_v37, 0.0  ;;  %v4889_v60 = vpop.eup %4888 }
 0x993   : > { %2250 = vadd.xlane.f32.xlu1 %v2249_v54  ;;  %2259 = vadd.xlane.f32.xlu0 %v2258_v32  ;;  %v2252_v25 = vsel %vm832_vm1, %v4889_v60, 0.0 }
 0x997   : > { %2253 = vadd.xlane.f32.xlu0 %v2252_v25 }
 0x9a4   : > { %2439 = vrot.lane.b32.xlu1 %v5205_v9, %s5033_s10 }
 0x9a8   : > { %2437 = vrot.lane.b32.xlu1 %v5213_v13, %s5033_s10 }
 0x9ac   : > { %2435 = vrot.lane.b32.xlu1 %v5219_v19, %s5033_s10 }
 0x9ad   : > { %2441 = vrot.lane.b32.xlu0 %v5203_v8, %s5033_s10 }
 0x9b0   : > { %2429 = vrot.lane.b32.xlu1 %v5227_v34, %s5033_s10 }
 0x9b1   : > { %2427 = vrot.lane.b32.xlu0 %v5196_v55, %s5033_s10 }
 0x9b4   : > { %2433 = vrot.lane.b32.xlu1 %v5235_v42, %s5033_s10 }
 0x9b5   : > { %2431 = vrot.lane.b32.xlu0 %v5229_v36, %s5033_s10 }
 0xa10   : > { %v2245_v16 = vpop.xlane.xlu0 %2244 }
 0xa14   : > { %v2248_v56 = vpop.xlane.xlu1 %2247  ;;  %v2239_v2 = vpop.xlane.xlu0 %2238 }
 0xa15   : > { %4890 = vrcp.f32 %v2248_v56 }
 0xa16   : > { %4892 = vrcp.f32 %v2239_v2 }
 0xa17   : > { %4894 = vrcp.f32 %v2245_v16 }
 0xa18   : > { %v2242_v53 = vpop.xlane.xlu1 %2241  ;;  %v2257_v18 = vpop.xlane.xlu0 %2256 }
 0xa19   : > { %4896 = vrcp.f32 %v2242_v53 }
 0xa1c   : > { %v2251_v52 = vpop.xlane.xlu1 %2250  ;;  %v2260_v11 = vpop.xlane.xlu0 %2259 }
 0xa1d   : > { %4898 = vrcp.f32 %v2260_v11 }
 0xa1e   : > { %4900 = vrcp.f32 %v2251_v52 }
 0xa1f   : > { %4902 = vrcp.f32 %v2257_v18 }
 0xa20   : > { %v2254_v63 = vpop.xlane.xlu0 %2253  ;;  %v2440_v53 = vpop.permute.xlu1 %2439 }
 0xa21   : > { %4904 = vrcp.f32 %v2254_v63 }
 0xa22   : > { %v4891_v27 = vpop.eup %4890 }
 0xa23   : > { %v4893_v58 = vpop.eup %4892  ;;  %v2272_v28 = vmul.f32 %v4891_v27, %v4879_v4 }
 0xa24   : > { %v4895_v15 = vpop.eup %4894  ;;  %v2442_v40 = vpop.permute.xlu0 %2441  ;;  %v2269_v49 = vmul.f32 %v4893_v58, %v4877_v59  ;;  %v2462_v58 = vsel %vm742_vm0, %v2440_v53, 0 }
 0xa25   : > { %4670 = vmatprep.subr.msk.bf16.mxu1 %vm742_vm0, %v2442_v40  ;;  %v2271_v54 = vmul.f32 %v4895_v15, %v5809_v29  ;;  %v2465_v56 = vsel %vm742_vm0, %v2442_v40, 0  ;;  %v2438_v15 = vpop.permute.xlu1 %2437 }
 0xa26   : > { %v4897_v46 = vpop.eup %4896 }
 0xa27   : > { %v2270_v17 = vmul.f32 %v4897_v46, %v4881_v44  ;;  %v2278_v25 = vpack.c.bf16 %v2272_v28, %v2271_v54 }
 0xa28   : > { %v2428_v27 = vpop.permute.xlu0 %2427 }
 0xa29   : > { %v2277_v32 = vpack.c.bf16 %v2270_v17, %v2269_v49 }
 0xa2a   : > { %v4899_v16 = vpop.eup %4898 }
 0xa2b   : > { %4522 = vmatprep.mubr.msk.bf16.mxu1 %vm832_vm1, %v2277_v32  ;;  %v4901_v2 = vpop.eup %4900  ;;  %v2276_v59 = vmul.f32 %v4899_v16, %v4885_v47  ;;  %v2459_v47 = vsel %vm742_vm0, %v2438_v15, 0 }
 0xa2c   : > { %4523 = vmatmul.mubr.msk.bf16.vlgmr.msra.gmra.mxu1 %vm832_vm1, %v2278_v25  ;;  %v4903_v18 = vpop.eup %4902  ;;  %v2273_v44 = vmul.f32 %v4901_v2, %v4887_v37  ;;  %v2436_v37 = vpop.permute.xlu1 %2435 }
 0xa2d   : > { %4531 = vmatpush3.bf16.xpose.msra.mxu1 %v2465_v56  ;;  %v2275_v29 = vmul.f32 %v4903_v18, %v5815_v43  ;;  %v2456_v43 = vsel %vm742_vm0, %v2436_v37, 0  ;;  %v2432_v40 = vpop.permute.xlu0 %2431 }
 0xa2e   : > { %4671 = vmatprep.subr.msk.bf16.mxu1 %vm742_vm0, %v2440_v53  ;;  %v4905_v4 = vpop.eup %4904 }
 0xa2f   : > { %v2274_v52 = vmul.f32 %v4905_v4, %v4889_v60  ;;  %v2280_v63 = vpack.c.bf16 %v2276_v59, %v2275_v29 }
 0xa30   : > { %v2430_v60 = vpop.permute.xlu1 %2429 }
 0xa31   : > { %v2279_v11 = vpack.c.bf16 %v2274_v52, %v2273_v44 }
 0xa33   : > { %4526 = vmatprep.mubr.msk.bf16.mxu1 %vm832_vm1, %v2279_v11 }
 0xa34   : > { %4527 = vmatmul.mubr.msk.bf16.gmra.mxu1 %vm832_vm1, %v2280_v63  ;;  %v2434_v46 = vpop.permute.xlu1 %2433 }
 0xa35   : > { %4533 = vmatpush3.bf16.xpose.msra.mxu1 %v2462_v58  ;;  %4538 = vmatprep.mubr.msk.bf16.mxu1 %vm742_vm0, %v2428_v27 }
 0xa36   : > { %4672 = vmatprep.subr.msk.bf16.mxu1 %vm742_vm0, %v2438_v15 }
 0xa3d   : > { %4535 = vmatpush3.bf16.xpose.msra.mxu1 %v2459_v47 }
 0xa3e   : > { %4673 = vmatprep.subr.msk.bf16.mxu1 %vm742_vm0, %v2436_v37 }
 0xa45   : > { %4537 = vmatpush3.bf16.xpose.msra.mxu1 %v2456_v43 }
 0xa4c   : > { %4539 = vmatmul.mubr.msk.bf16.vlgmr.msra.gmra.mxu1 %vm742_vm0, %v2430_v60 }
 0xa4d   : > { %4542 = vmatprep.mubr.msk.bf16.mxu1 %vm742_vm0, %v2432_v40 }
 0xa54   : > { %4543 = vmatmul.mubr.msk.bf16.gmra.mxu1 %vm742_vm0, %v2434_v46 }
 0xaec   : > { %v5857_v28 = vpop.f32.mrf.mxu1 }
 0xaee   : > { %v5859_v49 = vpop.f32.mrf.mxu1 }
 0xaf0   : > { %v5861_v17 = vpop.f32.mrf.mxu1 }
 0xaf2   : > { %v5863_v54 = vpop.f32.mrf.mxu1 }
 0xaf4   : > { %v5865_v32 = vpop.f32.mrf.mxu1 }
 0xaf5   : > { %6436 = vst [vmem:[#allocation9_spill] sm:$0xff] %v5865_v32 }
 0xaf6   : > { %v5867_v25 = vpop.f32.mrf.mxu1 }
 0xaf8   : > { %v5869_v16 = vpop.f32.mrf.mxu1 }
 0xaf9   : > { %6437 = vst [vmem:[#allocation10_spill] sm:$0xff] %v5869_v16 }
 0xafa   : > { %v5871_v56 = vpop.f32.mrf.mxu1 }
 0xafb   : > { %6438 = vst [vmem:[#allocation11_spill] sm:$0xff] %v5871_v56 }
 0xb0c   : > { %v4540_v2 = vpop.f32.mrf.mxu1 }
 0xb0d   : > { %v2510_v59 = vadd.f32 %v5695_v14, %v4540_v2 }
 0xb0e   : > { %v2501_v53 = vpop.f32.mrf.mxu1 }
 0xb0f   : > { %v2502_v18 = vadd.f32 %v5695_v14, %v2501_v53  ;;  %v2538_v58 = vsel %vm832_vm1, %v2510_v59, -inf }
 0xb10   : > { %v4541_v4 = vpop.f32.mrf.mxu1 }
 0xb11   : > { %v2532_v44 = vsel %vm832_vm1, %v2502_v18, -inf  ;;  %v2513_v63 = vadd.f32 %v5695_v14, %v4541_v4 }
 0xb12   : > { %v2504_v52 = vpop.f32.mrf.mxu1  ;;  %2533 = vmax.xlane.f32.xlu0 %v2532_v44 }
 0xb13   : > { %v2505_v29 = vadd.f32 %v5695_v14, %v2504_v52  ;;  %v2541_v60 = vsel %vm832_vm1, %v2513_v63, -inf }
 0xb14   : > { %v4544_v11 = vpop.f32.mrf.mxu1 }
 0xb15   : > { %v2535_v27 = vsel %vm832_vm1, %v2505_v29, -inf  ;;  %v2526_v37 = vadd.f32 %v5695_v14, %v4544_v11 }
 0xb16   : > { %2536 = vmax.xlane.f32.xlu1 %v2535_v27  ;;  %2539 = vmax.xlane.f32.xlu0 %v2538_v58  ;;  %v2517_v15 = vpop.f32.mrf.mxu1 }
 0xb17   : > { %v2518_v53 = vadd.f32 %v5695_v14, %v2517_v15  ;;  %v2550_v4 = vsel %vm832_vm1, %v2526_v37, -inf }
 0xb18   : > { %v4545_v47 = vpop.f32.mrf.mxu1 }
 0xb19   : > { %v2529_v43 = vadd.f32 %v5695_v14, %v4545_v47  ;;  %v2544_v52 = vsel %vm832_vm1, %v2518_v53, -inf }
 0xb1a   : > { %2542 = vmax.xlane.f32.xlu0 %v2541_v60  ;;  %v2520_v40 = vpop.f32.mrf.mxu1 }
 0xb1b   : > { %v2521_v46 = vadd.f32 %v5695_v14, %v2520_v40  ;;  %v2553_v2 = vsel %vm832_vm1, %v2529_v43, -inf }
 0xb1c   : > { %2554 = vmax.xlane.f32.xlu1 %v2553_v2 }
 0xb1d   : > { %v2547_v44 = vsel %vm832_vm1, %v2521_v46, -inf }
 0xb1e   : > { %2551 = vmax.xlane.f32.xlu0 %v2550_v4 }
 0xb20   : > { %2548 = vmax.xlane.f32.xlu1 %v2547_v44 }
 0xb22   : > { %2545 = vmax.xlane.f32.xlu0 %v2544_v52 }
 0xb31   : > { %2628 = vrot.lane.b32.xlu1 %v5317_v50, %s5033_s10 }
 0xb35   : > { %2626 = vrot.lane.b32.xlu1 %v5321_v51, %s5033_s10 }
 0xb38   : > { %2630 = vrot.lane.b32.xlu0 %v5315_v48, %s5033_s10 }
 0xb39   : > { %2624 = vrot.lane.b32.xlu1 %v5334_v38, %s5033_s10 }
 0xb9b   : > { %v2534_v14 = vpop.xlane.xlu0 %2533 }
 0xb9c   : > { %v2556_v11 = vsub.f32 %v2502_v18, %v2534_v14 }
 0xb9e   : > { %v2564_v40 = vmul.f32 1.442695, %v2556_v11 }
 0xb9f   : > { %v2537_v27 = vpop.xlane.xlu1 %2536  ;;  %v2540_v58 = vpop.xlane.xlu0 %2539 }
 0xba0   : > { %v2558_v15 = vsub.f32 %v2510_v59, %v2540_v58  ;;  %v2557_v47 = vsub.f32 %v2505_v29, %v2537_v27 }
 0xba2   : > { %v2568_v60 = vmul.f32 1.442695, %v2558_v15  ;;  %v2566_v52 = vmul.f32 1.442695, %v2557_v47 }
 0xba3   : > { %v2543_v2 = vpop.xlane.xlu0 %2542 }
 0xba4   : > { %v2559_v4 = vsub.f32 %v2513_v63, %v2543_v2  ;;  %4906 = vpow2.f32 %v2568_v60 }
 0xba5   : > { %v2555_v44 = vpop.xlane.xlu1 %2554  ;;  %4908 = vpow2.f32 %v2564_v40 }
 0xba6   : > { %v2570_v16 = vmul.f32 1.442695, %v2559_v4  ;;  %v2563_v56 = vsub.f32 %v2529_v43, %v2555_v44 }
 0xba7   : > { %v2552_v33 = vpop.xlane.xlu0 %2551 }
 0xba8   : > { %4910 = vpow2.f32 %v2570_v16  ;;  %v2562_v3 = vsub.f32 %v2526_v37, %v2552_v33  ;;  %v2578_v14 = vmul.f32 1.442695, %v2563_v56 }
 0xba9   : > { %v2549_v1 = vpop.xlane.xlu1 %2548  ;;  %4912 = vpow2.f32 %v2566_v52 }
 0xbaa   : > { %v2576_v18 = vmul.f32 1.442695, %v2562_v3  ;;  %v2561_v45 = vsub.f32 %v2521_v46, %v2549_v1 }
 0xbab   : > { %v2546_v59 = vpop.xlane.xlu0 %2545 }
 0xbac   : > { %4914 = vpow2.f32 %v2576_v18  ;;  %v2560_v29 = vsub.f32 %v2518_v53, %v2546_v59  ;;  %v2574_v63 = vmul.f32 1.442695, %v2561_v45 }
 0xbad   : > { %v2629_v11 = vpop.permute.xlu1 %2628  ;;  %4916 = vpow2.f32 %v2578_v14 }
 0xbae   : > { %v2572_v27 = vmul.f32 1.442695, %v2560_v29 }
 0xbaf   : > { %v2631_v58 = vpop.permute.xlu0 %2630 }
 0xbb0   : > { %4918 = vpow2.f32 %v2572_v27  ;;  %4546 = vmatprep.subr.bf16.mxu0 %v2631_v58 }
 0xbb1   : > { %4547 = vmatpush3.bf16.msra.mxu0 %v2631_v58  ;;  %v5897_v43 = vpop.eup %4906  ;;  %4920 = vpow2.f32 %v2574_v63  ;;  %v2627_v33 = vpop.permute.xlu1 %2626 }
 0xbb2   : > { %4548 = vmatprep.subr.bf16.mxu0 %v2629_v11  ;;  %v2586_v3 = vsel %vm832_vm1, %v5897_v43, 0.0  ;;  %v4909_v1 = vpop.eup %4908 }
 0xbb3   : > { %2587 = vadd.xlane.f32.xlu0 %v2586_v3  ;;  %v2580_v37 = vsel %vm832_vm1, %v4909_v1, 0.0 }
 0xbb5   : > { %v4911_v16 = vpop.eup %4910  ;;  %4549 = vmatpush3.bf16.msra.mxu0 %v2629_v11  ;;  %v2625_v53 = vpop.permute.xlu1 %2624 }
 0xbb6   : > { %4550 = vmatprep.subr.bf16.mxu0 %v2627_v33  ;;  %v2589_v56 = vsel %vm832_vm1, %v4911_v16, 0.0  ;;  %v4913_v45 = vpop.eup %4912 }
 0xbb7   : > { %2590 = vadd.xlane.f32.xlu1 %v2589_v56  ;;  %2581 = vadd.xlane.f32.xlu0 %v2580_v37  ;;  %v2583_v15 = vsel %vm832_vm1, %v4913_v45, 0.0 }
 0xbb9   : > { %v5903_v46 = vpop.eup %4914  ;;  %4551 = vmatpush3.bf16.msra.mxu0 %v2627_v33 }
 0xbba   : > { %4552 = vmatprep.subr.bf16.mxu0 %v2625_v53  ;;  %v2598_v47 = vsel %vm832_vm1, %v5903_v46, 0.0  ;;  %v4917_v60 = vpop.eup %4916 }
 0xbbb   : > { %2584 = vadd.xlane.f32.xlu1 %v2583_v15  ;;  %2599 = vadd.xlane.f32.xlu0 %v2598_v47  ;;  %v2601_v4 = vsel %vm832_vm1, %v4917_v60, 0.0 }
 0xbbd   : > { %v4919_v40 = vpop.eup %4918  ;;  %4553 = vmatpush3.bf16.msra.mxu0 %v2625_v53 }
 0xbbe   : > { %v2592_v2 = vsel %vm832_vm1, %v4919_v40, 0.0  ;;  %v4921_v44 = vpop.eup %4920 }
 0xbbf   : > { %2593 = vadd.xlane.f32.xlu1 %v2592_v2  ;;  %2602 = vadd.xlane.f32.xlu0 %v2601_v4  ;;  %v2595_v52 = vsel %vm832_vm1, %v4921_v44, 0.0 }
 0xbc3   : > { %2596 = vadd.xlane.f32.xlu0 %v2595_v52 }
 0xbd0   : > { %2782 = vrot.lane.b32.xlu1 %v5205_v9, %s5034_s12 }
 0xbd4   : > { %2780 = vrot.lane.b32.xlu1 %v5213_v13, %s5034_s12 }
 0xbd8   : > { %2778 = vrot.lane.b32.xlu1 %v5219_v19, %s5034_s12 }
 0xbd9   : > { %2784 = vrot.lane.b32.xlu0 %v5203_v8, %s5034_s12 }
 0xbdc   : > { %2772 = vrot.lane.b32.xlu1 %v5227_v34, %s5034_s12 }
 0xbdd   : > { %2770 = vrot.lane.b32.xlu0 %v5196_v55, %s5034_s12 }
 0xbe0   : > { %2776 = vrot.lane.b32.xlu1 %v5235_v42, %s5034_s12 }
 0xbe1   : > { %2774 = vrot.lane.b32.xlu0 %v5229_v36, %s5034_s12 }
 0xc3c   : > { %v2588_v18 = vpop.xlane.xlu0 %2587 }
 0xc40   : > { %v2591_v14 = vpop.xlane.xlu1 %2590  ;;  %v2582_v59 = vpop.xlane.xlu0 %2581 }
 0xc41   : > { %4922 = vrcp.f32 %v2591_v14 }
 0xc42   : > { %4924 = vrcp.f32 %v2582_v59 }
 0xc43   : > { %4926 = vrcp.f32 %v2588_v18 }
 0xc44   : > { %v2585_v29 = vpop.xlane.xlu1 %2584  ;;  %v2600_v11 = vpop.xlane.xlu0 %2599 }
 0xc45   : > { %4928 = vrcp.f32 %v2585_v29 }
 0xc48   : > { %v2594_v27 = vpop.xlane.xlu1 %2593  ;;  %v2603_v63 = vpop.xlane.xlu0 %2602 }
 0xc49   : > { %4930 = vrcp.f32 %v2603_v63 }
 0xc4a   : > { %4932 = vrcp.f32 %v2594_v27 }
 0xc4b   : > { %4934 = vrcp.f32 %v2600_v11 }
 0xc4c   : > { %v2597_v58 = vpop.xlane.xlu0 %2596  ;;  %v2783_v11 = vpop.permute.xlu1 %2782 }
 0xc4d   : > { %4936 = vrcp.f32 %v2597_v58 }
 0xc4e   : > { %v4923_v33 = vpop.eup %4922 }
 0xc4f   : > { %v4925_v3 = vpop.eup %4924  ;;  %v2615_v15 = vmul.f32 %v4923_v33, %v4911_v16 }
 0xc50   : > { %v4927_v56 = vpop.eup %4926  ;;  %v2785_v37 = vpop.permute.xlu0 %2784  ;;  %v2612_v47 = vmul.f32 %v4925_v3, %v4909_v1 }
 0xc51   : > { %4674 = vmatprep.subr.msk.bf16.mxu0 %vm742_vm0, %v2785_v37  ;;  %v2614_v4 = vmul.f32 %v4927_v56, %v5897_v43  ;;  %v2808_v59 = vsel %vm742_vm0, %v2785_v37, 0  ;;  %v2805_v56 = vsel %vm742_vm0, %v2783_v11, 0  ;;  %v2781_v37 = vpop.permute.xlu1 %2780 }
 0xc52   : > { %v4929_v53 = vpop.eup %4928 }
 0xc53   : > { %v2613_v2 = vmul.f32 %v4929_v53, %v4913_v45  ;;  %v2621_v18 = vpack.c.bf16 %v2615_v15, %v2614_v4 }
 0xc54   : > { %v2771_v3 = vpop.permute.xlu0 %2770 }
 0xc55   : > { %v2620_v52 = vpack.c.bf16 %v2613_v2, %v2612_v47 }
 0xc56   : > { %v4931_v14 = vpop.eup %4930 }
 0xc57   : > { %4554 = vmatprep.mubr.msk.bf16.mxu0 %vm832_vm1, %v2620_v52  ;;  %v4933_v29 = vpop.eup %4932  ;;  %v2619_v1 = vmul.f32 %v4931_v14, %v4917_v60  ;;  %v2802_v60 = vsel %vm742_vm0, %v2781_v37, 0 }
 0xc58   : > { %4555 = vmatmul.mubr.msk.bf16.vlgmr.msra.gmra.mxu0 %vm832_vm1, %v2621_v18  ;;  %v4935_v27 = vpop.eup %4934  ;;  %v2616_v45 = vmul.f32 %v4933_v29, %v4919_v40  ;;  %v2779_v40 = vpop.permute.xlu1 %2778 }
 0xc59   : > { %4563 = vmatpush3.bf16.xpose.msra.mxu0 %v2808_v59  ;;  %v2618_v43 = vmul.f32 %v4935_v27, %v5903_v46  ;;  %v2799_v46 = vsel %vm742_vm0, %v2779_v40, 0  ;;  %v2775_v53 = vpop.permute.xlu0 %2774 }
 0xc5a   : > { %4675 = vmatprep.subr.msk.bf16.mxu0 %vm742_vm0, %v2783_v11  ;;  %v4937_v16 = vpop.eup %4936 }
 0xc5b   : > { %v2617_v63 = vmul.f32 %v4937_v16, %v4921_v44  ;;  %v2623_v33 = vpack.c.bf16 %v2619_v1, %v2618_v43  ;;  %v5962_v16 = vld [vmem:[%s5275_s27] ss:$0 sm:$0xff] }
 0xc5c   : > { %v2773_v44 = vpop.permute.xlu1 %2772 }
 0xc5d   : > { %v2622_v58 = vpack.c.bf16 %v2617_v63, %v2616_v45 }
 0xc5f   : > { %4558 = vmatprep.mubr.msk.bf16.mxu0 %vm832_vm1, %v2622_v58 }
 0xc60   : > { %4559 = vmatmul.mubr.msk.bf16.gmra.mxu0 %vm832_vm1, %v2623_v33  ;;  %v2777_v15 = vpop.permute.xlu1 %2776 }
 0xc61   : > { %4565 = vmatpush3.bf16.xpose.msra.mxu0 %v2805_v56  ;;  %4570 = vmatprep.mubr.msk.bf16.mxu0 %vm742_vm0, %v2771_v3 }
 0xc62   : > { %4676 = vmatprep.subr.msk.bf16.mxu0 %vm742_vm0, %v2781_v37 }
 0xc69   : > { %4567 = vmatpush3.bf16.xpose.msra.mxu0 %v2802_v60 }
 0xc6a   : > { %4677 = vmatprep.subr.msk.bf16.mxu0 %vm742_vm0, %v2779_v40 }
 0xc71   : > { %4569 = vmatpush3.bf16.xpose.msra.mxu0 %v2799_v46 }
 0xc78   : > { %4571 = vmatmul.mubr.msk.bf16.vlgmr.msra.gmra.mxu0 %vm742_vm0, %v2773_v44 }
 0xc79   : > { %4574 = vmatprep.mubr.msk.bf16.mxu0 %vm742_vm0, %v2775_v53 }
 0xc80   : > { %4575 = vmatmul.mubr.msk.bf16.gmra.mxu0 %vm742_vm0, %v2777_v15 }
 0xd18   : > { %v5945_v47 = vpop.f32.mrf.mxu0 }
 0xd1a   : > { %v5947_v2 = vpop.f32.mrf.mxu0 }
 0xd1c   : > { %v5949_v4 = vpop.f32.mrf.mxu0 }
 0xd1d   : > { %6439 = vst [vmem:[#allocation12_spill] sm:$0xff] %v5949_v4 }
 0xd1e   : > { %v5951_v52 = vpop.f32.mrf.mxu0 }
 0xd1f   : > { %6440 = vst [vmem:[#allocation13_spill] sm:$0xff] %v5951_v52 }
 0xd20   : > { %v5953_v18 = vpop.f32.mrf.mxu0 }
 0xd21   : > { %6441 = vst [vmem:[#allocation14_spill] sm:$0xff] %v5953_v18 }
 0xd22   : > { %v5955_v14 = vpop.f32.mrf.mxu0 }
 0xd23   : > { %6442 = vst [vmem:[#allocation15_spill] sm:$0xff] %v5955_v14 }
 0xd24   : > { %v5957_v59 = vpop.f32.mrf.mxu0 }
 0xd25   : > { %6443 = vst [vmem:[#allocation16_spill] sm:$0xff] %v5957_v59 }
 0xd26   : > { %v5959_v29 = vpop.f32.mrf.mxu0 }
 0xd27   : > { %6444 = vst [vmem:[#allocation17_spill] sm:$0xff] %v5959_v29 }
 0xd38   : > { %v4572_v11 = vpop.f32.mrf.mxu0 }
 0xd39   : > { %v2853_v63 = vadd.f32 %v5962_v16, %v4572_v11 }
 0xd3a   : > { %v2844_v27 = vpop.f32.mrf.mxu0 }
 0xd3b   : > { %v2845_v1 = vadd.f32 %v5962_v16, %v2844_v27  ;;  %v2881_v60 = vsel %vm832_vm1, %v2853_v63, -inf }
 0xd3c   : > { %v4573_v45 = vpop.f32.mrf.mxu0 }
 0xd3d   : > { %v2875_v43 = vsel %vm832_vm1, %v2845_v1, -inf  ;;  %v2856_v56 = vadd.f32 %v5962_v16, %v4573_v45 }
 0xd3e   : > { %v2847_v58 = vpop.f32.mrf.mxu0  ;;  %2876 = vmax.xlane.f32.xlu0 %v2875_v43 }
 0xd3f   : > { %v2848_v33 = vadd.f32 %v5962_v16, %v2847_v58  ;;  %v2884_v15 = vsel %vm832_vm1, %v2856_v56, -inf }
 0xd40   : > { %v4576_v3 = vpop.f32.mrf.mxu0 }
 0xd41   : > { %v2878_v37 = vsel %vm832_vm1, %v2848_v33, -inf  ;;  %v2869_v44 = vadd.f32 %v5962_v16, %v4576_v3 }
 0xd42   : > { %2879 = vmax.xlane.f32.xlu1 %v2878_v37  ;;  %2882 = vmax.xlane.f32.xlu0 %v2881_v60  ;;  %v2860_v40 = vpop.f32.mrf.mxu0 }
 0xd43   : > { %v2861_v43 = vadd.f32 %v5962_v16, %v2860_v40  ;;  %v2893_v58 = vsel %vm832_vm1, %v2869_v44, -inf }
 0xd44   : > { %v4577_v46 = vpop.f32.mrf.mxu0 }
 0xd45   : > { %v2872_v53 = vadd.f32 %v5962_v16, %v4577_v46  ;;  %v2887_v3 = vsel %vm832_vm1, %v2861_v43, -inf }
 0xd46   : > { %2885 = vmax.xlane.f32.xlu0 %v2884_v15  ;;  %v2863_v11 = vpop.f32.mrf.mxu0 }
 0xd47   : > { %v2864_v27 = vadd.f32 %v5962_v16, %v2863_v11  ;;  %v2896_v45 = vsel %vm832_vm1, %v2872_v53, -inf }
 0xd48   : > { %2897 = vmax.xlane.f32.xlu1 %v2896_v45 }
 0xd49   : > { %v2890_v37 = vsel %vm832_vm1, %v2864_v27, -inf }
 0xd4a   : > { %2894 = vmax.xlane.f32.xlu0 %v2893_v58 }
 0xd4c   : > { %2891 = vmax.xlane.f32.xlu1 %v2890_v37 }
 0xd4e   : > { %2888 = vmax.xlane.f32.xlu0 %v2887_v3 }
 0xd5d   : > { %2971 = vrot.lane.b32.xlu1 %v5317_v50, %s5034_s12 }
 0xd61   : > { %2969 = vrot.lane.b32.xlu1 %v5321_v51, %s5034_s12 }
 0xd64   : > { %2973 = vrot.lane.b32.xlu0 %v5315_v48, %s5034_s12 }
 0xd65   : > { %2967 = vrot.lane.b32.xlu1 %v5334_v38, %s5034_s12 }
 0xdc7   : > { %v2877_v60 = vpop.xlane.xlu0 %2876 }
 0xdc8   : > { %v2899_v40 = vsub.f32 %v2845_v1, %v2877_v60 }
 0xdca   : > { %v2907_v37 = vmul.f32 1.442695, %v2899_v40 }
 0xdcb   : > { %v2880_v46 = vpop.xlane.xlu1 %2879  ;;  %v2883_v15 = vpop.xlane.xlu0 %2882 }
 0xdcc   : > { %v2901_v11 = vsub.f32 %v2853_v63, %v2883_v15  ;;  %v2900_v45 = vsub.f32 %v2848_v33, %v2880_v46 }
 0xdce   : > { %v2911_v58 = vmul.f32 1.442695, %v2901_v11  ;;  %v2909_v62 = vmul.f32 1.442695, %v2900_v45 }
 0xdcf   : > { %v2886_v3 = vpop.xlane.xlu0 %2885 }
 0xdd0   : > { %v2902_v59 = vsub.f32 %v2856_v56, %v2886_v3  ;;  %4938 = vpow2.f32 %v2911_v58 }
 0xdd1   : > { %v2898_v29 = vpop.xlane.xlu1 %2897  ;;  %4940 = vpow2.f32 %v2907_v37 }
 0xdd2   : > { %v2913_v21 = vmul.f32 1.442695, %v2902_v59  ;;  %v2906_v18 = vsub.f32 %v2872_v53, %v2898_v29 }
 0xdd3   : > { %v2895_v4 = vpop.xlane.xlu0 %2894 }
 0xdd4   : > { %4942 = vpow2.f32 %v2913_v21  ;;  %v2905_v14 = vsub.f32 %v2869_v44, %v2895_v4  ;;  %v2921_v60 = vmul.f32 1.442695, %v2906_v18 }
 0xdd5   : > { %v2892_v52 = vpop.xlane.xlu1 %2891  ;;  %4944 = vpow2.f32 %v2909_v62 }
 0xdd6   : > { %v2919_v1 = vmul.f32 1.442695, %v2905_v14  ;;  %v2904_v32 = vsub.f32 %v2864_v27, %v2892_v52 }
 0xdd7   : > { %v2889_v63 = vpop.xlane.xlu0 %2888 }
 0xdd8   : > { %4946 = vpow2.f32 %v2919_v1  ;;  %v2903_v33 = vsub.f32 %v2861_v43, %v2889_v63  ;;  %v2917_v56 = vmul.f32 1.442695, %v2904_v32 }
 0xdd9   : > { %v2972_v40 = vpop.permute.xlu1 %2971  ;;  %4948 = vpow2.f32 %v2921_v60 }
 0xdda   : > { %v2915_v46 = vmul.f32 1.442695, %v2903_v33 }
 0xddb   : > { %v2974_v15 = vpop.permute.xlu0 %2973 }
 0xddc   : > { %4950 = vpow2.f32 %v2915_v46  ;;  %4578 = vmatprep.subr.bf16.mxu1 %v2974_v15 }
 0xddd   : > { %4579 = vmatpush3.bf16.msra.mxu1 %v2974_v15  ;;  %v5988_v59 = vpop.eup %4938  ;;  %4952 = vpow2.f32 %v2917_v56  ;;  %v2970_v21 = vpop.permute.xlu1 %2969 }
 0xdde   : > { %4580 = vmatprep.subr.bf16.mxu1 %v2972_v40  ;;  %v2929_v62 = vsel %vm832_vm1, %v5988_v59, 0.0  ;;  %v4941_v4 = vpop.eup %4940 }
 0xddf   : > { %2930 = vadd.xlane.f32.xlu0 %v2929_v62  ;;  %v2923_v14 = vsel %vm832_vm1, %v4941_v4, 0.0 }
 0xde1   : > { %v4943_v52 = vpop.eup %4942  ;;  %4581 = vmatpush3.bf16.msra.mxu1 %v2972_v40  ;;  %v2968_v44 = vpop.permute.xlu1 %2967 }
 0xde2   : > { %4582 = vmatprep.subr.bf16.mxu1 %v2970_v21  ;;  %v2932_v18 = vsel %vm832_vm1, %v4943_v52, 0.0  ;;  %v4945_v32 = vpop.eup %4944 }
 0xde3   : > { %2933 = vadd.xlane.f32.xlu1 %v2932_v18  ;;  %2924 = vadd.xlane.f32.xlu0 %v2923_v14  ;;  %v2926_v53 = vsel %vm832_vm1, %v4945_v32, 0.0 }
 0xde5   : > { %v5994_v29 = vpop.eup %4946  ;;  %4583 = vmatpush3.bf16.msra.mxu1 %v2970_v21 }
 0xde6   : > { %4584 = vmatprep.subr.bf16.mxu1 %v2968_v44  ;;  %v2941_v27 = vsel %vm832_vm1, %v5994_v29, 0.0  ;;  %v4949_v43 = vpop.eup %4948 }
 0xde7   : > { %2927 = vadd.xlane.f32.xlu1 %v2926_v53  ;;  %2942 = vadd.xlane.f32.xlu0 %v2941_v27  ;;  %v2944_v58 = vsel %vm832_vm1, %v4949_v43, 0.0 }
 0xde9   : > { %v4951_v11 = vpop.eup %4950  ;;  %4585 = vmatpush3.bf16.msra.mxu1 %v2968_v44 }
 0xdea   : > { %v2935_v45 = vsel %vm832_vm1, %v4951_v11, 0.0  ;;  %v4953_v37 = vpop.eup %4952 }
 0xdeb   : > { %2936 = vadd.xlane.f32.xlu1 %v2935_v45  ;;  %2945 = vadd.xlane.f32.xlu0 %v2944_v58  ;;  %v2938_v3 = vsel %vm832_vm1, %v4953_v37, 0.0 }
 0xdef   : > { %2939 = vadd.xlane.f32.xlu0 %v2938_v3 }
 0xdfc   : > { %3125 = vrot.lane.b32.xlu1 %v5205_v9, %s5035_s13 }
 0xe00   : > { %3123 = vrot.lane.b32.xlu1 %v5213_v13, %s5035_s13 }
 0xe04   : > { %3121 = vrot.lane.b32.xlu1 %v5219_v19, %s5035_s13 }
 0xe05   : > { %3127 = vrot.lane.b32.xlu0 %v5203_v8, %s5035_s13 }
 0xe08   : > { %3115 = vrot.lane.b32.xlu1 %v5227_v34, %s5035_s13 }
 0xe09   : > { %3113 = vrot.lane.b32.xlu0 %v5196_v55, %s5035_s13 }
 0xe0c   : > { %3119 = vrot.lane.b32.xlu1 %v5235_v42, %s5035_s13 }
 0xe0d   : > { %3117 = vrot.lane.b32.xlu0 %v5229_v36, %s5035_s13 }
 0xe68   : > { %v2931_v9 = vpop.xlane.xlu0 %2930 }
 0xe6c   : > { %v2934_v13 = vpop.xlane.xlu1 %2933  ;;  %v2925_v1 = vpop.xlane.xlu0 %2924 }
 0xe6d   : > { %4954 = vrcp.f32 %v2934_v13 }
 0xe6e   : > { %4956 = vrcp.f32 %v2925_v1 }
 0xe6f   : > { %4958 = vrcp.f32 %v2931_v9 }
 0xe70   : > { %v2928_v19 = vpop.xlane.xlu1 %2927  ;;  %v2943_v8 = vpop.xlane.xlu0 %2942 }
 0xe71   : > { %4960 = vrcp.f32 %v2928_v19 }
 0xe74   : > { %v2937_v60 = vpop.xlane.xlu1 %2936  ;;  %v2946_v34 = vpop.xlane.xlu0 %2945 }
 0xe75   : > { %4962 = vrcp.f32 %v2946_v34 }
 0xe76   : > { %4964 = vrcp.f32 %v2937_v60 }
 0xe77   : > { %4966 = vrcp.f32 %v2943_v8 }
 0xe78   : > { %v2940_v55 = vpop.xlane.xlu0 %2939  ;;  %v3126_v27 = vpop.permute.xlu1 %3125 }
 0xe79   : > { %4968 = vrcp.f32 %v2940_v55  ;;  %v3148_v1 = vsel %vm742_vm0, %v3126_v27, 0 }
 0xe7a   : > { %v4955_v42 = vpop.eup %4954 }
 0xe7b   : > { %v4957_v63 = vpop.eup %4956  ;;  %v2958_v46 = vmul.f32 %v4955_v42, %v4943_v52 }
 0xe7c   : > { %v4959_v33 = vpop.eup %4958  ;;  %v3128_v36 = vpop.permute.xlu0 %3127  ;;  %v2955_v56 = vmul.f32 %v4957_v63, %v4941_v4 }
 0xe7d   : > { %4678 = vmatprep.subr.msk.bf16.mxu1 %vm742_vm0, %v3128_v36  ;;  %v2957_v21 = vmul.f32 %v4959_v33, %v5988_v59  ;;  %v3151_v44 = vsel %vm742_vm0, %v3128_v36, 0  ;;  %v3124_v19 = vpop.permute.xlu1 %3123 }
 0xe7e   : > { %v4961_v40 = vpop.eup %4960 }
 0xe7f   : > { %v2956_v15 = vmul.f32 %v4961_v40, %v4945_v32  ;;  %v2964_v18 = vpack.c.bf16 %v2958_v46, %v2957_v21 }
 0xe80   : > { %v3114_v13 = vpop.permute.xlu0 %3113 }
 0xe81   : > { %v2963_v62 = vpack.c.bf16 %v2956_v15, %v2955_v56 }
 0xe82   : > { %v4963_v14 = vpop.eup %4962 }
 0xe83   : > { %4586 = vmatprep.mubr.msk.bf16.mxu1 %vm832_vm1, %v2963_v62  ;;  %v4965_v53 = vpop.eup %4964  ;;  %v2962_v4 = vmul.f32 %v4963_v14, %v4949_v43  ;;  %v3145_v43 = vsel %vm742_vm0, %v3124_v19, 0 }
 0xe84   : > { %4587 = vmatmul.mubr.msk.bf16.vlgmr.msra.gmra.mxu1 %vm832_vm1, %v2964_v18  ;;  %v4967_v45 = vpop.eup %4966  ;;  %v2959_v32 = vmul.f32 %v4965_v53, %v4951_v11  ;;  %v3122_v11 = vpop.permute.xlu1 %3121 }
 0xe85   : > { %4595 = vmatpush3.bf16.xpose.msra.mxu1 %v3151_v44  ;;  %v2961_v59 = vmul.f32 %v4967_v45, %v5994_v29  ;;  %v3142_v29 = vsel %vm742_vm0, %v3122_v11, 0  ;;  %v3118_v8 = vpop.permute.xlu0 %3117 }
 0xe86   : > { %4679 = vmatprep.subr.msk.bf16.mxu1 %vm742_vm0, %v3126_v27  ;;  %v4969_v52 = vpop.eup %4968 }
 0xe87   : > { %v2960_v58 = vmul.f32 %v4969_v52, %v4953_v37  ;;  %v2966_v9 = vpack.c.bf16 %v2962_v4, %v2961_v59 }
 0xe88   : > { %v3116_v37 = vpop.permute.xlu1 %3115 }
 0xe89   : > { %v2965_v3 = vpack.c.bf16 %v2960_v58, %v2959_v32 }
 0xe8b   : > { %4590 = vmatprep.mubr.msk.bf16.mxu1 %vm832_vm1, %v2965_v3 }
 0xe8c   : > { %4591 = vmatmul.mubr.msk.bf16.gmra.mxu1 %vm832_vm1, %v2966_v9  ;;  %v3120_v60 = vpop.permute.xlu1 %3119 }
 0xe8d   : > { %4597 = vmatpush3.bf16.xpose.msra.mxu1 %v3148_v1  ;;  %4602 = vmatprep.mubr.msk.bf16.mxu1 %vm742_vm0, %v3114_v13 }
 0xe8e   : > { %4680 = vmatprep.subr.msk.bf16.mxu1 %vm742_vm0, %v3124_v19 }
 0xe95   : > { %4599 = vmatpush3.bf16.xpose.msra.mxu1 %v3145_v43 }
 0xe96   : > { %4681 = vmatprep.subr.msk.bf16.mxu1 %vm742_vm0, %v3122_v11 }
 0xe9d   : > { %4601 = vmatpush3.bf16.xpose.msra.mxu1 %v3142_v29 }
 0xea4   : > { %4603 = vmatmul.mubr.msk.bf16.vlgmr.msra.gmra.mxu1 %vm742_vm0, %v3116_v37 }
 0xea5   : > { %4606 = vmatprep.mubr.msk.bf16.mxu1 %vm742_vm0, %v3118_v8 }
 0xeac   : > { %4607 = vmatmul.mubr.msk.bf16.gmra.mxu1 %vm742_vm0, %v3120_v60 }
 0xf44   : > { %v6036_v34 = vpop.f32.mrf.mxu1 }
 0xf46   : > { %v6038_v55 = vpop.f32.mrf.mxu1 }
 0xf48   : > { %v6040_v42 = vpop.f32.mrf.mxu1 }
 0xf4a   : > { %v6042_v63 = vpop.f32.mrf.mxu1 }
 0xf4c   : > { %v6044_v33 = vpop.f32.mrf.mxu1 }
 0xf4e   : > { %v6046_v36 = vpop.f32.mrf.mxu1 }
 0xf50   : > { %v6048_v40 = vpop.f32.mrf.mxu1 }
 0xf52   : > { %v6050_v46 = vpop.f32.mrf.mxu1 }
 0xf64   : > { %v4604_v56 = vpop.f32.mrf.mxu1 }
 0xf65   : > { %v3196_v18 = vadd.f32 %v5962_v16, %v4604_v56 }
 0xf66   : > { %v3187_v15 = vpop.f32.mrf.mxu1 }
 0xf67   : > { %v3188_v21 = vadd.f32 %v5962_v16, %v3187_v15  ;;  %v3224_v4 = vsel %vm832_vm1, %v3196_v18, -inf }
 0xf68   : > { %v4605_v62 = vpop.f32.mrf.mxu1 }
 0xf69   : > { %v3218_v14 = vsel %vm832_vm1, %v3188_v21, -inf  ;;  %v3199_v45 = vadd.f32 %v5962_v16, %v4605_v62 }
 0xf6a   : > { %v3190_v44 = vpop.f32.mrf.mxu1  ;;  %3219 = vmax.xlane.f32.xlu0 %v3218_v14 }
 0xf6b   : > { %v3191_v53 = vadd.f32 %v5962_v16, %v3190_v44  ;;  %v3227_v3 = vsel %vm832_vm1, %v3199_v45, -inf }
 0xf6c   : > { %v4608_v27 = vpop.f32.mrf.mxu1 }
 0xf6d   : > { %v3221_v52 = vsel %vm832_vm1, %v3191_v53, -inf  ;;  %v3212_v1 = vadd.f32 %v5962_v16, %v4608_v27 }
 0xf6e   : > { %3222 = vmax.xlane.f32.xlu1 %v3221_v52  ;;  %3225 = vmax.xlane.f32.xlu0 %v3224_v4  ;;  %v3203_v32 = vpop.f32.mrf.mxu1 }
 0xf6f   : > { %v3204_v59 = vadd.f32 %v5962_v16, %v3203_v32  ;;  %v3236_v37 = vsel %vm832_vm1, %v3212_v1, -inf }
 0xf70   : > { %v4609_v58 = vpop.f32.mrf.mxu1 }
 0xf71   : > { %v3215_v19 = vadd.f32 %v5962_v16, %v4609_v58  ;;  %v3230_v11 = vsel %vm832_vm1, %v3204_v59, -inf }
 0xf72   : > { %3228 = vmax.xlane.f32.xlu0 %v3227_v3  ;;  %v3206_v9 = vpop.f32.mrf.mxu1 }
 0xf73   : > { %v6062_v13 = vadd.f32 %v5962_v16, %v3206_v9  ;;  %v3239_v29 = vsel %vm832_vm1, %v3215_v19, -inf }
 0xf75   : > { %v3233_v43 = vsel %vm832_vm1, %v6062_v13, -inf }
 0xf76   : > { %3234 = vmax.xlane.f32.xlu1 %v3233_v43  ;;  %3231 = vmax.xlane.f32.xlu0 %v3230_v11 }
 0xf7a   : > { %3240 = vmax.xlane.f32.xlu1 %v3239_v29  ;;  %3237 = vmax.xlane.f32.xlu0 %v3236_v37 }
 0xff3   : > { %v3220_v8 = vpop.xlane.xlu0 %3219 }
 0xff4   : > { %v3242_v60 = vsub.f32 %v3188_v21, %v3220_v8 }
 0xff6   : > { %v3250_v44 = vmul.f32 1.442695, %v3242_v60 }
 0xff7   : > { %v3223_v56 = vpop.xlane.xlu1 %3222  ;;  %v3226_v15 = vpop.xlane.xlu0 %3225 }
 0xff8   : > { %v3244_v62 = vsub.f32 %v3196_v18, %v3226_v15  ;;  %v3243_v14 = vsub.f32 %v3191_v53, %v3223_v56 }
 0xffa   : > { %v3254_v16 = vmul.f32 1.442695, %v3244_v62  ;;  %v3252_v4 = vmul.f32 1.442695, %v3243_v14 }
 0xffb   : > { %v3229_v27 = vpop.xlane.xlu0 %3228 }
 0xffc   : > { %v3245_v52 = vsub.f32 %v3199_v45, %v3229_v27  ;;  %4970 = vpow2.f32 %v3254_v16  ;;  %v4088_v27 = vpack.c.bf16 %v5664_v39, %v5664_v39  ;;  %v4104_v39 = vpack.c.bf16 %v5771_v22, %v5771_v22 }
 0xffd   : > { %4972 = vpow2.f32 %v3250_v44 }
 0xffe   : > { %v3256_v32 = vmul.f32 1.442695, %v3245_v52 }
 0xfff   : > { %v3232_v58 = vpop.xlane.xlu0 %3231  ;;  %v3235_v14 = vpop.xlane.xlu1 %3234 }
0x1000   : > { %4974 = vpow2.f32 %v3256_v32  ;;  %v3246_v3 = vsub.f32 %v3204_v59, %v3232_v58  ;;  %v3247_v52 = vsub.f32 %v6062_v13, %v3235_v14  ;;  %v4096_v32 = vpack.c.bf16 %v5680_v7, %v5680_v7 }
0x1001   : > { %4976 = vpow2.f32 %v3252_v4  ;;  %v4106_v13 = vpack.c.bf16 %v5769_v35, %v5769_v35  ;;  %v4114_v58 = vpack.c.bf16 %v5857_v28, %v5857_v28  ;;  %v4120_v35 = vpack.c.bf16 %v5947_v2, %v5947_v2 }
0x1002   : > { %v3258_v21 = vmul.f32 1.442695, %v3246_v3  ;;  %v4128_v3 = vpack.c.bf16 %v6038_v55, %v6038_v55  ;;  %v4130_v28 = vpack.c.bf16 %v6036_v34, %v6036_v34  ;;  %v4089_v2 = vpack.c.bf16 %v5668_v24, %v5668_v24 }
0x1003   : > { %v3238_v9 = vpop.xlane.xlu0 %3237  ;;  %v3241_v16 = vpop.xlane.xlu1 %3240  ;;  %v4091_v55 = vpack.c.bf16 %v5666_v0, %v5666_v0  ;;  %v4094_v34 = vpack.c.bf16 %v5670_v6, %v5670_v6  ;;  %v4100_v24 = vpack.c.bf16 %v5688_v31, %v5688_v31  ;;  %v4099_v0 = vpack.c.bf16 %v5682_v30, %v5682_v30 }
0x1004   : > { %v3248_v43 = vsub.f32 %v3212_v1, %v3238_v9  ;;  %v3249_v44 = vsub.f32 %v3215_v19, %v3241_v16  ;;  %v4102_v6 = vpack.c.bf16 %v5686_v20, %v5686_v20  ;;  %v4107_v30 = vpack.c.bf16 %v5773_v41, %v5773_v41  ;;  %v6446_v9 = vld [vmem:[#allocation13_spill] sm:$0xff] }
0x1005   : > { %v4110_v20 = vpack.c.bf16 %v5777_v5, %v5777_v5  ;;  %v4113_v31 = vpack.c.bf16 %v5863_v54, %v5863_v54  ;;  %v4115_v41 = vpack.c.bf16 %v5861_v17, %v5861_v17  ;;  %v4121_v54 = vpack.c.bf16 %v6446_v9, %v6446_v9 }
0x1006   : > { %v3262_v11 = vmul.f32 1.442695, %v3248_v43  ;;  %v3264_v4 = vmul.f32 1.442695, %v3249_v44  ;;  %v6447_v43 = vld [vmem:[#allocation15_spill] sm:$0xff] }
0x1008   : > { %4978 = vpow2.f32 %v3262_v11  ;;  %v6448_v11 = vld [vmem:[#allocation12_spill] sm:$0xff] }
0x1009   : > { %v6071_v29 = vpop.eup %4970  ;;  %4980 = vpow2.f32 %v3258_v21  ;;  %v4123_v17 = vpack.c.bf16 %v6448_v11, %v6448_v11  ;;  %v6449_v21 = vld [vmem:[#allocation14_spill] sm:$0xff] }
0x100a   : > { %v3272_v18 = vsel %vm832_vm1, %v6071_v29, 0.0  ;;  %v6075_v53 = vpop.eup %4972  ;;  %4982 = vpow2.f32 %v3264_v4  ;;  %v6453_v4 = vld [vmem:[#allocation5_spill] sm:$0xff] }
0x100b   : > { %3273 = vadd.xlane.f32.xlu0 %v3272_v18  ;;  %v3266_v1 = vsel %vm832_vm1, %v6075_v53, 0.0  ;;  %v4126_v18 = vpack.c.bf16 %v6449_v21, %v6449_v21 }
0x100d   : > { %v6077_v45 = vpop.eup %4974 }
0x100e   : > { %v3275_v37 = vsel %vm832_vm1, %v6077_v45, 0.0  ;;  %v6081_v59 = vpop.eup %4976 }
0x100f   : > { %3276 = vadd.xlane.f32.xlu1 %v3275_v37  ;;  %3267 = vadd.xlane.f32.xlu0 %v3266_v1  ;;  %v3269_v8 = vsel %vm832_vm1, %v6081_v59, 0.0  ;;  %v4129_v37 = vpack.c.bf16 %v6042_v63, %v6042_v63  ;;  %v4132_v1 = vpack.c.bf16 %v6046_v36, %v6046_v36  ;;  %v6451_v63 = vld [vmem:[#allocation3_spill] sm:$0xff] }
0x1010   : > { %v4095_v16 = vpack.c.bf16 %v6451_v63, %v6451_v63 }
0x1013   : > { %3270 = vadd.xlane.f32.xlu1 %v3269_v8  ;;  %v4131_v8 = vpack.c.bf16 %v6040_v42, %v6040_v42 }
0x1015   : > { %v6087_v60 = vpop.eup %4978 }
0x1016   : > { %v3284_v56 = vsel %vm832_vm1, %v6087_v60, 0.0  ;;  %v6091_v15 = vpop.eup %4980 }
0x1017   : > { %3285 = vadd.xlane.f32.xlu0 %v3284_v56  ;;  %v3278_v62 = vsel %vm832_vm1, %v6091_v15, 0.0  ;;  %v6450_v56 = vld [vmem:[#allocation4_spill] sm:$0xff] }
0x101b   : > { %3279 = vadd.xlane.f32.xlu0 %v3278_v62  ;;  %v4093_v62 = vpack.c.bf16 %v6450_v56, %v6450_v56 }
0x1024   : > { %3314 = vrot.lane.b32.xlu1 %v5317_v50, %s5035_s13  ;;  %v4090_v50 = vpack.c.bf16 %v5662_v61, %v5662_v61  ;;  %v6117_v61 = vpop.eup %4982 }
0x1025   : > { %v3287_v7 = vsel %vm832_vm1, %v6117_v61, 0.0 }
0x1028   : > { %3312 = vrot.lane.b32.xlu1 %v5321_v51, %s5035_s13  ;;  %v3260_v51 = vmul.f32 1.442695, %v3247_v52 }
0x102a   : > { %4984 = vpow2.f32 %v3260_v51 }
0x1031   : > { %3316 = vrot.lane.b32.xlu0 %v5315_v48, %s5035_s13  ;;  %v4098_v48 = vpack.c.bf16 %v5678_v23, %v5678_v23  ;;  %v4112_v23 = vpack.c.bf16 %v5859_v49, %v5859_v49  ;;  %v4122_v49 = vpack.c.bf16 %v5945_v47, %v5945_v47  ;;  %v4092_v47 = vpack.c.bf16 %v5672_v57, %v5672_v57 }
0x1032   : > { %v4105_v57 = vpack.c.bf16 %v5775_v26, %v5775_v26  ;;  %v4116_v26 = vpack.c.bf16 %v5867_v25, %v5867_v25  ;;  %v4124_v25 = vpack.c.bf16 %v6447_v43, %v6447_v43 }
0x1035   : > { %1365 = vrot.lane.b32.xlu0 %v4088_v27, %s5035_s13  ;;  %v6452_v27 = vld [vmem:[#allocation6_spill] sm:$0xff] }
0x1036   : > { %v4101_v52 = vpack.c.bf16 %v6452_v27, %v6452_v27 }
0x1037   : > { %v6124_v19 = vpop.eup %4984 }
0x1038   : > { %v3281_v22 = vsel %vm832_vm1, %v6124_v19, 0.0 }
0x1039   : > { %1369 = vrot.lane.b32.xlu0 %v4090_v50, %s5035_s13  ;;  %v4103_v50 = vpack.c.bf16 %v6453_v4, %v6453_v4 }
0x103d   : > { %1708 = vrot.lane.b32.xlu0 %v4096_v32, %s5034_s12  ;;  %v6454_v32 = vld [vmem:[#allocation8_spill] sm:$0xff] }
0x1041   : > { %1712 = vrot.lane.b32.xlu0 %v4098_v48, %s5034_s12  ;;  %v4109_v48 = vpack.c.bf16 %v6454_v32, %v6454_v32 }
0x1045   : > { %2051 = vrot.lane.b32.xlu0 %v4104_v39, %s5033_s10 }
0x1049   : > { %2055 = vrot.lane.b32.xlu0 %v4106_v13, %s5033_s10  ;;  %v6455_v13 = vld [vmem:[#allocation7_spill] sm:$0xff] }
0x104c   : > { %3288 = vadd.xlane.f32.xlu1 %v3287_v7  ;;  %v4111_v7 = vpack.c.bf16 %v6455_v13, %v6455_v13 }
0x104d   : > { %2394 = vrot.lane.b32.xlu0 %v4112_v23, %s5032_s9 }
0x1050   : > { %3282 = vadd.xlane.f32.xlu1 %v3281_v22 }
0x1051   : > { %2398 = vrot.lane.b32.xlu0 %v4114_v58, %s5032_s9 }
0x1055   : > { %2737 = vrot.lane.b32.xlu0 %v4120_v35, %s5031_s8 }
0x1059   : > { %2741 = vrot.lane.b32.xlu0 %v4122_v49, %s5031_s8  ;;  %v6456_v49 = vld [vmem:[#allocation11_spill] sm:$0xff] }
0x105d   : > { %3080 = vrot.lane.b32.xlu0 %v4128_v3, %s5030_s30  ;;  %v4117_v3 = vpack.c.bf16 %v6456_v49, %v6456_v49 }
0x1061   : > { %3310 = vrot.lane.b32.xlu1 %v5334_v38, %s5035_s13  ;;  %3084 = vrot.lane.b32.xlu0 %v4130_v28, %s5030_s30  ;;  %v4097_v38 = vpack.c.bf16 %v5684_v12, %v5684_v12  ;;  %v4108_v12 = vpack.c.bf16 %v5779_v10, %v5779_v10  ;;  %v6445_v10 = vld [vmem:[#allocation9_spill] sm:$0xff] }
0x1062   : > { %v4118_v5 = vpack.c.bf16 %v6445_v10, %v6445_v10 }
0x1065   : > { %1367 = vrot.lane.b32.xlu1 %v4089_v2, %s5035_s13  ;;  %1373 = vrot.lane.b32.xlu0 %v4092_v47, %s5035_s13 }
0x1069   : > { %1371 = vrot.lane.b32.xlu1 %v4091_v55, %s5035_s13  ;;  %1377 = vrot.lane.b32.xlu0 %v4094_v34, %s5035_s13  ;;  %v6457_v34 = vld [vmem:[#allocation10_spill] sm:$0xff] }
0x106d   : > { %1710 = vrot.lane.b32.xlu1 %v4097_v38, %s5034_s12  ;;  %1716 = vrot.lane.b32.xlu0 %v4100_v24, %s5034_s12  ;;  %v4119_v38 = vpack.c.bf16 %v6457_v34, %v6457_v34 }
0x1071   : > { %1714 = vrot.lane.b32.xlu1 %v4099_v0, %s5034_s12  ;;  %1720 = vrot.lane.b32.xlu0 %v4102_v6, %s5034_s12 }
0x1075   : > { %2053 = vrot.lane.b32.xlu1 %v4105_v57, %s5033_s10  ;;  %2059 = vrot.lane.b32.xlu0 %v4108_v12, %s5033_s10  ;;  %v6459_v57 = vld [vmem:[#allocation16_spill] sm:$0xff] }
0x1076   : > { %v4127_v12 = vpack.c.bf16 %v6459_v57, %v6459_v57 }
0x1079   : > { %2057 = vrot.lane.b32.xlu1 %v4107_v30, %s5033_s10  ;;  %2063 = vrot.lane.b32.xlu0 %v4110_v20, %s5033_s10  ;;  %v4133_v20 = vpack.c.bf16 %v6050_v46, %v6050_v46 }
0x107d   : > { %2396 = vrot.lane.b32.xlu1 %v4113_v31, %s5032_s9  ;;  %2402 = vrot.lane.b32.xlu0 %v4116_v26, %s5032_s9 }
0x1081   : > { %2400 = vrot.lane.b32.xlu1 %v4115_v41, %s5032_s9  ;;  %2406 = vrot.lane.b32.xlu0 %v4118_v5, %s5032_s9 }
0x1085   : > { %2739 = vrot.lane.b32.xlu1 %v4121_v54, %s5031_s8  ;;  %2745 = vrot.lane.b32.xlu0 %v4124_v25, %s5031_s8 }
0x1089   : > { %2743 = vrot.lane.b32.xlu1 %v4123_v17, %s5031_s8  ;;  %2749 = vrot.lane.b32.xlu0 %v4126_v18, %s5031_s8 }
0x108d   : > { %3082 = vrot.lane.b32.xlu1 %v4129_v37, %s5030_s30  ;;  %3088 = vrot.lane.b32.xlu0 %v4132_v1, %s5030_s30 }
0x1091   : > { %3086 = vrot.lane.b32.xlu1 %v4131_v8, %s5030_s30 }
0x1094   : > { %v6219_v14 = vpop.xlane.xlu0 %3273 }
0x1095   : > { %1375 = vrot.lane.b32.xlu1 %v4093_v62, %s5035_s13 }
0x1098   : > { %v3277_v36 = vpop.xlane.xlu1 %3276  ;;  %v3268_v44 = vpop.xlane.xlu0 %3267 }
0x1099   : > { %1379 = vrot.lane.b32.xlu1 %v4095_v16, %s5035_s13  ;;  %4986 = vrcp.f32 %v3268_v44 }
0x109c   : > { %v3271_v42 = vpop.xlane.xlu1 %3270 }
0x109d   : > { %4988 = vrcp.f32 %v3271_v42  ;;  %1718 = vrot.lane.b32.xlu1 %v4101_v52, %s5034_s12 }
0x109e   : > { %4990 = vrcp.f32 %v3277_v36 }
0x109f   : > { %4992 = vrcp.f32 %v6219_v14 }
0x10a0   : > { %v6230_v51 = vpop.xlane.xlu0 %3285  ;;  %v3315_v22 = vpop.permute.xlu1 %3314 }
0x10a1   : > { %1722 = vrot.lane.b32.xlu1 %v4103_v50, %s5034_s12 }
0x10a4   : > { %v3280_v39 = vpop.xlane.xlu0 %3279  ;;  %v3313_v24 = vpop.permute.xlu1 %3312 }
0x10a5   : > { %2061 = vrot.lane.b32.xlu1 %v4109_v48, %s5033_s10 }
0x10a6   : > { %v4987_v23 = vpop.eup %4986 }
0x10a7   : > { %v3298_v28 = vmul.f32 %v4987_v23, %v6075_v53  ;;  %v6458_v53 = vld [vmem:[#allocation17_spill] sm:$0xff] }
0x10a8   : > { %v3317_v58 = vpop.permute.xlu0 %3316 }
0x10a9   : > { %2065 = vrot.lane.b32.xlu1 %v4111_v7, %s5033_s10  ;;  %4610 = vmatprep.subr.bf16.mxu0 %v3317_v58 }
0x10aa   : > { %v4989_v35 = vpop.eup %4988  ;;  %4611 = vmatpush3.bf16.msra.mxu0 %v3317_v58 }
0x10ab   : > { %v3299_v2 = vmul.f32 %v4989_v35, %v6081_v59  ;;  %4612 = vmatprep.subr.bf16.mxu0 %v3315_v22  ;;  %v4125_v59 = vpack.c.bf16 %v6458_v53, %v6458_v53  ;;  %v4991_v43 = vpop.eup %4990 }
0x10ac   : > { %v1366_v47 = vpop.permute.xlu0 %1365  ;;  %v4993_v17 = vpop.eup %4992  ;;  %v3301_v21 = vmul.f32 %v4991_v43, %v6077_v45  ;;  %v4741_v43 = vld [vmem:[%s6427_s5] sm:$0xff]  }
0x10ad   : > { %2404 = vrot.lane.b32.xlu1 %v4117_v3, %s5032_s9  ;;  %v3306_v55 = vpack.c.bf16 %v3299_v2, %v3298_v28  ;;  %1390 = vst.msk [vmem:[#allocation2] sm:$0xf] %vm1389_vm3, %v1366_v47  ;;  %v3300_v1 = vmul.f32 %v4993_v17, %v6071_v29 }
0x10ae   : > { %4613 = vmatpush3.bf16.msra.mxu0 %v3315_v22 }
0x10af   : > { %4618 = vmatprep.mubr.msk.bf16.mxu0 %vm832_vm1, %v3306_v55  ;;  %4614 = vmatprep.subr.bf16.mxu0 %v3313_v24  ;;  %v3307_v8 = vpack.c.bf16 %v3301_v21, %v3300_v1 }
0x10b0   : > { %v1370_v0 = vpop.permute.xlu0 %1369 }
0x10b1   : > { %2408 = vrot.lane.b32.xlu1 %v4119_v38, %s5032_s9  ;;  %1392 = vst.msk [vmem:[#allocation2 + $0x8] sm:$0xf] %vm1389_vm3, %v1370_v0 }
0x10b2   : > { %4615 = vmatpush3.bf16.msra.mxu0 %v3313_v24 }
0x10b4   : > { %v1709_v6 = vpop.permute.xlu0 %1708 }
0x10b5   : > { %2747 = vrot.lane.b32.xlu1 %v4125_v59, %s5031_s8  ;;  %1733 = vst.msk [vmem:[#allocation2] sm:$0xf] %vm1732_vm4, %v1709_v6 }
0x10b8   : > { %v1713_v30 = vpop.permute.xlu0 %1712 }
0x10b9   : > { %2751 = vrot.lane.b32.xlu1 %v4127_v12, %s5031_s8  ;;  %1735 = vst.msk [vmem:[#allocation2 + $0x8] sm:$0xf] %vm1732_vm4, %v1713_v30  ;;  %v4734_v30 = vld [vmem:[%s6427_s5 + $0x38] sm:$0xff]  }
0x10bc   : > { %v2052_v31 = vpop.permute.xlu0 %2051 }
0x10bd   : > { %3090 = vrot.lane.b32.xlu1 %v4133_v20, %s5030_s30  ;;  %2076 = vst.msk [vmem:[#allocation2] sm:$0xf] %vm2075_vm5, %v2052_v31  ;;  %v4735_v20 = vld [vmem:[%s6427_s5 + $0x30] sm:$0xff]   ;;  %v4736_v31 = vld [vmem:[%s6427_s5 + $0x28] sm:$0xff]  }
0x10c0   : > { %v2056_v26 = vpop.permute.xlu0 %2055 }
0x10c1   : > { %2078 = vst.msk [vmem:[#allocation2 + $0x8] sm:$0xf] %vm2075_vm5, %v2056_v26  ;;  %v4737_v26 = vld [vmem:[%s6427_s5 + $0x20] sm:$0xff]  }
0x10c4   : > { %v2395_v41 = vpop.permute.xlu0 %2394 }
0x10c5   : > { %2419 = vst.msk [vmem:[#allocation2] sm:$0xf] %vm2418_vm6, %v2395_v41  ;;  %v4738_v41 = vld [vmem:[%s6427_s5 + $0x18] sm:$0xff]  }
0x10c8   : > { %v2399_v10 = vpop.permute.xlu0 %2398 }
0x10c9   : > { %2421 = vst.msk [vmem:[#allocation2 + $0x8] sm:$0xf] %vm2418_vm6, %v2399_v10  ;;  %v4739_v10 = vld [vmem:[%s6427_s5 + $0x10] sm:$0xff]  }
0x10cc   : > { %v2738_v5 = vpop.permute.xlu0 %2737 }
0x10cd   : > { %2762 = vst.msk [vmem:[#allocation2] sm:$0xf] %vm2761_vm7, %v2738_v5  ;;  %v4740_v5 = vld [vmem:[%s6427_s5 + $0x8] sm:$0xff]  }
0x10d0   : > { %v2742_v46 = vpop.permute.xlu0 %2741 }
0x10d1   : > { %2764 = vst.msk [vmem:[#allocation2 + $0x8] sm:$0xf] %vm2761_vm7, %v2742_v46 }
0x10d4   : > { %v3081_v9 = vpop.permute.xlu0 %3080 }
0x10d5   : > { %v3289_v54 = vpop.xlane.xlu1 %3288  ;;  %3105 = vst.msk [vmem:[#allocation2] sm:$0xf] %vm3104_vm8, %v3081_v9 }
0x10d6   : > { %4994 = vrcp.f32 %v3289_v54 }
0x10d7   : > { %4996 = vrcp.f32 %v3280_v39 }
0x10d8   : > { %4998 = vrcp.f32 %v6230_v51  ;;  %v3085_v25 = vpop.permute.xlu0 %3084 }
0x10d9   : > { %v3283_v11 = vpop.xlane.xlu1 %3282  ;;  %3107 = vst.msk [vmem:[#allocation2 + $0x8] sm:$0xf] %vm3104_vm8, %v3085_v25 }
0x10da   : > { %5000 = vrcp.f32 %v3283_v11 }
0x10dc   : > { %v1374_v18 = vpop.permute.xlu0 %1373 }
0x10dd   : > { %v3311_v37 = vpop.permute.xlu1 %3310  ;;  %1394 = vst.msk [vmem:[#allocation2 + $0x10] sm:$0xf] %vm1389_vm3, %v1374_v18  ;;  %v4134_v18 = vpack.c.bf16 %v6044_v33, %v6044_v33 }
0x10de   : > { %4616 = vmatprep.subr.bf16.mxu0 %v3311_v37 }
0x10df   : > { %4617 = vmatpush3.bf16.msra.mxu0 %v3311_v37 }
0x10e0   : > { %v1378_v56 = vpop.permute.xlu0 %1377  ;;  %4626 = vmatprep.subr.bf16.mxu0 %v4734_v30 }
0x10e1   : > { %v1368_v62 = vpop.permute.xlu1 %1367  ;;  %1396 = vst.msk [vmem:[#allocation2 + $0x18] sm:$0xf] %vm1389_vm3, %v1378_v56 }
0x10e2   : > { %1391 = vst.msk [vmem:[#allocation2 + $0x4] sm:$0xf] %vm1389_vm3, %v1368_v62  ;;  %4619 = vmatmul.mubr.msk.bf16.vlgmr.msra.gmra.mxu0 %vm832_vm1, %v3307_v8  ;;  %v4135_v8 = vpack.c.bf16 %v6048_v40, %v6048_v40 }
0x10e3   : > { %v4995_v14 = vpop.eup %4994  ;;  %4627 = vmatpush3.bf16.msra.mxu0 %v4734_v30 }
0x10e4   : > { %v4997_v63 = vpop.eup %4996  ;;  %v1717_v45 = vpop.permute.xlu0 %1716  ;;  %v3305_v44 = vmul.f32 %v4995_v14, %v6117_v61  ;;  %4628 = vmatprep.subr.bf16.mxu0 %v4735_v20 }
0x10e5   : > { %v1372_v16 = vpop.permute.xlu1 %1371  ;;  %v4999_v36 = vpop.eup %4998  ;;  %1737 = vst.msk [vmem:[#allocation2 + $0x10] sm:$0xf] %vm1732_vm4, %v1717_v45  ;;  %v3302_v27 = vmul.f32 %v4997_v63, %v6091_v15 }
0x10e6   : > { %1393 = vst.msk [vmem:[#allocation2 + $0xc] sm:$0xf] %vm1389_vm3, %v1372_v16  ;;  %v3304_v50 = vmul.f32 %v4999_v36, %v6087_v60 }
0x10e7   : > { %v5001_v29 = vpop.eup %5000  ;;  %4629 = vmatpush3.bf16.msra.mxu0 %v4735_v20 }
0x10e8   : > { %v3303_v52 = vmul.f32 %v5001_v29, %v6124_v19  ;;  %v1721_v42 = vpop.permute.xlu0 %1720  ;;  %v3309_v32 = vpack.c.bf16 %v3305_v44, %v3304_v50  ;;  %4630 = vmatprep.subr.bf16.mxu0 %v4736_v31 }
0x10e9   : > { %v1711_v4 = vpop.permute.xlu1 %1710  ;;  %1739 = vst.msk [vmem:[#allocation2 + $0x18] sm:$0xf] %vm1732_vm4, %v1721_v42 }
0x10ea   : > { %1734 = vst.msk [vmem:[#allocation2 + $0x4] sm:$0xf] %vm1732_vm4, %v1711_v4  ;;  %v3308_v51 = vpack.c.bf16 %v3303_v52, %v3302_v27 }
0x10eb   : > { %4631 = vmatpush3.bf16.msra.mxu0 %v4736_v31 }
0x10ec   : > { %4622 = vmatprep.mubr.msk.bf16.mxu0 %vm832_vm1, %v3308_v51  ;;  %v2060_v48 = vpop.permute.xlu0 %2059  ;;  %4632 = vmatprep.subr.bf16.mxu0 %v4737_v26 }
0x10ed   : > { %v1715_v39 = vpop.permute.xlu1 %1714  ;;  %4623 = vmatmul.mubr.msk.bf16.gmra.mxu0 %vm832_vm1, %v3309_v32  ;;  %2080 = vst.msk [vmem:[#allocation2 + $0x10] sm:$0xf] %vm2075_vm5, %v2060_v48 }
0x10ee   : > { %1736 = vst.msk [vmem:[#allocation2 + $0xc] sm:$0xf] %vm1732_vm4, %v1715_v39 }
0x10ef   : > { %4633 = vmatpush3.bf16.msra.mxu0 %v4737_v26 }
0x10f0   : > { %v2064_v15 = vpop.permute.xlu0 %2063  ;;  %4634 = vmatprep.subr.bf16.mxu0 %v4738_v41 }
0x10f1   : > { %v2054_v61 = vpop.permute.xlu1 %2053  ;;  %2082 = vst.msk [vmem:[#allocation2 + $0x18] sm:$0xf] %vm2075_vm5, %v2064_v15 }
0x10f2   : > { %2077 = vst.msk [vmem:[#allocation2 + $0x4] sm:$0xf] %vm2075_vm5, %v2054_v61  ;;  %v4188_v61 = vld [vmem:[%s5133_s11 + $0x8] sm:$0xff]  }
0x10f3   : > { %4635 = vmatpush3.bf16.msra.mxu0 %v4738_v41 }
0x10f4   : > { %v2403_v60 = vpop.permute.xlu0 %2402  ;;  %4636 = vmatprep.subr.bf16.mxu0 %v4739_v10 }
0x10f5   : > { %v2058_v19 = vpop.permute.xlu1 %2057  ;;  %2423 = vst.msk [vmem:[#allocation2 + $0x10] sm:$0xf] %vm2418_vm6, %v2403_v60  ;;  %v4052_v60 = vld [vmem:[%s6428_s6 + $0x3] ss:$0 sm:$0xff] }
0x10f6   : > { %2079 = vst.msk [vmem:[#allocation2 + $0xc] sm:$0xf] %vm2075_vm5, %v2058_v19  ;;  %v4158_v19 = vunpack.c.l.bf16 %v4188_v61 }
0x10f7   : > { %4637 = vmatpush3.bf16.msra.mxu0 %v4739_v10 }
0x10f8   : > { %v2407_v13 = vpop.permute.xlu0 %2406  ;;  %4638 = vmatprep.subr.bf16.mxu0 %v4740_v5 }
0x10f9   : > { %v2397_v7 = vpop.permute.xlu1 %2396  ;;  %2425 = vst.msk [vmem:[#allocation2 + $0x18] sm:$0xf] %vm2418_vm6, %v2407_v13 }
0x10fa   : > { %2420 = vst.msk [vmem:[#allocation2 + $0x4] sm:$0xf] %vm2418_vm6, %v2397_v7  ;;  %v4153_v7 = vld [vmem:[%s5133_s11] sm:$0xff]  }
0x10fb   : > { %4639 = vmatpush3.bf16.msra.mxu0 %v4740_v5 }
0x10fc   : > { %v2746_v23 = vpop.permute.xlu0 %2745  ;;  %4640 = vmatprep.subr.bf16.mxu0 %v4741_v43 }
0x10fd   : > { %v2401_v22 = vpop.permute.xlu1 %2400  ;;  %2766 = vst.msk [vmem:[#allocation2 + $0x10] sm:$0xf] %vm2761_vm7, %v2746_v23 }
0x10fe   : > { %2422 = vst.msk [vmem:[#allocation2 + $0xc] sm:$0xf] %vm2418_vm6, %v2401_v22 }
0x10ff   : > { %4641 = vmatpush3.bf16.msra.mxu0 %v4741_v43 }
0x1100   : > { %v2750_v58 = vpop.permute.xlu0 %2749 }
0x1101   : > { %v2740_v35 = vpop.permute.xlu1 %2739  ;;  %2768 = vst.msk [vmem:[#allocation2 + $0x18] sm:$0xf] %vm2761_vm7, %v2750_v58 }
0x1102   : > { %2763 = vst.msk [vmem:[#allocation2 + $0x4] sm:$0xf] %vm2761_vm7, %v2740_v35 }
0x1104   : > { %v3089_v49 = vpop.permute.xlu0 %3088 }
0x1105   : > { %v2744_v3 = vpop.permute.xlu1 %2743  ;;  %3109 = vst.msk [vmem:[#allocation2 + $0x10] sm:$0xf] %vm3104_vm8, %v3089_v49  ;;  %v4154_v49 = vunpack.c.l.bf16 %v4153_v7 }
0x1106   : > { %2765 = vst.msk [vmem:[#allocation2 + $0xc] sm:$0xf] %vm2761_vm7, %v2744_v3 }
0x1109   : > { %v3083_v28 = vpop.permute.xlu1 %3082 }
0x110a   : > { %3106 = vst.msk [vmem:[#allocation2 + $0x4] sm:$0xf] %vm3104_vm8, %v3083_v28  ;;  %v4155_v28 = vunpack.c.h.bf16 %v4153_v7 }
0x110d   : > { %v3087_v2 = vpop.permute.xlu1 %3086 }
0x110e   : > { %3108 = vst.msk [vmem:[#allocation2 + $0xc] sm:$0xf] %vm3104_vm8, %v3087_v2 }
0x1111   : > { %v1376_v47 = vpop.permute.xlu1 %1375 }
0x1112   : > { %1395 = vst.msk [vmem:[#allocation2 + $0x14] sm:$0xf] %vm1389_vm3, %v1376_v47 }
0x1115   : > { %v1380_v55 = vpop.permute.xlu1 %1379 }
0x1116   : > { %1397 = vst.msk [vmem:[#allocation2 + $0x1c] sm:$0xf] %vm1389_vm3, %v1380_v55 }
0x1119   : > { %v1719_v34 = vpop.permute.xlu1 %1718 }
0x111a   : > { %1738 = vst.msk [vmem:[#allocation2 + $0x14] sm:$0xf] %vm1732_vm4, %v1719_v34  ;;  %v4159_v34 = vunpack.c.h.bf16 %v4188_v61 }
0x111d   : > { %v1723_v38 = vpop.permute.xlu1 %1722 }
0x111e   : > { %1740 = vst.msk [vmem:[#allocation2 + $0x1c] sm:$0xf] %vm1732_vm4, %v1723_v38 }
0x1121   : > { %v2062_v24 = vpop.permute.xlu1 %2061 }
0x1122   : > { %2081 = vst.msk [vmem:[#allocation2 + $0x14] sm:$0xf] %vm2075_vm5, %v2062_v24 }
0x1125   : > { %v2066_v0 = vpop.permute.xlu1 %2065 }
0x1126   : > { %2083 = vst.msk [vmem:[#allocation2 + $0x1c] sm:$0xf] %vm2075_vm5, %v2066_v0  ;;  %v4189_v0 = vld [vmem:[%s5133_s11 + $0x10] sm:$0xff]  }
0x1127   : > { %v4163_v10 = vunpack.c.h.bf16 %v4189_v0 }
0x1129   : > { %v2405_v53 = vpop.permute.xlu1 %2404 }
0x112a   : > { %2424 = vst.msk [vmem:[#allocation2 + $0x14] sm:$0xf] %vm2418_vm6, %v2405_v53 }
0x112d   : > { %v2409_v59 = vpop.permute.xlu1 %2408 }
0x112e   : > { %2426 = vst.msk [vmem:[#allocation2 + $0x1c] sm:$0xf] %vm2418_vm6, %v2409_v59 }
0x1131   : > { %v2748_v6 = vpop.permute.xlu1 %2747 }
0x1132   : > { %2767 = vst.msk [vmem:[#allocation2 + $0x14] sm:$0xf] %vm2761_vm7, %v2748_v6  ;;  %v4162_v6 = vunpack.c.l.bf16 %v4189_v0 }
0x1135   : > { %v2752_v57 = vpop.permute.xlu1 %2751 }
0x1136   : > { %2769 = vst.msk [vmem:[#allocation2 + $0x1c] sm:$0xf] %vm2761_vm7, %v2752_v57  ;;  %v4190_v57 = vld [vmem:[%s5133_s11 + $0x18] sm:$0xff]  }
0x1137   : > { %v4166_v26 = vunpack.c.l.bf16 %v4190_v57  ;;  %v4167_v43 = vunpack.c.h.bf16 %v4190_v57 }
0x1139   : > { %v3091_v12 = vpop.permute.xlu1 %3090 }
0x113a   : > { %3110 = vst.msk [vmem:[#allocation2 + $0x14] sm:$0xf] %vm3104_vm8, %v3091_v12 }
0x11a2   : > { %v4620_v46 = vpop.f32.mrf.mxu0 }
0x11a3   : > { %v4138_v9 = vpack.c.bf16 %v4620_v46, %v4620_v46 }
0x11a4   : > { %v3368_v54 = vpop.f32.mrf.mxu0 }
0x11a5   : > { %3427 = vrot.lane.b32.xlu0 %v4138_v9, %s5029_s25  ;;  %v4136_v11 = vpack.c.bf16 %v3368_v54, %v3368_v54 }
0x11a6   : > { %v4621_v25 = vpop.f32.mrf.mxu0 }
0x11a7   : > { %v4139_v17 = vpack.c.bf16 %v4621_v25, %v4621_v25 }
0x11a8   : > { %v3371_v21 = vpop.f32.mrf.mxu0 }
0x11a9   : > { %3423 = vrot.lane.b32.xlu0 %v4136_v11, %s5029_s25  ;;  %3429 = vrot.lane.b32.xlu1 %v4139_v17, %s5029_s25  ;;  %v4137_v37 = vpack.c.bf16 %v3371_v21, %v3371_v21 }
0x11ad   : > { %3092 = vrot.lane.b32.xlu0 %v4134_v18, %s5030_s30  ;;  %3425 = vrot.lane.b32.xlu1 %v4137_v37, %s5029_s25  ;;  %v4624_v1 = vpop.f32.mrf.mxu0 }
0x11ae   : > { %v4142_v45 = vpack.c.bf16 %v4624_v1, %v4624_v1 }
0x11af   : > { %v3384_v56 = vpop.f32.mrf.mxu0 }
0x11b0   : > { %v4140_v62 = vpack.c.bf16 %v3384_v56, %v3384_v56 }
0x11b1   : > { %3094 = vrot.lane.b32.xlu1 %v4135_v8, %s5030_s30  ;;  %v4625_v14 = vpop.f32.mrf.mxu0 }
0x11b2   : > { %3431 = vrot.lane.b32.xlu0 %v4140_v62, %s5029_s25  ;;  %v4143_v33 = vpack.c.bf16 %v4625_v14, %v4625_v14 }
0x11b3   : > { %v3387_v63 = vpop.f32.mrf.mxu0 }
0x11b4   : > { %v4141_v16 = vpack.c.bf16 %v3387_v63, %v3387_v63 }
0x11b6   : > { %3435 = vrot.lane.b32.xlu0 %v4142_v45, %s5029_s25  ;;  %3433 = vrot.lane.b32.xlu1 %v4141_v16, %s5029_s25 }
0x11ba   : > { %3437 = vrot.lane.b32.xlu1 %v4143_v33, %s5029_s25 }
0x1217   : > { %v3428_v36 = vpop.permute.xlu0 %3427 }
0x1218   : > { %3450 = vst.msk [vmem:[#allocation2 + $0x8] sm:$0xf] %vm3447_vm9, %v3428_v36 }
0x121b   : > { %v3430_v40 = vpop.permute.xlu1 %3429  ;;  %v3424_v29 = vpop.permute.xlu0 %3423 }
0x121c   : > { %3451 = vst.msk [vmem:[#allocation2 + $0xc] sm:$0xf] %vm3447_vm9, %v3430_v40  ;;  %3448 = vst.msk [vmem:[#allocation2] sm:$0xf] %vm3447_vm9, %v3424_v29 }
0x121f   : > { %v3426_v44 = vpop.permute.xlu1 %3425  ;;  %v3093_v27 = vpop.permute.xlu0 %3092 }
0x1220   : > { %3449 = vst.msk [vmem:[#allocation2 + $0x4] sm:$0xf] %vm3447_vm9, %v3426_v44 }
0x1221   : > { %3111 = vst.msk [vmem:[#allocation2 + $0x18] sm:$0xf] %vm3104_vm8, %v3093_v27 }
0x1223   : > { %v3095_v52 = vpop.permute.xlu1 %3094  ;;  %v4743_v32 = vld [vmem:[#allocation2 + $0x8] sm:$0xff]  }
0x1224   : > { %3112 = vst.msk [vmem:[#allocation2 + $0x1c] sm:$0xf] %vm3104_vm8, %v3095_v52  ;;  %v3432_v42 = vpop.permute.xlu0 %3431 }
0x1225   : > { %3452 = vst.msk [vmem:[#allocation2 + $0x10] sm:$0xf] %vm3447_vm9, %v3432_v42 }
0x1227   : > { %v4742_v4 = vld [vmem:[#allocation2] sm:$0xff]  }
0x1228   : > { %v3434_v50 = vpop.permute.xlu1 %3433  ;;  %v3436_v51 = vpop.permute.xlu0 %3435  ;;  %4642 = vmatprep.mubr.bf16.mxu0 %v4742_v4 }
0x1229   : > { %3453 = vst.msk [vmem:[#allocation2 + $0x14] sm:$0xf] %vm3447_vm9, %v3434_v50  ;;  %3454 = vst.msk [vmem:[#allocation2 + $0x18] sm:$0xf] %vm3447_vm9, %v3436_v51  ;;  %4643 = vmatmul.mubr.bf16.vlgmr.msra.gmra.mxu0 %v4743_v32 }
0x122c   : > { %v3438_v48 = vpop.permute.xlu1 %3437 }
0x122d   : > { %3455 = vst.msk [vmem:[#allocation2 + $0x1c] sm:$0xf] %vm3447_vm9, %v3438_v48 }
0x1230   : > { %v4744_v39 = vld [vmem:[#allocation2 + $0x10] sm:$0xff]  }
0x1231   : > { %4646 = vmatprep.mubr.bf16.mxu0 %v4744_v39 }
0x1234   : > { %v4745_v15 = vld [vmem:[#allocation2 + $0x18] sm:$0xff]  }
0x1235   : > { %4647 = vmatmul.mubr.bf16.gmra.mxu0 %v4745_v15 }
0x12e9   : > { %v4644_v13 = vpop.f32.mrf.mxu0 }
0x12ea   : > { %v3600_v23 = vadd.f32 %v4644_v13, %v4052_v60 }
0x12eb   : > { %v3591_v22 = vpop.f32.mrf.mxu0 }
0x12ec   : > { %v3640_v58 = vadd.f32 %v4158_v19, %v3600_v23  ;;  %v3592_v35 = vadd.f32 %v4052_v60, %v3591_v22 }
0x12ed   : > { %v4645_v3 = vpop.f32.mrf.mxu0 }
0x12ee   : > { %3650 = vadd.xlane.f32.xlu0 %v3640_v58  ;;  %v3638_v47 = vadd.f32 %v4154_v49, %v3592_v35  ;;  %v3603_v55 = vadd.f32 %v4645_v3, %v4052_v60 }
0x12ef   : > { %v3594_v2 = vpop.f32.mrf.mxu0 }
0x12f0   : > { %v3595_v38 = vadd.f32 %v4052_v60, %v3594_v2  ;;  %v3641_v53 = vadd.f32 %v4159_v34, %v3603_v55 }
0x12f2   : > { %v3639_v24 = vadd.f32 %v4155_v28, %v3595_v38  ;;  %3646 = vadd.xlane.f32.xlu0 %v3638_v47 }
0x12f4   : > { %3648 = vadd.xlane.f32.xlu1 %v3639_v24 }
0x12f5   : > { %v4648_v59 = vpop.f32.mrf.mxu0 }
0x12f6   : > { %3652 = vadd.xlane.f32.xlu0 %v3641_v53  ;;  %v3616_v31 = vadd.f32 %v4648_v59, %v4052_v60 }
0x12f7   : > { %v3607_v12 = vpop.f32.mrf.mxu0 }
0x12f8   : > { %v3608_v30 = vadd.f32 %v4052_v60, %v3607_v12  ;;  %v3644_v9 = vadd.f32 %v4166_v26, %v3616_v31 }
0x12f9   : > { %v4649_v20 = vpop.f32.mrf.mxu0 }
0x12fa   : > { %v3642_v41 = vadd.f32 %v4162_v6, %v3608_v30  ;;  %v3619_v54 = vadd.f32 %v4649_v20, %v4052_v60 }
0x12fb   : > { %v3610_v5 = vpop.f32.mrf.mxu0 }
0x12fc   : > { %v3611_v46 = vadd.f32 %v4052_v60, %v3610_v5  ;;  %3654 = vadd.xlane.f32.xlu0 %v3642_v41  ;;  %v3645_v11 = vadd.f32 %v4167_v43, %v3619_v54 }
0x12fe   : > { %v3643_v25 = vadd.f32 %v4163_v10, %v3611_v46  ;;  %v4065_v46 = vld [vmem:[%s6428_s6 + $0x4] ss:$0 sm:$0xff] }
0x1300   : > { %3656 = vadd.xlane.f32.xlu1 %v3643_v25  ;;  %3658 = vadd.xlane.f32.xlu0 %v3644_v9 }
0x1304   : > { %3660 = vadd.xlane.f32.xlu1 %v3645_v11 }
0x1377   : > { %v3651_v17 = vpop.xlane.xlu0 %3650 }
0x1378   : > { %v3665_v21 = vmul.f32 0.0078125, %v3651_v17  ;;  %v4066_v17 = vld [vmem:[%s6428_s6 + $0x5] ss:$0 sm:$0xff] }
0x137a   : > { %v6369_v18 = vsub.f32 %v3640_v58, %v3665_v21 }
0x137b   : > { %v3647_v37 = vpop.xlane.xlu0 %3646 }
0x137c   : > { %v3663_v1 = vmul.f32 0.0078125, %v3647_v37  ;;  %v3681_v8 = vmul.f32 %v6369_v18, %v6369_v18 }
0x137d   : > { %v3649_v56 = vpop.xlane.xlu1 %3648 }
0x137e   : > { %v6373_v62 = vsub.f32 %v3638_v47, %v3663_v1  ;;  %3691 = vadd.xlane.f32.xlu0 %v3681_v8  ;;  %v3664_v63 = vmul.f32 0.0078125, %v3649_v56 }
0x137f   : > { %v3653_v14 = vpop.xlane.xlu0 %3652 }
0x1380   : > { %v3666_v45 = vmul.f32 0.0078125, %v3653_v14  ;;  %v3679_v16 = vmul.f32 %v6373_v62, %v6373_v62  ;;  %v6379_v36 = vsub.f32 %v3639_v24, %v3664_v63 }
0x1382   : > { %v6377_v33 = vsub.f32 %v3641_v53, %v3666_v45  ;;  %3687 = vadd.xlane.f32.xlu0 %v3679_v16  ;;  %v3680_v52 = vmul.f32 %v6379_v36, %v6379_v36 }
0x1384   : > { %v3682_v40 = vmul.f32 %v6377_v33, %v6377_v33 }
0x1385   : > { %v3655_v29 = vpop.xlane.xlu0 %3654 }
0x1386   : > { %v3667_v44 = vmul.f32 0.0078125, %v3655_v29  ;;  %3693 = vadd.xlane.f32.xlu1 %v3682_v40 }
0x1388   : > { %v6383_v27 = vsub.f32 %v3642_v41, %v3667_v44 }
0x1389   : > { %v3657_v42 = vpop.xlane.xlu1 %3656  ;;  %v3659_v4 = vpop.xlane.xlu0 %3658 }
0x138a   : > { %v3668_v50 = vmul.f32 0.0078125, %v3657_v42  ;;  %v3669_v51 = vmul.f32 0.0078125, %v3659_v4  ;;  %3689 = vadd.xlane.f32.xlu1 %v3680_v52  ;;  %v3683_v32 = vmul.f32 %v6383_v27, %v6383_v27 }
0x138c   : > { %v6389_v48 = vsub.f32 %v3643_v25, %v3668_v50  ;;  %v6391_v39 = vsub.f32 %v3644_v9, %v3669_v51  ;;  %3695 = vadd.xlane.f32.xlu0 %v3683_v32 }
0x138d   : > { %v3661_v15 = vpop.xlane.xlu1 %3660 }
0x138e   : > { %v3670_v61 = vmul.f32 0.0078125, %v3661_v15  ;;  %v3684_v60 = vmul.f32 %v6389_v48, %v6389_v48  ;;  %v3685_v19 = vmul.f32 %v6391_v39, %v6391_v39 }
0x1390   : > { %v6397_v13 = vsub.f32 %v3645_v11, %v3670_v61  ;;  %3697 = vadd.xlane.f32.xlu1 %v3684_v60  ;;  %3699 = vadd.xlane.f32.xlu0 %v3685_v19 }
0x1392   : > { %v3686_v7 = vmul.f32 %v6397_v13, %v6397_v13 }
0x1394   : > { %3701 = vadd.xlane.f32.xlu1 %v3686_v7 }
0x1407   : > { %v3692_v23 = vpop.xlane.xlu0 %3691 }
0x1408   : > { %v3705_v22 = vmul.f32 0.0078125, %v3692_v23 }
0x140a   : > { %v3713_v58 = vadd.f32 1e-05, %v3705_v22 }
0x140b   : > { %v3688_v35 = vpop.xlane.xlu0 %3687 }
0x140c   : > { %v3703_v49 = vmul.f32 0.0078125, %v3688_v35  ;;  %5002 = vrsqrt.f32 %v3713_v58 }
0x140e   : > { %v3711_v3 = vadd.f32 1e-05, %v3703_v49 }
0x140f   : > { %v3694_v28 = vpop.xlane.xlu1 %3693 }
0x1410   : > { %v3706_v2 = vmul.f32 0.0078125, %v3694_v28  ;;  %5004 = vrsqrt.f32 %v3711_v3 }
0x1412   : > { %v3714_v47 = vadd.f32 1e-05, %v3706_v2 }
0x1413   : > { %v3690_v55 = vpop.xlane.xlu1 %3689 }
0x1414   : > { %5006 = vrsqrt.f32 %v3714_v47  ;;  %v3704_v34 = vmul.f32 0.0078125, %v3690_v55 }
0x1415   : > { %v3696_v38 = vpop.xlane.xlu0 %3695 }
0x1416   : > { %v3712_v24 = vadd.f32 1e-05, %v3704_v34  ;;  %v3707_v0 = vmul.f32 0.0078125, %v3696_v38 }
0x1418   : > { %5008 = vrsqrt.f32 %v3712_v24  ;;  %v3715_v53 = vadd.f32 1e-05, %v3707_v0 }
0x1419   : > { %v3698_v59 = vpop.xlane.xlu1 %3697  ;;  %v3700_v6 = vpop.xlane.xlu0 %3699 }
0x141a   : > { %5010 = vrsqrt.f32 %v3715_v53  ;;  %v3708_v57 = vmul.f32 0.0078125, %v3698_v59  ;;  %v3709_v12 = vmul.f32 0.0078125, %v3700_v6  ;;  %v5003_v30 = vpop.eup %5002 }
0x141b   : > { %v3729_v41 = vmul.f32 %v5003_v30, %v6369_v18 }
0x141c   : > { %v3716_v20 = vadd.f32 1e-05, %v3708_v57  ;;  %v3717_v31 = vadd.f32 1e-05, %v3709_v12 }
0x141d   : > { %v3702_v26 = vpop.xlane.xlu1 %3701  ;;  %v5005_v5 = vpop.eup %5004  ;;  %v3742_v43 = vmul.f32 %v4065_v46, %v3729_v41 }
0x141e   : > { %5012 = vrsqrt.f32 %v3716_v20  ;;  %v3710_v10 = vmul.f32 0.0078125, %v3702_v26  ;;  %v3727_v25 = vmul.f32 %v5005_v5, %v6373_v62 }
0x141f   : > { %5014 = vrsqrt.f32 %v3717_v31  ;;  %v3755_v37 = vadd.f32 %v4066_v17, %v3742_v43 }
0x1420   : > { %v3718_v9 = vadd.f32 1e-05, %v3710_v10  ;;  %v3740_v1 = vmul.f32 %v4065_v46, %v3727_v25 }
0x1421   : > { %v5007_v54 = vpop.eup %5006 }
0x1422   : > { %v3730_v11 = vmul.f32 %v5007_v54, %v6377_v33  ;;  %5016 = vrsqrt.f32 %v3718_v9  ;;  %v3753_v16 = vadd.f32 %v4066_v17, %v3740_v1 }
0x1424   : > { %v3743_v21 = vmul.f32 %v4065_v46, %v3730_v11 }
0x1425   : > { %v5009_v18 = vpop.eup %5008 }
0x1426   : > { %v3756_v8 = vadd.f32 %v4066_v17, %v3743_v21  ;;  %v3728_v56 = vmul.f32 %v5009_v18, %v6379_v36 }
0x1427   : > { %v5011_v14 = vpop.eup %5010 }
0x1428   : > { %v4176_v62 = vpack.c.bf16 %v3756_v8, %v3755_v37  ;;  %v3741_v63 = vmul.f32 %v4065_v46, %v3728_v56  ;;  %v3731_v45 = vmul.f32 %v5011_v14, %v6383_v27 }
0x142a   : > { %4191 = vst [vmem:[%s312_s17 + $0x8] sm:$0xff] %v4176_v62   ;;  %v3754_v33 = vadd.f32 %v4066_v17, %v3741_v63  ;;  %v3744_v52 = vmul.f32 %v4065_v46, %v3731_v45 }
0x142b   : > { %v5013_v40 = vpop.eup %5012 }
0x142c   : > { %v5015_v29 = vpop.eup %5014  ;;  %v4171_v44 = vpack.c.bf16 %v3754_v33, %v3753_v16  ;;  %v3732_v42 = vmul.f32 %v5013_v40, %v6389_v48  ;;  %v3757_v51 = vadd.f32 %v4066_v17, %v3744_v52 }
0x142d   : > { %v3733_v36 = vmul.f32 %v5015_v29, %v6391_v39 }
0x142e   : > { %4172 = vst [vmem:[%s312_s17] sm:$0xff] %v4171_v44   ;;  %v3745_v4 = vmul.f32 %v4065_v46, %v3732_v42 }
0x142f   : > { %v5017_v50 = vpop.eup %5016  ;;  %v3746_v15 = vmul.f32 %v4065_v46, %v3733_v36 }
0x1430   : > { %v3758_v32 = vadd.f32 %v4066_v17, %v3745_v4  ;;  %v3734_v61 = vmul.f32 %v5017_v50, %v6397_v13 }
0x1431   : > { %v3759_v19 = vadd.f32 %v4066_v17, %v3746_v15 }
0x1432   : > { %v4181_v27 = vpack.c.bf16 %v3758_v32, %v3757_v51  ;;  %v3747_v60 = vmul.f32 %v4065_v46, %v3734_v61 }
0x1434   : > { %4192 = vst [vmem:[%s312_s17 + $0x10] sm:$0xff] %v4181_v27   ;;  %v3760_v7 = vadd.f32 %v4066_v17, %v3747_v60 }
0x1436   : > { %v4186_v23 = vpack.c.bf16 %v3760_v7, %v3759_v19 }
0x1438   : > { %4193 = vst [vmem:[%s312_s17 + $0x18] sm:$0xff] %v4186_v23  }
0x1439 PF: > { %s17_s24 = sadd.s32 1, %s5026_s24  }
0x143a   : > { %p14_p4 = scmp.ge.s32.totalorder %s17_s24, 4  }
0x143c   :  { %16 = sbr.rel (!%p14_p4) target bundleno = 1 (0x1), region = 84 }

// kernel: transformer_forward.19
= control target key start
LH: loop header
LB: loop body
LE: loop exit
PB: predicated region body
PF: predicated region fallthrough
CT: control target
= control target key end

     0   :  { %10 = vsyncpa [#allocation3], 0  ;;  %s1197_s0 = inlined_call_operand.vmem [shape: bf16[32,128], index: 0, kind: input, shape index: {}]   ;;  %s1198_s1 = inlined_call_operand.vmem [shape: bf16[128,256], index: 1, kind: input, shape index: {}]   ;;  %s1199_s2 = inlined_call_operand.vmem [shape: f32[1,256], index: 2, kind: input, shape index: {}]   ;;  %s1200_s3 = inlined_call_operand.vmem [shape: bf16[256,128], index: 3, kind: input, shape index: {}]   ;;  %s1201_s4 = inlined_call_operand.vmem [shape: f32[8,128], index: 4, kind: input, shape index: {}]   ;;  %s1202_s5 = inlined_call_operand.hbm [shape: f32[32,128], index: 5, kind: output, shape index: {}]  }
   0x1   :  { %12 = vsyncpa [#allocation3 + $0x1], 0  ;;  %s982_s18 = smov 0   ;;  %s984_s19 = smov 0  }
   0x2   :  { %s986_s20 = smov 0   ;;  %s988_s21 = smov 0  }
   0x3 LB: > { %s1003_s22 = sadd.s32 4294967295, %s946_s21   ;;  %s721_s23 = sadd.s32 4294967294, %s946_s21   ;;  %s946_s21 = sphi %s988_s21, %s1208_s21   ;;  %s942_s20 = sphi %s986_s20, %s1207_s20   ;;  %s938_s19 = sphi %s984_s19, %s1206_s19   ;;  %s934_s18 = sphi %s982_s18, %s1205_s18  }
   0x4   : > { %s1007_s24 = sadd.s32 1, %s946_s21   ;;  %s135_s25 = sadd.s32 1, %s942_s20 }
   0x5   : > { %s132_s26 = ssub.s32 %s946_s21, %s1007_s24  ;;  %p145_p0 = scmp.ne.s32.totalorder %s942_s20, %s938_s19 }
   0x6   : > { %p133_p1 = scmp.eq.s32.totalorder %s132_s26, 0  ;;  %p146_p2 = scmp.eq.s32.totalorder %s1003_s22, 1 }
   0x7   : > { %p151_p3 = scmp.ne.s32.totalorder %s938_s19, %s934_s18  ;;  %p152_p4 = scmp.eq.s32.totalorder %s721_s23, 1 }
   0x8   : > { %s1018_s27 = scalar_select %p133_p1, %s942_s20, %s135_s25  }
   0x9   : > { %p1020_p5 = por %p146_p2, %p145_p0  ;;  %p1024_p6 = por %p152_p4, %p151_p3 }
   0xa   : > { %p724_p7 = scmp.ge.s32.totalorder %s946_s21, 1  ;;  %p191_p8 = scmp.lt.s32.totalorder %s946_s21, 3 }
   0xc   : > { %p192_p9 = pnand %p724_p7, %p191_p8 }
   0xd   : > { %s726_s25 = sshll.u32 (!%p192_p9), %s1003_s22, 1  ;;  %s771_s10 = sshll.u32 (!%p192_p9), %s1003_s22, 8 }
   0xe   : > { %195 = sbr.rel (%p192_p9) target bundleno = 1089 (0x441), region = 40  ;;  %p220_p10 = scmp.lt.s32.totalorder (!%p192_p9), %s726_s25, 3 }
   0xf   : > { %s1153_s14 = scalar_lea.hbm (!%p192_p9), %s1202_s5, %s771_s10  ;;  %s949_s22 = smov (!%p192_p9), [#allocation2]  }
  0x10   : > { %s890_s17 = sshll.u32 (!%p192_p9), %s949_s22, 4  ;;  %s891_s17 = int_to_ptr.vmem [resolvable:$false] %s890_s17 }
  0x11   : > { %s892_s23 = scalar_lea.vmem (!%p192_p9), %s891_s17, 512 }
  0x13   : > { %v836_v0 = vld [vmem:[%s1198_s1 + $0x74] ss:$8 sps:$4 sm:$0xff]   ;;  %v838_v1 = vld [vmem:[%s1198_s1 + $0x70] ss:$8 sps:$4 sm:$0xff]   ;;  %v948_v2 = vmov 0   ;;  %s1210_s25 = smov (!%p220_p10, %s726_s25), 3  ;;  %v247_v34 = vlaneseq }
  0x14   : > { %375 = vmatprep.mubr.bf16.mxu0 %v948_v2  ;;  %343 = vmatprep.subr.bf16.mxu0 %v836_v0  ;;  %v839_v3 = vld [vmem:[%s1198_s1 + $0x64] ss:$8 sps:$4 sm:$0xff]   ;;  %v841_v4 = vld [vmem:[%s1198_s1 + $0x60] ss:$8 sps:$4 sm:$0xff]   ;;  %v842_v5 = vld [vmem:[%s1198_s1 + $0x54] ss:$8 sps:$4 sm:$0xff]  }
  0x15   : > { %344 = vmatpush1.bf16.msra.mxu0 %v838_v1  ;;  %v844_v6 = vld [vmem:[%s1198_s1 + $0x50] ss:$8 sps:$4 sm:$0xff]   ;;  %v845_v7 = vld [vmem:[%s1198_s1 + $0x44] ss:$8 sps:$4 sm:$0xff]   ;;  %v847_v8 = vld [vmem:[%s1198_s1 + $0x40] ss:$8 sps:$4 sm:$0xff]  }
  0x16   : > { %345 = vmatprep.subr.bf16.mxu0 %v839_v3  ;;  %v848_v9 = vld [vmem:[%s1198_s1 + $0x34] ss:$8 sps:$4 sm:$0xff]   ;;  %v850_v12 = vld [vmem:[%s1198_s1 + $0x30] ss:$8 sps:$4 sm:$0xff]   ;;  %v865_v15 = vld [vmem:[%s1200_s3 + $0x68] sm:$0xff]   ;;  %s727_s26 = sshll.u32 %s1210_s25, 2 }
  0x17   : > { %v861_v10 = vld [vmem:[%s1200_s3 + $0x78] sm:$0xff]   ;;  %v863_v13 = vld [vmem:[%s1200_s3 + $0x70] sm:$0xff]   ;;  %v851_v16 = vld [vmem:[%s1198_s1 + $0x24] ss:$8 sps:$4 sm:$0xff]   ;;  %s223_s11 = scalar_lea.vmem %s1197_s0, %s727_s26  ;;  %v248_v35 = vshrl.u32 %v247_v34, 7  ;;  %s216_s26 = sand.u32 1, %s938_s19  }
  0x18   : > { %v862_v11 = vld [vmem:[%s1200_s3 + $0x38] sm:$0xff]   ;;  %772 = vmatprep.subr.bf16.mxu1 %v861_v10  ;;  %v864_v14 = vld [vmem:[%s1200_s3 + $0x30] sm:$0xff]   ;;  %v853_v17 = vld [vmem:[%s1198_s1 + $0x20] ss:$8 sps:$4 sm:$0xff]   ;;  %s725_s7 = sshll.u32 %s216_s26, 4  ;;  %s1157_s15 = scalar_lea.sflag [#allocation3], %s216_s26 }
  0x19   : > { %346 = vmatpush1.bf16.msra.mxu0 %v841_v4  ;;  %773 = vmatpush3.bf16.msra.mxu1 %v862_v11  ;;  %v854_v18 = vld [vmem:[%s1198_s1 + $0x14] ss:$8 sps:$4 sm:$0xff]   ;;  %v866_v19 = vld [vmem:[%s1200_s3 + $0x28] sm:$0xff]   ;;  %v867_v20 = vld [vmem:[%s1200_s3 + $0x60] sm:$0xff]   ;;  %v253_v36 = vsub.s32 1, %v248_v35  ;;  %v249_v37 = vsub.s32 0, %v248_v35 }
  0x1a   : > { %347 = vmatprep.subr.bf16.mxu0 %v842_v5  ;;  %774 = vmatprep.subr.bf16.mxu1 %v863_v13  ;;  %v868_v21 = vld [vmem:[%s1200_s3 + $0x20] sm:$0xff]   ;;  %v856_v22 = vld [vmem:[%s1198_s1 + $0x10] ss:$8 sps:$4 sm:$0xff]   ;;  %v873_v30 = vld [vmem:[%s1200_s3 + $0x48] sm:$0xff]  }
  0x1b   : > { %v869_v23 = vld [vmem:[%s1200_s3 + $0x58] sm:$0xff]   ;;  %v857_v24 = vld [vmem:[%s1198_s1 + $0x4] ss:$8 sps:$4 sm:$0xff]   ;;  %v859_v26 = vld [vmem:[%s1198_s1] ss:$8 sps:$4 sm:$0xff]  }
  0x1c   : > { %v870_v25 = vld [vmem:[%s1200_s3 + $0x18] sm:$0xff]   ;;  %v227_v27 = vld [vmem:[%s223_s11] sm:$0xff]   ;;  %v871_v28 = vld [vmem:[%s1200_s3 + $0x50] sm:$0xff]   ;;  %s218_s11 = scalar_lea.vmem [#allocation2], %s725_s7 }
  0x1d   : > { %348 = vmatpush1.bf16.msra.mxu0 %v844_v6  ;;  %775 = vmatpush3.bf16.msra.mxu1 %v864_v14  ;;  %v872_v29 = vld [vmem:[%s1200_s3 + $0x10] sm:$0xff]   ;;  %v874_v31 = vld [vmem:[%s1200_s3 + $0x8] sm:$0xff]   ;;  %v875_v32 = vld [vmem:[%s1200_s3 + $0x40] sm:$0xff]   ;;  %v566_v59 = vunpack.c.l.bf16 %v227_v27  ;;  %v567_v1 = vunpack.c.h.bf16 %v227_v27  ;;  %s659_s12 = sshll.u32 %s218_s11, 4  ;;  %s1155_s12 = int_to_ptr.vmem [resolvable:$true] %s659_s12 }
  0x1e   : > { %349 = vmatprep.subr.bf16.mxu0 %v845_v7  ;;  %776 = vmatprep.subr.bf16.mxu1 %v865_v15  ;;  %v876_v33 = vld [vmem:[%s1200_s3] sm:$0xff]   ;;  %s886_s16 = scalar_lea.vmem %s1155_s12, 256  ;;  %p893_p0 = scmp.lt.s32.totalorder %s1155_s12, %s891_s17 }
  0x1f   : > { %v245_v38 = vld [vmem:[%s1199_s2] sm:$0x3]  ;;  %p887_p11 = scmp.ne.s32.totalorder %s1155_s12, %s886_s16  ;;  %p894_p1 = scmp.lt.s32.totalorder %s892_s23, %s886_s16 }
  0x20   : > { %v254_v40 = vrot.slane %v245_v38, %v253_v36  ;;  %v250_v41 = vrot.slane %v245_v38, %v249_v37  ;;  %v745_v56 = vld [vmem:[%s1201_s4] ss:$0 sm:$0xff] }
  0x21   : > { %350 = vmatpush1.bf16.msra.mxu0 %v847_v8  ;;  %777 = vmatpush3.bf16.msra.mxu1 %v866_v19  ;;  %v762_v19 = vld [vmem:[%s1201_s4 + $0x1] ss:$0 sm:$0xff]  ;;  %p888_p12 = pnand %p887_p11, %p1020_p5  ;;  %p895_p2 = por %p894_p1, %p893_p0 }
  0x22   : > { %351 = vmatprep.subr.bf16.mxu0 %v848_v9  ;;  %778 = vmatprep.subr.bf16.mxu1 %v867_v20 }
  0x23   : > { %p889_p13 = pneg %p888_p12 }
  0x25   : > { %352 = vmatpush1.bf16.msra.mxu0 %v850_v12  ;;  %779 = vmatpush3.bf16.msra.mxu1 %v868_v21  ;;  %v763_v21 = vld [vmem:[%s1201_s4 + $0x2] ss:$0 sm:$0xff]  ;;  %p896_p3 = pnand %p895_p2, %p889_p13 }
  0x26   : > { %353 = vmatprep.subr.bf16.mxu0 %v851_v16  ;;  %780 = vmatprep.subr.bf16.mxu1 %v869_v23 }
  0x29   : > { %354 = vmatpush1.bf16.msra.mxu0 %v853_v17  ;;  %781 = vmatpush3.bf16.msra.mxu1 %v870_v25 }
  0x2a   : > { %355 = vmatprep.subr.bf16.mxu0 %v854_v18  ;;  %782 = vmatprep.subr.bf16.mxu1 %v871_v28 }
  0x2d   : > { %356 = vmatpush1.bf16.msra.mxu0 %v856_v22  ;;  %783 = vmatpush3.bf16.msra.mxu1 %v872_v29 }
  0x2e   : > { %357 = vmatprep.subr.bf16.mxu0 %v857_v24  ;;  %784 = vmatprep.subr.bf16.mxu1 %v873_v30 }
  0x31   : > { %358 = vmatpush1.bf16.msra.mxu0 %v859_v26  ;;  %785 = vmatpush3.bf16.msra.mxu1 %v874_v31 }
  0x32   : > { %786 = vmatprep.subr.bf16.mxu1 %v875_v32 }
  0x34   : > { %376 = vmatmul.mubr.bf16.vlgmr.msra.gmra.mxu0 %v227_v27 }
  0x35   : > { %787 = vmatpush3.bf16.msra.mxu1 %v876_v33 }
  0xf4   : > { %v377_v39 = vpop.f32.mrf.mxu0 }
  0xf5   : > { %v378_v46 = vadd.f32 %v377_v39, %v250_v41 }
  0xf6   : > { %v379_v42 = vpop.f32.mrf.mxu0 }
  0xf7   : > { %v380_v44 = vadd.f32 %v379_v42, %v254_v40  ;;  %v386_v52 = vmax.f32 %v378_v46, 0.0 }
  0xf8   : > { %v381_v43 = vpop.f32.mrf.mxu0 }
  0xf9   : > { %v382_v45 = vadd.f32 %v381_v43, %v250_v41  ;;  %v387_v50 = vmax.f32 %v380_v44, 0.0  ;;  %v764_v43 = vld [vmem:[%s1201_s4 + $0x3] ss:$0 sm:$0xff] }
  0xfa   : > { %v383_v47 = vpop.f32.mrf.mxu0 }
  0xfb   : > { %v384_v48 = vadd.f32 %v383_v47, %v254_v40  ;;  %v388_v49 = vmax.f32 %v382_v45, 0.0  ;;  %v765_v45 = vld [vmem:[%s1201_s4 + $0x4] ss:$0 sm:$0xff] }
  0xfd   : > { %v389_v51 = vmax.f32 %v384_v48, 0.0  ;;  %v390_v54 = vpack.c.bf16 %v388_v49, %v386_v52 }
  0xff   : > { %v391_v53 = vpack.c.bf16 %v389_v51, %v387_v50 }
 0x101   : > { %557 = vmatprep.mubr.bf16.mxu1 %v391_v53 }
 0x102   : > { %558 = vmatmul.mubr.bf16.vlgmr.msra.gmra.mxu1 %v390_v54 }
 0x1c2   : > { %v788_v55 = vpop.f32.mrf.mxu1 }
 0x1c4   : > { %v789_v57 = vpop.f32.mrf.mxu1 }
 0x1c5   : > { %v790_v58 = vadd.f32 %v789_v57, %v788_v55 }
 0x1c6   : > { %v791_v60 = vpop.f32.mrf.mxu1 }
 0x1c7   : > { %v560_v61 = vadd.f32 %v790_v58, %v745_v56 }
 0x1c8   : > { %v792_v62 = vpop.f32.mrf.mxu1 }
 0x1c9   : > { %v793_v63 = vadd.f32 %v792_v62, %v791_v60  ;;  %v568_v0 = vadd.f32 %v566_v59, %v560_v61 }
 0x1cb   : > { %v563_v2 = vadd.f32 %v793_v63, %v745_v56  ;;  %570 = vadd.xlane.f32.xlu0 %v568_v0 }
 0x1cd   : > { %v569_v3 = vadd.f32 %v567_v1, %v563_v2 }
 0x1cf   : > { %572 = vadd.xlane.f32.xlu0 %v569_v3 }
 0x254   : > { %v571_v4 = vpop.xlane.xlu0 %570 }
 0x255   : > { %v575_v5 = vmul.f32 0.0078125, %v571_v4 }
 0x257   : > { %v577_v6 = vsub.f32 %v568_v0, %v575_v5 }
 0x258   : > { %v573_v7 = vpop.xlane.xlu0 %572 }
 0x259   : > { %v576_v8 = vmul.f32 0.0078125, %v573_v7  ;;  %v579_v9 = vmul.f32 %v577_v6, %v577_v6 }
 0x25b   : > { %v578_v10 = vsub.f32 %v569_v3, %v576_v8  ;;  %581 = vadd.xlane.f32.xlu1 %v579_v9 }
 0x25d   : > { %v580_v11 = vmul.f32 %v578_v10, %v578_v10 }
 0x25f   : > { %583 = vadd.xlane.f32.xlu1 %v580_v11 }
 0x2e4   : > { %v582_v12 = vpop.xlane.xlu1 %581 }
 0x2e5   : > { %v585_v13 = vmul.f32 0.0078125, %v582_v12 }
 0x2e7   : > { %v587_v14 = vadd.f32 1e-05, %v585_v13 }
 0x2e8   : > { %v584_v15 = vpop.xlane.xlu1 %583 }
 0x2e9   : > { %878 = vrsqrt.f32 %v587_v14  ;;  %v586_v16 = vmul.f32 0.0078125, %v584_v15 }
 0x2eb   : > { %v588_v17 = vadd.f32 1e-05, %v586_v16 }
 0x2ed   : > { %880 = vrsqrt.f32 %v588_v17 }
 0x2f6   : > { %v879_v18 = vpop.eup %878 }
 0x2f7   : > { %v591_v20 = vmul.f32 %v879_v18, %v577_v6 }
 0x2f9   : > { %v598_v22 = vmul.f32 %v762_v19, %v591_v20 }
 0x2fa   : > { %v881_v23 = vpop.eup %880 }
 0x2fb   : > { %v605_v24 = vadd.f32 %v763_v21, %v598_v22  ;;  %v592_v25 = vmul.f32 %v881_v23, %v578_v10 }
 0x2fd   : > { %607 = vadd.xlane.f32.xlu0 %v605_v24  ;;  %v599_v26 = vmul.f32 %v762_v19, %v592_v25 }
 0x2ff   : > { %v606_v27 = vadd.f32 %v763_v21, %v599_v26 }
 0x301   : > { %609 = vadd.xlane.f32.xlu1 %v606_v27 }
 0x386   : > { %v608_v28 = vpop.xlane.xlu0 %607 }
 0x387   : > { %v611_v29 = vmul.f32 0.0078125, %v608_v28 }
 0x389   : > { %v613_v30 = vsub.f32 %v605_v24, %v611_v29 }
 0x38a   : > { %v610_v31 = vpop.xlane.xlu1 %609 }
 0x38b   : > { %v612_v32 = vmul.f32 0.0078125, %v610_v31  ;;  %v615_v33 = vmul.f32 %v613_v30, %v613_v30 }
 0x38d   : > { %v614_v34 = vsub.f32 %v606_v27, %v612_v32  ;;  %617 = vadd.xlane.f32.xlu0 %v615_v33 }
 0x38f   : > { %v616_v35 = vmul.f32 %v614_v34, %v614_v34 }
 0x391   : > { %619 = vadd.xlane.f32.xlu1 %v616_v35 }
 0x416   : > { %v618_v36 = vpop.xlane.xlu0 %617 }
 0x417   : > { %v621_v37 = vmul.f32 0.0078125, %v618_v36 }
 0x419   : > { %v623_v38 = vadd.f32 1e-05, %v621_v37 }
 0x41a   : > { %v620_v39 = vpop.xlane.xlu1 %619 }
 0x41b   : > { %882 = vrsqrt.f32 %v623_v38  ;;  %v622_v40 = vmul.f32 0.0078125, %v620_v39 }
 0x41d   : > { %v624_v41 = vadd.f32 1e-05, %v622_v40 }
 0x41f   : > { %884 = vrsqrt.f32 %v624_v41 }
 0x428   : > { %v883_v42 = vpop.eup %882 }
 0x429   : > { %v627_v44 = vmul.f32 %v883_v42, %v613_v30 }
 0x42b   : > { %v634_v46 = vmul.f32 %v764_v43, %v627_v44 }
 0x42c   : > { %v885_v47 = vpop.eup %884 }
 0x42d   : > { %v628_v48 = vmul.f32 %v885_v47, %v614_v34  ;;  %v641_v49 = vadd.f32 %v765_v45, %v634_v46 }
 0x42f   : > { %v635_v50 = vmul.f32 %v764_v43, %v628_v48  ;;  %643 = vst [vmem:[%s218_s11] sm:$0xff] %v641_v49 }
 0x431   : > { %v642_v51 = vadd.f32 %v765_v45, %v635_v50 }
 0x433   : > { %644 = vst [vmem:[%s218_s11 + $0x8] sm:$0xff] %v642_v51 }
 0x434   : > { %899 = shalt.err (!%p896_p3)
}
 0x435   : > { %s900_s26 = scalar_lea.hbm %s1153_s14, 256  ;;  %s904_s7 = scalar_lea.hbm %s1202_s5, 512 }
 0x436   : > { %p901_p4 = scmp.ne.s32.totalorder %s1153_s14, %s900_s26  ;;  %p905_p9 = scmp.lt.s32.totalorder %s1153_s14, %s1202_s5 }
 0x437   : > { %p906_p10 = scmp.lt.s32.totalorder %s904_s7, %s900_s26 }
 0x438   : > { %p902_p7 = pnand %p901_p4, %p1020_p5 }
 0x439   : > { %p907_p11 = por %p906_p10, %p905_p9 }
 0x43a   : > { %p903_p8 = pneg %p902_p7 }
 0x43c   : > { %p908_p12 = pnand %p907_p11, %p903_p8 }
 0x43e   : > { %911 = shalt.err (!%p908_p12)
}
 0x43f   : > { %s950_s10 = smov 128   ;;  %s951_s11 = smov 8  }
 0x440   : > { %794 = dma.vmem_to_hbm [thread:$0]  (%p1020_p5), %s1155_s12, 256, %s1153_s14, %s1157_s15, %s950_s10, %s950_s10, %s951_s11  }
 0x441 PF: > { %p800_p13 = scmp.ge.s32.totalorder %s946_s21, 2  ;;  %s674_s13 = sand.u32 1, %s934_s18  }
 0x442   : > { %s675_s25 = scalar_lea.sflag [#allocation3], %s674_s13 }
 0x443   : > { %p797_p0 = pnand %p800_p13, %p1024_p6 }
 0x445   : > { %p798_p1 = pneg %p797_p0 }
 0x447   : > { %929 = dma.done.wait (%p798_p1), %s675_s25, 256  }
 0x448   : > { %931 = vsyncadd (%p798_p1), %s675_s25, 4294967040  ;;  %p15_p2 = scmp.ge.s32.totalorder %s1007_s24, 4   ;;  %s1205_s18 = smov %s938_s19 }
 0x449   : > { %s1206_s19 = smov %s942_s20  ;;  %s1207_s20 = smov %s1018_s27 }
 0x44a   : > { %s1208_s21 = smov %s1007_s24  ;;  %17 = sbr.rel (!%p15_p2) target bundleno = 3 (0x3), region = 75 }
 0x44f   :  { %680 = vsyncpa [#allocation3], 1 }
 0x450   :  { %682 = vsyncpa [#allocation3 + $0x1], 1 }

// kernel: transformer_forward.17
= control target key start
LH: loop header
LB: loop body
LE: loop exit
PB: predicated region body
PF: predicated region fallthrough
CT: control target
= control target key end

     0   :  { %s2328_s21 = smov 0   ;;  %s2742_s0 = inlined_call_operand.vmem [shape: bf16[2,16,128], index: 0, kind: input, shape index: {}]   ;;  %s2743_s1 = inlined_call_operand.vmem [shape: bf16[1,16,128], index: 1, kind: input, shape index: {}]   ;;  %s2744_s2 = inlined_call_operand.vmem [shape: bf16[128,256], index: 2, kind: input, shape index: {}]   ;;  %s2745_s3 = inlined_call_operand.vmem [shape: bf16[128,128], index: 3, kind: input, shape index: {}]   ;;  %s2746_s4 = inlined_call_operand.vmem [shape: bf16[128,128], index: 4, kind: input, shape index: {}]   ;;  %s2747_s5 = inlined_call_operand.vmem [shape: f32[8,128], index: 5, kind: input, shape index: {}]   ;;  %s2748_s6 = inlined_call_operand.vmem [shape: bf16[2,16,128], index: 6, kind: output, shape index: {}]  }
   0x1 LB: > { %s1846_s22 = sadd.s32 4294967295, %s2281_s21   ;;  %p1850_p0 = scmp.ge.s32.totalorder %s2281_s21, 1  ;;  %s2281_s21 = sphi %s2328_s21, %s16_s21  }
   0x2   : > { %p212_p1 = scmp.lt.s32.totalorder %s2281_s21, 3 }
   0x4   : > { %p213_p2 = pnand %p1850_p0, %p212_p1 }
   0x5   : > { %p242_p3 = scmp.lt.s32.totalorder (!%p213_p2), %s1846_s22, 1  ;;  %s2286_s20 = smov (!%p213_p2), 112  }
   0x6   : > { %216 = sbr.rel (%p213_p2) target bundleno = 2215 (0x8a7), region = 44  ;;  %s2287_s23 = smov (!%p213_p2), 80  }
   0x7   : > { %s2288_s24 = smov (!%p213_p2), 64   ;;  %s2289_s25 = smov (!%p213_p2), 48  }
   0x8   : > { %s2290_s26 = smov (!%p213_p2), 32   ;;  %s2291_s27 = smov (!%p213_p2), 16  }
   0x9   : > { %s2292_s28 = smov (!%p213_p2), 96  }
   0xb   : > { %v2165_v0 = vld [vmem:[%s2744_s2 + $0x74] ss:$8 sps:$4 sm:$0xff]   ;;  %v2167_v1 = vld [vmem:[%s2744_s2 + $0x70] ss:$8 sps:$4 sm:$0xff]   ;;  %v2283_v2 = vmov 0   ;;  %v2284_v4 = vmov 0.0  }
   0xc   : > { %396 = vmatprep.mubr.bf16.mxu0 %v2283_v2  ;;  %364 = vmatprep.subr.bf16.mxu0 %v2165_v0  ;;  %v2168_v3 = vld [vmem:[%s2744_s2 + $0x64] ss:$8 sps:$4 sm:$0xff]   ;;  %v2170_v5 = vld [vmem:[%s2744_s2 + $0x60] ss:$8 sps:$4 sm:$0xff]   ;;  %v2171_v6 = vld [vmem:[%s2744_s2 + $0x54] ss:$8 sps:$4 sm:$0xff]  }
   0xd   : > { %2011 = vmatprep.subr.bf16.mxu1 %v2284_v4  ;;  %365 = vmatpush1.bf16.msra.mxu0 %v2167_v1  ;;  %v2173_v7 = vld [vmem:[%s2744_s2 + $0x50] ss:$8 sps:$4 sm:$0xff]   ;;  %v2174_v8 = vld [vmem:[%s2744_s2 + $0x44] ss:$8 sps:$4 sm:$0xff]   ;;  %s2750_s22 = smov (!%p242_p3, %s1846_s22), 1  ;;  %vm2285_vm0 = vmmov 0  }
   0xe   : > { %366 = vmatprep.subr.bf16.mxu0 %v2168_v3  ;;  %v2176_v9 = vld [vmem:[%s2744_s2 + $0x40] ss:$8 sps:$4 sm:$0xff]   ;;  %v2177_v10 = vld [vmem:[%s2744_s2 + $0x34] ss:$8 sps:$4 sm:$0xff]   ;;  %s1932_s19 = sshll.u32 %s2750_s22, 3  ;;  %2027 = vmatprep.mubr.msk.bf16.mxu1 %vm2285_vm0, %v2284_v4  ;;  %vm539_vm1 = vcmask 130048  }
   0xf   : > { %v2189_v11 = vld [vmem:[%s2745_s3 + $0x38] sm:$0xff]   ;;  %v2190_v12 = vld [vmem:[%s2745_s3 + $0x30] sm:$0xff]   ;;  %v2180_v14 = vld [vmem:[%s2744_s2 + $0x24] ss:$8 sps:$4 sm:$0xff]   ;;  %s2388_s8 = scalar_lea.vmem %s2742_s0, %s1932_s19  ;;  %vm662_vm2 = vcmask 125952   ;;  %vm801_vm3 = vcmask 257152   ;;  %s251_s9 = scalar_lea.vmem %s2748_s6, %s1932_s19 }
  0x10   : > { %2012 = vmatpush3.bf16.msra.mxu1 %v2189_v11  ;;  %v2179_v13 = vld [vmem:[%s2744_s2 + $0x30] ss:$8 sps:$4 sm:$0xff]   ;;  %v2182_v15 = vld [vmem:[%s2744_s2 + $0x20] ss:$8 sps:$4 sm:$0xff]   ;;  %v2183_v17 = vld [vmem:[%s2744_s2 + $0x14] ss:$8 sps:$4 sm:$0xff]  }
  0x11   : > { %367 = vmatpush1.bf16.msra.mxu0 %v2170_v5  ;;  %2013 = vmatprep.subr.bf16.mxu1 %v2284_v4  ;;  %v2191_v16 = vld [vmem:[%s2745_s3 + $0x28] sm:$0xff]   ;;  %v2192_v18 = vld [vmem:[%s2745_s3 + $0x20] sm:$0xff]   ;;  %v2185_v19 = vld [vmem:[%s2744_s2 + $0x10] ss:$8 sps:$4 sm:$0xff]   ;;  %vm937_vm4 = vcmask 388352   ;;  %vm1073_vm5 = vcmask 519552  }
  0x12   : > { %368 = vmatprep.subr.bf16.mxu0 %v2171_v6  ;;  %v256_v20 = vld [vmem:[%s2388_s8] sm:$0xf]  ;;  %v257_v21 = vld [vmem:[%s2388_s8 + $0x4] sm:$0xf]  ;;  %v2193_v27 = vld [vmem:[%s2745_s3 + $0x18] sm:$0xff]   ;;  %vm1209_vm6 = vcmask 650752  }
  0x13   : > { %v258_v22 = vld [vmem:[%s2743_s1] sm:$0xf]  ;;  %v259_v23 = vld [vmem:[%s2743_s1 + $0x4] sm:$0xf]  ;;  %v2194_v30 = vld [vmem:[%s2745_s3 + $0x10] sm:$0xff]   ;;  %v1875_v33 = vcombine.low %v256_v20, %v257_v21  ;;  %vm1345_vm7 = vcmask 781952  }
  0x14   : > { %2014 = vmatpush3.bf16.msra.mxu1 %v2190_v12  ;;  %v2186_v24 = vld [vmem:[%s2744_s2 + $0x4] ss:$8 sps:$4 sm:$0xff]   ;;  %v260_v25 = vadd.bf16 %v258_v22, %v256_v20  ;;  %v261_v26 = vadd.bf16 %v259_v23, %v257_v21  ;;  %v2188_v28 = vld [vmem:[%s2744_s2] ss:$8 sps:$4 sm:$0xff]   ;;  %vm1481_vm8 = vcmask 913152   ;;  %vm1617_vm9 = vcmask 1044352  }
  0x15   : > { %369 = vmatpush1.bf16.msra.mxu0 %v2173_v7  ;;  %2015 = vmatprep.subr.bf16.mxu1 %v2284_v4  ;;  %v2195_v31 = vld [vmem:[%s2745_s3 + $0x8] sm:$0xff]   ;;  %v2196_v32 = vld [vmem:[%s2745_s3] sm:$0xff]  }
  0x16   : > { %370 = vmatprep.subr.bf16.mxu0 %v2174_v8  ;;  %v1855_v29 = vcombine.low %v260_v25, %v261_v26  ;;  %v1873_v36 = vld [vmem:[%s2747_s5 + $0x1] ss:$0 sm:$0xff]  ;;  %v1872_v41 = vld [vmem:[%s2747_s5] ss:$0 sm:$0xff]  ;;  %v1874_v49 = vld [vmem:[%s2747_s5 + $0x2] ss:$0 sm:$0xff] }
  0x18   : > { %2016 = vmatpush3.bf16.msra.mxu1 %v2191_v16 }
  0x19   : > { %371 = vmatpush1.bf16.msra.mxu0 %v2176_v9  ;;  %2017 = vmatprep.subr.bf16.mxu1 %v2284_v4 }
  0x1a   : > { %372 = vmatprep.subr.bf16.mxu0 %v2177_v10 }
  0x1c   : > { %2018 = vmatpush3.bf16.msra.mxu1 %v2192_v18 }
  0x1d   : > { %373 = vmatpush1.bf16.msra.mxu0 %v2179_v13  ;;  %2019 = vmatprep.subr.bf16.mxu1 %v2284_v4 }
  0x1e   : > { %374 = vmatprep.subr.bf16.mxu0 %v2180_v14 }
  0x20   : > { %2020 = vmatpush3.bf16.msra.mxu1 %v2193_v27 }
  0x21   : > { %375 = vmatpush1.bf16.msra.mxu0 %v2182_v15  ;;  %2021 = vmatprep.subr.bf16.mxu1 %v2284_v4 }
  0x22   : > { %376 = vmatprep.subr.bf16.mxu0 %v2183_v17 }
  0x24   : > { %2022 = vmatpush3.bf16.msra.mxu1 %v2194_v30 }
  0x25   : > { %377 = vmatpush1.bf16.msra.mxu0 %v2185_v19  ;;  %2023 = vmatprep.subr.bf16.mxu1 %v2284_v4 }
  0x26   : > { %378 = vmatprep.subr.bf16.mxu0 %v2186_v24 }
  0x28   : > { %2024 = vmatpush3.bf16.msra.mxu1 %v2195_v31 }
  0x29   : > { %379 = vmatpush1.bf16.msra.mxu0 %v2188_v28  ;;  %2025 = vmatprep.subr.bf16.mxu1 %v2284_v4 }
  0x2a   : > { %2055 = vmatprep.subr.bf16.mxu0 %v2284_v4 }
  0x2c   : > { %397 = vmatmul.mubr.bf16.vlgmr.msra.gmra.mxu0 %v1855_v29  ;;  %2026 = vmatpush3.bf16.msra.mxu1 %v2196_v32 }
  0x2d   : > { %2031 = vmatprep.subr.bf16.mxu1 %v2284_v4  ;;  %2057 = vmatprep.mubr.msk.bf16.mxu0 %vm2285_vm0, %v2284_v4 }
  0x2f   : > { %2028 = vmatmul.mubr.bf16.vlgmr.msra.gmra.mxu1 %v1875_v33 }
  0x30   : > { %2033 = vmatprep.mubr.msk.bf16.mxu1 %vm2285_vm0, %v2284_v4 }
  0xec   : > { %v398_v34 = vpop.f32.mrf.mxu0 }
  0xed   : > { %v411_v44 = vadd.f32 %v1872_v41, %v398_v34 }
  0xee   : > { %v400_v35 = vpop.f32.mrf.mxu0 }
  0xef   : > { %v419_v39 = vadd.f32 %v1873_v36, %v400_v35  ;;  %v413_v47 = vmul.f32 0.25, %v411_v44  ;;  %v529_v50 = vpop.f32.mrf.mxu1 }
  0xf0   : > { %v402_v37 = vpop.f32.mrf.mxu0  ;;  %v530_v52 = vadd.f32 %v1874_v49, %v529_v50 }
  0xf1   : > { %v412_v42 = vadd.f32 %v1872_v41, %v402_v37  ;;  %v2029_v51 = vpop.f32.mrf.mxu1 }
  0xf2   : > { %v404_v38 = vpop.f32.mrf.mxu0 }
  0xf3   : > { %v420_v40 = vadd.f32 %v1873_v36, %v404_v38  ;;  %v414_v46 = vmul.f32 0.25, %v412_v42  ;;  %v532_v53 = vpop.f32.mrf.mxu1 }
  0xf4   : > { %v533_v54 = vadd.f32 %v1874_v49, %v532_v53 }
  0xf5   : > { %v537_v43 = vpack.c.bf16 %v420_v40, %v419_v39  ;;  %v536_v48 = vpack.c.bf16 %v414_v46, %v413_v47  ;;  %v2030_v55 = vpop.f32.mrf.mxu1 }
  0xf6   : > { %v2456_v56 = vpack.c.bf16 %v533_v54, %v530_v52 }
  0xf7   : > { %v544_v45 = vsel %vm539_vm1, %v537_v43, 0 }
  0xf8   : > { %2032 = vmatpush3.bf16.xpose.msra.mxu1 %v544_v45 }
  0xf9   : > { %2037 = vmatprep.subr.bf16.mxu1 %v2284_v4 }
  0xff   : > { %2034 = vmatmul.mubr.msk.bf16.vlgmr.msra.gmra.mxu1 %vm539_vm1, %v536_v48 }
 0x100   : > { %2039 = vmatprep.mubr.msk.bf16.mxu1 %vm2285_vm0, %v2284_v4  ;;  %2038 = vmatpush3.bf16.msra.mxu1 %v2456_v56 }
 0x101   : > { %2043 = vmatprep.subr.bf16.mxu1 %v2284_v4 }
 0x1bf   : > { %v580_v57 = vpop.f32.mrf.mxu1 }
 0x1c0   : > { %v587_v58 = vsel %vm539_vm1, %v580_v57, -inf }
 0x1c1   : > { %588 = vmax.xlane.f32.xlu0 %v587_v58  ;;  %v2035_v59 = vpop.f32.mrf.mxu1 }
 0x1c3   : > { %v583_v60 = vpop.f32.mrf.mxu1 }
 0x1c4   : > { %v590_v61 = vsel %vm539_vm1, %v583_v60, -inf }
 0x1c5   : > { %591 = vmax.xlane.f32.xlu0 %v590_v61  ;;  %v2036_v62 = vpop.f32.mrf.mxu1 }
 0x1db   : > { %669 = vrot.lane.b32.xlu0 %v537_v43, %s2286_s20 }
 0x1df   : > { %942 = vrot.lane.b32.xlu0 %v537_v43, %s2287_s23 }
 0x1e3   : > { %1078 = vrot.lane.b32.xlu0 %v537_v43, %s2288_s24 }
 0x1e7   : > { %1214 = vrot.lane.b32.xlu0 %v537_v43, %s2289_s25 }
 0x1eb   : > { %1350 = vrot.lane.b32.xlu0 %v537_v43, %s2290_s26 }
 0x1ef   : > { %1486 = vrot.lane.b32.xlu0 %v537_v43, %s2291_s27 }
 0x24a   : > { %v589_v63 = vpop.xlane.xlu0 %588 }
 0x24b   : > { %v593_v0 = vsub.f32 %v580_v57, %v589_v63 }
 0x24d   : > { %v595_v1 = vmul.f32 1.442695, %v593_v0 }
 0x24e   : > { %v592_v2 = vpop.xlane.xlu0 %591 }
 0x24f   : > { %2207 = vpow2.f32 %v595_v1  ;;  %v594_v3 = vsub.f32 %v583_v60, %v592_v2 }
 0x251   : > { %v597_v5 = vmul.f32 1.442695, %v594_v3 }
 0x252   : > { %v670_v13 = vpop.permute.xlu0 %669 }
 0x253   : > { %2209 = vpow2.f32 %v597_v5  ;;  %v675_v24 = vsel %vm539_vm1, %v670_v13, 0 }
 0x256   : > { %v943_v18 = vpop.permute.xlu0 %942 }
 0x257   : > { %v948_v22 = vsel %vm539_vm1, %v943_v18, 0 }
 0x25a   : > { %v1079_v25 = vpop.permute.xlu0 %1078 }
 0x25b   : > { %v1084_v27 = vsel %vm539_vm1, %v1079_v25, 0 }
 0x25c   : > { %v2208_v6 = vpop.eup %2207 }
 0x25d   : > { %v599_v7 = vsel %vm539_vm1, %v2208_v6, 0.0 }
 0x25e   : > { %600 = vadd.xlane.f32.xlu1 %v599_v7  ;;  %v1215_v28 = vpop.permute.xlu0 %1214 }
 0x25f   : > { %v1220_v30 = vsel %vm539_vm1, %v1215_v28, 0 }
 0x260   : > { %v2210_v8 = vpop.eup %2209 }
 0x261   : > { %v602_v9 = vsel %vm539_vm1, %v2210_v8, 0.0 }
 0x262   : > { %603 = vadd.xlane.f32.xlu1 %v602_v9  ;;  %v1351_v31 = vpop.permute.xlu0 %1350 }
 0x263   : > { %v1356_v33 = vsel %vm539_vm1, %v1351_v31, 0 }
 0x266   : > { %v1487_v34 = vpop.permute.xlu0 %1486 }
 0x267   : > { %v1492_v36 = vsel %vm539_vm1, %v1487_v34, 0 }
 0x273   : > { %666 = vrot.lane.b32.xlu1 %v536_v48, %s2286_s20 }
 0x277   : > { %806 = vrot.lane.b32.xlu1 %v537_v43, %s2292_s28 }
 0x27b   : > { %804 = vrot.lane.b32.xlu1 %v536_v48, %s2292_s28 }
 0x27f   : > { %940 = vrot.lane.b32.xlu1 %v536_v48, %s2287_s23 }
 0x283   : > { %1076 = vrot.lane.b32.xlu1 %v536_v48, %s2288_s24 }
 0x287   : > { %1212 = vrot.lane.b32.xlu1 %v536_v48, %s2289_s25 }
 0x28b   : > { %1348 = vrot.lane.b32.xlu1 %v536_v48, %s2290_s26 }
 0x28f   : > { %1484 = vrot.lane.b32.xlu1 %v536_v48, %s2291_s27 }
 0x2e7   : > { %v601_v10 = vpop.xlane.xlu1 %600 }
 0x2e8   : > { %2211 = vrcp.f32 %v601_v10 }
 0x2eb   : > { %v604_v11 = vpop.xlane.xlu1 %603 }
 0x2ec   : > { %2213 = vrcp.f32 %v604_v11 }
 0x2ef   : > { %v667_v12 = vpop.permute.xlu1 %666 }
 0x2f3   : > { %v807_v14 = vpop.permute.xlu1 %806 }
 0x2f4   : > { %v812_v15 = vsel %vm539_vm1, %v807_v14, 0 }
 0x2f5   : > { %2056 = vmatpush3.bf16.xpose.msra.mxu0 %v812_v15  ;;  %v2212_v16 = vpop.eup %2211 }
 0x2f6   : > { %2067 = vmatprep.subr.bf16.mxu0 %v2284_v4  ;;  %v607_v19 = vmul.f32 %v2212_v16, %v2208_v6 }
 0x2f7   : > { %v805_v21 = vpop.permute.xlu1 %804 }
 0x2f9   : > { %v2214_v17 = vpop.eup %2213 }
 0x2fa   : > { %v608_v20 = vmul.f32 %v2214_v17, %v2210_v8 }
 0x2fb   : > { %v941_v26 = vpop.permute.xlu1 %940 }
 0x2fc   : > { %2058 = vmatmul.mubr.msk.bf16.vlgmr.msra.gmra.mxu0 %vm539_vm1, %v805_v21  ;;  %v609_v23 = vpack.c.bf16 %v608_v20, %v607_v19 }
 0x2fd   : > { %2068 = vmatpush3.bf16.xpose.msra.mxu0 %v948_v22  ;;  %2069 = vmatprep.mubr.msk.bf16.mxu0 %vm2285_vm0, %v2284_v4 }
 0x2fe   : > { %2040 = vmatmul.mubr.msk.bf16.vlgmr.msra.gmra.mxu1 %vm539_vm1, %v609_v23  ;;  %2079 = vmatprep.subr.bf16.mxu0 %v2284_v4 }
 0x2ff   : > { %2044 = vmatpush3.bf16.xpose.msra.mxu1 %v675_v24  ;;  %2045 = vmatprep.mubr.msk.bf16.mxu1 %vm2285_vm0, %v2284_v4  ;;  %v1077_v29 = vpop.permute.xlu1 %1076 }
 0x300   : > { %2049 = vmatprep.subr.bf16.mxu1 %v2284_v4 }
 0x303   : > { %v1213_v32 = vpop.permute.xlu1 %1212 }
 0x304   : > { %2070 = vmatmul.mubr.msk.bf16.vlgmr.msra.gmra.mxu0 %vm539_vm1, %v941_v26 }
 0x305   : > { %2080 = vmatpush3.bf16.xpose.msra.mxu0 %v1084_v27  ;;  %2081 = vmatprep.mubr.msk.bf16.mxu0 %vm2285_vm0, %v2284_v4 }
 0x306   : > { %2046 = vmatmul.mubr.msk.bf16.vlgmr.msra.gmra.mxu1 %vm539_vm1, %v667_v12  ;;  %2091 = vmatprep.subr.bf16.mxu0 %v2284_v4 }
 0x307   : > { %2051 = vmatprep.mubr.msk.bf16.mxu1 %vm2285_vm0, %v2284_v4  ;;  %v1349_v35 = vpop.permute.xlu1 %1348 }
 0x30b   : > { %v1485_v37 = vpop.permute.xlu1 %1484 }
 0x30c   : > { %2082 = vmatmul.mubr.msk.bf16.vlgmr.msra.gmra.mxu0 %vm539_vm1, %v1077_v29 }
 0x30d   : > { %2092 = vmatpush3.bf16.xpose.msra.mxu0 %v1220_v30  ;;  %2093 = vmatprep.mubr.msk.bf16.mxu0 %vm2285_vm0, %v2284_v4 }
 0x30e   : > { %2103 = vmatprep.subr.bf16.mxu0 %v2284_v4 }
 0x314   : > { %2094 = vmatmul.mubr.msk.bf16.vlgmr.msra.gmra.mxu0 %vm539_vm1, %v1213_v32 }
 0x315   : > { %2104 = vmatpush3.bf16.xpose.msra.mxu0 %v1356_v33  ;;  %2105 = vmatprep.mubr.msk.bf16.mxu0 %vm2285_vm0, %v2284_v4 }
 0x316   : > { %2115 = vmatprep.subr.bf16.mxu0 %v2284_v4 }
 0x31c   : > { %2106 = vmatmul.mubr.msk.bf16.vlgmr.msra.gmra.mxu0 %vm539_vm1, %v1349_v35 }
 0x31d   : > { %2116 = vmatpush3.bf16.xpose.msra.mxu0 %v1492_v36  ;;  %2117 = vmatprep.mubr.msk.bf16.mxu0 %vm2285_vm0, %v2284_v4 }
 0x31e   : > { %2127 = vmatprep.subr.bf16.mxu0 %v2284_v4 }
 0x324   : > { %2118 = vmatmul.mubr.msk.bf16.vlgmr.msra.gmra.mxu0 %vm539_vm1, %v1485_v37 }
 0x325   : > { %2143 = vmatprep.mubr.msk.bf16.mxu0 %vm2285_vm0, %v2284_v4 }
 0x3bc   : > { %v2516_v38 = vpop.f32.mrf.mxu0 }
 0x3bd   : > { %v855_v57 = vsel %vm539_vm1, %v2516_v38, -inf }
 0x3be   : > { %v647_v39 = vpop.f32.mrf.mxu1  ;;  %v2059_v40 = vpop.f32.mrf.mxu0 }
 0x3bf   : > { %v1934_v41 = vpack.c.bf16 %v647_v39, %v647_v39 }
 0x3c0   : > { %v2041_v42 = vpop.f32.mrf.mxu1  ;;  %v2518_v43 = vpop.f32.mrf.mxu0 }
 0x3c1   : > { %663 = vst.msk [vmem:[#allocation2] sm:$0xf] %vm662_vm2, %v1934_v41  ;;  %v858_v62 = vsel %vm539_vm1, %v2518_v43, -inf }
 0x3c2   : > { %v650_v44 = vpop.f32.mrf.mxu1  ;;  %v2060_v45 = vpop.f32.mrf.mxu0 }
 0x3c3   : > { %v1935_v46 = vpack.c.bf16 %v650_v44, %v650_v44 }
 0x3c4   : > { %v2042_v47 = vpop.f32.mrf.mxu1  ;;  %v2520_v48 = vpop.f32.mrf.mxu0 }
 0x3c5   : > { %664 = vst.msk [vmem:[#allocation2 + $0x4] sm:$0xf] %vm662_vm2, %v1935_v46  ;;  %v991_v2 = vsel %vm539_vm1, %v2520_v48, -inf }
 0x3c6   : > { %v2522_v49 = vpop.f32.mrf.mxu1  ;;  %v2071_v50 = vpop.f32.mrf.mxu0 }
 0x3c7   : > { %v718_v51 = vsel %vm539_vm1, %v2522_v49, -inf }
 0x3c8   : > { %v987_v52 = vpop.f32.mrf.mxu0  ;;  %719 = vmax.xlane.f32.xlu0 %v718_v51  ;;  %v2047_v53 = vpop.f32.mrf.mxu1 }
 0x3c9   : > { %v994_v63 = vsel %vm539_vm1, %v987_v52, -inf }
 0x3ca   : > { %v2526_v54 = vpop.f32.mrf.mxu1  ;;  %v2072_v55 = vpop.f32.mrf.mxu0 }
 0x3cb   : > { %v721_v58 = vsel %vm539_vm1, %v2526_v54, -inf }
 0x3cc   : > { %v2532_v59 = vpop.f32.mrf.mxu0  ;;  %856 = vmax.xlane.f32.xlu0 %v855_v57  ;;  %722 = vmax.xlane.f32.xlu1 %v721_v58  ;;  %v2048_v60 = vpop.f32.mrf.mxu1 }
 0x3cd   : > { %v1127_v7 = vsel %vm539_vm1, %v2532_v59, -inf }
 0x3ce   : > { %v2083_v61 = vpop.f32.mrf.mxu0 }
 0x3d0   : > { %v1123_v0 = vpop.f32.mrf.mxu0  ;;  %859 = vmax.xlane.f32.xlu0 %v858_v62  ;;  %995 = vmax.xlane.f32.xlu1 %v994_v63 }
 0x3d1   : > { %v1130_v3 = vsel %vm539_vm1, %v1123_v0, -inf }
 0x3d2   : > { %v2084_v1 = vpop.f32.mrf.mxu0 }
 0x3d4   : > { %v2540_v5 = vpop.f32.mrf.mxu0  ;;  %992 = vmax.xlane.f32.xlu0 %v991_v2  ;;  %1131 = vmax.xlane.f32.xlu1 %v1130_v3 }
 0x3d5   : > { %v1263_v11 = vsel %vm539_vm1, %v2540_v5, -inf }
 0x3d6   : > { %v2095_v6 = vpop.f32.mrf.mxu0 }
 0x3d8   : > { %v1259_v8 = vpop.f32.mrf.mxu0  ;;  %1128 = vmax.xlane.f32.xlu0 %v1127_v7 }
 0x3d9   : > { %v1266_v9 = vsel %vm539_vm1, %v1259_v8, -inf }
 0x3da   : > { %v2096_v10 = vpop.f32.mrf.mxu0  ;;  %1267 = vmax.xlane.f32.xlu1 %v1266_v9 }
 0x3dc   : > { %v2547_v12 = vpop.f32.mrf.mxu0  ;;  %1264 = vmax.xlane.f32.xlu0 %v1263_v11 }
 0x3dd   : > { %v1399_v14 = vsel %vm539_vm1, %v2547_v12, -inf }
 0x3de   : > { %v2107_v13 = vpop.f32.mrf.mxu0 }
 0x3e0   : > { %v2551_v15 = vpop.f32.mrf.mxu0  ;;  %1400 = vmax.xlane.f32.xlu0 %v1399_v14 }
 0x3e1   : > { %v1402_v16 = vsel %vm539_vm1, %v2551_v15, -inf }
 0x3e2   : > { %v2108_v17 = vpop.f32.mrf.mxu0  ;;  %1403 = vmax.xlane.f32.xlu1 %v1402_v16 }
 0x3e4   : > { %v2555_v18 = vpop.f32.mrf.mxu0 }
 0x3e5   : > { %v1535_v19 = vsel %vm539_vm1, %v2555_v18, -inf }
 0x3e6   : > { %v2119_v20 = vpop.f32.mrf.mxu0  ;;  %1536 = vmax.xlane.f32.xlu0 %v1535_v19 }
 0x3e8   : > { %v2559_v21 = vpop.f32.mrf.mxu0 }
 0x3e9   : > { %v1538_v22 = vsel %vm539_vm1, %v2559_v21, -inf }
 0x3ea   : > { %v2120_v23 = vpop.f32.mrf.mxu0  ;;  %1539 = vmax.xlane.f32.xlu1 %v1538_v22 }
 0x451   : > { %v720_v24 = vpop.xlane.xlu0 %719 }
 0x452   : > { %v724_v40 = vsub.f32 %v2522_v49, %v720_v24 }
 0x454   : > { %v726_v45 = vmul.f32 1.442695, %v724_v40 }
 0x455   : > { %v857_v25 = vpop.xlane.xlu0 %856  ;;  %v723_v26 = vpop.xlane.xlu1 %722 }
 0x456   : > { %v861_v27 = vsub.f32 %v2516_v38, %v857_v25  ;;  %v725_v49 = vsub.f32 %v2526_v54, %v723_v26 }
 0x458   : > { %v863_v28 = vmul.f32 1.442695, %v861_v27  ;;  %v728_v58 = vmul.f32 1.442695, %v725_v49 }
 0x459   : > { %v860_v29 = vpop.xlane.xlu0 %859  ;;  %v996_v30 = vpop.xlane.xlu1 %995 }
 0x45a   : > { %2215 = vpow2.f32 %v863_v28  ;;  %v862_v31 = vsub.f32 %v2518_v43, %v860_v29  ;;  %v998_v32 = vsub.f32 %v987_v52, %v996_v30 }
 0x45c   : > { %v865_v33 = vmul.f32 1.442695, %v862_v31  ;;  %v1001_v34 = vmul.f32 1.442695, %v998_v32 }
 0x45d   : > { %v993_v35 = vpop.xlane.xlu0 %992  ;;  %v1132_v36 = vpop.xlane.xlu1 %1131 }
 0x45e   : > { %2217 = vpow2.f32 %v865_v33  ;;  %v997_v37 = vsub.f32 %v2520_v48, %v993_v35  ;;  %v1134_v39 = vsub.f32 %v1123_v0, %v1132_v36 }
 0x45f   : > { %2219 = vpow2.f32 %v1001_v34 }
 0x460   : > { %v999_v41 = vmul.f32 1.442695, %v997_v37  ;;  %v1137_v38 = vmul.f32 1.442695, %v1134_v39 }
 0x461   : > { %v1129_v42 = vpop.xlane.xlu0 %1128 }
 0x462   : > { %2221 = vpow2.f32 %v999_v41  ;;  %v1133_v44 = vsub.f32 %v2532_v59, %v1129_v42 }
 0x463   : > { %v1268_v43 = vpop.xlane.xlu1 %1267  ;;  %2223 = vpow2.f32 %v1137_v38 }
 0x464   : > { %v1135_v46 = vmul.f32 1.442695, %v1133_v44  ;;  %v1270_v47 = vsub.f32 %v1259_v8, %v1268_v43 }
 0x465   : > { %v1265_v50 = vpop.xlane.xlu0 %1264 }
 0x466   : > { %2225 = vpow2.f32 %v1135_v46  ;;  %v1269_v51 = vsub.f32 %v2540_v5, %v1265_v50  ;;  %v1273_v52 = vmul.f32 1.442695, %v1270_v47 }
 0x467   : > { %v2569_v48 = vpop.eup %2215  ;;  %2227 = vpow2.f32 %v726_v45 }
 0x468   : > { %v1271_v53 = vmul.f32 1.442695, %v1269_v51  ;;  %v867_v55 = vsel %vm539_vm1, %v2569_v48, 0.0 }
 0x469   : > { %868 = vadd.xlane.f32.xlu0 %v867_v55  ;;  %v1401_v13 = vpop.xlane.xlu0 %1400 }
 0x46a   : > { %2229 = vpow2.f32 %v1271_v53  ;;  %v1405_v14 = vsub.f32 %v2547_v12, %v1401_v13 }
 0x46b   : > { %v2574_v57 = vpop.eup %2217  ;;  %2231 = vpow2.f32 %v1273_v52  ;;  %v1404_v17 = vpop.xlane.xlu1 %1403 }
 0x46c   : > { %v870_v59 = vsel %vm539_vm1, %v2574_v57, 0.0  ;;  %v2578_v60 = vpop.eup %2219  ;;  %2233 = vpow2.f32 %v728_v58  ;;  %v1407_v16 = vmul.f32 1.442695, %v1405_v14  ;;  %v1406_v19 = vsub.f32 %v2551_v15, %v1404_v17 }
 0x46d   : > { %871 = vadd.xlane.f32.xlu1 %v870_v59  ;;  %v1006_v62 = vsel %vm539_vm1, %v2578_v60, 0.0 }
 0x46e   : > { %2235 = vpow2.f32 %v1407_v16  ;;  %v1409_v22 = vmul.f32 1.442695, %v1406_v19 }
 0x46f   : > { %v2580_v61 = vpop.eup %2221  ;;  %v1537_v20 = vpop.xlane.xlu0 %1536 }
 0x470   : > { %v1003_v54 = vsel %vm539_vm1, %v2580_v61, 0.0  ;;  %v2586_v63 = vpop.eup %2223  ;;  %v1541_v23 = vsub.f32 %v2555_v18, %v1537_v20  ;;  %2237 = vpow2.f32 %v1409_v22 }
 0x471   : > { %1004 = vadd.xlane.f32.xlu0 %v1003_v54  ;;  %1007 = vadd.xlane.f32.xlu1 %v1006_v62  ;;  %v1142_v3 = vsel %vm539_vm1, %v2586_v63, 0.0 }
 0x472   : > { %v1543_v25 = vmul.f32 1.442695, %v1541_v23 }
 0x473   : > { %v2588_v0 = vpop.eup %2225  ;;  %v1540_v24 = vpop.xlane.xlu1 %1539 }
 0x474   : > { %v2590_v1 = vpop.eup %2227  ;;  %v1139_v2 = vsel %vm539_vm1, %v2588_v0, 0.0  ;;  %v1542_v26 = vsub.f32 %v2559_v21, %v1540_v24  ;;  %2239 = vpow2.f32 %v1543_v25 }
 0x475   : > { %1140 = vadd.xlane.f32.xlu0 %v1139_v2  ;;  %1143 = vadd.xlane.f32.xlu1 %v1142_v3  ;;  %v730_v6 = vsel %vm539_vm1, %v2590_v1, 0.0 }
 0x476   : > { %v1545_v27 = vmul.f32 1.442695, %v1542_v26 }
 0x477   : > { %v2596_v5 = vpop.eup %2229 }
 0x478   : > { %v1275_v7 = vsel %vm539_vm1, %v2596_v5, 0.0  ;;  %v2602_v8 = vpop.eup %2231  ;;  %2241 = vpow2.f32 %v1545_v27 }
 0x479   : > { %731 = vadd.xlane.f32.xlu0 %v730_v6  ;;  %1276 = vadd.xlane.f32.xlu1 %v1275_v7  ;;  %v1278_v9 = vsel %vm539_vm1, %v2602_v8, 0.0  ;;  %v2234_v10 = vpop.eup %2233 }
 0x47a   : > { %v733_v11 = vsel %vm539_vm1, %v2234_v10, 0.0 }
 0x47b   : > { %v2615_v28 = vpop.eup %2235 }
 0x47c   : > { %v1411_v12 = vsel %vm539_vm1, %v2615_v28, 0.0 }
 0x47d   : > { %1279 = vadd.xlane.f32.xlu1 %v1278_v9  ;;  %v2619_v29 = vpop.eup %2237 }
 0x47e   : > { %v1414_v15 = vsel %vm539_vm1, %v2619_v29, 0.0 }
 0x481   : > { %734 = vadd.xlane.f32.xlu1 %v733_v11  ;;  %v2623_v18 = vpop.eup %2239 }
 0x482   : > { %v1547_v21 = vsel %vm539_vm1, %v2623_v18, 0.0 }
 0x485   : > { %v2627_v30 = vpop.eup %2241 }
 0x486   : > { %v1550_v31 = vsel %vm539_vm1, %v2627_v30, 0.0 }
 0x48f   : > { %742 = vrot.lane.b32.xlu0 %v2456_v56, %s2286_s20 }
 0x492   : > { %878 = vrot.lane.b32.xlu1 %v2456_v56, %s2292_s28 }
 0x4ae   : > { %1412 = vadd.xlane.f32.xlu0 %v1411_v12 }
 0x4b6   : > { %1415 = vadd.xlane.f32.xlu1 %v1414_v15 }
 0x4ba   : > { %1548 = vadd.xlane.f32.xlu1 %v1547_v21 }
 0x4be   : > { %1551 = vadd.xlane.f32.xlu1 %v1550_v31 }
 0x4c4   : > { %1014 = vrot.lane.b32.xlu0 %v2456_v56, %s2287_s23 }
 0x4c8   : > { %1286 = vrot.lane.b32.xlu0 %v2456_v56, %s2289_s25 }
 0x4cc   : > { %1422 = vrot.lane.b32.xlu0 %v2456_v56, %s2290_s26 }
 0x4cf   : > { %1150 = vrot.lane.b32.xlu1 %v2456_v56, %s2288_s24 }
 0x4d0   : > { %1558 = vrot.lane.b32.xlu0 %v2456_v56, %s2291_s27 }
 0x4f2   : > { %v869_v32 = vpop.xlane.xlu0 %868 }
 0x4f6   : > { %v872_v33 = vpop.xlane.xlu1 %871 }
 0x4fa   : > { %v1005_v34 = vpop.xlane.xlu0 %1004  ;;  %v1008_v35 = vpop.xlane.xlu1 %1007 }
 0x4fe   : > { %v1141_v36 = vpop.xlane.xlu0 %1140  ;;  %v1144_v37 = vpop.xlane.xlu1 %1143 }
 0x502   : > { %v732_v39 = vpop.xlane.xlu0 %731  ;;  %v1277_v40 = vpop.xlane.xlu1 %1276 }
 0x503   : > { %2243 = vrcp.f32 %v732_v39 }
 0x506   : > { %v743_v41 = vpop.permute.xlu0 %742  ;;  %v1280_v38 = vpop.xlane.xlu1 %1279 }
 0x507   : > { %2050 = vmatpush3.bf16.msra.mxu1 %v743_v41 }
 0x508   : > { %2061 = vmatprep.subr.bf16.mxu1 %v2284_v4 }
 0x50a   : > { %v735_v42 = vpop.xlane.xlu1 %734 }
 0x50b   : > { %2245 = vrcp.f32 %v735_v42 }
 0x50c   : > { %2247 = vrcp.f32 %v872_v33 }
 0x50d   : > { %2249 = vrcp.f32 %v869_v32 }
 0x50e   : > { %v879_v50 = vpop.permute.xlu1 %878  ;;  %2251 = vrcp.f32 %v1005_v34 }
 0x50f   : > { %2253 = vrcp.f32 %v1008_v35 }
 0x510   : > { %v2244_v44 = vpop.eup %2243  ;;  %2255 = vrcp.f32 %v1141_v36 }
 0x511   : > { %v738_v45 = vmul.f32 %v2244_v44, %v2590_v1  ;;  %2257 = vrcp.f32 %v1144_v37  ;;  %v2198_v44 = vld [vmem:[%s2746_s4 + $0x38] sm:$0xff]  }
 0x512   : > { %2259 = vrcp.f32 %v1280_v38  ;;  %2128 = vmatpush3.bf16.msra.mxu0 %v2198_v44 }
 0x513   : > { %2261 = vrcp.f32 %v1277_v40  ;;  %2129 = vmatprep.subr.bf16.mxu0 %v2284_v4 }
 0x518   : > { %v2246_v56 = vpop.eup %2245 }
 0x519   : > { %v739_v43 = vmul.f32 %v2246_v56, %v2234_v10  ;;  %v2248_v47 = vpop.eup %2247  ;;  %v2199_v56 = vld [vmem:[%s2746_s4 + $0x30] sm:$0xff]  }
 0x51a   : > { %v2250_v51 = vpop.eup %2249  ;;  %v876_v49 = vmul.f32 %v2248_v47, %v2574_v57  ;;  %2130 = vmatpush3.bf16.msra.mxu0 %v2199_v56  ;;  %v2200_v47 = vld [vmem:[%s2746_s4 + $0x28] sm:$0xff]  }
 0x51b   : > { %v740_v46 = vpack.c.bf16 %v739_v43, %v738_v45  ;;  %v875_v52 = vmul.f32 %v2250_v51, %v2569_v48  ;;  %v2252_v55 = vpop.eup %2251  ;;  %2131 = vmatprep.subr.bf16.mxu0 %v2284_v4 }
 0x51c   : > { %v2254_v58 = vpop.eup %2253  ;;  %v1011_v54 = vmul.f32 %v2252_v55, %v2580_v61 }
 0x51d   : > { %2052 = vmatmul.mubr.msk.bf16.vlgmr.msra.gmra.mxu1 %vm539_vm1, %v740_v46  ;;  %v877_v53 = vpack.c.bf16 %v876_v49, %v875_v52  ;;  %v1012_v57 = vmul.f32 %v2254_v58, %v2578_v60  ;;  %v2256_v3 = vpop.eup %2255  ;;  %v2201_v52 = vld [vmem:[%s2746_s4 + $0x20] sm:$0xff]  }
 0x51e   : > { %2062 = vmatpush3.bf16.msra.mxu1 %v879_v50  ;;  %2063 = vmatprep.mubr.msk.bf16.mxu1 %vm2285_vm0, %v2284_v4  ;;  %v2258_v6 = vpop.eup %2257  ;;  %v1147_v60 = vmul.f32 %v2256_v3, %v2588_v0 }
 0x51f   : > { %2073 = vmatprep.subr.bf16.mxu1 %v2284_v4  ;;  %v1013_v48 = vpack.c.bf16 %v1012_v57, %v1011_v54  ;;  %v1148_v61 = vmul.f32 %v2258_v6, %v2586_v63  ;;  %v2260_v11 = vpop.eup %2259  ;;  %2132 = vmatpush3.bf16.msra.mxu0 %v2200_v47  ;;  %v2204_v6 = vld [vmem:[%s2746_s4 + $0x8] sm:$0xff]  }
 0x520   : > { %v2262_v14 = vpop.eup %2261  ;;  %v1284_v63 = vmul.f32 %v2260_v11, %v2602_v8  ;;  %2133 = vmatprep.subr.bf16.mxu0 %v2284_v4 }
 0x521   : > { %v1149_v10 = vpack.c.bf16 %v1148_v61, %v1147_v60  ;;  %v1283_v0 = vmul.f32 %v2262_v14, %v2596_v5  ;;  %v2205_v60 = vld [vmem:[%s2746_s4] sm:$0xff]  }
 0x523   : > { %v1285_v16 = vpack.c.bf16 %v1284_v63, %v1283_v0  ;;  %2134 = vmatpush3.bf16.msra.mxu0 %v2201_v52 }
 0x524   : > { %2135 = vmatprep.subr.bf16.mxu0 %v2284_v4 }
 0x525   : > { %2064 = vmatmul.mubr.msk.bf16.vlgmr.msra.gmra.mxu1 %vm539_vm1, %v877_v53 }
 0x526   : > { %2075 = vmatprep.mubr.msk.bf16.mxu1 %vm2285_vm0, %v2284_v4 }
 0x537   : > { %v1413_v59 = vpop.xlane.xlu0 %1412 }
 0x53b   : > { %v1015_v62 = vpop.permute.xlu0 %1014 }
 0x53c   : > { %2074 = vmatpush3.bf16.msra.mxu1 %v1015_v62 }
 0x53d   : > { %2085 = vmatprep.subr.bf16.mxu1 %v2284_v4 }
 0x53f   : > { %2076 = vmatmul.mubr.msk.bf16.vlgmr.msra.gmra.mxu1 %vm539_vm1, %v1013_v48  ;;  %v1416_v1 = vpop.xlane.xlu1 %1415  ;;  %v1287_v13 = vpop.permute.xlu0 %1286  ;;  %v2203_v48 = vld [vmem:[%s2746_s4 + $0x10] sm:$0xff]  }
 0x540   : > { %2087 = vmatprep.mubr.msk.bf16.mxu1 %vm2285_vm0, %v2284_v4  ;;  %2263 = vrcp.f32 %v1416_v1 }
 0x541   : > { %2265 = vrcp.f32 %v1413_v59  ;;  %v2202_v59 = vld [vmem:[%s2746_s4 + $0x18] sm:$0xff]  }
 0x542   : > { %2136 = vmatpush3.bf16.msra.mxu0 %v2202_v59 }
 0x543   : > { %v1549_v2 = vpop.xlane.xlu1 %1548  ;;  %v1423_v19 = vpop.permute.xlu0 %1422  ;;  %2137 = vmatprep.subr.bf16.mxu0 %v2284_v4 }
 0x546   : > { %2138 = vmatpush3.bf16.msra.mxu0 %v2203_v48 }
 0x547   : > { %v1552_v7 = vpop.xlane.xlu1 %1551  ;;  %v1559_v25 = vpop.permute.xlu0 %1558  ;;  %2139 = vmatprep.subr.bf16.mxu0 %v2284_v4 }
 0x548   : > { %2267 = vrcp.f32 %v1552_v7 }
 0x549   : > { %2269 = vrcp.f32 %v1549_v2 }
 0x54a   : > { %2140 = vmatpush3.bf16.msra.mxu0 %v2204_v6 }
 0x54b   : > { %v1151_v9 = vpop.permute.xlu1 %1150  ;;  %2141 = vmatprep.subr.bf16.mxu0 %v2284_v4 }
 0x54c   : > { %2086 = vmatpush3.bf16.msra.mxu1 %v1151_v9 }
 0x54d   : > { %2097 = vmatprep.subr.bf16.mxu1 %v2284_v4  ;;  %v2264_v17 = vpop.eup %2263 }
 0x54e   : > { %v2266_v20 = vpop.eup %2265  ;;  %v1420_v22 = vmul.f32 %v2264_v17, %v2619_v29  ;;  %2142 = vmatpush3.bf16.msra.mxu0 %v2205_v60 }
 0x54f   : > { %2088 = vmatmul.mubr.msk.bf16.vlgmr.msra.gmra.mxu1 %vm539_vm1, %v1149_v10  ;;  %v1419_v23 = vmul.f32 %v2266_v20, %v2615_v28 }
 0x550   : > { %2098 = vmatpush3.bf16.msra.mxu1 %v1287_v13  ;;  %2099 = vmatprep.mubr.msk.bf16.mxu1 %vm2285_vm0, %v2284_v4 }
 0x551   : > { %2109 = vmatprep.subr.bf16.mxu1 %v2284_v4  ;;  %v1421_v8 = vpack.c.bf16 %v1420_v22, %v1419_v23 }
 0x555   : > { %v2268_v24 = vpop.eup %2267 }
 0x556   : > { %v2270_v5 = vpop.eup %2269  ;;  %v1556_v26 = vmul.f32 %v2268_v24, %v2627_v30 }
 0x557   : > { %2100 = vmatmul.mubr.msk.bf16.vlgmr.msra.gmra.mxu1 %vm539_vm1, %v1285_v16  ;;  %v1555_v27 = vmul.f32 %v2270_v5, %v2623_v18 }
 0x558   : > { %2110 = vmatpush3.bf16.msra.mxu1 %v1423_v19  ;;  %2111 = vmatprep.mubr.msk.bf16.mxu1 %vm2285_vm0, %v2284_v4 }
 0x559   : > { %2121 = vmatprep.subr.bf16.mxu1 %v2284_v4  ;;  %v1557_v12 = vpack.c.bf16 %v1556_v26, %v1555_v27 }
 0x55f   : > { %2112 = vmatmul.mubr.msk.bf16.vlgmr.msra.gmra.mxu1 %vm539_vm1, %v1421_v8 }
 0x560   : > { %2122 = vmatpush3.bf16.msra.mxu1 %v1559_v25  ;;  %2123 = vmatprep.mubr.msk.bf16.mxu1 %vm2285_vm0, %v2284_v4 }
 0x567   : > { %2124 = vmatmul.mubr.msk.bf16.vlgmr.msra.gmra.mxu1 %vm539_vm1, %v1557_v12 }
 0x5dd   : > { %v782_v29 = vpop.f32.mrf.mxu1 }
 0x5de   : > { %v1936_v15 = vpack.c.bf16 %v782_v29, %v782_v29 }
 0x5df   : > { %v2053_v28 = vpop.f32.mrf.mxu1 }
 0x5e0   : > { %795 = vrot.lane.b32.xlu1 %v1936_v15, %s2291_s27  ;;  %v1953_v15 = vld [vmem:[%s2388_s8] sm:$0xff]  }
 0x5e1   : > { %v785_v21 = vpop.f32.mrf.mxu1  ;;  %v1916_v28 = vld [vmem:[%s2747_s5 + $0x3] ss:$0 sm:$0xff] }
 0x5e2   : > { %v1937_v31 = vpack.c.bf16 %v785_v21, %v785_v21  ;;  %v1954_v21 = vunpack.c.l.bf16 %v1953_v15 }
 0x5e3   : > { %v2054_v32 = vpop.f32.mrf.mxu1 }
 0x5e4   : > { %797 = vrot.lane.b32.xlu0 %v1937_v31, %s2291_s27 }
 0x5e5   : > { %v918_v33 = vpop.f32.mrf.mxu1 }
 0x5e6   : > { %v1938_v34 = vpack.c.bf16 %v918_v33, %v918_v33 }
 0x5e7   : > { %v2065_v35 = vpop.f32.mrf.mxu1 }
 0x5e8   : > { %931 = vrot.lane.b32.xlu1 %v1938_v34, %s2290_s26  ;;  %v1955_v35 = vunpack.c.h.bf16 %v1953_v15 }
 0x5e9   : > { %v921_v30 = vpop.f32.mrf.mxu1 }
 0x5ea   : > { %v1939_v18 = vpack.c.bf16 %v921_v30, %v921_v30 }
 0x5eb   : > { %v2066_v36 = vpop.f32.mrf.mxu1 }
 0x5ec   : > { %933 = vrot.lane.b32.xlu0 %v1939_v18, %s2290_s26 }
 0x5ff   : > { %v1054_v37 = vpop.f32.mrf.mxu1 }
 0x600   : > { %v1940_v39 = vpack.c.bf16 %v1054_v37, %v1054_v37 }
 0x601   : > { %v2077_v40 = vpop.f32.mrf.mxu1 }
 0x602   : > { %1067 = vrot.lane.b32.xlu1 %v1940_v39, %s2289_s25 }
 0x603   : > { %v1057_v41 = vpop.f32.mrf.mxu1 }
 0x604   : > { %v1941_v38 = vpack.c.bf16 %v1057_v41, %v1057_v41 }
 0x605   : > { %v2078_v42 = vpop.f32.mrf.mxu1 }
 0x606   : > { %1069 = vrot.lane.b32.xlu0 %v1941_v38, %s2289_s25 }
 0x60f   : > { %v1190_v45 = vpop.f32.mrf.mxu1 }
 0x610   : > { %v1942_v43 = vpack.c.bf16 %v1190_v45, %v1190_v45 }
 0x611   : > { %v2089_v46 = vpop.f32.mrf.mxu1 }
 0x612   : > { %1203 = vrot.lane.b32.xlu1 %v1942_v43, %s2288_s24 }
 0x613   : > { %v1193_v50 = vpop.f32.mrf.mxu1 }
 0x614   : > { %v1943_v51 = vpack.c.bf16 %v1193_v50, %v1193_v50 }
 0x615   : > { %v2090_v49 = vpop.f32.mrf.mxu1 }
 0x616   : > { %1205 = vrot.lane.b32.xlu0 %v1943_v51, %s2288_s24 }
 0x617   : > { %v1326_v53 = vpop.f32.mrf.mxu1 }
 0x618   : > { %v1944_v55 = vpack.c.bf16 %v1326_v53, %v1326_v53 }
 0x619   : > { %v2101_v58 = vpop.f32.mrf.mxu1 }
 0x61a   : > { %1339 = vrot.lane.b32.xlu1 %v1944_v55, %s2287_s23  ;;  %v1926_v55 = vld [vmem:[%s2747_s5 + $0x4] ss:$0 sm:$0xff] }
 0x61b   : > { %v1329_v54 = vpop.f32.mrf.mxu1 }
 0x61c   : > { %v1945_v57 = vpack.c.bf16 %v1329_v54, %v1329_v54 }
 0x61d   : > { %v2102_v62 = vpop.f32.mrf.mxu1 }
 0x61e   : > { %1341 = vrot.lane.b32.xlu0 %v1945_v57, %s2287_s23  ;;  %v1927_v57 = vld [vmem:[%s2747_s5 + $0x5] ss:$0 sm:$0xff] }
 0x61f   : > { %v1462_v1 = vpop.f32.mrf.mxu1 }
 0x620   : > { %v1946_v2 = vpack.c.bf16 %v1462_v1, %v1462_v1 }
 0x621   : > { %v2113_v3 = vpop.f32.mrf.mxu1 }
 0x622   : > { %1475 = vrot.lane.b32.xlu1 %v1946_v2, %s2292_s28 }
 0x623   : > { %v1465_v7 = vpop.f32.mrf.mxu1 }
 0x624   : > { %v1947_v61 = vpack.c.bf16 %v1465_v7, %v1465_v7 }
 0x625   : > { %v2114_v9 = vpop.f32.mrf.mxu1 }
 0x626   : > { %1477 = vrot.lane.b32.xlu0 %v1947_v61, %s2292_s28 }
 0x627   : > { %v1598_v10 = vpop.f32.mrf.mxu1 }
 0x628   : > { %v1948_v11 = vpack.c.bf16 %v1598_v10, %v1598_v10 }
 0x629   : > { %v2125_v13 = vpop.f32.mrf.mxu1 }
 0x62a   : > { %1611 = vrot.lane.b32.xlu1 %v1948_v11, %s2286_s20 }
 0x62b   : > { %v1601_v14 = vpop.f32.mrf.mxu1 }
 0x62c   : > { %v1949_v63 = vpack.c.bf16 %v1601_v14, %v1601_v14 }
 0x62d   : > { %v2126_v0 = vpop.f32.mrf.mxu1 }
 0x62e   : > { %1613 = vrot.lane.b32.xlu0 %v1949_v63, %s2286_s20 }
 0x652   : > { %v796_v16 = vpop.permute.xlu1 %795 }
 0x653   : > { %802 = vst.msk [vmem:[#allocation2] sm:$0xf] %vm801_vm3, %v796_v16 }
 0x656   : > { %v798_v17 = vpop.permute.xlu0 %797 }
 0x657   : > { %803 = vst.msk [vmem:[#allocation2 + $0x4] sm:$0xf] %vm801_vm3, %v798_v17 }
 0x65a   : > { %v932_v4 = vpop.permute.xlu1 %931 }
 0x65b   : > { %938 = vst.msk [vmem:[#allocation2] sm:$0xf] %vm937_vm4, %v932_v4 }
 0x65e   : > { %v934_v19 = vpop.permute.xlu0 %933 }
 0x65f   : > { %939 = vst.msk [vmem:[#allocation2 + $0x4] sm:$0xf] %vm937_vm4, %v934_v19 }
 0x674   : > { %v1068_v20 = vpop.permute.xlu1 %1067 }
 0x675   : > { %1074 = vst.msk [vmem:[#allocation2] sm:$0xf] %vm1073_vm5, %v1068_v20 }
 0x678   : > { %v1070_v22 = vpop.permute.xlu0 %1069 }
 0x679   : > { %1075 = vst.msk [vmem:[#allocation2 + $0x4] sm:$0xf] %vm1073_vm5, %v1070_v22 }
 0x684   : > { %v1204_v23 = vpop.permute.xlu1 %1203 }
 0x685   : > { %1210 = vst.msk [vmem:[#allocation2] sm:$0xf] %vm1209_vm6, %v1204_v23 }
 0x688   : > { %v1206_v8 = vpop.permute.xlu0 %1205 }
 0x689   : > { %1211 = vst.msk [vmem:[#allocation2 + $0x4] sm:$0xf] %vm1209_vm6, %v1206_v8 }
 0x68c   : > { %v1340_v24 = vpop.permute.xlu1 %1339 }
 0x68d   : > { %1346 = vst.msk [vmem:[#allocation2] sm:$0xf] %vm1345_vm7, %v1340_v24 }
 0x690   : > { %v1342_v25 = vpop.permute.xlu0 %1341 }
 0x691   : > { %1347 = vst.msk [vmem:[#allocation2 + $0x4] sm:$0xf] %vm1345_vm7, %v1342_v25 }
 0x694   : > { %v1476_v5 = vpop.permute.xlu1 %1475 }
 0x695   : > { %1482 = vst.msk [vmem:[#allocation2] sm:$0xf] %vm1481_vm8, %v1476_v5 }
 0x698   : > { %v1478_v26 = vpop.permute.xlu0 %1477 }
 0x699   : > { %1483 = vst.msk [vmem:[#allocation2 + $0x4] sm:$0xf] %vm1481_vm8, %v1478_v26 }
 0x69c   : > { %v1612_v27 = vpop.permute.xlu1 %1611 }
 0x69d   : > { %1618 = vst.msk [vmem:[#allocation2] sm:$0xf] %vm1617_vm9, %v1612_v27 }
 0x6a0   : > { %v1614_v12 = vpop.permute.xlu0 %1613 }
 0x6a1   : > { %1619 = vst.msk [vmem:[#allocation2 + $0x4] sm:$0xf] %vm1617_vm9, %v1614_v12 }
 0x6a8   : > { %v2206_v29 = vld [vmem:[#allocation2] sm:$0xff]  }
 0x6a9   : > { %2144 = vmatmul.mubr.bf16.vlgmr.msra.gmra.mxu0 %v2206_v29 }
 0x769   : > { %v1731_v31 = vpop.f32.mrf.mxu0 }
 0x76a   : > { %v1732_v32 = vadd.f32 %v1916_v28, %v1731_v31 }
 0x76b   : > { %v2145_v33 = vpop.f32.mrf.mxu0 }
 0x76c   : > { %v1742_v34 = vadd.f32 %v1954_v21, %v1732_v32 }
 0x76d   : > { %v1734_v30 = vpop.f32.mrf.mxu0 }
 0x76e   : > { %v1735_v18 = vadd.f32 %v1916_v28, %v1734_v30  ;;  %1744 = vadd.xlane.f32.xlu1 %v1742_v34 }
 0x76f   : > { %v2146_v36 = vpop.f32.mrf.mxu0 }
 0x770   : > { %v1743_v37 = vadd.f32 %v1955_v35, %v1735_v18 }
 0x772   : > { %1746 = vadd.xlane.f32.xlu0 %v1743_v37 }
 0x7f7   : > { %v1745_v39 = vpop.xlane.xlu1 %1744 }
 0x7f8   : > { %v1749_v40 = vmul.f32 0.0078125, %v1745_v39 }
 0x7fa   : > { %v1751_v41 = vsub.f32 %v1742_v34, %v1749_v40 }
 0x7fb   : > { %v1747_v38 = vpop.xlane.xlu0 %1746 }
 0x7fc   : > { %v1750_v42 = vmul.f32 0.0078125, %v1747_v38  ;;  %v1753_v44 = vmul.f32 %v1751_v41, %v1751_v41 }
 0x7fe   : > { %v1752_v56 = vsub.f32 %v1743_v37, %v1750_v42  ;;  %1755 = vadd.xlane.f32.xlu0 %v1753_v44 }
 0x800   : > { %v1754_v45 = vmul.f32 %v1752_v56, %v1752_v56 }
 0x802   : > { %1757 = vadd.xlane.f32.xlu0 %v1754_v45 }
 0x887   : > { %v1756_v43 = vpop.xlane.xlu0 %1755 }
 0x888   : > { %v1759_v46 = vmul.f32 0.0078125, %v1756_v43 }
 0x88a   : > { %v1761_v47 = vadd.f32 1e-05, %v1759_v46 }
 0x88b   : > { %v1758_v50 = vpop.xlane.xlu0 %1757 }
 0x88c   : > { %2271 = vrsqrt.f32 %v1761_v47  ;;  %v1760_v51 = vmul.f32 0.0078125, %v1758_v50 }
 0x88e   : > { %v1762_v49 = vadd.f32 1e-05, %v1760_v51 }
 0x890   : > { %2273 = vrsqrt.f32 %v1762_v49 }
 0x899   : > { %v2272_v52 = vpop.eup %2271 }
 0x89a   : > { %v1765_v53 = vmul.f32 %v2272_v52, %v1751_v41 }
 0x89c   : > { %v1772_v59 = vmul.f32 %v1926_v55, %v1765_v53 }
 0x89d   : > { %v2274_v58 = vpop.eup %2273 }
 0x89e   : > { %v1766_v54 = vmul.f32 %v2274_v58, %v1752_v56  ;;  %v1779_v48 = vadd.f32 %v1927_v57, %v1772_v59 }
 0x8a0   : > { %v1773_v62 = vmul.f32 %v1926_v55, %v1766_v54 }
 0x8a2   : > { %v1780_v1 = vadd.f32 %v1927_v57, %v1773_v62 }
 0x8a4   : > { %v1959_v2 = vpack.c.bf16 %v1780_v1, %v1779_v48 }
 0x8a6   : > { %1960 = vst [vmem:[%s251_s9] sm:$0xff] %v1959_v2  }
 0x8a7 PF: > { %s16_s21 = sadd.s32 1, %s2281_s21  }
 0x8a8   : > { %p13_p4 = scmp.ge.s32.totalorder %s16_s21, 4  }
 0x8aa   :  { %15 = sbr.rel (!%p13_p4) target bundleno = 1 (0x1), region = 74 }

</bundles_post_ra>
